<compile_context>
chip_gen: v6e
topology: v6e:2x2x1
jax: 0.10.0
libtpu: 0.0.40
codegen_flags: <defaults>
</compile_context>

<pallas_src>
import functools

import jax
import jax.numpy as jnp
from jax.experimental import pallas as pl
from jax.experimental.pallas import tpu as pltpu

_LANE = 128
_VMEM_LIMIT = 32 * 1024 * 1024      # per-step working sets are kept ~<=12 MB
_EPS = 1e-5
_TARGET_M = 2048                    # rows fed to the MXU per conv tile


# ---------------------------------------------------------------------------
# small helpers
# ---------------------------------------------------------------------------
def _round_up(x, m):
    return ((x + m - 1) // m) * m


def _pad_last(x, target):
    pad = target - x.shape[-1]
    if pad == 0:
        return x
    cfg = [(0, 0)] * (x.ndim - 1) + [(0, pad)]
    return jnp.pad(x, cfg)


def _pick_tile(m, cap):
    """Largest divisor of m that is <= cap (prefer multiples of 8)."""
    cap = max(1, min(m, cap))
    for t in range(cap - cap % 8, 7, -8):
        if m % t == 0:
            return t
    for t in range(cap, 0, -1):
        if m % t == 0:
            return t
    return 1


def _pick_rows(H2, W2, target_m=_TARGET_M):
    """Row-tile height R | H2 so that R*W2 ~ target_m rows per conv step."""
    best = 1
    for r in range(1, H2 + 1):
        if H2 % r == 0 and r * W2 <= target_m:
            best = r
    return best


def _prep_conv1_w(w, out_c, cp, cout_p):
    """(out_c, 2*out_c, 3, 3) -> (3, 3, 2*cp, cout_p) bf16, cat fused in K."""
    wt = jnp.transpose(w, (2, 3, 1, 0))                      # (ky, kx, ci, co)
    w_up = jnp.pad(wt[:, :, :out_c, :],
                   ((0, 0), (0, 0), (0, cp - out_c), (0, cout_p - out_c)))
    w_sk = jnp.pad(wt[:, :, out_c:, :],
                   ((0, 0), (0, 0), (0, cp - out_c), (0, cout_p - out_c)))
    return jnp.concatenate([w_up, w_sk], axis=2).astype(jnp.bfloat16)


def _prep_conv2_w(w, cp, cout_p):
    """(out_c, in_c, 3, 3) -> (3, 3, cp, cout_p) bf16."""
    out_c, in_c = w.shape[0], w.shape[1]
    wt = jnp.transpose(w, (2, 3, 1, 0))
    wt = jnp.pad(wt, ((0, 0), (0, 0), (0, cp - in_c), (0, cout_p - out_c)))
    return wt.astype(jnp.bfloat16)


# ---------------------------------------------------------------------------
# shared conv machinery (inside kernels)
# ---------------------------------------------------------------------------
def _accumulate_taps(buf_ref, w_ref, R, W2):
    """3x3 conv over a flat ((R+2)*W2, K) bf16 halo buffer -> (R*W2, cout) f32.

    Taps are grouped by kx: the three ky slabs are contiguous, 8-aligned views
    of the flat buffer (no relayout), and the +/-1 horizontal shifts are done
    on the f32 results with pltpu.roll + a column mask (zero at the image's
    left/right borders).
    """
    M = R * W2
    col = jax.lax.broadcasted_iota(jnp.int32, (R, W2, 1), 1).reshape(M, 1)

    def tap_group(kx):
        t = jnp.dot(buf_ref[0:M, :], w_ref[0, kx],
                    preferred_element_type=jnp.float32)
        t = t + jnp.dot(buf_ref[W2:W2 + M, :], w_ref[1, kx],
                        preferred_element_type=jnp.float32)
        t = t + jnp.dot(buf_ref[2 * W2:2 * W2 + M, :], w_ref[2, kx],
                        preferred_element_type=jnp.float32)
        return t

    acc = tap_group(1)                                        # kx = 1: no shift
    acc = acc + jnp.where(col != 0,
                          pltpu.roll(tap_group(0), shift=1, axis=0), 0.0)
    acc = acc + jnp.where(col != W2 - 1,
                          pltpu.roll(tap_group(2), shift=M - 1, axis=0), 0.0)
    return acc


def _emit_outputs(acc, o_ref, sum_ref, ssq_ref, R, W2, cout_p):
    o_ref[...] = acc.reshape(1, R, W2, cout_p).astype(o_ref.dtype)
    s = jnp.sum(acc, axis=0, keepdims=True)                   # (1, cout_p)
    q = jnp.sum(acc * acc, axis=0, keepdims=True)
    sum_ref[...] = jnp.broadcast_to(s, (8, cout_p))
    ssq_ref[...] = jnp.broadcast_to(q, (8, cout_p))


def _make_conv1_kernel(R, W2, cp, cout_p):
    """conv3x3(cat([up, skip], C)) on one (image, row-block); per-tile BN stats."""
    K = 2 * cp
    M = R * W2
    HB = (R + 1) * W2

    def kernel(up_b_ref, up_t_ref, up_d_ref, sk_b_ref, sk_t_ref, sk_d_ref,
               w_ref, o_ref, sum_ref, ssq_ref, buf_ref):
        r = pl.program_id(1)
        last = pl.num_programs(1) - 1

        # body rows of the fused-cat operand (up channels in [0,cp), skip in [cp,2cp))
        buf_ref[W2:W2 + M, 0:cp] = up_b_ref[0].reshape(M, cp)
        buf_ref[W2:W2 + M, cp:K] = sk_b_ref[0].reshape(M, cp)

        @pl.when(r == 0)                      # top halo row: spatial zero padding
        def _():
            buf_ref[0:W2, :] = jnp.zeros((W2, K), jnp.bfloat16)

        @pl.when(r != 0)
        def _():
            buf_ref[0:W2, 0:cp] = up_t_ref[0, 0]
            buf_ref[0:W2, cp:K] = sk_t_ref[0, 0]

        @pl.when(r == last)                   # bottom halo row
        def _():
            buf_ref[HB:HB + W2, :] = jnp.zeros((W2, K), jnp.bfloat16)

        @pl.when(r != last)
        def _():
            buf_ref[HB:HB + W2, 0:cp] = up_d_ref[0, 0]
            buf_ref[HB:HB + W2, cp:K] = sk_d_ref[0, 0]

        acc = _accumulate_taps(buf_ref, w_ref, R, W2)
        _emit_outputs(acc, o_ref, sum_ref, ssq_ref, R, W2, cout_p)

    return kernel


def _make_conv2_kernel(R, W2, cp, cout_p):
    """relu(bn1(c1)) fused into the buffer prologue -> conv3x3; per-tile BN2 stats."""
    K = cp
    M = R * W2
    HB = (R + 1) * W2

    def kernel(x_b_ref, x_t_ref, x_d_ref, aff_ref, w_ref,
               o_ref, sum_ref, ssq_ref, buf_ref):
        r = pl.program_id(1)
        last = pl.num_programs(1) - 1
        scale = aff_ref[0:1, :]                               # hoisted once
        shift = aff_ref[1:2, :]

        def bn_relu(v):                                       # v: (rows, cp) bf16
            y = v.astype(jnp.float32) * scale + shift
            return jnp.maximum(y, 0.0).astype(jnp.bfloat16)

        buf_ref[W2:W2 + M, :] = bn_relu(x_b_ref[0].reshape(M, cp))

        @pl.when(r == 0)
        def _():
            buf_ref[0:W2, :] = jnp.zeros((W2, K), jnp.bfloat16)

        @pl.when(r != 0)
        def _():
            buf_ref[0:W2, :] = bn_relu(x_t_ref[0, 0])

        @pl.when(r == last)
        def _():
            buf_ref[HB:HB + W2, :] = jnp.zeros((W2, K), jnp.bfloat16)

        @pl.when(r != last)
        def _():
            buf_ref[HB:HB + W2, :] = bn_relu(x_d_ref[0, 0])

        acc = _accumulate_taps(buf_ref, w_ref, R, W2)
        _emit_outputs(acc, o_ref, sum_ref, ssq_ref, R, W2, cout_p)

    return kernel


def _up_kernel(x_ref, w0_ref, w1_ref, b_ref, o_ref):
    # x: (tr, W, cin_p) bf16 ; w0/w1: (cin_p, 2*cout_p) for output sub-rows a=0/1
    tr, W, cin_p = x_ref.shape
    c2 = o_ref.shape[-1]
    x = x_ref[...].reshape(tr * W, cin_p)
    y0 = jnp.dot(x, w0_ref[...], preferred_element_type=jnp.float32) + b_ref[...]
    y1 = jnp.dot(x, w1_ref[...], preferred_element_type=jnp.float32) + b_ref[...]
    o_ref[:, 0:1, :, :] = y0.reshape(tr, 1, W, c2).astype(o_ref.dtype)
    o_ref[:, 1:2, :, :] = y1.reshape(tr, 1, W, c2).astype(o_ref.dtype)


def _bn_relu_kernel(x_ref, aff_ref, o_ref):
    scale = aff_ref[0:1, :]
    shift = aff_ref[1:2, :]
    y = x_ref[...].astype(jnp.float32) * scale + shift
    o_ref[...] = jnp.maximum(y, 0.0)


# ---------------------------------------------------------------------------
# pallas_call wrappers
# ---------------------------------------------------------------------------
def pallas_up_conv(x_nhwc, w, b, cout_p):
    """ConvTranspose2d(k=2, s=2) emitting the pixel-shuffled NHWC layout directly."""
    N, H, W, cin_p = x_nhwc.shape
    in_c, out_c = w.shape[0], w.shape[1]
    wt = jnp.transpose(w, (0, 2, 3, 1))                       # (ci, a, b, co)
    wt = jnp.pad(wt, ((0, cin_p - in_c), (0, 0), (0, 0), (0, cout_p - out_c)))
    w0 = wt[:, 0].reshape(cin_p, 2 * cout_p).astype(jnp.bfloat16)
    w1 = wt[:, 1].reshape(cin_p, 2 * cout_p).astype(jnp.bfloat16)
    bias = jnp.tile(jnp.pad(b, (0, cout_p - out_c)), 2)
    bias = bias.reshape(1, 2 * cout_p).astype(jnp.float32)

    NH = N * H
    tr = _pick_tile(NH, max(8, _TARGET_M // max(W, 1)))
    xf = x_nhwc.reshape(NH, W, cin_p)
    y = pl.pallas_call(
        _up_kernel,
        out_shape=jax.ShapeDtypeStruct((NH, 2, W, 2 * cout_p), jnp.bfloat16),
        grid=(NH // tr,),
        in_specs=[
            pl.BlockSpec((tr, W, cin_p), lambda i: (i, 0, 0)),
            pl.BlockSpec((cin_p, 2 * cout_p), lambda i: (0, 0)),
            pl.BlockSpec((cin_p, 2 * cout_p), lambda i: (0, 0)),
            pl.BlockSpec((1, 2 * cout_p), lambda i: (0, 0)),
        ],
        out_specs=pl.BlockSpec((tr, 2, W, 2 * cout_p), lambda i: (i, 0, 0, 0)),
        compiler_params=pltpu.CompilerParams(
            dimension_semantics=("parallel",), vmem_limit_bytes=_VMEM_LIMIT),
    )(xf, w0, w1, bias)
    # contiguous (free) reshape: (N, H, a, W, b, co) -> (N, 2H, 2W, co)
    return y.reshape(N, 2 * H, 2 * W, cout_p)


def _halo_specs(H2, W2, R, cch):
    body = pl.BlockSpec((1, R, W2, cch), lambda n, r: (n, r, 0, 0))
    top = pl.BlockSpec((1, 1, W2, cch),
                       lambda n, r: (n, jnp.maximum(r * R - 1, 0), 0, 0))
    bot = pl.BlockSpec((1, 1, W2, cch),
                       lambda n, r: (n, jnp.minimum(r * R + R, H2 - 1), 0, 0))
    return body, top, bot


def _conv_out_specs(N, H2, W2, R, cout_p, n_rt):
    return (
        (jax.ShapeDtypeStruct((N, H2, W2, cout_p), jnp.bfloat16),
         jax.ShapeDtypeStruct((N * n_rt * 8, cout_p), jnp.float32),
         jax.ShapeDtypeStruct((N * n_rt * 8, cout_p), jnp.float32)),
        (pl.BlockSpec((1, R, W2, cout_p), lambda n, r: (n, r, 0, 0)),
         pl.BlockSpec((8, cout_p), lambda n, r: (n * n_rt + r, 0)),
         pl.BlockSpec((8, cout_p), lambda n, r: (n * n_rt + r, 0))),
    )


def pallas_conv1_cat_stats(up, skip, w, cout_p, R):
    """conv3x3(cat([up, skip], C)); emits bf16 activations + per-tile BN stats."""
    N, H2, W2, cp = up.shape
    n_rt = H2 // R
    out_c = w.shape[0]
    wb = _prep_conv1_w(w, out_c, cp, cout_p)
    ub, ut, ud = _halo_specs(H2, W2, R, cp)
    sb, st, sd = _halo_specs(H2, W2, R, cp)
    wspec = pl.BlockSpec((3, 3, 2 * cp, cout_p), lambda n, r: (0, 0, 0, 0))
    out_shapes, out_specs = _conv_out_specs(N, H2, W2, R, cout_p, n_rt)
    return pl.pallas_call(
        _make_conv1_kernel(R, W2, cp, cout_p),
        out_shape=out_shapes,
        grid=(N, n_rt),
        in_specs=[ub, ut, ud, sb, st, sd, wspec],
        out_specs=out_specs,
        scratch_shapes=[pltpu.VMEM(((R + 2) * W2, 2 * cp), jnp.bfloat16)],
        compiler_params=pltpu.CompilerParams(
            dimension_semantics=("parallel", "parallel"),
            vmem_limit_bytes=_VMEM_LIMIT),
    )(up, up, up, skip, skip, skip, wb)


def pallas_conv2_bn1_stats(c1, aff1, w, cout_p, R):
    """relu(bn1(c1)) fused prologue -> conv3x3; emits bf16 activations + BN2 stats."""
    N, H2, W2, cp = c1.shape
    n_rt = H2 // R
    wb = _prep_conv2_w(w, cp, cout_p)
    xb, xt, xd = _halo_specs(H2, W2, R, cp)
    affspec = pl.BlockSpec((2, cp), lambda n, r: (0, 0))
    wspec = pl.BlockSpec((3, 3, cp, cout_p), lambda n, r: (0, 0, 0, 0))
    out_shapes, out_specs = _conv_out_specs(N, H2, W2, R, cout_p, n_rt)
    return pl.pallas_call(
        _make_conv2_kernel(R, W2, cp, cout_p),
        out_shape=out_shapes,
        grid=(N, n_rt),
        in_specs=[xb, xt, xd, affspec, wspec],
        out_specs=out_specs,
        scratch_shapes=[pltpu.VMEM(((R + 2) * W2, cp), jnp.bfloat16)],
        compiler_params=pltpu.CompilerParams(
            dimension_semantics=("parallel", "parallel"),
            vmem_limit_bytes=_VMEM_LIMIT),
    )(c1, c1, c1, aff1, wb)


def pallas_bn_relu_apply(x2d, aff):
    m, c = x2d.shape
    tm = _pick_tile(m, 4096)
    return pl.pallas_call(
        _bn_relu_kernel,
        out_shape=jax.ShapeDtypeStruct((m, c), jnp.float32),
        grid=(m // tm,),
        in_specs=[pl.BlockSpec((tm, c), lambda i: (i, 0)),
                  pl.BlockSpec((2, c), lambda i: (0, 0))],
        out_specs=pl.BlockSpec((tm, c), lambda i: (i, 0)),
        compiler_params=pltpu.CompilerParams(
            dimension_semantics=("parallel",), vmem_limit_bytes=_VMEM_LIMIT),
    )(x2d, aff)


def _bn_affine(sums, ssqs, gamma, beta, count, cout_p):
    """Training-mode BatchNorm folded to per-channel (scale, shift)."""
    out_c = gamma.shape[0]
    g = jnp.pad(gamma, (0, cout_p - out_c))
    b = jnp.pad(beta, (0, cout_p - out_c))
    total = jnp.sum(sums, axis=0) / 8.0        # stats were replicated over 8 rows
    total_sq = jnp.sum(ssqs, axis=0) / 8.0
    mean = total / count
    # TODO(synk): E[x^2]-E[x]^2 in f32 is cancellation-prone for large means;
    # a two-pass / Welford reduction would be more robust.
    var = jnp.maximum(total_sq / count - mean * mean, 0.0)
    scale = g * jax.lax.rsqrt(var + _EPS)
    shift = b - mean * scale
    return jnp.stack([scale, shift], axis=0).astype(jnp.float32)


# ---------------------------------------------------------------------------
# decoder_block forward
# ---------------------------------------------------------------------------
def decoder_block_forward(params, inputs_nchw, skip_nchw):
    """Matches decoder_block.forward(inputs, skip) with BatchNorm in training mode.

    The conv1/conv2 biases are intentionally not added: a per-channel constant
    is exactly absorbed by the mean-subtraction of the following training-mode
    BatchNorm, so the module output is unchanged.
    """
    N, in_c, H, W = inputs_nchw.shape
    out_c = params["up_b"].shape[0]
    H2, W2 = 2 * H, 2 * W
    assert W2 % 8 == 0, "decoder_block kernel assumes the upsampled width is a multiple of 8"
    cin_p = _round_up(in_c, _LANE)
    cout_p = _round_up(out_c, _LANE)

    # NCHW -> lane-dense NHWC (channels padded to 128), activations in bf16
    x = _pad_last(jnp.transpose(inputs_nchw, (0, 2, 3, 1)), cin_p).astype(jnp.bfloat16)
    skip = _pad_last(jnp.transpose(skip_nchw, (0, 2, 3, 1)), cout_p).astype(jnp.bfloat16)

    R = _pick_rows(H2, W2)                     # row-tile height for the conv kernels
    count = float(N * H2 * W2)

    # 1) ConvTranspose2d(k=2, s=2): tiled matmul writing the shuffled layout directly
    up = pallas_up_conv(x, params["up_w"], params["up_b"], cout_p)

    # 2) conv1 over cat([up, skip]) fused as one K=2*cp contraction; emits BN1 stats
    c1, s1, q1 = pallas_conv1_cat_stats(up, skip, params["conv1_w"], cout_p, R)
    aff1 = _bn_affine(s1, q1, params["bn1_g"], params["bn1_b"], count, cout_p)

    # 3) conv2 with BN1+ReLU fused into its prologue; emits BN2 stats
    c2, s2, q2 = pallas_conv2_bn1_stats(c1, aff1, params["conv2_w"], cout_p, R)
    aff2 = _bn_affine(s2, q2, params["bn2_g"], params["bn2_b"], count, cout_p)

    # 4) BN2 + ReLU in a big-tile lane-dense pass
    out = pallas_bn_relu_apply(c2.reshape(N * H2 * W2, cout_p), aff2)
    out = out.reshape(N, H2, W2, cout_p)[..., :out_c]
    return jnp.transpose(out, (0, 3, 1, 2))    # back to NCHW (interface glue)


# ---------------------------------------------------------------------------
# pure-JAX reference (f32, HIGHEST precision) for the numerical sanity check
# ---------------------------------------------------------------------------
def _reference_forward(params, inputs_nchw, skip_nchw):
    x = inputs_nchw
    w = params["up_w"]
    N, _, H, W = x.shape
    Cout = w.shape[1]
    up = jnp.einsum("ncij,cdab->ndiajb", x, w,
                    precision=jax.lax.Precision.HIGHEST)
    up = up.reshape(N, Cout, 2 * H, 2 * W) + params["up_b"][None, :, None, None]
    h = jnp.concatenate([up, skip_nchw], axis=1)

    def conv3(t, wc, bc):
        y = jax.lax.conv_general_dilated(
            t, wc, window_strides=(1, 1), padding=((1, 1), (1, 1)),
            dimension_numbers=("NCHW", "OIHW", "NCHW"),
            precision=jax.lax.Precision.HIGHEST)
        return y + bc[None, :, None, None]

    def bn_relu(t, g, b):
        mean = jnp.mean(t, axis=(0, 2, 3), keepdims=True)
        var = jnp.var(t, axis=(0, 2, 3), keepdims=True)
        y = (t - mean) * jax.lax.rsqrt(var + _EPS)
        y = y * g[None, :, None, None] + b[None, :, None, None]
        return jnp.maximum(y, 0.0)

    h = bn_relu(conv3(h, params["conv1_w"], params["conv1_b"]),
                params["bn1_g"], params["bn1_b"])
    h = bn_relu(conv3(h, params["conv2_w"], params["conv2_b"]),
                params["bn2_g"], params["bn2_b"])
    return h


# ---------------------------------------------------------------------------
# deterministic parameters
# ---------------------------------------------------------------------------
def make_params(key, in_c, out_c):
    ks = jax.random.split(key, 6)
    return {
        "up_w": 0.1 * jax.random.normal(ks[0], (in_c, out_c, 2, 2), jnp.float32),
        "up_b": 0.1 * jax.random.normal(ks[1], (out_c,), jnp.float32),
        "conv1_w": 0.1 * jax.random.normal(ks[2], (out_c, 2 * out_c, 3, 3), jnp.float32),
        "conv1_b": 0.1 * jax.random.normal(ks[3], (out_c,), jnp.float32),
        "bn1_g": jnp.ones((out_c,), jnp.float32),
        "bn1_b": jnp.zeros((out_c,), jnp.float32),
        "conv2_w": 0.1 * jax.random.normal(ks[4], (out_c, out_c, 3, 3), jnp.float32),
        "conv2_b": 0.1 * jax.random.normal(ks[5], (out_c,), jnp.float32),
        "bn2_g": jnp.ones((out_c,), jnp.float32),
        "bn2_b": jnp.zeros((out_c,), jnp.float32),
    }


if __name__ == "__main__":
    key = jax.random.PRNGKey(0)
    k_in, k_skip, k_par = jax.random.split(key, 3)

    # decoder_block(in_c=8, out_c=4), small spatial shapes
    N, in_c, out_c, H, W = 2, 8, 4, 8, 8
    inputs = jax.random.normal(k_in, (N, in_c, H, W), jnp.float32)            # NCHW
    skip = jax.random.normal(k_skip, (N, out_c, 2 * H, 2 * W), jnp.float32)   # NCHW
    params = make_params(k_par, in_c, out_c)

    fwd = jax.jit(functools.partial(decoder_block_forward, params))
    out = fwd(inputs, skip)
    jax.block_until_ready(out)

    assert out.shape == (N, out_c, 2 * H, 2 * W), out.shape

    ref = _reference_forward(params, inputs, skip)
    err = float(jnp.max(jnp.abs(out - ref)))
    assert err < 5e-2, f"max abs error vs reference: {err}"

    print("KERNEL_OK")
</pallas_src>

<mosaic_0001>
module attributes {stable_mosaic.version = 11 : i64} {
  func.func @_up_kernel(%arg0: i32, %arg1: memref<16x8x128xbf16, #tpu.memory_space<vmem>>, %arg2: memref<128x256xbf16, #tpu.memory_space<vmem>>, %arg3: memref<128x256xbf16, #tpu.memory_space<vmem>>, %arg4: memref<1x256xf32, #tpu.memory_space<vmem>>, %arg5: memref<16x2x8x256xbf16, #tpu.memory_space<vmem>>) attributes {dimension_semantics = [#tpu.dimension_semantics<parallel>], iteration_bounds = array<i64: 1>, scalar_prefetch = 0 : i64, scratch_operands = 0 : i64, tpu.core_type = #tpu.core_type<tc>, window_params = [{transform_indices = @transform_0, window_bounds = array<i64: 16, 8, 128>}, {pipeline_mode = #tpu.pipeline_mode<synchronous>, transform_indices = @transform_1, window_bounds = array<i64: 128, 256>}, {pipeline_mode = #tpu.pipeline_mode<synchronous>, transform_indices = @transform_2, window_bounds = array<i64: 128, 256>}, {pipeline_mode = #tpu.pipeline_mode<synchronous>, transform_indices = @transform_3, window_bounds = array<i64: 1, 256>}, {transform_indices = @transform_4, window_bounds = array<i64: 16, 2, 8, 256>}]} {
    %c0 = arith.constant 0 : index
    %c0_0 = arith.constant 0 : index
    %c0_1 = arith.constant 0 : index
    %0 = vector.load %arg1[%c0, %c0_0, %c0_1] : memref<16x8x128xbf16, #tpu.memory_space<vmem>>, vector<16x8x128xbf16>
    %1 = vector.shape_cast %0 : vector<16x8x128xbf16> to vector<128x128xbf16>
    %c0_2 = arith.constant 0 : index
    %c0_3 = arith.constant 0 : index
    %2 = vector.load %arg2[%c0_2, %c0_3] : memref<128x256xbf16, #tpu.memory_space<vmem>>, vector<128x256xbf16>
    %cst = arith.constant dense<0.000000e+00> : vector<128x256xf32>
    %3 = tpu.matmul %1, %2, %cst {dimension_numbers = #tpu.dot_dimension_numbers<[1], [0], [0], [1], [0, 0, 1, 1], [], []>} : vector<128x128xbf16>, vector<128x256xbf16>, vector<128x256xf32> -> vector<128x256xf32>
    %c0_4 = arith.constant 0 : index
    %c0_5 = arith.constant 0 : index
    %4 = vector.load %arg4[%c0_4, %c0_5] : memref<1x256xf32, #tpu.memory_space<vmem>>, vector<1x256xf32>
    %5 = vector.broadcast %4 : vector<1x256xf32> to vector<128x256xf32>
    %6 = arith.addf %3, %5 : vector<128x256xf32>
    %c0_6 = arith.constant 0 : index
    %c0_7 = arith.constant 0 : index
    %7 = vector.load %arg3[%c0_6, %c0_7] : memref<128x256xbf16, #tpu.memory_space<vmem>>, vector<128x256xbf16>
    %cst_8 = arith.constant dense<0.000000e+00> : vector<128x256xf32>
    %8 = tpu.matmul %1, %7, %cst_8 {dimension_numbers = #tpu.dot_dimension_numbers<[1], [0], [0], [1], [0, 0, 1, 1], [], []>} : vector<128x128xbf16>, vector<128x256xbf16>, vector<128x256xf32> -> vector<128x256xf32>
    %c0_9 = arith.constant 0 : index
    %c0_10 = arith.constant 0 : index
    %9 = vector.load %arg4[%c0_9, %c0_10] : memref<1x256xf32, #tpu.memory_space<vmem>>, vector<1x256xf32>
    %10 = vector.broadcast %9 : vector<1x256xf32> to vector<128x256xf32>
    %11 = arith.addf %8, %10 : vector<128x256xf32>
    %12 = vector.shape_cast %6 : vector<128x256xf32> to vector<16x1x8x256xf32>
    %13 = arith.truncf %12 : vector<16x1x8x256xf32> to vector<16x1x8x256xbf16>
    %c0_11 = arith.constant 0 : index
    %c0_12 = arith.constant 0 : index
    %c0_13 = arith.constant 0 : index
    %c0_14 = arith.constant 0 : index
    %14 = vector.load %arg5[%c0_11, %c0_12, %c0_13, %c0_14] : memref<16x2x8x256xbf16, #tpu.memory_space<vmem>>, vector<16x1x8x256xbf16>
    tpu.vector_store %arg5[%c0_11, %c0_12, %c0_13, %c0_14], %13 {strides = array<i32>} : memref<16x2x8x256xbf16, #tpu.memory_space<vmem>>, vector<16x1x8x256xbf16>,
    %15 = vector.shape_cast %11 : vector<128x256xf32> to vector<16x1x8x256xf32>
    %16 = arith.truncf %15 : vector<16x1x8x256xf32> to vector<16x1x8x256xbf16>
    %c0_15 = arith.constant 0 : index
    %c1 = arith.constant 1 : index
    %c0_16 = arith.constant 0 : index
    %c0_17 = arith.constant 0 : index
    %17 = vector.load %arg5[%c0_15, %c1, %c0_16, %c0_17] : memref<16x2x8x256xbf16, #tpu.memory_space<vmem>>, vector<16x1x8x256xbf16>
    tpu.vector_store %arg5[%c0_15, %c1, %c0_16, %c0_17], %16 {strides = array<i32>} : memref<16x2x8x256xbf16, #tpu.memory_space<vmem>>, vector<16x1x8x256xbf16>,
    return
  }
  func.func @transform_0(%arg0: i32) -> (i32, i32, i32) {
    %c0_i32 = arith.constant 0 : i32
    %c0_i32_0 = arith.constant 0 : i32
    %c0_i32_1 = arith.constant 0 : i32
    return %arg0, %c0_i32, %c0_i32_0 : i32, i32, i32
  }
  func.func @transform_1(%arg0: i32) -> (i32, i32) {
    %c0_i32 = arith.constant 0 : i32
    %c0_i32_0 = arith.constant 0 : i32
    %c0_i32_1 = arith.constant 0 : i32
    return %c0_i32, %c0_i32_0 : i32, i32
  }
  func.func @transform_2(%arg0: i32) -> (i32, i32) {
    %c0_i32 = arith.constant 0 : i32
    %c0_i32_0 = arith.constant 0 : i32
    %c0_i32_1 = arith.constant 0 : i32
    return %c0_i32, %c0_i32_0 : i32, i32
  }
  func.func @transform_3(%arg0: i32) -> (i32, i32) {
    %c0_i32 = arith.constant 0 : i32
    %c0_i32_0 = arith.constant 0 : i32
    %c0_i32_1 = arith.constant 0 : i32
    return %c0_i32, %c0_i32_0 : i32, i32
  }
  func.func @transform_4(%arg0: i32) -> (i32, i32, i32, i32) {
    %c0_i32 = arith.constant 0 : i32
    %c0_i32_0 = arith.constant 0 : i32
    %c0_i32_1 = arith.constant 0 : i32
    %c0_i32_2 = arith.constant 0 : i32
    return %arg0, %c0_i32, %c0_i32_0, %c0_i32_1 : i32, i32, i32, i32
  }
}

module attributes {stable_mosaic.version = 11 : i64} {
  func.func @kernel(%arg0: i32, %arg1: i32, %arg2: memref<1x16x16x128xbf16, #tpu.memory_space<vmem>>, %arg3: memref<1x1x16x128xbf16, #tpu.memory_space<vmem>>, %arg4: memref<1x1x16x128xbf16, #tpu.memory_space<vmem>>, %arg5: memref<1x16x16x128xbf16, #tpu.memory_space<vmem>>, %arg6: memref<1x1x16x128xbf16, #tpu.memory_space<vmem>>, %arg7: memref<1x1x16x128xbf16, #tpu.memory_space<vmem>>, %arg8: memref<3x3x256x128xbf16, #tpu.memory_space<vmem>>, %arg9: memref<1x16x16x128xbf16, #tpu.memory_space<vmem>>, %arg10: memref<8x128xf32, #tpu.memory_space<vmem>>, %arg11: memref<8x128xf32, #tpu.memory_space<vmem>>, %arg12: memref<288x256xbf16, #tpu.memory_space<vmem>>) attributes {dimension_semantics = [#tpu.dimension_semantics<parallel>, #tpu.dimension_semantics<parallel>], iteration_bounds = array<i64: 2, 1>, scalar_prefetch = 0 : i64, scratch_operands = 1 : i64, tpu.core_type = #tpu.core_type<tc>, window_params = [{transform_indices = @transform_0, window_bounds = array<i64: 1, 16, 16, 128>}, {transform_indices = @transform_1, window_bounds = array<i64: 1, 1, 16, 128>}, {transform_indices = @transform_2, window_bounds = array<i64: 1, 1, 16, 128>}, {transform_indices = @transform_3, window_bounds = array<i64: 1, 16, 16, 128>}, {transform_indices = @transform_4, window_bounds = array<i64: 1, 1, 16, 128>}, {transform_indices = @transform_5, window_bounds = array<i64: 1, 1, 16, 128>}, {pipeline_mode = #tpu.pipeline_mode<synchronous>, transform_indices = @transform_6, window_bounds = array<i64: 3, 3, 256, 128>}, {transform_indices = @transform_7, window_bounds = array<i64: 1, 16, 16, 128>}, {transform_indices = @transform_8, window_bounds = array<i64: 8, 128>}, {transform_indices = @transform_9, window_bounds = array<i64: 8, 128>}]} {
    %c0 = arith.constant 0 : index
    %c0_0 = arith.constant 0 : index
    %c0_1 = arith.constant 0 : index
    %c0_2 = arith.constant 0 : index
    %0 = vector.load %arg2[%c0, %c0_0, %c0_1, %c0_2] : memref<1x16x16x128xbf16, #tpu.memory_space<vmem>>, vector<1x16x16x128xbf16>
    %1 = vector.shape_cast %0 : vector<1x16x16x128xbf16> to vector<16x16x128xbf16>
    %2 = vector.shape_cast %1 : vector<16x16x128xbf16> to vector<256x128xbf16>
    %c16 = arith.constant 16 : index
    %c0_3 = arith.constant 0 : index
    %3 = vector.load %arg12[%c16, %c0_3] : memref<288x256xbf16, #tpu.memory_space<vmem>>, vector<256x128xbf16>
    tpu.vector_store %arg12[%c16, %c0_3], %2 {strides = array<i32>} : memref<288x256xbf16, #tpu.memory_space<vmem>>, vector<256x128xbf16>,
    %c0_4 = arith.constant 0 : index
    %c0_5 = arith.constant 0 : index
    %c0_6 = arith.constant 0 : index
    %c0_7 = arith.constant 0 : index
    %4 = vector.load %arg5[%c0_4, %c0_5, %c0_6, %c0_7] : memref<1x16x16x128xbf16, #tpu.memory_space<vmem>>, vector<1x16x16x128xbf16>
    %5 = vector.shape_cast %4 : vector<1x16x16x128xbf16> to vector<16x16x128xbf16>
    %6 = vector.shape_cast %5 : vector<16x16x128xbf16> to vector<256x128xbf16>
    %c16_8 = arith.constant 16 : index
    %c128 = arith.constant 128 : index
    %7 = vector.load %arg12[%c16_8, %c128] : memref<288x256xbf16, #tpu.memory_space<vmem>>, vector<256x128xbf16>
    tpu.vector_store %arg12[%c16_8, %c128], %6 {strides = array<i32>} : memref<288x256xbf16, #tpu.memory_space<vmem>>, vector<256x128xbf16>,
    %c0_i32 = arith.constant 0 : i32
    %8 = arith.cmpi eq, %arg1, %c0_i32 : i32
    %9 = arith.extui %8 : i1 to i32
    %c0_i32_9 = arith.constant 0 : i32
    %10 = arith.cmpi ne, %9, %c0_i32_9 : i32
    scf.if %10 {
      %cst_88 = arith.constant 0.000000e+00 : bf16
      %94 = vector.broadcast %cst_88 : bf16 to vector<16x256xbf16>
      %c0_89 = arith.constant 0 : index
      %c0_90 = arith.constant 0 : index
      %95 = vector.load %arg12[%c0_89, %c0_90] : memref<288x256xbf16, #tpu.memory_space<vmem>>, vector<16x256xbf16>
      tpu.vector_store %arg12[%c0_89, %c0_90], %94 {strides = array<i32>} : memref<288x256xbf16, #tpu.memory_space<vmem>>, vector<16x256xbf16>,
    } else {
    }
    %c0_i32_10 = arith.constant 0 : i32
    %11 = arith.cmpi ne, %arg1, %c0_i32_10 : i32
    %12 = arith.extui %11 : i1 to i32
    %c0_i32_11 = arith.constant 0 : i32
    %13 = arith.cmpi ne, %12, %c0_i32_11 : i32
    scf.if %13 {
      %c0_88 = arith.constant 0 : index
      %c0_89 = arith.constant 0 : index
      %c0_90 = arith.constant 0 : index
      %c0_91 = arith.constant 0 : index
      %94 = vector.load %arg3[%c0_88, %c0_89, %c0_90, %c0_91] : memref<1x1x16x128xbf16, #tpu.memory_space<vmem>>, vector<1x1x16x128xbf16>
      %95 = vector.shape_cast %94 : vector<1x1x16x128xbf16> to vector<16x128xbf16>
      %c0_92 = arith.constant 0 : index
      %c0_93 = arith.constant 0 : index
      %96 = vector.load %arg12[%c0_92, %c0_93] : memref<288x256xbf16, #tpu.memory_space<vmem>>, vector<16x128xbf16>
      tpu.vector_store %arg12[%c0_92, %c0_93], %95 {strides = array<i32>} : memref<288x256xbf16, #tpu.memory_space<vmem>>, vector<16x128xbf16>,
      %c0_94 = arith.constant 0 : index
      %c0_95 = arith.constant 0 : index
      %c0_96 = arith.constant 0 : index
      %c0_97 = arith.constant 0 : index
      %97 = vector.load %arg6[%c0_94, %c0_95, %c0_96, %c0_97] : memref<1x1x16x128xbf16, #tpu.memory_space<vmem>>, vector<1x1x16x128xbf16>
      %98 = vector.shape_cast %97 : vector<1x1x16x128xbf16> to vector<16x128xbf16>
      %c0_98 = arith.constant 0 : index
      %c128_99 = arith.constant 128 : index
      %99 = vector.load %arg12[%c0_98, %c128_99] : memref<288x256xbf16, #tpu.memory_space<vmem>>, vector<16x128xbf16>
      tpu.vector_store %arg12[%c0_98, %c128_99], %98 {strides = array<i32>} : memref<288x256xbf16, #tpu.memory_space<vmem>>, vector<16x128xbf16>,
    } else {
    }
    %c0_i32_12 = arith.constant 0 : i32
    %14 = arith.cmpi eq, %arg1, %c0_i32_12 : i32
    %15 = arith.extui %14 : i1 to i32
    %c0_i32_13 = arith.constant 0 : i32
    %16 = arith.cmpi ne, %15, %c0_i32_13 : i32
    scf.if %16 {
      %cst_88 = arith.constant 0.000000e+00 : bf16
      %94 = vector.broadcast %cst_88 : bf16 to vector<16x256xbf16>
      %c272 = arith.constant 272 : index
      %c0_89 = arith.constant 0 : index
      %95 = vector.load %arg12[%c272, %c0_89] : memref<288x256xbf16, #tpu.memory_space<vmem>>, vector<16x256xbf16>
      tpu.vector_store %arg12[%c272, %c0_89], %94 {strides = array<i32>} : memref<288x256xbf16, #tpu.memory_space<vmem>>, vector<16x256xbf16>,
    } else {
    }
    %c0_i32_14 = arith.constant 0 : i32
    %17 = arith.cmpi ne, %arg1, %c0_i32_14 : i32
    %18 = arith.extui %17 : i1 to i32
    %c0_i32_15 = arith.constant 0 : i32
    %19 = arith.cmpi ne, %18, %c0_i32_15 : i32
    scf.if %19 {
      %c0_88 = arith.constant 0 : index
      %c0_89 = arith.constant 0 : index
      %c0_90 = arith.constant 0 : index
      %c0_91 = arith.constant 0 : index
      %94 = vector.load %arg4[%c0_88, %c0_89, %c0_90, %c0_91] : memref<1x1x16x128xbf16, #tpu.memory_space<vmem>>, vector<1x1x16x128xbf16>
      %95 = vector.shape_cast %94 : vector<1x1x16x128xbf16> to vector<16x128xbf16>
      %c272 = arith.constant 272 : index
      %c0_92 = arith.constant 0 : index
      %96 = vector.load %arg12[%c272, %c0_92] : memref<288x256xbf16, #tpu.memory_space<vmem>>, vector<16x128xbf16>
      tpu.vector_store %arg12[%c272, %c0_92], %95 {strides = array<i32>} : memref<288x256xbf16, #tpu.memory_space<vmem>>, vector<16x128xbf16>,
      %c0_93 = arith.constant 0 : index
      %c0_94 = arith.constant 0 : index
      %c0_95 = arith.constant 0 : index
      %c0_96 = arith.constant 0 : index
      %97 = vector.load %arg7[%c0_93, %c0_94, %c0_95, %c0_96] : memref<1x1x16x128xbf16, #tpu.memory_space<vmem>>, vector<1x1x16x128xbf16>
      %98 = vector.shape_cast %97 : vector<1x1x16x128xbf16> to vector<16x128xbf16>
      %c272_97 = arith.constant 272 : index
      %c128_98 = arith.constant 128 : index
      %99 = vector.load %arg12[%c272_97, %c128_98] : memref<288x256xbf16, #tpu.memory_space<vmem>>, vector<16x128xbf16>
      tpu.vector_store %arg12[%c272_97, %c128_98], %98 {strides = array<i32>} : memref<288x256xbf16, #tpu.memory_space<vmem>>, vector<16x128xbf16>,
    } else {
    }
    %20 = tpu.iota {dimensions = array<i32: 1>} : vector<16x16x1xi32>
    %21 = vector.shape_cast %20 : vector<16x16x1xi32> to vector<256x1xi32>
    %c0_16 = arith.constant 0 : index
    %c0_17 = arith.constant 0 : index
    %22 = vector.load %arg12[%c0_16, %c0_17] : memref<288x256xbf16, #tpu.memory_space<vmem>>, vector<256x256xbf16>
    %c0_18 = arith.constant 0 : index
    %c1 = arith.constant 1 : index
    %c0_19 = arith.constant 0 : index
    %c0_20 = arith.constant 0 : index
    %23 = vector.load %arg8[%c0_18, %c1, %c0_19, %c0_20] : memref<3x3x256x128xbf16, #tpu.memory_space<vmem>>, vector<1x1x256x128xbf16>
    %24 = vector.shape_cast %23 : vector<1x1x256x128xbf16> to vector<256x128xbf16>
    %cst = arith.constant dense<0.000000e+00> : vector<256x128xf32>
    %25 = tpu.matmul %22, %24, %cst {dimension_numbers = #tpu.dot_dimension_numbers<[1], [0], [0], [1], [0, 0, 1, 1], [], []>} : vector<256x256xbf16>, vector<256x128xbf16>, vector<256x128xf32> -> vector<256x128xf32>
    %c16_21 = arith.constant 16 : index
    %c0_22 = arith.constant 0 : index
    %26 = vector.load %arg12[%c16_21, %c0_22] : memref<288x256xbf16, #tpu.memory_space<vmem>>, vector<256x256xbf16>
    %c1_23 = arith.constant 1 : index
    %c1_24 = arith.constant 1 : index
    %c0_25 = arith.constant 0 : index
    %c0_26 = arith.constant 0 : index
    %27 = vector.load %arg8[%c1_23, %c1_24, %c0_25, %c0_26] : memref<3x3x256x128xbf16, #tpu.memory_space<vmem>>, vector<1x1x256x128xbf16>
    %28 = vector.shape_cast %27 : vector<1x1x256x128xbf16> to vector<256x128xbf16>
    %cst_27 = arith.constant dense<0.000000e+00> : vector<256x128xf32>
    %29 = tpu.matmul %26, %28, %cst_27 {dimension_numbers = #tpu.dot_dimension_numbers<[1], [0], [0], [1], [0, 0, 1, 1], [], []>} : vector<256x256xbf16>, vector<256x128xbf16>, vector<256x128xf32> -> vector<256x128xf32>
    %30 = arith.addf %25, %29 : vector<256x128xf32>
    %c32 = arith.constant 32 : index
    %c0_28 = arith.constant 0 : index
    %31 = vector.load %arg12[%c32, %c0_28] : memref<288x256xbf16, #tpu.memory_space<vmem>>, vector<256x256xbf16>
    %c2 = arith.constant 2 : index
    %c1_29 = arith.constant 1 : index
    %c0_30 = arith.constant 0 : index
    %c0_31 = arith.constant 0 : index
    %32 = vector.load %arg8[%c2, %c1_29, %c0_30, %c0_31] : memref<3x3x256x128xbf16, #tpu.memory_space<vmem>>, vector<1x1x256x128xbf16>
    %33 = vector.shape_cast %32 : vector<1x1x256x128xbf16> to vector<256x128xbf16>
    %cst_32 = arith.constant dense<0.000000e+00> : vector<256x128xf32>
    %34 = tpu.matmul %31, %33, %cst_32 {dimension_numbers = #tpu.dot_dimension_numbers<[1], [0], [0], [1], [0, 0, 1, 1], [], []>} : vector<256x256xbf16>, vector<256x128xbf16>, vector<256x128xf32> -> vector<256x128xf32>
    %35 = arith.addf %30, %34 : vector<256x128xf32>
    %c0_i32_33 = arith.constant 0 : i32
    %36 = vector.broadcast %c0_i32_33 : i32 to vector<256x1xi32>
    %37 = arith.cmpi ne, %21, %36 : vector<256x1xi32>
    %c0_34 = arith.constant 0 : index
    %c0_35 = arith.constant 0 : index
    %38 = vector.load %arg12[%c0_34, %c0_35] : memref<288x256xbf16, #tpu.memory_space<vmem>>, vector<256x256xbf16>
    %c0_36 = arith.constant 0 : index
    %c0_37 = arith.constant 0 : index
    %c0_38 = arith.constant 0 : index
    %c0_39 = arith.constant 0 : index
    %39 = vector.load %arg8[%c0_36, %c0_37, %c0_38, %c0_39] : memref<3x3x256x128xbf16, #tpu.memory_space<vmem>>, vector<1x1x256x128xbf16>
    %40 = vector.shape_cast %39 : vector<1x1x256x128xbf16> to vector<256x128xbf16>
    %cst_40 = arith.constant dense<0.000000e+00> : vector<256x128xf32>
    %41 = tpu.matmul %38, %40, %cst_40 {dimension_numbers = #tpu.dot_dimension_numbers<[1], [0], [0], [1], [0, 0, 1, 1], [], []>} : vector<256x256xbf16>, vector<256x128xbf16>, vector<256x128xf32> -> vector<256x128xf32>
    %c16_41 = arith.constant 16 : index
    %c0_42 = arith.constant 0 : index
    %42 = vector.load %arg12[%c16_41, %c0_42] : memref<288x256xbf16, #tpu.memory_space<vmem>>, vector<256x256xbf16>
    %c1_43 = arith.constant 1 : index
    %c0_44 = arith.constant 0 : index
    %c0_45 = arith.constant 0 : index
    %c0_46 = arith.constant 0 : index
    %43 = vector.load %arg8[%c1_43, %c0_44, %c0_45, %c0_46] : memref<3x3x256x128xbf16, #tpu.memory_space<vmem>>, vector<1x1x256x128xbf16>
    %44 = vector.shape_cast %43 : vector<1x1x256x128xbf16> to vector<256x128xbf16>
    %cst_47 = arith.constant dense<0.000000e+00> : vector<256x128xf32>
    %45 = tpu.matmul %42, %44, %cst_47 {dimension_numbers = #tpu.dot_dimension_numbers<[1], [0], [0], [1], [0, 0, 1, 1], [], []>} : vector<256x256xbf16>, vector<256x128xbf16>, vector<256x128xf32> -> vector<256x128xf32>
    %46 = arith.addf %41, %45 : vector<256x128xf32>
    %c32_48 = arith.constant 32 : index
    %c0_49 = arith.constant 0 : index
    %47 = vector.load %arg12[%c32_48, %c0_49] : memref<288x256xbf16, #tpu.memory_space<vmem>>, vector<256x256xbf16>
    %c2_50 = arith.constant 2 : index
    %c0_51 = arith.constant 0 : index
    %c0_52 = arith.constant 0 : index
    %c0_53 = arith.constant 0 : index
    %48 = vector.load %arg8[%c2_50, %c0_51, %c0_52, %c0_53] : memref<3x3x256x128xbf16, #tpu.memory_space<vmem>>, vector<1x1x256x128xbf16>
    %49 = vector.shape_cast %48 : vector<1x1x256x128xbf16> to vector<256x128xbf16>
    %cst_54 = arith.constant dense<0.000000e+00> : vector<256x128xf32>
    %50 = tpu.matmul %47, %49, %cst_54 {dimension_numbers = #tpu.dot_dimension_numbers<[1], [0], [0], [1], [0, 0, 1, 1], [], []>} : vector<256x256xbf16>, vector<256x128xbf16>, vector<256x128xf32> -> vector<256x128xf32>
    %51 = arith.addf %46, %50 : vector<256x128xf32>
    %c1_i32 = arith.constant 1 : i32
    %52 = tpu.dynamic_rotate %51 by %c1_i32 dim 0 : vector<256x128xf32>, i32 -> vector<256x128xf32>
    %cst_55 = arith.constant 0.000000e+00 : f32
    %53 = vector.shape_cast %37 : vector<256x1xi1> to vector<256x1xi1>
    %54 = vector.broadcast %53 : vector<256x1xi1> to vector<256x128xi1>
    %55 = vector.broadcast %cst_55 : f32 to vector<256x128xf32>
    %56 = arith.select %54, %52, %55 : vector<256x128xi1>, vector<256x128xf32>
    %57 = arith.addf %35, %56 : vector<256x128xf32>
    %c15_i32 = arith.constant 15 : i32
    %58 = vector.broadcast %c15_i32 : i32 to vector<256x1xi32>
    %59 = arith.cmpi ne, %21, %58 : vector<256x1xi32>
    %c0_56 = arith.constant 0 : index
    %c0_57 = arith.constant 0 : index
    %60 = vector.load %arg12[%c0_56, %c0_57] : memref<288x256xbf16, #tpu.memory_space<vmem>>, vector<256x256xbf16>
    %c0_58 = arith.constant 0 : index
    %c2_59 = arith.constant 2 : index
    %c0_60 = arith.constant 0 : index
    %c0_61 = arith.constant 0 : index
    %61 = vector.load %arg8[%c0_58, %c2_59, %c0_60, %c0_61] : memref<3x3x256x128xbf16, #tpu.memory_space<vmem>>, vector<1x1x256x128xbf16>
    %62 = vector.shape_cast %61 : vector<1x1x256x128xbf16> to vector<256x128xbf16>
    %cst_62 = arith.constant dense<0.000000e+00> : vector<256x128xf32>
    %63 = tpu.matmul %60, %62, %cst_62 {dimension_numbers = #tpu.dot_dimension_numbers<[1], [0], [0], [1], [0, 0, 1, 1], [], []>} : vector<256x256xbf16>, vector<256x128xbf16>, vector<256x128xf32> -> vector<256x128xf32>
    %c16_63 = arith.constant 16 : index
    %c0_64 = arith.constant 0 : index
    %64 = vector.load %arg12[%c16_63, %c0_64] : memref<288x256xbf16, #tpu.memory_space<vmem>>, vector<256x256xbf16>
    %c1_65 = arith.constant 1 : index
    %c2_66 = arith.constant 2 : index
    %c0_67 = arith.constant 0 : index
    %c0_68 = arith.constant 0 : index
    %65 = vector.load %arg8[%c1_65, %c2_66, %c0_67, %c0_68] : memref<3x3x256x128xbf16, #tpu.memory_space<vmem>>, vector<1x1x256x128xbf16>
    %66 = vector.shape_cast %65 : vector<1x1x256x128xbf16> to vector<256x128xbf16>
    %cst_69 = arith.constant dense<0.000000e+00> : vector<256x128xf32>
    %67 = tpu.matmul %64, %66, %cst_69 {dimension_numbers = #tpu.dot_dimension_numbers<[1], [0], [0], [1], [0, 0, 1, 1], [], []>} : vector<256x256xbf16>, vector<256x128xbf16>, vector<256x128xf32> -> vector<256x128xf32>
    %68 = arith.addf %63, %67 : vector<256x128xf32>
    %c32_70 = arith.constant 32 : index
    %c0_71 = arith.constant 0 : index
    %69 = vector.load %arg12[%c32_70, %c0_71] : memref<288x256xbf16, #tpu.memory_space<vmem>>, vector<256x256xbf16>
    %c2_72 = arith.constant 2 : index
    %c2_73 = arith.constant 2 : index
    %c0_74 = arith.constant 0 : index
    %c0_75 = arith.constant 0 : index
    %70 = vector.load %arg8[%c2_72, %c2_73, %c0_74, %c0_75] : memref<3x3x256x128xbf16, #tpu.memory_space<vmem>>, vector<1x1x256x128xbf16>
    %71 = vector.shape_cast %70 : vector<1x1x256x128xbf16> to vector<256x128xbf16>
    %cst_76 = arith.constant dense<0.000000e+00> : vector<256x128xf32>
    %72 = tpu.matmul %69, %71, %cst_76 {dimension_numbers = #tpu.dot_dimension_numbers<[1], [0], [0], [1], [0, 0, 1, 1], [], []>} : vector<256x256xbf16>, vector<256x128xbf16>, vector<256x128xf32> -> vector<256x128xf32>
    %73 = arith.addf %68, %72 : vector<256x128xf32>
    %c255_i32 = arith.constant 255 : i32
    %74 = tpu.dynamic_rotate %73 by %c255_i32 dim 0 : vector<256x128xf32>, i32 -> vector<256x128xf32>
    %cst_77 = arith.constant 0.000000e+00 : f32
    %75 = vector.shape_cast %59 : vector<256x1xi1> to vector<256x1xi1>
    %76 = vector.broadcast %75 : vector<256x1xi1> to vector<256x128xi1>
    %77 = vector.broadcast %cst_77 : f32 to vector<256x128xf32>
    %78 = arith.select %76, %74, %77 : vector<256x128xi1>, vector<256x128xf32>
    %79 = arith.addf %57, %78 : vector<256x128xf32>
    %80 = vector.shape_cast %79 : vector<256x128xf32> to vector<1x16x16x128xf32>
    %81 = arith.truncf %80 : vector<1x16x16x128xf32> to vector<1x16x16x128xbf16>
    %c0_78 = arith.constant 0 : index
    %c0_79 = arith.constant 0 : index
    %c0_80 = arith.constant 0 : index
    %c0_81 = arith.constant 0 : index
    %82 = vector.load %arg9[%c0_78, %c0_79, %c0_80, %c0_81] : memref<1x16x16x128xbf16, #tpu.memory_space<vmem>>, vector<1x16x16x128xbf16>
    tpu.vector_store %arg9[%c0_78, %c0_79, %c0_80, %c0_81], %81 {strides = array<i32>} : memref<1x16x16x128xbf16, #tpu.memory_space<vmem>>, vector<1x16x16x128xbf16>,
    %cst_82 = arith.constant dense<0.000000e+00> : vector<128xf32>
    %83 = vector.multi_reduction <add>, %79, %cst_82 [0] : vector<256x128xf32> to vector<128xf32>
    %84 = vector.shape_cast %83 : vector<128xf32> to vector<1x128xf32>
    %85 = arith.mulf %79, %79 : vector<256x128xf32>
    %cst_83 = arith.constant dense<0.000000e+00> : vector<128xf32>
    %86 = vector.multi_reduction <add>, %85, %cst_83 [0] : vector<256x128xf32> to vector<128xf32>
    %87 = vector.shape_cast %86 : vector<128xf32> to vector<1x128xf32>
    %88 = vector.shape_cast %84 : vector<1x128xf32> to vector<1x128xf32>
    %89 = vector.broadcast %88 : vector<1x128xf32> to vector<8x128xf32>
    %c0_84 = arith.constant 0 : index
    %c0_85 = arith.constant 0 : index
    %90 = vector.load %arg10[%c0_84, %c0_85] : memref<8x128xf32, #tpu.memory_space<vmem>>, vector<8x128xf32>
    tpu.vector_store %arg10[%c0_84, %c0_85], %89 {strides = array<i32>} : memref<8x128xf32, #tpu.memory_space<vmem>>, vector<8x128xf32>,
    %91 = vector.shape_cast %87 : vector<1x128xf32> to vector<1x128xf32>
    %92 = vector.broadcast %91 : vector<1x128xf32> to vector<8x128xf32>
    %c0_86 = arith.constant 0 : index
    %c0_87 = arith.constant 0 : index
    %93 = vector.load %arg11[%c0_86, %c0_87] : memref<8x128xf32, #tpu.memory_space<vmem>>, vector<8x128xf32>
    tpu.vector_store %arg11[%c0_86, %c0_87], %92 {strides = array<i32>} : memref<8x128xf32, #tpu.memory_space<vmem>>, vector<8x128xf32>,
    return
  }
  func.func @transform_0(%arg0: i32, %arg1: i32) -> (i32, i32, i32, i32) {
    %c0_i32 = arith.constant 0 : i32
    %c0_i32_0 = arith.constant 0 : i32
    %c0_i32_1 = arith.constant 0 : i32
    return %arg0, %arg1, %c0_i32, %c0_i32_0 : i32, i32, i32, i32
  }
  func.func @transform_1(%arg0: i32, %arg1: i32) -> (i32, i32, i32, i32) {
    %c16_i32 = arith.constant 16 : i32
    %0 = arith.muli %arg1, %c16_i32 : i32
    %c1_i32 = arith.constant 1 : i32
    %1 = arith.subi %0, %c1_i32 : i32
    %c0_i32 = arith.constant 0 : i32
    %2 = arith.maxsi %1, %c0_i32 : i32
    %c0_i32_0 = arith.constant 0 : i32
    %c0_i32_1 = arith.constant 0 : i32
    %c0_i32_2 = arith.constant 0 : i32
    return %arg0, %2, %c0_i32_0, %c0_i32_1 : i32, i32, i32, i32
  }
  func.func @transform_2(%arg0: i32, %arg1: i32) -> (i32, i32, i32, i32) {
    %c16_i32 = arith.constant 16 : i32
    %0 = arith.muli %arg1, %c16_i32 : i32
    %c16_i32_0 = arith.constant 16 : i32
    %1 = arith.addi %0, %c16_i32_0 : i32
    %c15_i32 = arith.constant 15 : i32
    %2 = arith.minsi %1, %c15_i32 : i32
    %c0_i32 = arith.constant 0 : i32
    %c0_i32_1 = arith.constant 0 : i32
    %c0_i32_2 = arith.constant 0 : i32
    return %arg0, %2, %c0_i32, %c0_i32_1 : i32, i32, i32, i32
  }
  func.func @transform_3(%arg0: i32, %arg1: i32) -> (i32, i32, i32, i32) {
    %c0_i32 = arith.constant 0 : i32
    %c0_i32_0 = arith.constant 0 : i32
    %c0_i32_1 = arith.constant 0 : i32
    return %arg0, %arg1, %c0_i32, %c0_i32_0 : i32, i32, i32, i32
  }
  func.func @transform_4(%arg0: i32, %arg1: i32) -> (i32, i32, i32, i32) {
    %c16_i32 = arith.constant 16 : i32
    %0 = arith.muli %arg1, %c16_i32 : i32
    %c1_i32 = arith.constant 1 : i32
    %1 = arith.subi %0, %c1_i32 : i32
    %c0_i32 = arith.constant 0 : i32
    %2 = arith.maxsi %1, %c0_i32 : i32
    %c0_i32_0 = arith.constant 0 : i32
    %c0_i32_1 = arith.constant 0 : i32
    %c0_i32_2 = arith.constant 0 : i32
    return %arg0, %2, %c0_i32_0, %c0_i32_1 : i32, i32, i32, i32
  }
  func.func @transform_5(%arg0: i32, %arg1: i32) -> (i32, i32, i32, i32) {
    %c16_i32 = arith.constant 16 : i32
    %0 = arith.muli %arg1, %c16_i32 : i32
    %c16_i32_0 = arith.constant 16 : i32
    %1 = arith.addi %0, %c16_i32_0 : i32
    %c15_i32 = arith.constant 15 : i32
    %2 = arith.minsi %1, %c15_i32 : i32
    %c0_i32 = arith.constant 0 : i32
    %c0_i32_1 = arith.constant 0 : i32
    %c0_i32_2 = arith.constant 0 : i32
    return %arg0, %2, %c0_i32, %c0_i32_1 : i32, i32, i32, i32
  }
  func.func @transform_6(%arg0: i32, %arg1: i32) -> (i32, i32, i32, i32) {
    %c0_i32 = arith.constant 0 : i32
    %c0_i32_0 = arith.constant 0 : i32
    %c0_i32_1 = arith.constant 0 : i32
    %c0_i32_2 = arith.constant 0 : i32
    %c0_i32_3 = arith.constant 0 : i32
    return %c0_i32, %c0_i32_0, %c0_i32_1, %c0_i32_2 : i32, i32, i32, i32
  }
  func.func @transform_7(%arg0: i32, %arg1: i32) -> (i32, i32, i32, i32) {
    %c0_i32 = arith.constant 0 : i32
    %c0_i32_0 = arith.constant 0 : i32
    %c0_i32_1 = arith.constant 0 : i32
    return %arg0, %arg1, %c0_i32, %c0_i32_0 : i32, i32, i32, i32
  }
  func.func @transform_8(%arg0: i32, %arg1: i32) -> (i32, i32) {
    %c1_i32 = arith.constant 1 : i32
    %0 = arith.muli %arg0, %c1_i32 : i32
    %1 = arith.addi %0, %arg1 : i32
    %c0_i32 = arith.constant 0 : i32
    %c0_i32_0 = arith.constant 0 : i32
    return %1, %c0_i32 : i32, i32
  }
  func.func @transform_9(%arg0: i32, %arg1: i32) -> (i32, i32) {
    %c1_i32 = arith.constant 1 : i32
    %0 = arith.muli %arg0, %c1_i32 : i32
    %1 = arith.addi %0, %arg1 : i32
    %c0_i32 = arith.constant 0 : i32
    %c0_i32_0 = arith.constant 0 : i32
    return %1, %c0_i32 : i32, i32
  }
}

module attributes {stable_mosaic.version = 11 : i64} {
  func.func @_bn_relu_kernel(%arg0: i32, %arg1: memref<512x128xbf16, #tpu.memory_space<vmem>>, %arg2: memref<2x128xf32, #tpu.memory_space<vmem>>, %arg3: memref<512x128xf32, #tpu.memory_space<vmem>>) attributes {dimension_semantics = [#tpu.dimension_semantics<parallel>], iteration_bounds = array<i64: 1>, scalar_prefetch = 0 : i64, scratch_operands = 0 : i64, tpu.core_type = #tpu.core_type<tc>, window_params = [{transform_indices = @transform_0, window_bounds = array<i64: 512, 128>}, {pipeline_mode = #tpu.pipeline_mode<synchronous>, transform_indices = @transform_1, window_bounds = array<i64: 2, 128>}, {transform_indices = @transform_2, window_bounds = array<i64: 512, 128>}]} {
    %c0 = arith.constant 0 : index
    %c0_0 = arith.constant 0 : index
    %0 = vector.load %arg2[%c0, %c0_0] : memref<2x128xf32, #tpu.memory_space<vmem>>, vector<1x128xf32>
    %c1 = arith.constant 1 : index
    %c0_1 = arith.constant 0 : index
    %1 = vector.load %arg2[%c1, %c0_1] : memref<2x128xf32, #tpu.memory_space<vmem>>, vector<1x128xf32>
    %c0_2 = arith.constant 0 : index
    %c0_3 = arith.constant 0 : index
    %2 = vector.load %arg1[%c0_2, %c0_3] : memref<512x128xbf16, #tpu.memory_space<vmem>>, vector<512x128xbf16>
    %3 = arith.extf %2 : vector<512x128xbf16> to vector<512x128xf32>
    %4 = vector.broadcast %0 : vector<1x128xf32> to vector<512x128xf32>
    %5 = arith.mulf %3, %4 : vector<512x128xf32>
    %6 = vector.broadcast %1 : vector<1x128xf32> to vector<512x128xf32>
    %7 = arith.addf %5, %6 : vector<512x128xf32>
    %cst = arith.constant 0.000000e+00 : f32
    %8 = vector.broadcast %cst : f32 to vector<512x128xf32>
    %9 = arith.maximumf %7, %8 : vector<512x128xf32>
    %c0_4 = arith.constant 0 : index
    %c0_5 = arith.constant 0 : index
    %10 = vector.load %arg3[%c0_4, %c0_5] : memref<512x128xf32, #tpu.memory_space<vmem>>, vector<512x128xf32>
    tpu.vector_store %arg3[%c0_4, %c0_5], %9 {strides = array<i32>} : memref<512x128xf32, #tpu.memory_space<vmem>>, vector<512x128xf32>,
    return
  }
  func.func @transform_0(%arg0: i32) -> (i32, i32) {
    %c0_i32 = arith.constant 0 : i32
    %c0_i32_0 = arith.constant 0 : i32
    return %arg0, %c0_i32 : i32, i32
  }
  func.func @transform_1(%arg0: i32) -> (i32, i32) {
    %c0_i32 = arith.constant 0 : i32
    %c0_i32_0 = arith.constant 0 : i32
    %c0_i32_1 = arith.constant 0 : i32
    return %c0_i32, %c0_i32_0 : i32, i32
  }
  func.func @transform_2(%arg0: i32) -> (i32, i32) {
    %c0_i32 = arith.constant 0 : i32
    %c0_i32_0 = arith.constant 0 : i32
    return %arg0, %c0_i32 : i32, i32
  }
}

module attributes {stable_mosaic.version = 11 : i64} {
  func.func @kernel(%arg0: i32, %arg1: i32, %arg2: memref<1x16x16x128xbf16, #tpu.memory_space<vmem>>, %arg3: memref<1x1x16x128xbf16, #tpu.memory_space<vmem>>, %arg4: memref<1x1x16x128xbf16, #tpu.memory_space<vmem>>, %arg5: memref<2x128xf32, #tpu.memory_space<vmem>>, %arg6: memref<3x3x128x128xbf16, #tpu.memory_space<vmem>>, %arg7: memref<1x16x16x128xbf16, #tpu.memory_space<vmem>>, %arg8: memref<8x128xf32, #tpu.memory_space<vmem>>, %arg9: memref<8x128xf32, #tpu.memory_space<vmem>>, %arg10: memref<288x128xbf16, #tpu.memory_space<vmem>>) attributes {dimension_semantics = [#tpu.dimension_semantics<parallel>, #tpu.dimension_semantics<parallel>], iteration_bounds = array<i64: 2, 1>, scalar_prefetch = 0 : i64, scratch_operands = 1 : i64, tpu.core_type = #tpu.core_type<tc>, window_params = [{transform_indices = @transform_0, window_bounds = array<i64: 1, 16, 16, 128>}, {transform_indices = @transform_1, window_bounds = array<i64: 1, 1, 16, 128>}, {transform_indices = @transform_2, window_bounds = array<i64: 1, 1, 16, 128>}, {pipeline_mode = #tpu.pipeline_mode<synchronous>, transform_indices = @transform_3, window_bounds = array<i64: 2, 128>}, {pipeline_mode = #tpu.pipeline_mode<synchronous>, transform_indices = @transform_4, window_bounds = array<i64: 3, 3, 128, 128>}, {transform_indices = @transform_5, window_bounds = array<i64: 1, 16, 16, 128>}, {transform_indices = @transform_6, window_bounds = array<i64: 8, 128>}, {transform_indices = @transform_7, window_bounds = array<i64: 8, 128>}]} {
    %c0 = arith.constant 0 : index
    %c0_0 = arith.constant 0 : index
    %0 = vector.load %arg5[%c0, %c0_0] : memref<2x128xf32, #tpu.memory_space<vmem>>, vector<1x128xf32>
    %c1 = arith.constant 1 : index
    %c0_1 = arith.constant 0 : index
    %1 = vector.load %arg5[%c1, %c0_1] : memref<2x128xf32, #tpu.memory_space<vmem>>, vector<1x128xf32>
    %c0_2 = arith.constant 0 : index
    %c0_3 = arith.constant 0 : index
    %c0_4 = arith.constant 0 : index
    %c0_5 = arith.constant 0 : index
    %2 = vector.load %arg2[%c0_2, %c0_3, %c0_4, %c0_5] : memref<1x16x16x128xbf16, #tpu.memory_space<vmem>>, vector<1x16x16x128xbf16>
    %3 = vector.shape_cast %2 : vector<1x16x16x128xbf16> to vector<16x16x128xbf16>
    %4 = vector.shape_cast %3 : vector<16x16x128xbf16> to vector<256x128xbf16>
    %5 = arith.extf %4 : vector<256x128xbf16> to vector<256x128xf32>
    %6 = vector.broadcast %0 : vector<1x128xf32> to vector<256x128xf32>
    %7 = arith.mulf %5, %6 : vector<256x128xf32>
    %8 = vector.broadcast %1 : vector<1x128xf32> to vector<256x128xf32>
    %9 = arith.addf %7, %8 : vector<256x128xf32>
    %cst = arith.constant 0.000000e+00 : f32
    %10 = vector.broadcast %cst : f32 to vector<256x128xf32>
    %11 = arith.maximumf %9, %10 : vector<256x128xf32>
    %12 = arith.truncf %11 : vector<256x128xf32> to vector<256x128xbf16>
    %c16 = arith.constant 16 : index
    %c0_6 = arith.constant 0 : index
    %13 = vector.load %arg10[%c16, %c0_6] : memref<288x128xbf16, #tpu.memory_space<vmem>>, vector<256x128xbf16>
    tpu.vector_store %arg10[%c16, %c0_6], %12 {strides = array<i32>} : memref<288x128xbf16, #tpu.memory_space<vmem>>, vector<256x128xbf16>,
    %c0_i32 = arith.constant 0 : i32
    %14 = arith.cmpi eq, %arg1, %c0_i32 : i32
    %15 = arith.extui %14 : i1 to i32
    %c0_i32_7 = arith.constant 0 : i32
    %16 = arith.cmpi ne, %15, %c0_i32_7 : i32
    scf.if %16 {
      %cst_88 = arith.constant 0.000000e+00 : bf16
      %100 = vector.broadcast %cst_88 : bf16 to vector<16x128xbf16>
      %c0_89 = arith.constant 0 : index
      %c0_90 = arith.constant 0 : index
      %101 = vector.load %arg10[%c0_89, %c0_90] : memref<288x128xbf16, #tpu.memory_space<vmem>>, vector<16x128xbf16>
      tpu.vector_store %arg10[%c0_89, %c0_90], %100 {strides = array<i32>} : memref<288x128xbf16, #tpu.memory_space<vmem>>, vector<16x128xbf16>,
    } else {
    }
    %c0_i32_8 = arith.constant 0 : i32
    %17 = arith.cmpi ne, %arg1, %c0_i32_8 : i32
    %18 = arith.extui %17 : i1 to i32
    %c0_i32_9 = arith.constant 0 : i32
    %19 = arith.cmpi ne, %18, %c0_i32_9 : i32
    scf.if %19 {
      %c0_88 = arith.constant 0 : index
      %c0_89 = arith.constant 0 : index
      %c0_90 = arith.constant 0 : index
      %c0_91 = arith.constant 0 : index
      %100 = vector.load %arg3[%c0_88, %c0_89, %c0_90, %c0_91] : memref<1x1x16x128xbf16, #tpu.memory_space<vmem>>, vector<1x1x16x128xbf16>
      %101 = vector.shape_cast %100 : vector<1x1x16x128xbf16> to vector<16x128xbf16>
      %102 = arith.extf %101 : vector<16x128xbf16> to vector<16x128xf32>
      %103 = vector.broadcast %0 : vector<1x128xf32> to vector<16x128xf32>
      %104 = arith.mulf %102, %103 : vector<16x128xf32>
      %105 = vector.broadcast %1 : vector<1x128xf32> to vector<16x128xf32>
      %106 = arith.addf %104, %105 : vector<16x128xf32>
      %cst_92 = arith.constant 0.000000e+00 : f32
      %107 = vector.broadcast %cst_92 : f32 to vector<16x128xf32>
      %108 = arith.maximumf %106, %107 : vector<16x128xf32>
      %109 = arith.truncf %108 : vector<16x128xf32> to vector<16x128xbf16>
      %c0_93 = arith.constant 0 : index
      %c0_94 = arith.constant 0 : index
      %110 = vector.load %arg10[%c0_93, %c0_94] : memref<288x128xbf16, #tpu.memory_space<vmem>>, vector<16x128xbf16>
      tpu.vector_store %arg10[%c0_93, %c0_94], %109 {strides = array<i32>} : memref<288x128xbf16, #tpu.memory_space<vmem>>, vector<16x128xbf16>,
    } else {
    }
    %c0_i32_10 = arith.constant 0 : i32
    %20 = arith.cmpi eq, %arg1, %c0_i32_10 : i32
    %21 = arith.extui %20 : i1 to i32
    %c0_i32_11 = arith.constant 0 : i32
    %22 = arith.cmpi ne, %21, %c0_i32_11 : i32
    scf.if %22 {
      %cst_88 = arith.constant 0.000000e+00 : bf16
      %100 = vector.broadcast %cst_88 : bf16 to vector<16x128xbf16>
      %c272 = arith.constant 272 : index
      %c0_89 = arith.constant 0 : index
      %101 = vector.load %arg10[%c272, %c0_89] : memref<288x128xbf16, #tpu.memory_space<vmem>>, vector<16x128xbf16>
      tpu.vector_store %arg10[%c272, %c0_89], %100 {strides = array<i32>} : memref<288x128xbf16, #tpu.memory_space<vmem>>, vector<16x128xbf16>,
    } else {
    }
    %c0_i32_12 = arith.constant 0 : i32
    %23 = arith.cmpi ne, %arg1, %c0_i32_12 : i32
    %24 = arith.extui %23 : i1 to i32
    %c0_i32_13 = arith.constant 0 : i32
    %25 = arith.cmpi ne, %24, %c0_i32_13 : i32
    scf.if %25 {
      %c0_88 = arith.constant 0 : index
      %c0_89 = arith.constant 0 : index
      %c0_90 = arith.constant 0 : index
      %c0_91 = arith.constant 0 : index
      %100 = vector.load %arg4[%c0_88, %c0_89, %c0_90, %c0_91] : memref<1x1x16x128xbf16, #tpu.memory_space<vmem>>, vector<1x1x16x128xbf16>
      %101 = vector.shape_cast %100 : vector<1x1x16x128xbf16> to vector<16x128xbf16>
      %102 = arith.extf %101 : vector<16x128xbf16> to vector<16x128xf32>
      %103 = vector.broadcast %0 : vector<1x128xf32> to vector<16x128xf32>
      %104 = arith.mulf %102, %103 : vector<16x128xf32>
      %105 = vector.broadcast %1 : vector<1x128xf32> to vector<16x128xf32>
      %106 = arith.addf %104, %105 : vector<16x128xf32>
      %cst_92 = arith.constant 0.000000e+00 : f32
      %107 = vector.broadcast %cst_92 : f32 to vector<16x128xf32>
      %108 = arith.maximumf %106, %107 : vector<16x128xf32>
      %109 = arith.truncf %108 : vector<16x128xf32> to vector<16x128xbf16>
      %c272 = arith.constant 272 : index
      %c0_93 = arith.constant 0 : index
      %110 = vector.load %arg10[%c272, %c0_93] : memref<288x128xbf16, #tpu.memory_space<vmem>>, vector<16x128xbf16>
      tpu.vector_store %arg10[%c272, %c0_93], %109 {strides = array<i32>} : memref<288x128xbf16, #tpu.memory_space<vmem>>, vector<16x128xbf16>,
    } else {
    }
    %26 = tpu.iota {dimensions = array<i32: 1>} : vector<16x16x1xi32>
    %27 = vector.shape_cast %26 : vector<16x16x1xi32> to vector<256x1xi32>
    %c0_14 = arith.constant 0 : index
    %c0_15 = arith.constant 0 : index
    %28 = vector.load %arg10[%c0_14, %c0_15] : memref<288x128xbf16, #tpu.memory_space<vmem>>, vector<256x128xbf16>
    %c0_16 = arith.constant 0 : index
    %c1_17 = arith.constant 1 : index
    %c0_18 = arith.constant 0 : index
    %c0_19 = arith.constant 0 : index
    %29 = vector.load %arg6[%c0_16, %c1_17, %c0_18, %c0_19] : memref<3x3x128x128xbf16, #tpu.memory_space<vmem>>, vector<1x1x128x128xbf16>
    %30 = vector.shape_cast %29 : vector<1x1x128x128xbf16> to vector<128x128xbf16>
    %cst_20 = arith.constant dense<0.000000e+00> : vector<256x128xf32>
    %31 = tpu.matmul %28, %30, %cst_20 {dimension_numbers = #tpu.dot_dimension_numbers<[1], [0], [0], [1], [0, 0, 1, 1], [], []>} : vector<256x128xbf16>, vector<128x128xbf16>, vector<256x128xf32> -> vector<256x128xf32>
    %c16_21 = arith.constant 16 : index
    %c0_22 = arith.constant 0 : index
    %32 = vector.load %arg10[%c16_21, %c0_22] : memref<288x128xbf16, #tpu.memory_space<vmem>>, vector<256x128xbf16>
    %c1_23 = arith.constant 1 : index
    %c1_24 = arith.constant 1 : index
    %c0_25 = arith.constant 0 : index
    %c0_26 = arith.constant 0 : index
    %33 = vector.load %arg6[%c1_23, %c1_24, %c0_25, %c0_26] : memref<3x3x128x128xbf16, #tpu.memory_space<vmem>>, vector<1x1x128x128xbf16>
    %34 = vector.shape_cast %33 : vector<1x1x128x128xbf16> to vector<128x128xbf16>
    %cst_27 = arith.constant dense<0.000000e+00> : vector<256x128xf32>
    %35 = tpu.matmul %32, %34, %cst_27 {dimension_numbers = #tpu.dot_dimension_numbers<[1], [0], [0], [1], [0, 0, 1, 1], [], []>} : vector<256x128xbf16>, vector<128x128xbf16>, vector<256x128xf32> -> vector<256x128xf32>
    %36 = arith.addf %31, %35 : vector<256x128xf32>
    %c32 = arith.constant 32 : index
    %c0_28 = arith.constant 0 : index
    %37 = vector.load %arg10[%c32, %c0_28] : memref<288x128xbf16, #tpu.memory_space<vmem>>, vector<256x128xbf16>
    %c2 = arith.constant 2 : index
    %c1_29 = arith.constant 1 : index
    %c0_30 = arith.constant 0 : index
    %c0_31 = arith.constant 0 : index
    %38 = vector.load %arg6[%c2, %c1_29, %c0_30, %c0_31] : memref<3x3x128x128xbf16, #tpu.memory_space<vmem>>, vector<1x1x128x128xbf16>
    %39 = vector.shape_cast %38 : vector<1x1x128x128xbf16> to vector<128x128xbf16>
    %cst_32 = arith.constant dense<0.000000e+00> : vector<256x128xf32>
    %40 = tpu.matmul %37, %39, %cst_32 {dimension_numbers = #tpu.dot_dimension_numbers<[1], [0], [0], [1], [0, 0, 1, 1], [], []>} : vector<256x128xbf16>, vector<128x128xbf16>, vector<256x128xf32> -> vector<256x128xf32>
    %41 = arith.addf %36, %40 : vector<256x128xf32>
    %c0_i32_33 = arith.constant 0 : i32
    %42 = vector.broadcast %c0_i32_33 : i32 to vector<256x1xi32>
    %43 = arith.cmpi ne, %27, %42 : vector<256x1xi32>
    %c0_34 = arith.constant 0 : index
    %c0_35 = arith.constant 0 : index
    %44 = vector.load %arg10[%c0_34, %c0_35] : memref<288x128xbf16, #tpu.memory_space<vmem>>, vector<256x128xbf16>
    %c0_36 = arith.constant 0 : index
    %c0_37 = arith.constant 0 : index
    %c0_38 = arith.constant 0 : index
    %c0_39 = arith.constant 0 : index
    %45 = vector.load %arg6[%c0_36, %c0_37, %c0_38, %c0_39] : memref<3x3x128x128xbf16, #tpu.memory_space<vmem>>, vector<1x1x128x128xbf16>
    %46 = vector.shape_cast %45 : vector<1x1x128x128xbf16> to vector<128x128xbf16>
    %cst_40 = arith.constant dense<0.000000e+00> : vector<256x128xf32>
    %47 = tpu.matmul %44, %46, %cst_40 {dimension_numbers = #tpu.dot_dimension_numbers<[1], [0], [0], [1], [0, 0, 1, 1], [], []>} : vector<256x128xbf16>, vector<128x128xbf16>, vector<256x128xf32> -> vector<256x128xf32>
    %c16_41 = arith.constant 16 : index
    %c0_42 = arith.constant 0 : index
    %48 = vector.load %arg10[%c16_41, %c0_42] : memref<288x128xbf16, #tpu.memory_space<vmem>>, vector<256x128xbf16>
    %c1_43 = arith.constant 1 : index
    %c0_44 = arith.constant 0 : index
    %c0_45 = arith.constant 0 : index
    %c0_46 = arith.constant 0 : index
    %49 = vector.load %arg6[%c1_43, %c0_44, %c0_45, %c0_46] : memref<3x3x128x128xbf16, #tpu.memory_space<vmem>>, vector<1x1x128x128xbf16>
    %50 = vector.shape_cast %49 : vector<1x1x128x128xbf16> to vector<128x128xbf16>
    %cst_47 = arith.constant dense<0.000000e+00> : vector<256x128xf32>
    %51 = tpu.matmul %48, %50, %cst_47 {dimension_numbers = #tpu.dot_dimension_numbers<[1], [0], [0], [1], [0, 0, 1, 1], [], []>} : vector<256x128xbf16>, vector<128x128xbf16>, vector<256x128xf32> -> vector<256x128xf32>
    %52 = arith.addf %47, %51 : vector<256x128xf32>
    %c32_48 = arith.constant 32 : index
    %c0_49 = arith.constant 0 : index
    %53 = vector.load %arg10[%c32_48, %c0_49] : memref<288x128xbf16, #tpu.memory_space<vmem>>, vector<256x128xbf16>
    %c2_50 = arith.constant 2 : index
    %c0_51 = arith.constant 0 : index
    %c0_52 = arith.constant 0 : index
    %c0_53 = arith.constant 0 : index
    %54 = vector.load %arg6[%c2_50, %c0_51, %c0_52, %c0_53] : memref<3x3x128x128xbf16, #tpu.memory_space<vmem>>, vector<1x1x128x128xbf16>
    %55 = vector.shape_cast %54 : vector<1x1x128x128xbf16> to vector<128x128xbf16>
    %cst_54 = arith.constant dense<0.000000e+00> : vector<256x128xf32>
    %56 = tpu.matmul %53, %55, %cst_54 {dimension_numbers = #tpu.dot_dimension_numbers<[1], [0], [0], [1], [0, 0, 1, 1], [], []>} : vector<256x128xbf16>, vector<128x128xbf16>, vector<256x128xf32> -> vector<256x128xf32>
    %57 = arith.addf %52, %56 : vector<256x128xf32>
    %c1_i32 = arith.constant 1 : i32
    %58 = tpu.dynamic_rotate %57 by %c1_i32 dim 0 : vector<256x128xf32>, i32 -> vector<256x128xf32>
    %cst_55 = arith.constant 0.000000e+00 : f32
    %59 = vector.shape_cast %43 : vector<256x1xi1> to vector<256x1xi1>
    %60 = vector.broadcast %59 : vector<256x1xi1> to vector<256x128xi1>
    %61 = vector.broadcast %cst_55 : f32 to vector<256x128xf32>
    %62 = arith.select %60, %58, %61 : vector<256x128xi1>, vector<256x128xf32>
    %63 = arith.addf %41, %62 : vector<256x128xf32>
    %c15_i32 = arith.constant 15 : i32
    %64 = vector.broadcast %c15_i32 : i32 to vector<256x1xi32>
    %65 = arith.cmpi ne, %27, %64 : vector<256x1xi32>
    %c0_56 = arith.constant 0 : index
    %c0_57 = arith.constant 0 : index
    %66 = vector.load %arg10[%c0_56, %c0_57] : memref<288x128xbf16, #tpu.memory_space<vmem>>, vector<256x128xbf16>
    %c0_58 = arith.constant 0 : index
    %c2_59 = arith.constant 2 : index
    %c0_60 = arith.constant 0 : index
    %c0_61 = arith.constant 0 : index
    %67 = vector.load %arg6[%c0_58, %c2_59, %c0_60, %c0_61] : memref<3x3x128x128xbf16, #tpu.memory_space<vmem>>, vector<1x1x128x128xbf16>
    %68 = vector.shape_cast %67 : vector<1x1x128x128xbf16> to vector<128x128xbf16>
    %cst_62 = arith.constant dense<0.000000e+00> : vector<256x128xf32>
    %69 = tpu.matmul %66, %68, %cst_62 {dimension_numbers = #tpu.dot_dimension_numbers<[1], [0], [0], [1], [0, 0, 1, 1], [], []>} : vector<256x128xbf16>, vector<128x128xbf16>, vector<256x128xf32> -> vector<256x128xf32>
    %c16_63 = arith.constant 16 : index
    %c0_64 = arith.constant 0 : index
    %70 = vector.load %arg10[%c16_63, %c0_64] : memref<288x128xbf16, #tpu.memory_space<vmem>>, vector<256x128xbf16>
    %c1_65 = arith.constant 1 : index
    %c2_66 = arith.constant 2 : index
    %c0_67 = arith.constant 0 : index
    %c0_68 = arith.constant 0 : index
    %71 = vector.load %arg6[%c1_65, %c2_66, %c0_67, %c0_68] : memref<3x3x128x128xbf16, #tpu.memory_space<vmem>>, vector<1x1x128x128xbf16>
    %72 = vector.shape_cast %71 : vector<1x1x128x128xbf16> to vector<128x128xbf16>
    %cst_69 = arith.constant dense<0.000000e+00> : vector<256x128xf32>
    %73 = tpu.matmul %70, %72, %cst_69 {dimension_numbers = #tpu.dot_dimension_numbers<[1], [0], [0], [1], [0, 0, 1, 1], [], []>} : vector<256x128xbf16>, vector<128x128xbf16>, vector<256x128xf32> -> vector<256x128xf32>
    %74 = arith.addf %69, %73 : vector<256x128xf32>
    %c32_70 = arith.constant 32 : index
    %c0_71 = arith.constant 0 : index
    %75 = vector.load %arg10[%c32_70, %c0_71] : memref<288x128xbf16, #tpu.memory_space<vmem>>, vector<256x128xbf16>
    %c2_72 = arith.constant 2 : index
    %c2_73 = arith.constant 2 : index
    %c0_74 = arith.constant 0 : index
    %c0_75 = arith.constant 0 : index
    %76 = vector.load %arg6[%c2_72, %c2_73, %c0_74, %c0_75] : memref<3x3x128x128xbf16, #tpu.memory_space<vmem>>, vector<1x1x128x128xbf16>
    %77 = vector.shape_cast %76 : vector<1x1x128x128xbf16> to vector<128x128xbf16>
    %cst_76 = arith.constant dense<0.000000e+00> : vector<256x128xf32>
    %78 = tpu.matmul %75, %77, %cst_76 {dimension_numbers = #tpu.dot_dimension_numbers<[1], [0], [0], [1], [0, 0, 1, 1], [], []>} : vector<256x128xbf16>, vector<128x128xbf16>, vector<256x128xf32> -> vector<256x128xf32>
    %79 = arith.addf %74, %78 : vector<256x128xf32>
    %c255_i32 = arith.constant 255 : i32
    %80 = tpu.dynamic_rotate %79 by %c255_i32 dim 0 : vector<256x128xf32>, i32 -> vector<256x128xf32>
    %cst_77 = arith.constant 0.000000e+00 : f32
    %81 = vector.shape_cast %65 : vector<256x1xi1> to vector<256x1xi1>
    %82 = vector.broadcast %81 : vector<256x1xi1> to vector<256x128xi1>
    %83 = vector.broadcast %cst_77 : f32 to vector<256x128xf32>
    %84 = arith.select %82, %80, %83 : vector<256x128xi1>, vector<256x128xf32>
    %85 = arith.addf %63, %84 : vector<256x128xf32>
    %86 = vector.shape_cast %85 : vector<256x128xf32> to vector<1x16x16x128xf32>
    %87 = arith.truncf %86 : vector<1x16x16x128xf32> to vector<1x16x16x128xbf16>
    %c0_78 = arith.constant 0 : index
    %c0_79 = arith.constant 0 : index
    %c0_80 = arith.constant 0 : index
    %c0_81 = arith.constant 0 : index
    %88 = vector.load %arg7[%c0_78, %c0_79, %c0_80, %c0_81] : memref<1x16x16x128xbf16, #tpu.memory_space<vmem>>, vector<1x16x16x128xbf16>
    tpu.vector_store %arg7[%c0_78, %c0_79, %c0_80, %c0_81], %87 {strides = array<i32>} : memref<1x16x16x128xbf16, #tpu.memory_space<vmem>>, vector<1x16x16x128xbf16>,
    %cst_82 = arith.constant dense<0.000000e+00> : vector<128xf32>
    %89 = vector.multi_reduction <add>, %85, %cst_82 [0] : vector<256x128xf32> to vector<128xf32>
    %90 = vector.shape_cast %89 : vector<128xf32> to vector<1x128xf32>
    %91 = arith.mulf %85, %85 : vector<256x128xf32>
    %cst_83 = arith.constant dense<0.000000e+00> : vector<128xf32>
    %92 = vector.multi_reduction <add>, %91, %cst_83 [0] : vector<256x128xf32> to vector<128xf32>
    %93 = vector.shape_cast %92 : vector<128xf32> to vector<1x128xf32>
    %94 = vector.shape_cast %90 : vector<1x128xf32> to vector<1x128xf32>
    %95 = vector.broadcast %94 : vector<1x128xf32> to vector<8x128xf32>
    %c0_84 = arith.constant 0 : index
    %c0_85 = arith.constant 0 : index
    %96 = vector.load %arg8[%c0_84, %c0_85] : memref<8x128xf32, #tpu.memory_space<vmem>>, vector<8x128xf32>
    tpu.vector_store %arg8[%c0_84, %c0_85], %95 {strides = array<i32>} : memref<8x128xf32, #tpu.memory_space<vmem>>, vector<8x128xf32>,
    %97 = vector.shape_cast %93 : vector<1x128xf32> to vector<1x128xf32>
    %98 = vector.broadcast %97 : vector<1x128xf32> to vector<8x128xf32>
    %c0_86 = arith.constant 0 : index
    %c0_87 = arith.constant 0 : index
    %99 = vector.load %arg9[%c0_86, %c0_87] : memref<8x128xf32, #tpu.memory_space<vmem>>, vector<8x128xf32>
    tpu.vector_store %arg9[%c0_86, %c0_87], %98 {strides = array<i32>} : memref<8x128xf32, #tpu.memory_space<vmem>>, vector<8x128xf32>,
    return
  }
  func.func @transform_0(%arg0: i32, %arg1: i32) -> (i32, i32, i32, i32) {
    %c0_i32 = arith.constant 0 : i32
    %c0_i32_0 = arith.constant 0 : i32
    %c0_i32_1 = arith.constant 0 : i32
    return %arg0, %arg1, %c0_i32, %c0_i32_0 : i32, i32, i32, i32
  }
  func.func @transform_1(%arg0: i32, %arg1: i32) -> (i32, i32, i32, i32) {
    %c16_i32 = arith.constant 16 : i32
    %0 = arith.muli %arg1, %c16_i32 : i32
    %c1_i32 = arith.constant 1 : i32
    %1 = arith.subi %0, %c1_i32 : i32
    %c0_i32 = arith.constant 0 : i32
    %2 = arith.maxsi %1, %c0_i32 : i32
    %c0_i32_0 = arith.constant 0 : i32
    %c0_i32_1 = arith.constant 0 : i32
    %c0_i32_2 = arith.constant 0 : i32
    return %arg0, %2, %c0_i32_0, %c0_i32_1 : i32, i32, i32, i32
  }
  func.func @transform_2(%arg0: i32, %arg1: i32) -> (i32, i32, i32, i32) {
    %c16_i32 = arith.constant 16 : i32
    %0 = arith.muli %arg1, %c16_i32 : i32
    %c16_i32_0 = arith.constant 16 : i32
    %1 = arith.addi %0, %c16_i32_0 : i32
    %c15_i32 = arith.constant 15 : i32
    %2 = arith.minsi %1, %c15_i32 : i32
    %c0_i32 = arith.constant 0 : i32
    %c0_i32_1 = arith.constant 0 : i32
    %c0_i32_2 = arith.constant 0 : i32
    return %arg0, %2, %c0_i32, %c0_i32_1 : i32, i32, i32, i32
  }
  func.func @transform_3(%arg0: i32, %arg1: i32) -> (i32, i32) {
    %c0_i32 = arith.constant 0 : i32
    %c0_i32_0 = arith.constant 0 : i32
    %c0_i32_1 = arith.constant 0 : i32
    return %c0_i32, %c0_i32_0 : i32, i32
  }
  func.func @transform_4(%arg0: i32, %arg1: i32) -> (i32, i32, i32, i32) {
    %c0_i32 = arith.constant 0 : i32
    %c0_i32_0 = arith.constant 0 : i32
    %c0_i32_1 = arith.constant 0 : i32
    %c0_i32_2 = arith.constant 0 : i32
    %c0_i32_3 = arith.constant 0 : i32
    return %c0_i32, %c0_i32_0, %c0_i32_1, %c0_i32_2 : i32, i32, i32, i32
  }
  func.func @transform_5(%arg0: i32, %arg1: i32) -> (i32, i32, i32, i32) {
    %c0_i32 = arith.constant 0 : i32
    %c0_i32_0 = arith.constant 0 : i32
    %c0_i32_1 = arith.constant 0 : i32
    return %arg0, %arg1, %c0_i32, %c0_i32_0 : i32, i32, i32, i32
  }
  func.func @transform_6(%arg0: i32, %arg1: i32) -> (i32, i32) {
    %c1_i32 = arith.constant 1 : i32
    %0 = arith.muli %arg0, %c1_i32 : i32
    %1 = arith.addi %0, %arg1 : i32
    %c0_i32 = arith.constant 0 : i32
    %c0_i32_0 = arith.constant 0 : i32
    return %1, %c0_i32 : i32, i32
  }
  func.func @transform_7(%arg0: i32, %arg1: i32) -> (i32, i32) {
    %c1_i32 = arith.constant 1 : i32
    %0 = arith.muli %arg0, %c1_i32 : i32
    %1 = arith.addi %0, %arg1 : i32
    %c0_i32 = arith.constant 0 : i32
    %c0_i32_0 = arith.constant 0 : i32
    return %1, %c0_i32 : i32, i32
  }
}

</mosaic_0001>

<bundles_post_ra>
// kernel: tile.8
= control target key start
LH: loop header
LB: loop body
LE: loop exit
PB: predicated region body
PF: predicated region fallthrough
CT: control target
= control target key end

     0   :  { %s22_s0 = inlined_call_operand.vmem [shape: f32[128], index: 0, kind: input, shape index: {}]   ;;  %s23_s1 = inlined_call_operand.vmem [shape: f32[2,128], index: 1, kind: output, shape index: {}]  }
   0x1   :  { %v4_v0 = vld [vmem:[%s22_s0] ss:$0 sm:$0xff] }
   0x2   :  { %5 = vst [vmem:[%s23_s1] sm:$0x3] %v4_v0 }

// kernel: decoder_block_forward.4
= control target key start
LH: loop header
LB: loop body
LE: loop exit
PB: predicated region body
PF: predicated region fallthrough
CT: control target
= control target key end

     0   :  { %v982_v1 = vmov 0   ;;  %v52_v41 = vlaneseq  ;;  %s1311_s1 = inlined_call_operand.vmem [shape: bf16[128,256], index: 1, kind: input, shape index: {}]   ;;  %s1312_s2 = inlined_call_operand.vmem [shape: bf16[128,256], index: 2, kind: input, shape index: {}]   ;;  %s1313_s0 = inlined_call_operand.vmem [shape: bf16[16,8,128], index: 0, kind: input, shape index: {}]   ;;  %s1314_s3 = inlined_call_operand.vmem [shape: f32[1,256], index: 3, kind: input, shape index: {}]   ;;  %s1315_s4 = inlined_call_operand.vmem [shape: bf16[16,2,8,256], index: 4, kind: output, shape index: {}]  }
   0x1   :  { %v926_v0 = vld [vmem:[%s1311_s1 + $0x74] ss:$8 sps:$4 sm:$0xff]   ;;  %222 = vmatprep.mubr.bf16.mxu0 %v982_v1  ;;  %431 = vmatprep.mubr.bf16.mxu1 %v982_v1  ;;  %v930_v3 = vld [vmem:[%s1311_s1 + $0x70] ss:$8 sps:$4 sm:$0xff]   ;;  %v932_v5 = vld [vmem:[%s1311_s1 + $0x64] ss:$8 sps:$4 sm:$0xff]  }
   0x2   :  { %v928_v2 = vld [vmem:[%s1312_s2 + $0x74] ss:$8 sps:$4 sm:$0xff]   ;;  %190 = vmatprep.subr.bf16.mxu0 %v926_v0  ;;  %v931_v4 = vld [vmem:[%s1312_s2 + $0x70] ss:$8 sps:$4 sm:$0xff]   ;;  %v934_v6 = vld [vmem:[%s1312_s2 + $0x64] ss:$8 sps:$4 sm:$0xff]  }
   0x3   :  { %399 = vmatprep.subr.bf16.mxu1 %v928_v2  ;;  %191 = vmatpush1.bf16.msra.mxu0 %v930_v3  ;;  %v936_v7 = vld [vmem:[%s1311_s1 + $0x60] ss:$8 sps:$4 sm:$0xff]   ;;  %v938_v9 = vld [vmem:[%s1311_s1 + $0x54] ss:$8 sps:$4 sm:$0xff]   ;;  %v942_v11 = vld [vmem:[%s1311_s1 + $0x50] ss:$8 sps:$4 sm:$0xff]  }
   0x4   :  { %400 = vmatpush1.bf16.msra.mxu1 %v931_v4  ;;  %192 = vmatprep.subr.bf16.mxu0 %v932_v5  ;;  %v937_v8 = vld [vmem:[%s1312_s2 + $0x60] ss:$8 sps:$4 sm:$0xff]   ;;  %v940_v10 = vld [vmem:[%s1312_s2 + $0x54] ss:$8 sps:$4 sm:$0xff]   ;;  %v943_v12 = vld [vmem:[%s1312_s2 + $0x50] ss:$8 sps:$4 sm:$0xff]  }
   0x5   :  { %401 = vmatprep.subr.bf16.mxu1 %v934_v6  ;;  %v944_v13 = vld [vmem:[%s1311_s1 + $0x44] ss:$8 sps:$4 sm:$0xff]   ;;  %v948_v15 = vld [vmem:[%s1311_s1 + $0x40] ss:$8 sps:$4 sm:$0xff]   ;;  %v950_v17 = vld [vmem:[%s1311_s1 + $0x34] ss:$8 sps:$4 sm:$0xff]  }
   0x6   :  { %v946_v14 = vld [vmem:[%s1312_s2 + $0x44] ss:$8 sps:$4 sm:$0xff]   ;;  %v949_v16 = vld [vmem:[%s1312_s2 + $0x40] ss:$8 sps:$4 sm:$0xff]   ;;  %v952_v18 = vld [vmem:[%s1312_s2 + $0x34] ss:$8 sps:$4 sm:$0xff]  }
   0x7   :  { %193 = vmatpush1.bf16.msra.mxu0 %v936_v7  ;;  %v954_v19 = vld [vmem:[%s1311_s1 + $0x30] ss:$8 sps:$4 sm:$0xff]   ;;  %v956_v21 = vld [vmem:[%s1311_s1 + $0x24] ss:$8 sps:$4 sm:$0xff]   ;;  %v960_v23 = vld [vmem:[%s1311_s1 + $0x20] ss:$8 sps:$4 sm:$0xff]  }
   0x8   :  { %402 = vmatpush1.bf16.msra.mxu1 %v937_v8  ;;  %194 = vmatprep.subr.bf16.mxu0 %v938_v9  ;;  %v955_v20 = vld [vmem:[%s1312_s2 + $0x30] ss:$8 sps:$4 sm:$0xff]   ;;  %v958_v22 = vld [vmem:[%s1312_s2 + $0x24] ss:$8 sps:$4 sm:$0xff]   ;;  %v961_v24 = vld [vmem:[%s1312_s2 + $0x20] ss:$8 sps:$4 sm:$0xff]  }
   0x9   :  { %403 = vmatprep.subr.bf16.mxu1 %v940_v10  ;;  %v962_v25 = vld [vmem:[%s1311_s1 + $0x14] ss:$8 sps:$4 sm:$0xff]   ;;  %v966_v27 = vld [vmem:[%s1311_s1 + $0x10] ss:$8 sps:$4 sm:$0xff]   ;;  %v968_v29 = vld [vmem:[%s1311_s1 + $0x4] ss:$8 sps:$4 sm:$0xff]  }
   0xa   :  { %v964_v26 = vld [vmem:[%s1312_s2 + $0x14] ss:$8 sps:$4 sm:$0xff]   ;;  %v967_v28 = vld [vmem:[%s1312_s2 + $0x10] ss:$8 sps:$4 sm:$0xff]   ;;  %v970_v30 = vld [vmem:[%s1312_s2 + $0x4] ss:$8 sps:$4 sm:$0xff]  }
   0xb   :  { %195 = vmatpush1.bf16.msra.mxu0 %v942_v11  ;;  %v972_v31 = vld [vmem:[%s1311_s1] ss:$8 sps:$4 sm:$0xff]   ;;  %v976_v35 = vld [vmem:[%s1313_s0 + $0x10] sm:$0xff]   ;;  %v977_v36 = vld [vmem:[%s1313_s0 + $0x18] sm:$0xff]   ;;  %v53_v42 = vshrl.u32 %v52_v41, 7 }
   0xc   :  { %404 = vmatpush1.bf16.msra.mxu1 %v943_v12  ;;  %196 = vmatprep.subr.bf16.mxu0 %v944_v13  ;;  %v973_v32 = vld [vmem:[%s1312_s2] ss:$8 sps:$4 sm:$0xff]   ;;  %v980_v39 = vld [vmem:[%s1313_s0 + $0x30] sm:$0xff]   ;;  %v981_v40 = vld [vmem:[%s1313_s0 + $0x38] sm:$0xff]  }
   0xd   :  { %405 = vmatprep.subr.bf16.mxu1 %v946_v14  ;;  %v974_v33 = vld [vmem:[%s1313_s0] sm:$0xff]   ;;  %v975_v34 = vld [vmem:[%s1313_s0 + $0x8] sm:$0xff]   ;;  %v54_v43 = vsub.s32 0, %v53_v42  ;;  %v58_v44 = vsub.s32 1, %v53_v42 }
   0xe   :  { %v978_v37 = vld [vmem:[%s1313_s0 + $0x20] sm:$0xff]   ;;  %v979_v38 = vld [vmem:[%s1313_s0 + $0x28] sm:$0xff]  }
   0xf   :  { %197 = vmatpush1.bf16.msra.mxu0 %v948_v15  ;;  %v50_v45 = vld [vmem:[%s1314_s3] sm:$0x3] }
  0x10   :  { %406 = vmatpush1.bf16.msra.mxu1 %v949_v16  ;;  %198 = vmatprep.subr.bf16.mxu0 %v950_v17  ;;  %v1147_v46 = vrot.slane %v50_v45, %v54_v43  ;;  %v1149_v47 = vrot.slane %v50_v45, %v58_v44 }
  0x11   :  { %407 = vmatprep.subr.bf16.mxu1 %v952_v18 }
  0x13   :  { %199 = vmatpush1.bf16.msra.mxu0 %v954_v19 }
  0x14   :  { %408 = vmatpush1.bf16.msra.mxu1 %v955_v20  ;;  %200 = vmatprep.subr.bf16.mxu0 %v956_v21 }
  0x15   :  { %409 = vmatprep.subr.bf16.mxu1 %v958_v22 }
  0x17   :  { %201 = vmatpush1.bf16.msra.mxu0 %v960_v23 }
  0x18   :  { %410 = vmatpush1.bf16.msra.mxu1 %v961_v24  ;;  %202 = vmatprep.subr.bf16.mxu0 %v962_v25 }
  0x19   :  { %411 = vmatprep.subr.bf16.mxu1 %v964_v26 }
  0x1b   :  { %203 = vmatpush1.bf16.msra.mxu0 %v966_v27 }
  0x1c   :  { %412 = vmatpush1.bf16.msra.mxu1 %v967_v28  ;;  %204 = vmatprep.subr.bf16.mxu0 %v968_v29 }
  0x1d   :  { %413 = vmatprep.subr.bf16.mxu1 %v970_v30 }
  0x1f   :  { %205 = vmatpush1.bf16.msra.mxu0 %v972_v31 }
  0x20   :  { %414 = vmatpush1.bf16.msra.mxu1 %v973_v32 }
  0x22   :  { %223 = vmatmul.mubr.bf16.vlgmr.msra.gmra.mxu0 %v974_v33 }
  0x23   :  { %432 = vmatmul.mubr.bf16.vlgmr.msra.gmra.mxu1 %v974_v33  ;;  %232 = vmatprep.mubr.bf16.mxu0 %v982_v1 }
  0x24   :  { %441 = vmatprep.mubr.bf16.mxu1 %v982_v1 }
  0x2a   :  { %233 = vmatmul.mubr.bf16.gmra.mxu0 %v975_v34 }
  0x2b   :  { %442 = vmatmul.mubr.bf16.gmra.mxu1 %v975_v34  ;;  %242 = vmatprep.mubr.bf16.mxu0 %v982_v1 }
  0x2c   :  { %451 = vmatprep.mubr.bf16.mxu1 %v982_v1 }
  0x32   :  { %243 = vmatmul.mubr.bf16.gmra.mxu0 %v976_v35 }
  0x33   :  { %452 = vmatmul.mubr.bf16.gmra.mxu1 %v976_v35  ;;  %252 = vmatprep.mubr.bf16.mxu0 %v982_v1 }
  0x34   :  { %461 = vmatprep.mubr.bf16.mxu1 %v982_v1 }
  0x3a   :  { %253 = vmatmul.mubr.bf16.gmra.mxu0 %v977_v36 }
  0x3b   :  { %462 = vmatmul.mubr.bf16.gmra.mxu1 %v977_v36  ;;  %262 = vmatprep.mubr.bf16.mxu0 %v982_v1 }
  0x3c   :  { %471 = vmatprep.mubr.bf16.mxu1 %v982_v1 }
  0x42   :  { %263 = vmatmul.mubr.bf16.gmra.mxu0 %v978_v37 }
  0x43   :  { %472 = vmatmul.mubr.bf16.gmra.mxu1 %v978_v37  ;;  %272 = vmatprep.mubr.bf16.mxu0 %v982_v1 }
  0x44   :  { %481 = vmatprep.mubr.bf16.mxu1 %v982_v1 }
  0x4a   :  { %273 = vmatmul.mubr.bf16.gmra.mxu0 %v979_v38 }
  0x4b   :  { %482 = vmatmul.mubr.bf16.gmra.mxu1 %v979_v38  ;;  %282 = vmatprep.mubr.bf16.mxu0 %v982_v1 }
  0x4c   :  { %491 = vmatprep.mubr.bf16.mxu1 %v982_v1 }
  0x52   :  { %283 = vmatmul.mubr.bf16.gmra.mxu0 %v980_v39 }
  0x53   :  { %492 = vmatmul.mubr.bf16.gmra.mxu1 %v980_v39  ;;  %292 = vmatprep.mubr.bf16.mxu0 %v982_v1 }
  0x54   :  { %501 = vmatprep.mubr.bf16.mxu1 %v982_v1 }
  0x5a   :  { %293 = vmatmul.mubr.bf16.gmra.mxu0 %v981_v40 }
  0x5b   :  { %502 = vmatmul.mubr.bf16.gmra.mxu1 %v981_v40 }
  0xe2   :  { %v224_v48 = vpop.f32.mrf.mxu0 }
  0xe3   :  { %v433_v49 = vpop.f32.mrf.mxu1  ;;  %v225_v52 = vadd.f32 %v224_v48, %v1147_v46 }
  0xe4   :  { %v226_v50 = vpop.f32.mrf.mxu0  ;;  %v434_v53 = vadd.f32 %v433_v49, %v1147_v46 }
  0xe5   :  { %v435_v51 = vpop.f32.mrf.mxu1  ;;  %v227_v54 = vadd.f32 %v226_v50, %v1149_v47 }
  0xe6   :  { %v436_v55 = vadd.f32 %v435_v51, %v1149_v47  ;;  %v228_v56 = vpop.f32.mrf.mxu0 }
  0xe7   :  { %v437_v57 = vpop.f32.mrf.mxu1  ;;  %v893_v58 = vpack.c.bf16 %v227_v54, %v225_v52  ;;  %v229_v62 = vadd.f32 %v228_v56, %v1147_v46 }
  0xe8   :  { %v909_v59 = vpack.c.bf16 %v436_v55, %v434_v53  ;;  %v230_v60 = vpop.f32.mrf.mxu0  ;;  %v438_v63 = vadd.f32 %v437_v57, %v1147_v46 }
  0xe9   :  { %v439_v61 = vpop.f32.mrf.mxu1  ;;  %640 = vst [vmem:[%s1315_s4] sm:$0xff] %v893_v58  ;;  %v231_v0 = vadd.f32 %v230_v60, %v1149_v47 }
  0xea   :  { %877 = vst [vmem:[%s1315_s4 + $0x8] sm:$0xff] %v909_v59  ;;  %v440_v1 = vadd.f32 %v439_v61, %v1149_v47  ;;  %v234_v2 = vpop.f32.mrf.mxu0 }
  0xeb   :  { %v443_v3 = vpop.f32.mrf.mxu1  ;;  %v894_v4 = vpack.c.bf16 %v231_v0, %v229_v62  ;;  %v235_v8 = vadd.f32 %v234_v2, %v1147_v46 }
  0xec   :  { %v910_v5 = vpack.c.bf16 %v440_v1, %v438_v63  ;;  %v236_v6 = vpop.f32.mrf.mxu0  ;;  %v444_v9 = vadd.f32 %v443_v3, %v1147_v46 }
  0xed   :  { %v445_v7 = vpop.f32.mrf.mxu1  ;;  %641 = vst [vmem:[%s1315_s4 + $0x10] sm:$0xff] %v894_v4  ;;  %v237_v10 = vadd.f32 %v236_v6, %v1149_v47 }
  0xee   :  { %878 = vst [vmem:[%s1315_s4 + $0x18] sm:$0xff] %v910_v5  ;;  %v446_v11 = vadd.f32 %v445_v7, %v1149_v47  ;;  %v238_v12 = vpop.f32.mrf.mxu0 }
  0xef   :  { %v447_v13 = vpop.f32.mrf.mxu1  ;;  %v895_v14 = vpack.c.bf16 %v237_v10, %v235_v8  ;;  %v239_v18 = vadd.f32 %v238_v12, %v1147_v46 }
  0xf0   :  { %v911_v15 = vpack.c.bf16 %v446_v11, %v444_v9  ;;  %v240_v16 = vpop.f32.mrf.mxu0  ;;  %v448_v19 = vadd.f32 %v447_v13, %v1147_v46 }
  0xf1   :  { %v449_v17 = vpop.f32.mrf.mxu1  ;;  %642 = vst [vmem:[%s1315_s4 + $0x20] sm:$0xff] %v895_v14  ;;  %v241_v20 = vadd.f32 %v240_v16, %v1149_v47 }
  0xf2   :  { %879 = vst [vmem:[%s1315_s4 + $0x28] sm:$0xff] %v911_v15  ;;  %v450_v21 = vadd.f32 %v449_v17, %v1149_v47  ;;  %v244_v22 = vpop.f32.mrf.mxu0 }
  0xf3   :  { %v453_v23 = vpop.f32.mrf.mxu1  ;;  %v896_v24 = vpack.c.bf16 %v241_v20, %v239_v18  ;;  %v245_v28 = vadd.f32 %v244_v22, %v1147_v46 }
  0xf4   :  { %v912_v25 = vpack.c.bf16 %v450_v21, %v448_v19  ;;  %v246_v26 = vpop.f32.mrf.mxu0  ;;  %v454_v29 = vadd.f32 %v453_v23, %v1147_v46 }
  0xf5   :  { %v455_v27 = vpop.f32.mrf.mxu1  ;;  %643 = vst [vmem:[%s1315_s4 + $0x30] sm:$0xff] %v896_v24  ;;  %v247_v30 = vadd.f32 %v246_v26, %v1149_v47 }
  0xf6   :  { %880 = vst [vmem:[%s1315_s4 + $0x38] sm:$0xff] %v912_v25  ;;  %v456_v31 = vadd.f32 %v455_v27, %v1149_v47  ;;  %v248_v32 = vpop.f32.mrf.mxu0 }
  0xf7   :  { %v457_v33 = vpop.f32.mrf.mxu1  ;;  %v897_v34 = vpack.c.bf16 %v247_v30, %v245_v28  ;;  %v249_v38 = vadd.f32 %v248_v32, %v1147_v46 }
  0xf8   :  { %v913_v35 = vpack.c.bf16 %v456_v31, %v454_v29  ;;  %v250_v36 = vpop.f32.mrf.mxu0  ;;  %v458_v39 = vadd.f32 %v457_v33, %v1147_v46 }
  0xf9   :  { %v459_v37 = vpop.f32.mrf.mxu1  ;;  %644 = vst [vmem:[%s1315_s4 + $0x40] sm:$0xff] %v897_v34  ;;  %v251_v40 = vadd.f32 %v250_v36, %v1149_v47 }
  0xfa   :  { %881 = vst [vmem:[%s1315_s4 + $0x48] sm:$0xff] %v913_v35  ;;  %v460_v41 = vadd.f32 %v459_v37, %v1149_v47  ;;  %v254_v42 = vpop.f32.mrf.mxu0 }
  0xfb   :  { %v463_v43 = vpop.f32.mrf.mxu1  ;;  %v898_v44 = vpack.c.bf16 %v251_v40, %v249_v38  ;;  %v255_v50 = vadd.f32 %v254_v42, %v1147_v46 }
  0xfc   :  { %v914_v45 = vpack.c.bf16 %v460_v41, %v458_v39  ;;  %v256_v48 = vpop.f32.mrf.mxu0  ;;  %v464_v51 = vadd.f32 %v463_v43, %v1147_v46 }
  0xfd   :  { %v465_v49 = vpop.f32.mrf.mxu1  ;;  %645 = vst [vmem:[%s1315_s4 + $0x50] sm:$0xff] %v898_v44  ;;  %v257_v52 = vadd.f32 %v256_v48, %v1149_v47 }
  0xfe   :  { %882 = vst [vmem:[%s1315_s4 + $0x58] sm:$0xff] %v914_v45  ;;  %v466_v53 = vadd.f32 %v465_v49, %v1149_v47  ;;  %v258_v54 = vpop.f32.mrf.mxu0 }
  0xff   :  { %v467_v55 = vpop.f32.mrf.mxu1  ;;  %v899_v56 = vpack.c.bf16 %v257_v52, %v255_v50  ;;  %v259_v60 = vadd.f32 %v258_v54, %v1147_v46 }
 0x100   :  { %v915_v57 = vpack.c.bf16 %v466_v53, %v464_v51  ;;  %v260_v58 = vpop.f32.mrf.mxu0  ;;  %v468_v61 = vadd.f32 %v467_v55, %v1147_v46 }
 0x101   :  { %v469_v59 = vpop.f32.mrf.mxu1  ;;  %646 = vst [vmem:[%s1315_s4 + $0x60] sm:$0xff] %v899_v56  ;;  %v261_v62 = vadd.f32 %v260_v58, %v1149_v47 }
 0x102   :  { %883 = vst [vmem:[%s1315_s4 + $0x68] sm:$0xff] %v915_v57  ;;  %v470_v63 = vadd.f32 %v469_v59, %v1149_v47  ;;  %v264_v0 = vpop.f32.mrf.mxu0 }
 0x103   :  { %v473_v1 = vpop.f32.mrf.mxu1  ;;  %v900_v2 = vpack.c.bf16 %v261_v62, %v259_v60  ;;  %v265_v6 = vadd.f32 %v264_v0, %v1147_v46 }
 0x104   :  { %v916_v3 = vpack.c.bf16 %v470_v63, %v468_v61  ;;  %v266_v4 = vpop.f32.mrf.mxu0  ;;  %v474_v7 = vadd.f32 %v473_v1, %v1147_v46 }
 0x105   :  { %v475_v5 = vpop.f32.mrf.mxu1  ;;  %647 = vst [vmem:[%s1315_s4 + $0x70] sm:$0xff] %v900_v2  ;;  %v267_v8 = vadd.f32 %v266_v4, %v1149_v47 }
 0x106   :  { %884 = vst [vmem:[%s1315_s4 + $0x78] sm:$0xff] %v916_v3  ;;  %v476_v9 = vadd.f32 %v475_v5, %v1149_v47  ;;  %v268_v10 = vpop.f32.mrf.mxu0 }
 0x107   :  { %v477_v11 = vpop.f32.mrf.mxu1  ;;  %v901_v12 = vpack.c.bf16 %v267_v8, %v265_v6  ;;  %v269_v16 = vadd.f32 %v268_v10, %v1147_v46 }
 0x108   :  { %v917_v13 = vpack.c.bf16 %v476_v9, %v474_v7  ;;  %v270_v14 = vpop.f32.mrf.mxu0  ;;  %v478_v17 = vadd.f32 %v477_v11, %v1147_v46 }
 0x109   :  { %v479_v15 = vpop.f32.mrf.mxu1  ;;  %648 = vst [vmem:[%s1315_s4 + $0x80] sm:$0xff] %v901_v12  ;;  %v271_v18 = vadd.f32 %v270_v14, %v1149_v47 }
 0x10a   :  { %885 = vst [vmem:[%s1315_s4 + $0x88] sm:$0xff] %v917_v13  ;;  %v480_v19 = vadd.f32 %v479_v15, %v1149_v47  ;;  %v274_v20 = vpop.f32.mrf.mxu0 }
 0x10b   :  { %v483_v21 = vpop.f32.mrf.mxu1  ;;  %v902_v22 = vpack.c.bf16 %v271_v18, %v269_v16  ;;  %v275_v26 = vadd.f32 %v274_v20, %v1147_v46 }
 0x10c   :  { %v918_v23 = vpack.c.bf16 %v480_v19, %v478_v17  ;;  %v276_v24 = vpop.f32.mrf.mxu0  ;;  %v484_v27 = vadd.f32 %v483_v21, %v1147_v46 }
 0x10d   :  { %v485_v25 = vpop.f32.mrf.mxu1  ;;  %649 = vst [vmem:[%s1315_s4 + $0x90] sm:$0xff] %v902_v22  ;;  %v277_v28 = vadd.f32 %v276_v24, %v1149_v47 }
 0x10e   :  { %886 = vst [vmem:[%s1315_s4 + $0x98] sm:$0xff] %v918_v23  ;;  %v486_v29 = vadd.f32 %v485_v25, %v1149_v47  ;;  %v278_v30 = vpop.f32.mrf.mxu0 }
 0x10f   :  { %v487_v31 = vpop.f32.mrf.mxu1  ;;  %v903_v32 = vpack.c.bf16 %v277_v28, %v275_v26  ;;  %v279_v36 = vadd.f32 %v278_v30, %v1147_v46 }
 0x110   :  { %v919_v33 = vpack.c.bf16 %v486_v29, %v484_v27  ;;  %v280_v34 = vpop.f32.mrf.mxu0  ;;  %v488_v37 = vadd.f32 %v487_v31, %v1147_v46 }
 0x111   :  { %v489_v35 = vpop.f32.mrf.mxu1  ;;  %650 = vst [vmem:[%s1315_s4 + $0xa0] sm:$0xff] %v903_v32  ;;  %v281_v38 = vadd.f32 %v280_v34, %v1149_v47 }
 0x112   :  { %887 = vst [vmem:[%s1315_s4 + $0xa8] sm:$0xff] %v919_v33  ;;  %v490_v39 = vadd.f32 %v489_v35, %v1149_v47  ;;  %v284_v40 = vpop.f32.mrf.mxu0 }
 0x113   :  { %v493_v41 = vpop.f32.mrf.mxu1  ;;  %v904_v42 = vpack.c.bf16 %v281_v38, %v279_v36  ;;  %v285_v48 = vadd.f32 %v284_v40, %v1147_v46 }
 0x114   :  { %v920_v43 = vpack.c.bf16 %v490_v39, %v488_v37  ;;  %v286_v44 = vpop.f32.mrf.mxu0  ;;  %v494_v49 = vadd.f32 %v493_v41, %v1147_v46 }
 0x115   :  { %v495_v45 = vpop.f32.mrf.mxu1  ;;  %651 = vst [vmem:[%s1315_s4 + $0xb0] sm:$0xff] %v904_v42  ;;  %v287_v50 = vadd.f32 %v286_v44, %v1149_v47 }
 0x116   :  { %888 = vst [vmem:[%s1315_s4 + $0xb8] sm:$0xff] %v920_v43  ;;  %v496_v51 = vadd.f32 %v495_v45, %v1149_v47  ;;  %v288_v52 = vpop.f32.mrf.mxu0 }
 0x117   :  { %v497_v53 = vpop.f32.mrf.mxu1  ;;  %v905_v54 = vpack.c.bf16 %v287_v50, %v285_v48  ;;  %v289_v58 = vadd.f32 %v288_v52, %v1147_v46 }
 0x118   :  { %v921_v55 = vpack.c.bf16 %v496_v51, %v494_v49  ;;  %v290_v56 = vpop.f32.mrf.mxu0  ;;  %v498_v59 = vadd.f32 %v497_v53, %v1147_v46 }
 0x119   :  { %v499_v57 = vpop.f32.mrf.mxu1  ;;  %652 = vst [vmem:[%s1315_s4 + $0xc0] sm:$0xff] %v905_v54  ;;  %v291_v60 = vadd.f32 %v290_v56, %v1149_v47 }
 0x11a   :  { %889 = vst [vmem:[%s1315_s4 + $0xc8] sm:$0xff] %v921_v55  ;;  %v500_v61 = vadd.f32 %v499_v57, %v1149_v47  ;;  %v294_v62 = vpop.f32.mrf.mxu0 }
 0x11b   :  { %v503_v63 = vpop.f32.mrf.mxu1  ;;  %v906_v0 = vpack.c.bf16 %v291_v60, %v289_v58  ;;  %v295_v4 = vadd.f32 %v294_v62, %v1147_v46 }
 0x11c   :  { %v922_v1 = vpack.c.bf16 %v500_v61, %v498_v59  ;;  %v296_v2 = vpop.f32.mrf.mxu0  ;;  %v504_v5 = vadd.f32 %v503_v63, %v1147_v46 }
 0x11d   :  { %v505_v3 = vpop.f32.mrf.mxu1  ;;  %653 = vst [vmem:[%s1315_s4 + $0xd0] sm:$0xff] %v906_v0  ;;  %v297_v6 = vadd.f32 %v296_v2, %v1149_v47 }
 0x11e   :  { %890 = vst [vmem:[%s1315_s4 + $0xd8] sm:$0xff] %v922_v1  ;;  %v506_v7 = vadd.f32 %v505_v3, %v1149_v47  ;;  %v298_v8 = vpop.f32.mrf.mxu0 }
 0x11f   :  { %v507_v9 = vpop.f32.mrf.mxu1  ;;  %v907_v10 = vpack.c.bf16 %v297_v6, %v295_v4  ;;  %v299_v14 = vadd.f32 %v298_v8, %v1147_v46 }
 0x120   :  { %v923_v11 = vpack.c.bf16 %v506_v7, %v504_v5  ;;  %v300_v12 = vpop.f32.mrf.mxu0  ;;  %v508_v15 = vadd.f32 %v507_v9, %v1147_v46 }
 0x121   :  { %v509_v13 = vpop.f32.mrf.mxu1  ;;  %654 = vst [vmem:[%s1315_s4 + $0xe0] sm:$0xff] %v907_v10  ;;  %v301_v16 = vadd.f32 %v300_v12, %v1149_v47 }
 0x122   :  { %891 = vst [vmem:[%s1315_s4 + $0xe8] sm:$0xff] %v923_v11  ;;  %v510_v17 = vadd.f32 %v509_v13, %v1149_v47 }
 0x123   :  { %v908_v18 = vpack.c.bf16 %v301_v16, %v299_v14 }
 0x124   :  { %v924_v19 = vpack.c.bf16 %v510_v17, %v508_v15 }
 0x125   :  { %655 = vst [vmem:[%s1315_s4 + $0xf0] sm:$0xff] %v908_v18 }
 0x126   :  { %892 = vst [vmem:[%s1315_s4 + $0xf8] sm:$0xff] %v924_v19 }

// kernel: decoder_block_forward.7
= control target key start
LH: loop header
LB: loop body
LE: loop exit
PB: predicated region body
PF: predicated region fallthrough
CT: control target
= control target key end

     0   :  { %s1011_s0 = inlined_call_operand.vmem [shape: bf16[512,128], index: 0, kind: input, shape index: {}]   ;;  %s1012_s1 = inlined_call_operand.vmem [shape: f32[2,128], index: 1, kind: input, shape index: {}]   ;;  %s1013_s2 = inlined_call_operand.vmem [shape: f32[512,128], index: 2, kind: output, shape index: {}]  }
   0x1   :  { %v588_v0 = vld [vmem:[%s1012_s1] ss:$0 sm:$0xff]  ;;  %v539_v4 = vld [vmem:[%s1011_s0 + $0x8] sm:$0xff]   ;;  %v540_v5 = vld [vmem:[%s1011_s0 + $0x10] sm:$0xff]  }
   0x2   :  { %v412_v1 = vld [vmem:[%s1011_s0] sm:$0xff]   ;;  %v541_v6 = vld [vmem:[%s1011_s0 + $0x18] sm:$0xff]   ;;  %v417_v8 = vunpack.c.l.bf16 %v539_v4  ;;  %v418_v9 = vunpack.c.h.bf16 %v539_v4  ;;  %v421_v10 = vunpack.c.l.bf16 %v540_v5  ;;  %v422_v11 = vunpack.c.h.bf16 %v540_v5  ;;  %v543_v33 = vld [vmem:[%s1011_s0 + $0x28] sm:$0xff]  }
   0x3   :  { %v413_v2 = vunpack.c.l.bf16 %v412_v1  ;;  %v414_v3 = vunpack.c.h.bf16 %v412_v1  ;;  %v605_v7 = vld [vmem:[%s1012_s1 + $0x1] ss:$0 sm:$0xff]  ;;  %v425_v14 = vunpack.c.l.bf16 %v541_v6  ;;  %v426_v15 = vunpack.c.h.bf16 %v541_v6  ;;  %v544_v34 = vld [vmem:[%s1011_s0 + $0x30] sm:$0xff]   ;;  %v545_v39 = vld [vmem:[%s1011_s0 + $0x38] sm:$0xff]  }
   0x4   :  { %v147_v16 = vmul.f32 %v417_v8, %v588_v0  ;;  %v148_v17 = vmul.f32 %v418_v9, %v588_v0  ;;  %v149_v18 = vmul.f32 %v421_v10, %v588_v0  ;;  %v150_v19 = vmul.f32 %v422_v11, %v588_v0  ;;  %v542_v28 = vld [vmem:[%s1011_s0 + $0x20] sm:$0xff]   ;;  %v547_v6 = vld [vmem:[%s1011_s0 + $0x48] sm:$0xff]   ;;  %v548_v8 = vld [vmem:[%s1011_s0 + $0x50] sm:$0xff]  }
   0x5   :  { %v145_v12 = vmul.f32 %v413_v2, %v588_v0  ;;  %v146_v13 = vmul.f32 %v414_v3, %v588_v0  ;;  %v151_v22 = vmul.f32 %v425_v14, %v588_v0  ;;  %v152_v23 = vmul.f32 %v426_v15, %v588_v0  ;;  %v546_v1 = vld [vmem:[%s1011_s0 + $0x40] sm:$0xff]  }
   0x6   :  { %v215_v24 = vadd.f32 %v605_v7, %v147_v16  ;;  %v216_v25 = vadd.f32 %v605_v7, %v148_v17  ;;  %v217_v26 = vadd.f32 %v605_v7, %v149_v18  ;;  %v218_v27 = vadd.f32 %v605_v7, %v150_v19 }
   0x7   :  { %v213_v20 = vadd.f32 %v605_v7, %v145_v12  ;;  %v214_v21 = vadd.f32 %v605_v7, %v146_v13  ;;  %v219_v31 = vadd.f32 %v605_v7, %v151_v22  ;;  %v220_v32 = vadd.f32 %v605_v7, %v152_v23  ;;  %v549_v13 = vld [vmem:[%s1011_s0 + $0x58] sm:$0xff]  }
   0x8   :  { %v279_v35 = vmax.f32 %v215_v24, 0.0  ;;  %v280_v36 = vmax.f32 %v216_v25, 0.0  ;;  %v281_v37 = vmax.f32 %v217_v26, 0.0  ;;  %v282_v38 = vmax.f32 %v218_v27, 0.0 }
   0x9   :  { %v277_v29 = vmax.f32 %v213_v20, 0.0  ;;  %v278_v30 = vmax.f32 %v214_v21, 0.0  ;;  %v283_v40 = vmax.f32 %v219_v31, 0.0  ;;  %v284_v41 = vmax.f32 %v220_v32, 0.0 }
   0xa   :  { %v429_v42 = vunpack.c.l.bf16 %v542_v28  ;;  %v430_v43 = vunpack.c.h.bf16 %v542_v28  ;;  %343 = vst [vmem:[%s1013_s2 + $0x10] sm:$0xff] %v279_v35  ;;  %344 = vst [vmem:[%s1013_s2 + $0x18] sm:$0xff] %v280_v36  ;;  %v433_v44 = vunpack.c.l.bf16 %v543_v33  ;;  %v434_v45 = vunpack.c.h.bf16 %v543_v33 }
   0xb   :  { %341 = vst [vmem:[%s1013_s2] sm:$0xff] %v277_v29  ;;  %342 = vst [vmem:[%s1013_s2 + $0x8] sm:$0xff] %v278_v30  ;;  %v437_v46 = vunpack.c.l.bf16 %v544_v34  ;;  %v438_v47 = vunpack.c.h.bf16 %v544_v34  ;;  %v441_v50 = vunpack.c.l.bf16 %v545_v39  ;;  %v442_v51 = vunpack.c.h.bf16 %v545_v39 }
   0xc   :  { %345 = vst [vmem:[%s1013_s2 + $0x20] sm:$0xff] %v281_v37  ;;  %346 = vst [vmem:[%s1013_s2 + $0x28] sm:$0xff] %v282_v38  ;;  %v153_v48 = vmul.f32 %v429_v42, %v588_v0  ;;  %v154_v49 = vmul.f32 %v430_v43, %v588_v0  ;;  %v155_v52 = vmul.f32 %v433_v44, %v588_v0  ;;  %v445_v16 = vunpack.c.l.bf16 %v546_v1  ;;  %v550_v38 = vld [vmem:[%s1011_s0 + $0x60] sm:$0xff]   ;;  %v551_v43 = vld [vmem:[%s1011_s0 + $0x68] sm:$0xff]  }
   0xd   :  { %347 = vst [vmem:[%s1013_s2 + $0x30] sm:$0xff] %v283_v40  ;;  %348 = vst [vmem:[%s1013_s2 + $0x38] sm:$0xff] %v284_v41  ;;  %v156_v53 = vmul.f32 %v434_v45, %v588_v0  ;;  %v157_v54 = vmul.f32 %v437_v46, %v588_v0  ;;  %v158_v55 = vmul.f32 %v438_v47, %v588_v0  ;;  %v446_v17 = vunpack.c.h.bf16 %v546_v1  ;;  %v552_v44 = vld [vmem:[%s1011_s0 + $0x70] sm:$0xff]  }
   0xe   :  { %v221_v56 = vadd.f32 %v605_v7, %v153_v48  ;;  %v222_v57 = vadd.f32 %v605_v7, %v154_v49  ;;  %v159_v58 = vmul.f32 %v441_v50, %v588_v0  ;;  %v160_v59 = vmul.f32 %v442_v51, %v588_v0  ;;  %v553_v49 = vld [vmem:[%s1011_s0 + $0x78] sm:$0xff]  }
   0xf   :  { %v223_v60 = vadd.f32 %v605_v7, %v155_v52  ;;  %v224_v61 = vadd.f32 %v605_v7, %v156_v53  ;;  %v225_v62 = vadd.f32 %v605_v7, %v157_v54  ;;  %v226_v63 = vadd.f32 %v605_v7, %v158_v55 }
  0x10   :  { %v285_v2 = vmax.f32 %v221_v56, 0.0  ;;  %v286_v3 = vmax.f32 %v222_v57, 0.0  ;;  %v227_v4 = vadd.f32 %v605_v7, %v159_v58  ;;  %v228_v5 = vadd.f32 %v605_v7, %v160_v59 }
  0x11   :  { %v287_v9 = vmax.f32 %v223_v60, 0.0  ;;  %v288_v10 = vmax.f32 %v224_v61, 0.0  ;;  %v289_v11 = vmax.f32 %v225_v62, 0.0  ;;  %v290_v12 = vmax.f32 %v226_v63, 0.0 }
  0x12   :  { %349 = vst [vmem:[%s1013_s2 + $0x40] sm:$0xff] %v285_v2  ;;  %350 = vst [vmem:[%s1013_s2 + $0x48] sm:$0xff] %v286_v3  ;;  %v291_v14 = vmax.f32 %v227_v4, 0.0  ;;  %v292_v15 = vmax.f32 %v228_v5, 0.0  ;;  %v449_v18 = vunpack.c.l.bf16 %v547_v6  ;;  %v450_v19 = vunpack.c.h.bf16 %v547_v6 }
  0x13   :  { %351 = vst [vmem:[%s1013_s2 + $0x50] sm:$0xff] %v287_v9  ;;  %352 = vst [vmem:[%s1013_s2 + $0x58] sm:$0xff] %v288_v10  ;;  %v453_v20 = vunpack.c.l.bf16 %v548_v8  ;;  %v454_v21 = vunpack.c.h.bf16 %v548_v8  ;;  %v161_v22 = vmul.f32 %v445_v16, %v588_v0  ;;  %v162_v23 = vmul.f32 %v446_v17, %v588_v0  ;;  %v555_v17 = vld [vmem:[%s1011_s0 + $0x88] sm:$0xff]  }
  0x14   :  { %353 = vst [vmem:[%s1013_s2 + $0x60] sm:$0xff] %v289_v11  ;;  %354 = vst [vmem:[%s1013_s2 + $0x68] sm:$0xff] %v290_v12  ;;  %v457_v24 = vunpack.c.l.bf16 %v549_v13  ;;  %v458_v25 = vunpack.c.h.bf16 %v549_v13  ;;  %v163_v26 = vmul.f32 %v449_v18, %v588_v0  ;;  %v164_v27 = vmul.f32 %v450_v19, %v588_v0  ;;  %v554_v12 = vld [vmem:[%s1011_s0 + $0x80] sm:$0xff]   ;;  %v556_v18 = vld [vmem:[%s1011_s0 + $0x90] sm:$0xff]  }
  0x15   :  { %355 = vst [vmem:[%s1013_s2 + $0x70] sm:$0xff] %v291_v14  ;;  %356 = vst [vmem:[%s1013_s2 + $0x78] sm:$0xff] %v292_v15  ;;  %v165_v28 = vmul.f32 %v453_v20, %v588_v0  ;;  %v166_v29 = vmul.f32 %v454_v21, %v588_v0  ;;  %v229_v30 = vadd.f32 %v605_v7, %v161_v22  ;;  %v461_v52 = vunpack.c.l.bf16 %v550_v38 }
  0x16   :  { %v230_v31 = vadd.f32 %v605_v7, %v162_v23  ;;  %v167_v32 = vmul.f32 %v457_v24, %v588_v0  ;;  %v168_v33 = vmul.f32 %v458_v25, %v588_v0  ;;  %v231_v34 = vadd.f32 %v605_v7, %v163_v26  ;;  %v557_v23 = vld [vmem:[%s1011_s0 + $0x98] sm:$0xff]  }
  0x17   :  { %v232_v35 = vadd.f32 %v605_v7, %v164_v27  ;;  %v233_v36 = vadd.f32 %v605_v7, %v165_v28  ;;  %v234_v37 = vadd.f32 %v605_v7, %v166_v29  ;;  %v293_v39 = vmax.f32 %v229_v30, 0.0 }
  0x18   :  { %v294_v40 = vmax.f32 %v230_v31, 0.0  ;;  %v235_v41 = vadd.f32 %v605_v7, %v167_v32  ;;  %v236_v42 = vadd.f32 %v605_v7, %v168_v33  ;;  %v295_v45 = vmax.f32 %v231_v34, 0.0 }
  0x19   :  { %v296_v46 = vmax.f32 %v232_v35, 0.0  ;;  %v297_v47 = vmax.f32 %v233_v36, 0.0  ;;  %v298_v48 = vmax.f32 %v234_v37, 0.0  ;;  %357 = vst [vmem:[%s1013_s2 + $0x80] sm:$0xff] %v293_v39  ;;  %v462_v53 = vunpack.c.h.bf16 %v550_v38 }
  0x1a   :  { %358 = vst [vmem:[%s1013_s2 + $0x88] sm:$0xff] %v294_v40  ;;  %v299_v50 = vmax.f32 %v235_v41, 0.0  ;;  %v300_v51 = vmax.f32 %v236_v42, 0.0  ;;  %359 = vst [vmem:[%s1013_s2 + $0x90] sm:$0xff] %v295_v45  ;;  %v465_v54 = vunpack.c.l.bf16 %v551_v43  ;;  %v466_v55 = vunpack.c.h.bf16 %v551_v43 }
  0x1b   :  { %360 = vst [vmem:[%s1013_s2 + $0x98] sm:$0xff] %v296_v46  ;;  %361 = vst [vmem:[%s1013_s2 + $0xa0] sm:$0xff] %v297_v47  ;;  %v469_v56 = vunpack.c.l.bf16 %v552_v44  ;;  %v470_v57 = vunpack.c.h.bf16 %v552_v44  ;;  %v169_v58 = vmul.f32 %v461_v52, %v588_v0  ;;  %v170_v59 = vmul.f32 %v462_v53, %v588_v0  ;;  %v559_v53 = vld [vmem:[%s1011_s0 + $0xa8] sm:$0xff]  }
  0x1c   :  { %362 = vst [vmem:[%s1013_s2 + $0xa8] sm:$0xff] %v298_v48  ;;  %363 = vst [vmem:[%s1013_s2 + $0xb0] sm:$0xff] %v299_v50  ;;  %v473_v60 = vunpack.c.l.bf16 %v553_v49  ;;  %v474_v61 = vunpack.c.h.bf16 %v553_v49  ;;  %v171_v62 = vmul.f32 %v465_v54, %v588_v0  ;;  %v172_v63 = vmul.f32 %v466_v55, %v588_v0  ;;  %v558_v48 = vld [vmem:[%s1011_s0 + $0xa0] sm:$0xff]   ;;  %v560_v54 = vld [vmem:[%s1011_s0 + $0xb0] sm:$0xff]  }
  0x1d   :  { %364 = vst [vmem:[%s1013_s2 + $0xb8] sm:$0xff] %v300_v51  ;;  %v173_v1 = vmul.f32 %v469_v56, %v588_v0  ;;  %v174_v2 = vmul.f32 %v470_v57, %v588_v0  ;;  %v237_v3 = vadd.f32 %v605_v7, %v169_v58  ;;  %v238_v4 = vadd.f32 %v605_v7, %v170_v59  ;;  %v561_v59 = vld [vmem:[%s1011_s0 + $0xb8] sm:$0xff]  }
  0x1e   :  { %v175_v5 = vmul.f32 %v473_v60, %v588_v0  ;;  %v176_v6 = vmul.f32 %v474_v61, %v588_v0  ;;  %v239_v8 = vadd.f32 %v605_v7, %v171_v62  ;;  %v240_v9 = vadd.f32 %v605_v7, %v172_v63 }
  0x1f   :  { %v241_v10 = vadd.f32 %v605_v7, %v173_v1  ;;  %v242_v11 = vadd.f32 %v605_v7, %v174_v2  ;;  %v301_v13 = vmax.f32 %v237_v3, 0.0  ;;  %v302_v14 = vmax.f32 %v238_v4, 0.0 }
  0x20   :  { %v243_v15 = vadd.f32 %v605_v7, %v175_v5  ;;  %v244_v16 = vadd.f32 %v605_v7, %v176_v6  ;;  %v303_v19 = vmax.f32 %v239_v8, 0.0  ;;  %v304_v20 = vmax.f32 %v240_v9, 0.0 }
  0x21   :  { %v305_v21 = vmax.f32 %v241_v10, 0.0  ;;  %v306_v22 = vmax.f32 %v242_v11, 0.0  ;;  %365 = vst [vmem:[%s1013_s2 + $0xc0] sm:$0xff] %v301_v13  ;;  %366 = vst [vmem:[%s1013_s2 + $0xc8] sm:$0xff] %v302_v14  ;;  %v477_v26 = vunpack.c.l.bf16 %v554_v12  ;;  %v478_v27 = vunpack.c.h.bf16 %v554_v12 }
  0x22   :  { %v307_v24 = vmax.f32 %v243_v15, 0.0  ;;  %v308_v25 = vmax.f32 %v244_v16, 0.0  ;;  %367 = vst [vmem:[%s1013_s2 + $0xd0] sm:$0xff] %v303_v19  ;;  %368 = vst [vmem:[%s1013_s2 + $0xd8] sm:$0xff] %v304_v20  ;;  %v481_v28 = vunpack.c.l.bf16 %v555_v17  ;;  %v482_v29 = vunpack.c.h.bf16 %v555_v17 }
  0x23   :  { %369 = vst [vmem:[%s1013_s2 + $0xe0] sm:$0xff] %v305_v21  ;;  %370 = vst [vmem:[%s1013_s2 + $0xe8] sm:$0xff] %v306_v22  ;;  %v485_v30 = vunpack.c.l.bf16 %v556_v18  ;;  %v486_v31 = vunpack.c.h.bf16 %v556_v18  ;;  %v177_v32 = vmul.f32 %v477_v26, %v588_v0  ;;  %v178_v33 = vmul.f32 %v478_v27, %v588_v0  ;;  %v562_v22 = vld [vmem:[%s1011_s0 + $0xc0] sm:$0xff]   ;;  %v563_v27 = vld [vmem:[%s1011_s0 + $0xc8] sm:$0xff]  }
  0x24   :  { %371 = vst [vmem:[%s1013_s2 + $0xf0] sm:$0xff] %v307_v24  ;;  %372 = vst [vmem:[%s1013_s2 + $0xf8] sm:$0xff] %v308_v25  ;;  %v489_v34 = vunpack.c.l.bf16 %v557_v23  ;;  %v490_v35 = vunpack.c.h.bf16 %v557_v23  ;;  %v179_v36 = vmul.f32 %v481_v28, %v588_v0  ;;  %v180_v37 = vmul.f32 %v482_v29, %v588_v0  ;;  %v564_v28 = vld [vmem:[%s1011_s0 + $0xd0] sm:$0xff]  }
  0x25   :  { %v181_v38 = vmul.f32 %v485_v30, %v588_v0  ;;  %v182_v39 = vmul.f32 %v486_v31, %v588_v0  ;;  %v245_v40 = vadd.f32 %v605_v7, %v177_v32  ;;  %v246_v41 = vadd.f32 %v605_v7, %v178_v33  ;;  %v565_v33 = vld [vmem:[%s1011_s0 + $0xd8] sm:$0xff]  }
  0x26   :  { %v183_v42 = vmul.f32 %v489_v34, %v588_v0  ;;  %v184_v43 = vmul.f32 %v490_v35, %v588_v0  ;;  %v247_v44 = vadd.f32 %v605_v7, %v179_v36  ;;  %v248_v45 = vadd.f32 %v605_v7, %v180_v37 }
  0x27   :  { %v249_v46 = vadd.f32 %v605_v7, %v181_v38  ;;  %v250_v47 = vadd.f32 %v605_v7, %v182_v39  ;;  %v309_v49 = vmax.f32 %v245_v40, 0.0  ;;  %v310_v50 = vmax.f32 %v246_v41, 0.0 }
  0x28   :  { %v251_v51 = vadd.f32 %v605_v7, %v183_v42  ;;  %v252_v52 = vadd.f32 %v605_v7, %v184_v43  ;;  %v311_v55 = vmax.f32 %v247_v44, 0.0  ;;  %v312_v56 = vmax.f32 %v248_v45, 0.0 }
  0x29   :  { %v313_v57 = vmax.f32 %v249_v46, 0.0  ;;  %v314_v58 = vmax.f32 %v250_v47, 0.0  ;;  %373 = vst [vmem:[%s1013_s2 + $0x100] sm:$0xff] %v309_v49  ;;  %374 = vst [vmem:[%s1013_s2 + $0x108] sm:$0xff] %v310_v50  ;;  %v493_v62 = vunpack.c.l.bf16 %v558_v48  ;;  %v494_v63 = vunpack.c.h.bf16 %v558_v48 }
  0x2a   :  { %v315_v60 = vmax.f32 %v251_v51, 0.0  ;;  %v316_v61 = vmax.f32 %v252_v52, 0.0  ;;  %375 = vst [vmem:[%s1013_s2 + $0x110] sm:$0xff] %v311_v55  ;;  %376 = vst [vmem:[%s1013_s2 + $0x118] sm:$0xff] %v312_v56  ;;  %v497_v1 = vunpack.c.l.bf16 %v559_v53  ;;  %v498_v2 = vunpack.c.h.bf16 %v559_v53 }
  0x2b   :  { %377 = vst [vmem:[%s1013_s2 + $0x120] sm:$0xff] %v313_v57  ;;  %378 = vst [vmem:[%s1013_s2 + $0x128] sm:$0xff] %v314_v58  ;;  %v501_v3 = vunpack.c.l.bf16 %v560_v54  ;;  %v502_v4 = vunpack.c.h.bf16 %v560_v54  ;;  %v185_v5 = vmul.f32 %v493_v62, %v588_v0  ;;  %v186_v6 = vmul.f32 %v494_v63, %v588_v0  ;;  %v566_v58 = vld [vmem:[%s1011_s0 + $0xe0] sm:$0xff]   ;;  %v567_v63 = vld [vmem:[%s1011_s0 + $0xe8] sm:$0xff]  }
  0x2c   :  { %379 = vst [vmem:[%s1013_s2 + $0x130] sm:$0xff] %v315_v60  ;;  %380 = vst [vmem:[%s1013_s2 + $0x138] sm:$0xff] %v316_v61  ;;  %v505_v8 = vunpack.c.l.bf16 %v561_v59  ;;  %v506_v9 = vunpack.c.h.bf16 %v561_v59  ;;  %v187_v10 = vmul.f32 %v497_v1, %v588_v0  ;;  %v188_v11 = vmul.f32 %v498_v2, %v588_v0  ;;  %v568_v1 = vld [vmem:[%s1011_s0 + $0xf0] sm:$0xff]  }
  0x2d   :  { %v189_v12 = vmul.f32 %v501_v3, %v588_v0  ;;  %v190_v13 = vmul.f32 %v502_v4, %v588_v0  ;;  %v253_v14 = vadd.f32 %v605_v7, %v185_v5  ;;  %v254_v15 = vadd.f32 %v605_v7, %v186_v6  ;;  %v569_v6 = vld [vmem:[%s1011_s0 + $0xf8] sm:$0xff]  }
  0x2e   :  { %v191_v16 = vmul.f32 %v505_v8, %v588_v0  ;;  %v192_v17 = vmul.f32 %v506_v9, %v588_v0  ;;  %v255_v18 = vadd.f32 %v605_v7, %v187_v10  ;;  %v256_v19 = vadd.f32 %v605_v7, %v188_v11 }
  0x2f   :  { %v257_v20 = vadd.f32 %v605_v7, %v189_v12  ;;  %v258_v21 = vadd.f32 %v605_v7, %v190_v13  ;;  %v317_v23 = vmax.f32 %v253_v14, 0.0  ;;  %v318_v24 = vmax.f32 %v254_v15, 0.0 }
  0x30   :  { %v259_v25 = vadd.f32 %v605_v7, %v191_v16  ;;  %v260_v26 = vadd.f32 %v605_v7, %v192_v17  ;;  %v319_v29 = vmax.f32 %v255_v18, 0.0  ;;  %v320_v30 = vmax.f32 %v256_v19, 0.0 }
  0x31   :  { %v321_v31 = vmax.f32 %v257_v20, 0.0  ;;  %v322_v32 = vmax.f32 %v258_v21, 0.0  ;;  %381 = vst [vmem:[%s1013_s2 + $0x140] sm:$0xff] %v317_v23  ;;  %382 = vst [vmem:[%s1013_s2 + $0x148] sm:$0xff] %v318_v24  ;;  %v509_v36 = vunpack.c.l.bf16 %v562_v22  ;;  %v510_v37 = vunpack.c.h.bf16 %v562_v22 }
  0x32   :  { %v323_v34 = vmax.f32 %v259_v25, 0.0  ;;  %v324_v35 = vmax.f32 %v260_v26, 0.0  ;;  %383 = vst [vmem:[%s1013_s2 + $0x150] sm:$0xff] %v319_v29  ;;  %384 = vst [vmem:[%s1013_s2 + $0x158] sm:$0xff] %v320_v30  ;;  %v513_v38 = vunpack.c.l.bf16 %v563_v27  ;;  %v514_v39 = vunpack.c.h.bf16 %v563_v27 }
  0x33   :  { %385 = vst [vmem:[%s1013_s2 + $0x160] sm:$0xff] %v321_v31  ;;  %386 = vst [vmem:[%s1013_s2 + $0x168] sm:$0xff] %v322_v32  ;;  %v517_v40 = vunpack.c.l.bf16 %v564_v28  ;;  %v518_v41 = vunpack.c.h.bf16 %v564_v28  ;;  %v193_v42 = vmul.f32 %v509_v36, %v588_v0  ;;  %v194_v43 = vmul.f32 %v510_v37, %v588_v0 }
  0x34   :  { %387 = vst [vmem:[%s1013_s2 + $0x170] sm:$0xff] %v323_v34  ;;  %388 = vst [vmem:[%s1013_s2 + $0x178] sm:$0xff] %v324_v35  ;;  %v521_v44 = vunpack.c.l.bf16 %v565_v33  ;;  %v522_v45 = vunpack.c.h.bf16 %v565_v33  ;;  %v195_v46 = vmul.f32 %v513_v38, %v588_v0  ;;  %v196_v47 = vmul.f32 %v514_v39, %v588_v0 }
  0x35   :  { %v197_v48 = vmul.f32 %v517_v40, %v588_v0  ;;  %v198_v49 = vmul.f32 %v518_v41, %v588_v0  ;;  %v261_v50 = vadd.f32 %v605_v7, %v193_v42  ;;  %v262_v51 = vadd.f32 %v605_v7, %v194_v43 }
  0x36   :  { %v199_v52 = vmul.f32 %v521_v44, %v588_v0  ;;  %v200_v53 = vmul.f32 %v522_v45, %v588_v0  ;;  %v263_v54 = vadd.f32 %v605_v7, %v195_v46  ;;  %v264_v55 = vadd.f32 %v605_v7, %v196_v47 }
  0x37   :  { %v265_v56 = vadd.f32 %v605_v7, %v197_v48  ;;  %v266_v57 = vadd.f32 %v605_v7, %v198_v49  ;;  %v325_v59 = vmax.f32 %v261_v50, 0.0  ;;  %v326_v60 = vmax.f32 %v262_v51, 0.0 }
  0x38   :  { %v267_v61 = vadd.f32 %v605_v7, %v199_v52  ;;  %v268_v62 = vadd.f32 %v605_v7, %v200_v53  ;;  %v327_v2 = vmax.f32 %v263_v54, 0.0  ;;  %v328_v3 = vmax.f32 %v264_v55, 0.0 }
  0x39   :  { %v329_v4 = vmax.f32 %v265_v56, 0.0  ;;  %v330_v5 = vmax.f32 %v266_v57, 0.0  ;;  %389 = vst [vmem:[%s1013_s2 + $0x180] sm:$0xff] %v325_v59  ;;  %390 = vst [vmem:[%s1013_s2 + $0x188] sm:$0xff] %v326_v60  ;;  %v525_v10 = vunpack.c.l.bf16 %v566_v58  ;;  %v526_v11 = vunpack.c.h.bf16 %v566_v58 }
  0x3a   :  { %v331_v8 = vmax.f32 %v267_v61, 0.0  ;;  %v332_v9 = vmax.f32 %v268_v62, 0.0  ;;  %391 = vst [vmem:[%s1013_s2 + $0x190] sm:$0xff] %v327_v2  ;;  %392 = vst [vmem:[%s1013_s2 + $0x198] sm:$0xff] %v328_v3  ;;  %v529_v12 = vunpack.c.l.bf16 %v567_v63  ;;  %v530_v13 = vunpack.c.h.bf16 %v567_v63 }
  0x3b   :  { %393 = vst [vmem:[%s1013_s2 + $0x1a0] sm:$0xff] %v329_v4  ;;  %394 = vst [vmem:[%s1013_s2 + $0x1a8] sm:$0xff] %v330_v5  ;;  %v533_v14 = vunpack.c.l.bf16 %v568_v1  ;;  %v534_v15 = vunpack.c.h.bf16 %v568_v1  ;;  %v201_v16 = vmul.f32 %v525_v10, %v588_v0  ;;  %v202_v17 = vmul.f32 %v526_v11, %v588_v0 }
  0x3c   :  { %395 = vst [vmem:[%s1013_s2 + $0x1b0] sm:$0xff] %v331_v8  ;;  %396 = vst [vmem:[%s1013_s2 + $0x1b8] sm:$0xff] %v332_v9  ;;  %v537_v18 = vunpack.c.l.bf16 %v569_v6  ;;  %v538_v19 = vunpack.c.h.bf16 %v569_v6  ;;  %v203_v20 = vmul.f32 %v529_v12, %v588_v0  ;;  %v204_v21 = vmul.f32 %v530_v13, %v588_v0 }
  0x3d   :  { %v205_v22 = vmul.f32 %v533_v14, %v588_v0  ;;  %v206_v23 = vmul.f32 %v534_v15, %v588_v0  ;;  %v269_v24 = vadd.f32 %v605_v7, %v201_v16  ;;  %v270_v25 = vadd.f32 %v605_v7, %v202_v17 }
  0x3e   :  { %v207_v26 = vmul.f32 %v537_v18, %v588_v0  ;;  %v208_v27 = vmul.f32 %v538_v19, %v588_v0  ;;  %v271_v28 = vadd.f32 %v605_v7, %v203_v20  ;;  %v272_v29 = vadd.f32 %v605_v7, %v204_v21 }
  0x3f   :  { %v273_v30 = vadd.f32 %v605_v7, %v205_v22  ;;  %v274_v31 = vadd.f32 %v605_v7, %v206_v23  ;;  %v333_v32 = vmax.f32 %v269_v24, 0.0  ;;  %v334_v33 = vmax.f32 %v270_v25, 0.0 }
  0x40   :  { %v275_v34 = vadd.f32 %v605_v7, %v207_v26  ;;  %v276_v35 = vadd.f32 %v605_v7, %v208_v27  ;;  %v335_v36 = vmax.f32 %v271_v28, 0.0  ;;  %v336_v37 = vmax.f32 %v272_v29, 0.0 }
  0x41   :  { %v337_v38 = vmax.f32 %v273_v30, 0.0  ;;  %v338_v39 = vmax.f32 %v274_v31, 0.0  ;;  %397 = vst [vmem:[%s1013_s2 + $0x1c0] sm:$0xff] %v333_v32  ;;  %398 = vst [vmem:[%s1013_s2 + $0x1c8] sm:$0xff] %v334_v33 }
  0x42   :  { %v339_v0 = vmax.f32 %v275_v34, 0.0  ;;  %v340_v40 = vmax.f32 %v276_v35, 0.0  ;;  %399 = vst [vmem:[%s1013_s2 + $0x1d0] sm:$0xff] %v335_v36  ;;  %400 = vst [vmem:[%s1013_s2 + $0x1d8] sm:$0xff] %v336_v37 }
  0x43   :  { %401 = vst [vmem:[%s1013_s2 + $0x1e0] sm:$0xff] %v337_v38  ;;  %402 = vst [vmem:[%s1013_s2 + $0x1e8] sm:$0xff] %v338_v39 }
  0x44   :  { %403 = vst [vmem:[%s1013_s2 + $0x1f0] sm:$0xff] %v339_v0  ;;  %404 = vst [vmem:[%s1013_s2 + $0x1f8] sm:$0xff] %v340_v40 }

// kernel: decoder_block_forward.6
= control target key start
LH: loop header
LB: loop body
LE: loop exit
PB: predicated region body
PF: predicated region fallthrough
CT: control target
= control target key end

     0   :  { %s5541_s24 = smov 0   ;;  %s5543_s1 = smov 0   ;;  %s6827_s0 = inlined_call_operand.vmem [shape: bf16[2,16,16,128], index: 0, kind: input, shape index: {}, may-alias: {0,1,2}]   ;;  %s6828_s1 = inlined_call_operand.vmem [shape: bf16[2,16,16,128], index: 1, kind: input, shape index: {}, may-alias: {0,1,2}]   ;;  %s6829_s2 = inlined_call_operand.vmem [shape: bf16[2,16,16,128], index: 2, kind: input, shape index: {}, may-alias: {0,1,2}]   ;;  %s6830_s3 = inlined_call_operand.vmem [shape: f32[2,128], index: 3, kind: input, shape index: {}]   ;;  %s6831_s4 = inlined_call_operand.vmem [shape: bf16[3,3,128,128], index: 4, kind: input, shape index: {}]   ;;  %s6832_s5 = inlined_call_operand.vmem [shape: bf16[2,16,16,128], index: 5, kind: output, shape index: {0}]   ;;  %s6833_s6 = inlined_call_operand.vmem [shape: f32[16,128], index: 6, kind: output, shape index: {1}]   ;;  %s6834_s7 = inlined_call_operand.vmem [shape: f32[16,128], index: 7, kind: output, shape index: {2}]  }
   0x1   :  { %s5545_s2 = smov 0  }
   0x2 LB: > { %s30_s25 = sadd.s32 1, %s5494_s1  ;;  %p4011_p0 = scmp.ge.s32.totalorder %s5498_s2, 1  ;;  %s5498_s2 = sphi %s5545_s2, %s18_s2   ;;  %s5494_s1 = sphi %s5543_s1, %s6929_s1   ;;  %s5490_s24 = sphi %s5541_s24, %s6928_s24  }
   0x3   : > { %p32_p1 = scmp.ge.s32.totalorder %s30_s25, 2  ;;  %p332_p2 = scmp.lt.s32.totalorder %s5498_s2, 3 }
   0x5   : > { %s6931_s25 = smov (%p32_p1, %s30_s25), 0  ;;  %p333_p3 = pnand %p4011_p0, %p332_p2 }
   0x7   : > { %336 = sbr.rel (%p333_p3) target bundleno = 566 (0x236), region = 40 }
   0xc   : > { %v5359_v0 = vld [vmem:[%s6831_s4 + $0x138] sm:$0xff]   ;;  %p411_p4 = scmp.lt.s32.totalorder %s5490_s24, 1  ;;  %v5360_v1 = vld [vmem:[%s6831_s4 + $0x130] sm:$0xff]   ;;  %v5500_v2 = vmov 0   ;;  %v5361_v3 = vld [vmem:[%s6831_s4 + $0x128] sm:$0xff]  }
   0xd   : > { %4886 = vmatprep.subr.bf16.mxu0 %v5359_v0  ;;  %5318 = vmatprep.subr.bf16.mxu1 %v5359_v0  ;;  %813 = vst [vmem:[#allocation2] sm:$0xf] %v5500_v2  ;;  %814 = vst [vmem:[#allocation2 + $0x4] sm:$0xf] %v5500_v2  ;;  %v5362_v4 = vld [vmem:[%s6831_s4 + $0x120] sm:$0xff]   ;;  %v5363_v21 = vld [vmem:[%s6831_s4 + $0x118] sm:$0xff]  }
   0xe   : > { %s6933_s24 = smov (!%p411_p4, %s5490_s24), 1  ;;  %842 = vst [vmem:[#allocation2 + $0x88] sm:$0xf] %v5500_v2  ;;  %843 = vst [vmem:[#allocation2 + $0x8c] sm:$0xf] %v5500_v2  ;;  %4887 = vmatpush3.bf16.msra.mxu0 %v5359_v0  ;;  %5326 = vmatpush3.bf16.msra.mxu1 %v5359_v0  ;;  %v5364_v34 = vld [vmem:[%s6831_s4 + $0x110] sm:$0xff]  }
   0xf   : > { %4888 = vmatprep.subr.bf16.mxu0 %v5360_v1  ;;  %5319 = vmatprep.subr.bf16.mxu1 %v5360_v1  ;;  %s4327_s9 = sshll.u32 %s6933_s24, 7  ;;  %v5584_v5 = vld [vmem:[%s6830_s3] ss:$0 sm:$0xff]  ;;  %v5593_v12 = vld [vmem:[%s6830_s3 + $0x1] ss:$0 sm:$0xff]  ;;  %v5365_v58 = vld [vmem:[%s6831_s4 + $0x108] sm:$0xff]  }
  0x10   : > { %s5576_s12 = scalar_lea.vmem %s6827_s0, %s4327_s9  ;;  %s6632_s18 = scalar_lea.vmem %s6832_s5, %s4327_s9 }
  0x11   : > { %v4401_v6 = vld [vmem:[%s5576_s12] sm:$0xff]   ;;  %v4624_v10 = vld [vmem:[%s5576_s12 + $0x8] sm:$0xff]   ;;  %v4625_v33 = vld [vmem:[%s5576_s12 + $0x10] sm:$0xff]   ;;  %s4020_s9 = sshll.u32 %s6933_s24, 3 }
  0x12   : > { %4889 = vmatpush3.bf16.msra.mxu0 %v5360_v1  ;;  %5327 = vmatpush3.bf16.msra.mxu1 %v5360_v1  ;;  %v4402_v7 = vunpack.c.l.bf16 %v4401_v6  ;;  %v4403_v8 = vunpack.c.h.bf16 %v4401_v6  ;;  %v4631_v9 = vld [vmem:[%s5576_s12 + $0x40] sm:$0xff]   ;;  %v4632_v11 = vld [vmem:[%s5576_s12 + $0x48] sm:$0xff]   ;;  %v4406_v15 = vunpack.c.l.bf16 %v4624_v10  ;;  %v4407_v16 = vunpack.c.h.bf16 %v4624_v10  ;;  %v4633_v39 = vld [vmem:[%s5576_s12 + $0x50] sm:$0xff]   ;;  %s470_s21 = scalar_lea.vmem %s6833_s6, %s4020_s9  ;;  %s476_s23 = scalar_lea.vmem %s6834_s7, %s4020_s9 }
  0x13   : > { %4890 = vmatprep.subr.bf16.mxu0 %v5361_v3  ;;  %5320 = vmatprep.subr.bf16.mxu1 %v5361_v3  ;;  %v4434_v13 = vunpack.c.l.bf16 %v4631_v9  ;;  %v4435_v14 = vunpack.c.h.bf16 %v4631_v9  ;;  %v4438_v19 = vunpack.c.l.bf16 %v4632_v11  ;;  %v4439_v20 = vunpack.c.h.bf16 %v4632_v11  ;;  %v4626_v44 = vld [vmem:[%s5576_s12 + $0x18] sm:$0xff]  }
  0x14   : > { %v549_v17 = vmul.f32 %v4402_v7, %v5584_v5  ;;  %v550_v18 = vmul.f32 %v4403_v8, %v5584_v5  ;;  %v551_v24 = vmul.f32 %v4406_v15, %v5584_v5  ;;  %v552_v27 = vmul.f32 %v4407_v16, %v5584_v5  ;;  %v4634_v53 = vld [vmem:[%s5576_s12 + $0x58] sm:$0xff]   ;;  %v4627_v8 = vld [vmem:[%s5576_s12 + $0x20] sm:$0xff]  }
  0x15   : > { %v565_v22 = vmul.f32 %v4434_v13, %v5584_v5  ;;  %v566_v23 = vmul.f32 %v4435_v14, %v5584_v5  ;;  %v567_v28 = vmul.f32 %v4438_v19, %v5584_v5  ;;  %v568_v32 = vmul.f32 %v4439_v20, %v5584_v5  ;;  %v5366_v14 = vld [vmem:[%s6831_s4 + $0x100] sm:$0xff]  }
  0x16   : > { %4891 = vmatpush3.bf16.msra.mxu0 %v5361_v3  ;;  %5328 = vmatpush3.bf16.msra.mxu1 %v5361_v3  ;;  %v585_v25 = vadd.f32 %v5593_v12, %v549_v17  ;;  %v586_v26 = vadd.f32 %v5593_v12, %v550_v18  ;;  %v587_v31 = vadd.f32 %v5593_v12, %v551_v24  ;;  %v4410_v48 = vunpack.c.l.bf16 %v4625_v33  ;;  %v4635_v19 = vld [vmem:[%s5576_s12 + $0x60] sm:$0xff]   ;;  %v4628_v24 = vld [vmem:[%s5576_s12 + $0x28] sm:$0xff]  }
  0x17   : > { %4892 = vmatprep.subr.bf16.mxu0 %v5362_v4  ;;  %5321 = vmatprep.subr.bf16.mxu1 %v5362_v4  ;;  %v601_v29 = vadd.f32 %v5593_v12, %v565_v22  ;;  %v602_v30 = vadd.f32 %v5593_v12, %v566_v23  ;;  %v588_v37 = vadd.f32 %v5593_v12, %v552_v27  ;;  %v4411_v51 = vunpack.c.h.bf16 %v4625_v33  ;;  %v5653_v27 = vld [vmem:[%s6831_s4 + $0x78] sm:$0xff]  }
  0x18   : > { %v617_v35 = vmax.f32 %v585_v25, 0.0  ;;  %v618_v36 = vmax.f32 %v586_v26, 0.0  ;;  %v603_v38 = vadd.f32 %v5593_v12, %v567_v28  ;;  %v619_v42 = vmax.f32 %v587_v31, 0.0  ;;  %v5646_v25 = vld [vmem:[%s5576_s12 + $0x68] sm:$0xff]  }
  0x19   : > { %v633_v40 = vmax.f32 %v601_v29, 0.0  ;;  %v634_v41 = vmax.f32 %v602_v30, 0.0  ;;  %v604_v43 = vadd.f32 %v5593_v12, %v568_v32  ;;  %v620_v46 = vmax.f32 %v588_v37, 0.0  ;;  %v5372_v37 = vld [vmem:[%s6831_s4 + $0x1f8] sm:$0xff]  }
  0x1a   : > { %4893 = vmatpush3.bf16.msra.mxu0 %v5362_v4  ;;  %5329 = vmatpush3.bf16.msra.mxu1 %v5362_v4  ;;  %v4467_v45 = vpack.c.bf16 %v618_v36, %v617_v35  ;;  %v635_v47 = vmax.f32 %v603_v38, 0.0  ;;  %v4442_v52 = vunpack.c.l.bf16 %v4633_v39  ;;  %v553_v55 = vmul.f32 %v4410_v48, %v5584_v5 }
  0x1b   : > { %4894 = vmatprep.subr.bf16.mxu0 %v5363_v21  ;;  %5322 = vmatprep.subr.bf16.mxu1 %v5363_v21  ;;  %v4507_v49 = vpack.c.bf16 %v634_v41, %v633_v40  ;;  %v636_v50 = vmax.f32 %v604_v43, 0.0  ;;  %v4472_v54 = vpack.c.bf16 %v620_v46, %v619_v42  ;;  %v4443_v56 = vunpack.c.h.bf16 %v4633_v39  ;;  %v4629_v46 = vld [vmem:[%s5576_s12 + $0x30] sm:$0xff]  }
  0x1c   : > { %4639 = vst [vmem:[#allocation2 + $0x8] sm:$0xff] %v4467_v45   ;;  %v4414_v57 = vunpack.c.l.bf16 %v4626_v44  ;;  %v554_v60 = vmul.f32 %v4411_v51, %v5584_v5  ;;  %v569_v61 = vmul.f32 %v4442_v52, %v5584_v5  ;;  %v4415_v62 = vunpack.c.h.bf16 %v4626_v44 }
  0x1d   : > { %4647 = vst [vmem:[#allocation2 + $0x48] sm:$0xff] %v4507_v49   ;;  %v4512_v59 = vpack.c.bf16 %v636_v50, %v635_v47  ;;  %4640 = vst [vmem:[#allocation2 + $0x10] sm:$0xff] %v4472_v54   ;;  %v589_v63 = vadd.f32 %v5593_v12, %v553_v55  ;;  %v570_v0 = vmul.f32 %v4443_v56, %v5584_v5  ;;  %v4446_v2 = vunpack.c.l.bf16 %v4634_v53  ;;  %v5373_v49 = vld [vmem:[%s6831_s4 + $0x70] sm:$0xff]  }
  0x1e   : > { %4895 = vmatpush3.bf16.msra.mxu0 %v5363_v21  ;;  %5330 = vmatpush3.bf16.msra.mxu1 %v5363_v21  ;;  %v555_v1 = vmul.f32 %v4414_v57, %v5584_v5  ;;  %v590_v3 = vadd.f32 %v5593_v12, %v554_v60  ;;  %v605_v4 = vadd.f32 %v5593_v12, %v569_v61  ;;  %v4447_v7 = vunpack.c.h.bf16 %v4634_v53  ;;  %v5374_v54 = vld [vmem:[%s6831_s4 + $0x1f0] sm:$0xff]  }
  0x1f   : > { %4896 = vmatprep.subr.bf16.mxu0 %v5364_v34  ;;  %5323 = vmatprep.subr.bf16.mxu1 %v5364_v34  ;;  %4648 = vst [vmem:[#allocation2 + $0x50] sm:$0xff] %v4512_v59   ;;  %v556_v6 = vmul.f32 %v4415_v62, %v5584_v5  ;;  %v621_v9 = vmax.f32 %v589_v63, 0.0  ;;  %v606_v10 = vadd.f32 %v5593_v12, %v570_v0  ;;  %v4418_v23 = vunpack.c.l.bf16 %v4627_v8  ;;  %v4637_v63 = vld [vmem:[%s5576_s12 + $0x70] sm:$0xff]  }
  0x20   : > { %v591_v11 = vadd.f32 %v5593_v12, %v555_v1  ;;  %v571_v13 = vmul.f32 %v4446_v2, %v5584_v5  ;;  %v622_v15 = vmax.f32 %v590_v3, 0.0  ;;  %v637_v16 = vmax.f32 %v605_v4, 0.0  ;;  %v5379_v4 = vld [vmem:[%s6831_s4 + $0x68] sm:$0xff]  }
  0x21   : > { %v592_v17 = vadd.f32 %v5593_v12, %v556_v6  ;;  %v572_v18 = vmul.f32 %v4447_v7, %v5584_v5  ;;  %v638_v20 = vmax.f32 %v606_v10, 0.0  ;;  %v4419_v31 = vunpack.c.h.bf16 %v4627_v8  ;;  %v5380_v6 = vld [vmem:[%s6831_s4 + $0x1e8] sm:$0xff]  }
  0x22   : > { %4897 = vmatpush3.bf16.msra.mxu0 %v5364_v34  ;;  %5331 = vmatpush3.bf16.msra.mxu1 %v5364_v34  ;;  %v623_v21 = vmax.f32 %v591_v11, 0.0  ;;  %v607_v22 = vadd.f32 %v5593_v12, %v571_v13  ;;  %v4477_v28 = vpack.c.bf16 %v622_v15, %v621_v9  ;;  %v557_v35 = vmul.f32 %v4418_v23, %v5584_v5  ;;  %v4630_v11 = vld [vmem:[%s5576_s12 + $0x38] sm:$0xff]  }
  0x23   : > { %4898 = vmatprep.subr.bf16.mxu0 %v5365_v58  ;;  %5324 = vmatprep.subr.bf16.mxu1 %v5365_v58  ;;  %v5648_v26 = vld [vmem:[#allocation2 + $0x8] sm:$0xff]   ;;  %v624_v29 = vmax.f32 %v592_v17, 0.0  ;;  %v608_v30 = vadd.f32 %v5593_v12, %v572_v18  ;;  %v4517_v33 = vpack.c.bf16 %v638_v20, %v637_v16  ;;  %v4450_v36 = vunpack.c.l.bf16 %v4635_v19 }
  0x24   : > { %v5656_v32 = vld [vmem:[#allocation2 + $0x48] sm:$0xff]   ;;  %v639_v34 = vmax.f32 %v607_v22, 0.0  ;;  %4641 = vst [vmem:[#allocation2 + $0x18] sm:$0xff] %v4477_v28   ;;  %v558_v40 = vmul.f32 %v4419_v31, %v5584_v5  ;;  %v4451_v41 = vunpack.c.h.bf16 %v4635_v19  ;;  %4902 = vmatprep.mubr.bf16.mxu0 %v5648_v26  ;;  %v593_v42 = vadd.f32 %v5593_v12, %v557_v35  ;;  %v5668_v47 = vld [vmem:[#allocation2 + $0x10] sm:$0xff]   ;;  %v4638_v28 = vld [vmem:[%s5576_s12 + $0x78] sm:$0xff]  }
  0x25   : > { %v4482_v38 = vpack.c.bf16 %v624_v29, %v623_v21  ;;  %v640_v39 = vmax.f32 %v608_v30, 0.0  ;;  %4918 = vmatprep.mubr.bf16.mxu1 %v5656_v32  ;;  %4649 = vst [vmem:[#allocation2 + $0x58] sm:$0xff] %v4517_v33   ;;  %v573_v43 = vmul.f32 %v4450_v36, %v5584_v5  ;;  %v4422_v44 = vunpack.c.l.bf16 %v4628_v24  ;;  %v5381_v30 = vld [vmem:[%s6831_s4 + $0x60] sm:$0xff]  }
  0x26   : > { %4899 = vmatpush3.bf16.msra.mxu0 %v5365_v58  ;;  %5332 = vmatpush3.bf16.msra.mxu1 %v5365_v58  ;;  %v4423_v45 = vunpack.c.h.bf16 %v4628_v24  ;;  %v5670_v48 = vld [vmem:[#allocation2 + $0x50] sm:$0xff]   ;;  %v594_v51 = vadd.f32 %v5593_v12, %v558_v40  ;;  %v574_v52 = vmul.f32 %v4451_v41, %v5584_v5  ;;  %v4454_v53 = vunpack.c.l.bf16 %v5646_v25  ;;  %v5382_v41 = vld [vmem:[%s6831_s4 + $0x1e0] sm:$0xff]  }
  0x27   : > { %4900 = vmatprep.subr.bf16.mxu0 %v5366_v14  ;;  %5325 = vmatprep.subr.bf16.mxu1 %v5366_v14  ;;  %4642 = vst [vmem:[#allocation2 + $0x20] sm:$0xff] %v4482_v38   ;;  %v4522_v50 = vpack.c.bf16 %v640_v39, %v639_v34  ;;  %v625_v55 = vmax.f32 %v593_v42, 0.0  ;;  %v609_v56 = vadd.f32 %v5593_v12, %v573_v43  ;;  %v4455_v61 = vunpack.c.h.bf16 %v5646_v25 }
  0x28   : > { %v559_v57 = vmul.f32 %v4422_v44, %v5584_v5  ;;  %v560_v58 = vmul.f32 %v4423_v45, %v5584_v5  ;;  %v626_v59 = vmax.f32 %v594_v51, 0.0  ;;  %v610_v60 = vadd.f32 %v5593_v12, %v574_v52  ;;  %v5387_v52 = vld [vmem:[%s6831_s4 + $0x58] sm:$0xff]  }
  0x29   : > { %4650 = vst [vmem:[#allocation2 + $0x60] sm:$0xff] %v4522_v50   ;;  %v575_v62 = vmul.f32 %v4454_v53, %v5584_v5  ;;  %v641_v0 = vmax.f32 %v609_v56, 0.0  ;;  %v4426_v3 = vunpack.c.l.bf16 %v4629_v46  ;;  %v576_v9 = vmul.f32 %v4455_v61, %v5584_v5 }
  0x2a   : > { %4901 = vmatpush3.bf16.msra.mxu0 %v5366_v14  ;;  %5333 = vmatpush3.bf16.msra.mxu1 %v5366_v14  ;;  %v595_v1 = vadd.f32 %v5593_v12, %v559_v57  ;;  %v596_v2 = vadd.f32 %v5593_v12, %v560_v58  ;;  %v4487_v7 = vpack.c.bf16 %v626_v59, %v625_v55  ;;  %v642_v8 = vmax.f32 %v610_v60, 0.0  ;;  %v5388_v60 = vld [vmem:[%s6831_s4 + $0x1d8] sm:$0xff]  }
  0x2b   : > { %4934 = vmatprep.subr.bf16.mxu1 %v5653_v27  ;;  %4982 = vmatprep.subr.bf16.mxu0 %v5372_v37  ;;  %v611_v10 = vadd.f32 %v5593_v12, %v575_v62  ;;  %v5703_v13 = vld [vmem:[#allocation2 + $0x18] sm:$0xff]   ;;  %v4427_v15 = vunpack.c.h.bf16 %v4629_v46  ;;  %v561_v16 = vmul.f32 %v4426_v3, %v5584_v5  ;;  %v4458_v17 = vunpack.c.l.bf16 %v4637_v63 }
  0x2c   : > { %v627_v14 = vmax.f32 %v595_v1, 0.0  ;;  %v5706_v18 = vld [vmem:[#allocation2 + $0x58] sm:$0xff]   ;;  %4643 = vst [vmem:[#allocation2 + $0x28] sm:$0xff] %v4487_v7   ;;  %v4527_v19 = vpack.c.bf16 %v642_v8, %v641_v0  ;;  %v628_v20 = vmax.f32 %v596_v2, 0.0  ;;  %v612_v21 = vadd.f32 %v5593_v12, %v576_v9 }
  0x2d   : > { %4903 = vmatmul.mubr.bf16.vlgmr.msra.gmra.mxu0 %v5668_v47  ;;  %4919 = vmatmul.mubr.bf16.vlgmr.msra.gmra.mxu1 %v5670_v48  ;;  %v4459_v22 = vunpack.c.h.bf16 %v4637_v63  ;;  %v643_v23 = vmax.f32 %v611_v10, 0.0  ;;  %v562_v24 = vmul.f32 %v4427_v15, %v5584_v5  ;;  %v597_v25 = vadd.f32 %v5593_v12, %v561_v16  ;;  %v5395_v10 = vld [vmem:[%s6831_s4 + $0x48] sm:$0xff]   ;;  %v5398_v16 = vld [vmem:[%s6831_s4 + $0x1c0] sm:$0xff]  }
  0x2e   : > { %4935 = vmatpush3.bf16.msra.mxu1 %v5653_v27  ;;  %4983 = vmatpush3.bf16.msra.mxu0 %v5372_v37  ;;  %v577_v27 = vmul.f32 %v4458_v17, %v5584_v5  ;;  %v5715_v29 = vld [vmem:[#allocation2 + $0x20] sm:$0xff]   ;;  %4651 = vst [vmem:[#allocation2 + $0x68] sm:$0xff] %v4527_v19   ;;  %v4492_v31 = vpack.c.bf16 %v628_v20, %v627_v14  ;;  %v644_v33 = vmax.f32 %v612_v21, 0.0  ;;  %v4430_v35 = vunpack.c.l.bf16 %v4630_v11  ;;  %v5778_v17 = vld [vmem:[#allocation2 + $0x10] sm:$0xff]  }
  0x2f   : > { %4936 = vmatprep.subr.bf16.mxu1 %v5373_v49  ;;  %4984 = vmatprep.subr.bf16.mxu0 %v5374_v54  ;;  %v578_v34 = vmul.f32 %v4459_v22, %v5584_v5  ;;  %v598_v37 = vadd.f32 %v5593_v12, %v562_v24  ;;  %v629_v38 = vmax.f32 %v597_v25, 0.0  ;;  %v4431_v40 = vunpack.c.h.bf16 %v4630_v11  ;;  %v5396_v11 = vld [vmem:[%s6831_s4 + $0x1c8] sm:$0xff]   ;;  %v5397_v20 = vld [vmem:[%s6831_s4 + $0x40] sm:$0xff]   ;;  %v5796_v24 = vld [vmem:[#allocation2 + $0x18] sm:$0xff]  }
  0x30   : > { %4906 = vmatprep.mubr.bf16.mxu0 %v5703_v13  ;;  %4922 = vmatprep.mubr.bf16.mxu1 %v5706_v18  ;;  %v5721_v36 = vld [vmem:[#allocation2 + $0x60] sm:$0xff]   ;;  %v613_v39 = vadd.f32 %v5593_v12, %v577_v27  ;;  %4644 = vst [vmem:[#allocation2 + $0x30] sm:$0xff] %v4492_v31   ;;  %v4532_v42 = vpack.c.bf16 %v644_v33, %v643_v23  ;;  %v4462_v45 = vunpack.c.l.bf16 %v4638_v28  ;;  %v4463_v51 = vunpack.c.h.bf16 %v4638_v28  ;;  %v5403_v23 = vld [vmem:[%s6831_s4 + $0x38] sm:$0xff]   ;;  %v5407_v28 = vld [vmem:[%s6831_s4 + $0x30] sm:$0xff]  }
  0x31   : > { %v614_v43 = vadd.f32 %v5593_v12, %v578_v34  ;;  %v563_v44 = vmul.f32 %v4430_v35, %v5584_v5  ;;  %v630_v46 = vmax.f32 %v598_v37, 0.0  ;;  %v564_v50 = vmul.f32 %v4431_v40, %v5584_v5  ;;  %v5785_v21 = vld [vmem:[#allocation2] sm:$0xff]   ;;  %v5402_v25 = vld [vmem:[%s6831_s4 + $0xf8] sm:$0xff]   ;;  %v5411_v31 = vld [vmem:[%s6831_s4 + $0x28] sm:$0xff]  }
  0x32   : > { %4937 = vmatpush3.bf16.msra.mxu1 %v5373_v49  ;;  %4985 = vmatpush3.bf16.msra.mxu0 %v5374_v54  ;;  %v645_v49 = vmax.f32 %v613_v39, 0.0  ;;  %4652 = vst [vmem:[#allocation2 + $0x70] sm:$0xff] %v4532_v42   ;;  %v579_v55 = vmul.f32 %v4462_v45, %v5584_v5  ;;  %v580_v59 = vmul.f32 %v4463_v51, %v5584_v5  ;;  %v5390_v5 = vld [vmem:[%s6831_s4 + $0x1d0] sm:$0xff]   ;;  %v5801_v27 = vld [vmem:[#allocation2 + $0x20] sm:$0xff]   ;;  %v5410_v34 = vld [vmem:[%s6831_s4 + $0xe8] sm:$0xff]  }
  0x33   : > { %4938 = vmatprep.subr.bf16.mxu1 %v5379_v4  ;;  %4986 = vmatprep.subr.bf16.mxu0 %v5380_v6  ;;  %v646_v53 = vmax.f32 %v614_v43, 0.0  ;;  %v599_v54 = vadd.f32 %v5593_v12, %v563_v44  ;;  %v5738_v56 = vld [vmem:[#allocation2 + $0x28] sm:$0xff]   ;;  %v4497_v57 = vpack.c.bf16 %v630_v46, %v629_v38  ;;  %v600_v58 = vadd.f32 %v5593_v12, %v564_v50  ;;  %v5415_v37 = vld [vmem:[%s6831_s4 + $0x20] sm:$0xff]   ;;  %v5419_v39 = vld [vmem:[%s6831_s4 + $0x18] sm:$0xff]  }
  0x34   : > { %v615_v63 = vadd.f32 %v5593_v12, %v579_v55  ;;  %v616_v2 = vadd.f32 %v5593_v12, %v580_v59  ;;  %v5816_v33 = vld [vmem:[#allocation2 + $0x28] sm:$0xff]   ;;  %v5414_v38 = vld [vmem:[%s6831_s4 + $0xe0] sm:$0xff]   ;;  %v5423_v43 = vld [vmem:[%s6831_s4 + $0x10] sm:$0xff]  }
  0x35   : > { %4907 = vmatmul.mubr.bf16.gmra.mxu0 %v5715_v29  ;;  %4923 = vmatmul.mubr.bf16.gmra.mxu1 %v5721_v36  ;;  %v4537_v61 = vpack.c.bf16 %v646_v53, %v645_v49  ;;  %v631_v62 = vmax.f32 %v599_v54, 0.0  ;;  %v5747_v0 = vld [vmem:[#allocation2 + $0x68] sm:$0xff]   ;;  %4645 = vst [vmem:[#allocation2 + $0x38] sm:$0xff] %v4497_v57   ;;  %v632_v1 = vmax.f32 %v600_v58, 0.0  ;;  %v5422_v44 = vld [vmem:[%s6831_s4 + $0xd0] sm:$0xff]   ;;  %v5431_v51 = vld [vmem:[%s6831_s4] sm:$0xff]  }
  0x36   : > { %4939 = vmatpush3.bf16.msra.mxu1 %v5379_v4  ;;  %4987 = vmatpush3.bf16.msra.mxu0 %v5380_v6  ;;  %v647_v3 = vmax.f32 %v615_v63, 0.0  ;;  %v5389_v6 = vld [vmem:[%s6831_s4 + $0x50] sm:$0xff]   ;;  %v648_v8 = vmax.f32 %v616_v2, 0.0  ;;  %v5427_v45 = vld [vmem:[%s6831_s4 + $0x8] sm:$0xff]   ;;  %v5433_v53 = vld [vmem:[%s6831_s4 + $0x178] sm:$0xff]  }
  0x37   : > { %4940 = vmatprep.subr.bf16.mxu1 %v5381_v30  ;;  %4988 = vmatprep.subr.bf16.mxu0 %v5382_v41  ;;  %4653 = vst [vmem:[#allocation2 + $0x78] sm:$0xff] %v4537_v61   ;;  %v5753_v4 = vld [vmem:[#allocation2 + $0x30] sm:$0xff]   ;;  %v4502_v7 = vpack.c.bf16 %v632_v1, %v631_v62  ;;  %v5856_v46 = vld [vmem:[#allocation2 + $0x48] sm:$0xff]   ;;  %v5876_v54 = vld [vmem:[#allocation2 + $0x58] sm:$0xff]  }
  0x38   : > { %4910 = vmatprep.mubr.bf16.mxu0 %v5738_v56  ;;  %4926 = vmatprep.mubr.bf16.mxu1 %v5747_v0  ;;  %v4542_v9 = vpack.c.bf16 %v648_v8, %v647_v3  ;;  %v5821_v35 = vld [vmem:[#allocation2 + $0x30] sm:$0xff]   ;;  %v5426_v49 = vld [vmem:[%s6831_s4 + $0xc8] sm:$0xff]   ;;  %v5432_v55 = vld [vmem:[%s6831_s4 + $0x1b8] sm:$0xff]  }
  0x39   : > { %v5759_v12 = vld [vmem:[#allocation2 + $0x70] sm:$0xff]   ;;  %4646 = vst [vmem:[#allocation2 + $0x40] sm:$0xff] %v4502_v7   ;;  %v5881_v57 = vld [vmem:[#allocation2 + $0x60] sm:$0xff]   ;;  %v5887_v58 = vld [vmem:[#allocation2 + $0x68] sm:$0xff]  }
  0x3a   : > { %4941 = vmatpush3.bf16.msra.mxu1 %v5381_v30  ;;  %4989 = vmatpush3.bf16.msra.mxu0 %v5382_v41  ;;  %4654 = vst [vmem:[#allocation2 + $0x80] sm:$0xff] %v4542_v9   ;;  %v5406_v30 = vld [vmem:[%s6831_s4 + $0xf0] sm:$0xff]   ;;  %v5418_v41 = vld [vmem:[%s6831_s4 + $0xd8] sm:$0xff]   ;;  %v5903_v62 = vld [vmem:[#allocation2 + $0x88] sm:$0xff]  }
  0x3b   : > { %4942 = vmatprep.subr.bf16.mxu1 %v5387_v52  ;;  %4990 = vmatprep.subr.bf16.mxu0 %v5388_v60  ;;  %v5861_v50 = vld [vmem:[#allocation2 + $0x50] sm:$0xff]   ;;  %v5437_v2 = vld [vmem:[%s6831_s4 + $0x168] sm:$0xff]   ;;  %v5438_v3 = vld [vmem:[%s6831_s4 + $0x1a0] sm:$0xff]  }
  0x3c   : > { %v5769_v14 = vld [vmem:[#allocation2 + $0x38] sm:$0xff]   ;;  %v5889_v59 = vld [vmem:[#allocation2 + $0x70] sm:$0xff]  }
  0x3d   : > { %4911 = vmatmul.mubr.bf16.gmra.mxu0 %v5753_v4  ;;  %4927 = vmatmul.mubr.bf16.gmra.mxu1 %v5759_v12  ;;  %v5836_v40 = vld [vmem:[#allocation2 + $0x38] sm:$0xff]   ;;  %v5435_v63 = vld [vmem:[%s6831_s4 + $0x170] sm:$0xff]  }
  0x3e   : > { %4991 = vmatpush3.bf16.msra.mxu0 %v5388_v60  ;;  %4943 = vmatpush3.bf16.msra.mxu1 %v5387_v52  ;;  %v5771_v15 = vld [vmem:[#allocation2 + $0x78] sm:$0xff]   ;;  %v5430_v52 = vld [vmem:[%s6831_s4 + $0xc0] sm:$0xff]   ;;  %v5434_v1 = vld [vmem:[%s6831_s4 + $0x1b0] sm:$0xff]  }
  0x3f   : > { %4992 = vmatprep.subr.bf16.mxu0 %v5390_v5  ;;  %4944 = vmatprep.subr.bf16.mxu1 %v5389_v6  ;;  %v5895_v60 = vld [vmem:[#allocation2 + $0x78] sm:$0xff]   ;;  %v5443_v8 = vld [vmem:[%s6831_s4 + $0x150] sm:$0xff]  }
  0x40   : > { %4914 = vmatprep.mubr.bf16.mxu0 %v5769_v14  ;;  %4930 = vmatprep.mubr.bf16.mxu1 %v5771_v15  ;;  %v5780_v19 = vld [vmem:[#allocation2 + $0x40] sm:$0xff]   ;;  %v5440_v7 = vld [vmem:[%s6831_s4 + $0x198] sm:$0xff]   ;;  %v5442_v9 = vld [vmem:[%s6831_s4 + $0x190] sm:$0xff]  }
  0x41   : > { %v5788_v22 = vld [vmem:[#allocation2 + $0x80] sm:$0xff]  }
  0x42   : > { %4993 = vmatpush3.bf16.msra.mxu0 %v5390_v5  ;;  %4945 = vmatpush3.bf16.msra.mxu1 %v5389_v6  ;;  %v5841_v42 = vld [vmem:[#allocation2 + $0x40] sm:$0xff]   ;;  %v5441_v6 = vld [vmem:[%s6831_s4 + $0x158] sm:$0xff]  }
  0x43   : > { %4994 = vmatprep.subr.bf16.mxu0 %v5396_v11  ;;  %4946 = vmatprep.subr.bf16.mxu1 %v5395_v10  ;;  %v5897_v61 = vld [vmem:[#allocation2 + $0x80] sm:$0xff]  }
  0x44   : > { %v5439_v5 = vld [vmem:[%s6831_s4 + $0x160] sm:$0xff]  }
  0x45   : > { %4915 = vmatmul.mubr.bf16.gmra.mxu0 %v5780_v19  ;;  %4931 = vmatmul.mubr.bf16.gmra.mxu1 %v5788_v22 }
  0x46   : > { %4995 = vmatpush3.bf16.msra.mxu0 %v5396_v11  ;;  %4998 = vmatprep.mubr.bf16.mxu0 %v5778_v17  ;;  %v5444_v11 = vld [vmem:[%s6831_s4 + $0x188] sm:$0xff]  }
  0x47   : > { %4996 = vmatprep.subr.bf16.mxu0 %v5398_v16  ;;  %4947 = vmatpush3.bf16.msra.mxu1 %v5395_v10  ;;  %v5445_v10 = vld [vmem:[%s6831_s4 + $0x148] sm:$0xff]  }
  0x48   : > { %4950 = vmatprep.mubr.bf16.mxu1 %v5785_v21  ;;  %4948 = vmatprep.subr.bf16.mxu1 %v5397_v20 }
  0x4a   : > { %4997 = vmatpush3.bf16.msra.mxu0 %v5398_v16  ;;  %v5447_v16 = vld [vmem:[%s6831_s4 + $0x140] sm:$0xff]  }
  0x4b   : > { %5078 = vmatprep.subr.bf16.mxu0 %v5403_v23  ;;  %4949 = vmatpush3.bf16.msra.mxu1 %v5397_v20  ;;  %v5446_v20 = vld [vmem:[%s6831_s4 + $0x180] sm:$0xff]  }
  0x4c   : > { %5030 = vmatprep.subr.bf16.mxu1 %v5402_v25 }
  0x4d   : > { %4999 = vmatmul.mubr.bf16.vlgmr.msra.gmra.mxu0 %v5796_v24 }
  0x4e   : > { %5079 = vmatpush3.bf16.msra.mxu0 %v5403_v23  ;;  %5002 = vmatprep.mubr.bf16.mxu0 %v5801_v27  ;;  %v5449_v23 = vld [vmem:[%s6831_s4 + $0x238] sm:$0xff]  }
  0x4f   : > { %4951 = vmatmul.mubr.bf16.vlgmr.msra.gmra.mxu1 %v5648_v26  ;;  %5080 = vmatprep.subr.bf16.mxu0 %v5407_v28 }
  0x50   : > { %5031 = vmatpush3.bf16.msra.mxu1 %v5402_v25  ;;  %4954 = vmatprep.mubr.bf16.mxu1 %v5668_v47  ;;  %v5448_v25 = vld [vmem:[%s6831_s4 + $0xb8] sm:$0xff]  }
  0x51   : > { %5032 = vmatprep.subr.bf16.mxu1 %v5406_v30 }
  0x52   : > { %5081 = vmatpush3.bf16.msra.mxu0 %v5407_v28  ;;  %v5450_v28 = vld [vmem:[%s6831_s4 + $0xb0] sm:$0xff]  }
  0x53   : > { %5082 = vmatprep.subr.bf16.mxu0 %v5411_v31 }
  0x54   : > { %5033 = vmatpush3.bf16.msra.mxu1 %v5406_v30  ;;  %v5453_v30 = vld [vmem:[%s6831_s4 + $0x228] sm:$0xff]  }
  0x55   : > { %5003 = vmatmul.mubr.bf16.gmra.mxu0 %v5816_v33  ;;  %5034 = vmatprep.subr.bf16.mxu1 %v5410_v34 }
  0x56   : > { %5006 = vmatprep.mubr.bf16.mxu0 %v5821_v35  ;;  %5083 = vmatpush3.bf16.msra.mxu0 %v5411_v31  ;;  %v5454_v31 = vld [vmem:[%s6831_s4 + $0xa0] sm:$0xff]  }
  0x57   : > { %4955 = vmatmul.mubr.bf16.gmra.mxu1 %v5703_v13  ;;  %5084 = vmatprep.subr.bf16.mxu0 %v5415_v37 }
  0x58   : > { %4958 = vmatprep.mubr.bf16.mxu1 %v5715_v29  ;;  %5035 = vmatpush3.bf16.msra.mxu1 %v5410_v34  ;;  %v5457_v34 = vld [vmem:[%s6831_s4 + $0x218] sm:$0xff]  }
  0x59   : > { %5036 = vmatprep.subr.bf16.mxu1 %v5414_v38 }
  0x5a   : > { %5085 = vmatpush3.bf16.msra.mxu0 %v5415_v37  ;;  %v5458_v37 = vld [vmem:[%s6831_s4 + $0x90] sm:$0xff]  }
  0x5b   : > { %5086 = vmatprep.subr.bf16.mxu0 %v5419_v39 }
  0x5c   : > { %5037 = vmatpush3.bf16.msra.mxu1 %v5414_v38  ;;  %v5461_v38 = vld [vmem:[%s6831_s4 + $0x208] sm:$0xff]  }
  0x5d   : > { %5007 = vmatmul.mubr.bf16.gmra.mxu0 %v5836_v40  ;;  %5038 = vmatprep.subr.bf16.mxu1 %v5418_v41 }
  0x5e   : > { %5010 = vmatprep.mubr.bf16.mxu0 %v5841_v42  ;;  %5087 = vmatpush3.bf16.msra.mxu0 %v5419_v39  ;;  %v5460_v39 = vld [vmem:[%s6831_s4 + $0x88] sm:$0xff]  }
  0x5f   : > { %4959 = vmatmul.mubr.bf16.gmra.mxu1 %v5738_v56  ;;  %5088 = vmatprep.subr.bf16.mxu0 %v5423_v43 }
  0x60   : > { %4962 = vmatprep.mubr.bf16.mxu1 %v5753_v4  ;;  %5039 = vmatpush3.bf16.msra.mxu1 %v5418_v41  ;;  %v5463_v41 = vld [vmem:[%s6831_s4 + $0x200] sm:$0xff]  }
  0x61   : > { %5040 = vmatprep.subr.bf16.mxu1 %v5422_v44 }
  0x62   : > { %5089 = vmatpush3.bf16.msra.mxu0 %v5423_v43  ;;  %v5462_v43 = vld [vmem:[%s6831_s4 + $0x80] sm:$0xff]  }
  0x63   : > { %5090 = vmatprep.subr.bf16.mxu0 %v5427_v45 }
  0x64   : > { %5041 = vmatpush3.bf16.msra.mxu1 %v5422_v44  ;;  %v6046_v44 = vld [vmem:[#allocation2 + $0x48] sm:$0xff]  }
  0x65   : > { %5011 = vmatmul.mubr.bf16.gmra.mxu0 %v5856_v46  ;;  %5042 = vmatprep.subr.bf16.mxu1 %v5426_v49 }
  0x66   : > { %5014 = vmatprep.mubr.bf16.mxu0 %v5861_v50  ;;  %5091 = vmatpush3.bf16.msra.mxu0 %v5427_v45 }
  0x67   : > { %4963 = vmatmul.mubr.bf16.gmra.mxu1 %v5769_v14  ;;  %5092 = vmatprep.subr.bf16.mxu0 %v5431_v51 }
  0x68   : > { %4966 = vmatprep.mubr.bf16.mxu1 %v5780_v19  ;;  %5043 = vmatpush3.bf16.msra.mxu1 %v5426_v49 }
  0x69   : > { %5044 = vmatprep.subr.bf16.mxu1 %v5430_v52 }
  0x6a   : > { %5093 = vmatpush3.bf16.msra.mxu0 %v5431_v51  ;;  %v6053_v51 = vld [vmem:[#allocation2 + $0x50] sm:$0xff]  }
  0x6b   : > { %5174 = vmatprep.subr.bf16.mxu0 %v5433_v53 }
  0x6c   : > { %5045 = vmatpush3.bf16.msra.mxu1 %v5430_v52 }
  0x6d   : > { %5015 = vmatmul.mubr.bf16.gmra.mxu0 %v5876_v54  ;;  %5126 = vmatprep.subr.bf16.mxu1 %v5432_v55 }
  0x6e   : > { %5018 = vmatprep.mubr.bf16.mxu0 %v5881_v57 }
  0x6f   : > { %4967 = vmatmul.mubr.bf16.gmra.mxu1 %v5656_v32 }
  0x70   : > { %4970 = vmatprep.mubr.bf16.mxu1 %v5670_v48 }
  0x75   : > { %5019 = vmatmul.mubr.bf16.gmra.mxu0 %v5887_v58 }
  0x76   : > { %5022 = vmatprep.mubr.bf16.mxu0 %v5889_v59 }
  0x77   : > { %4971 = vmatmul.mubr.bf16.gmra.mxu1 %v5706_v18 }
  0x78   : > { %4974 = vmatprep.mubr.bf16.mxu1 %v5721_v36 }
  0x7d   : > { %5023 = vmatmul.mubr.bf16.gmra.mxu0 %v5895_v60 }
  0x7e   : > { %5026 = vmatprep.mubr.bf16.mxu0 %v5897_v61 }
  0x7f   : > { %4975 = vmatmul.mubr.bf16.gmra.mxu1 %v5747_v0 }
  0x80   : > { %4978 = vmatprep.mubr.bf16.mxu1 %v5759_v12 }
  0x85   : > { %5027 = vmatmul.mubr.bf16.gmra.mxu0 %v5903_v62 }
  0x86   : > { %5094 = vmatprep.mubr.bf16.mxu0 %v5785_v21 }
  0x87   : > { %4979 = vmatmul.mubr.bf16.gmra.mxu1 %v5771_v15 }
  0x88   : > { %5046 = vmatprep.mubr.bf16.mxu1 %v5648_v26 }
  0x8d   : > { %5095 = vmatmul.mubr.bf16.vlgmr.msra.gmra.mxu0 %v5648_v26  ;;  %v5436_v26 = vld [vmem:[%s6831_s4 + $0x1a8] sm:$0xff]  }
  0x8e   : > { %5175 = vmatpush3.bf16.msra.mxu0 %v5433_v53  ;;  %5098 = vmatprep.mubr.bf16.mxu0 %v5668_v47 }
  0x8f   : > { %5047 = vmatmul.mubr.bf16.vlgmr.msra.gmra.mxu1 %v5668_v47  ;;  %5176 = vmatprep.subr.bf16.mxu0 %v5435_v63 }
  0x90   : > { %5127 = vmatpush3.bf16.msra.mxu1 %v5432_v55  ;;  %5050 = vmatprep.mubr.bf16.mxu1 %v5703_v13 }
  0x91   : > { %5128 = vmatprep.subr.bf16.mxu1 %v5434_v1 }
  0x92   : > { %5177 = vmatpush3.bf16.msra.mxu0 %v5435_v63 }
  0x93   : > { %5178 = vmatprep.subr.bf16.mxu0 %v5437_v2 }
  0x94   : > { %5129 = vmatpush3.bf16.msra.mxu1 %v5434_v1 }
  0x95   : > { %5099 = vmatmul.mubr.bf16.gmra.mxu0 %v5703_v13  ;;  %5130 = vmatprep.subr.bf16.mxu1 %v5436_v26 }
  0x96   : > { %5102 = vmatprep.mubr.bf16.mxu0 %v5715_v29  ;;  %5179 = vmatpush3.bf16.msra.mxu0 %v5437_v2 }
  0x97   : > { %5051 = vmatmul.mubr.bf16.gmra.mxu1 %v5715_v29  ;;  %5180 = vmatprep.subr.bf16.mxu0 %v5439_v5 }
  0x98   : > { %5054 = vmatprep.mubr.bf16.mxu1 %v5738_v56  ;;  %5131 = vmatpush3.bf16.msra.mxu1 %v5436_v26 }
  0x99   : > { %5132 = vmatprep.subr.bf16.mxu1 %v5438_v3 }
  0x9a   : > { %5181 = vmatpush3.bf16.msra.mxu0 %v5439_v5 }
  0x9b   : > { %5182 = vmatprep.subr.bf16.mxu0 %v5441_v6 }
  0x9c   : > { %5133 = vmatpush3.bf16.msra.mxu1 %v5438_v3 }
  0x9d   : > { %5103 = vmatmul.mubr.bf16.gmra.mxu0 %v5738_v56  ;;  %5134 = vmatprep.subr.bf16.mxu1 %v5440_v7 }
  0x9e   : > { %5106 = vmatprep.mubr.bf16.mxu0 %v5753_v4  ;;  %5183 = vmatpush3.bf16.msra.mxu0 %v5441_v6 }
  0x9f   : > { %5055 = vmatmul.mubr.bf16.gmra.mxu1 %v5753_v4  ;;  %5184 = vmatprep.subr.bf16.mxu0 %v5443_v8 }
  0xa0   : > { %5058 = vmatprep.mubr.bf16.mxu1 %v5769_v14  ;;  %5135 = vmatpush3.bf16.msra.mxu1 %v5440_v7 }
  0xa1   : > { %5136 = vmatprep.subr.bf16.mxu1 %v5442_v9 }
  0xa2   : > { %5185 = vmatpush3.bf16.msra.mxu0 %v5443_v8 }
  0xa3   : > { %5186 = vmatprep.subr.bf16.mxu0 %v5445_v10 }
  0xa4   : > { %5137 = vmatpush3.bf16.msra.mxu1 %v5442_v9 }
  0xa5   : > { %5107 = vmatmul.mubr.bf16.gmra.mxu0 %v5769_v14  ;;  %5138 = vmatprep.subr.bf16.mxu1 %v5444_v11 }
  0xa6   : > { %5110 = vmatprep.mubr.bf16.mxu0 %v5780_v19  ;;  %5187 = vmatpush3.bf16.msra.mxu0 %v5445_v10 }
  0xa7   : > { %5059 = vmatmul.mubr.bf16.gmra.mxu1 %v5780_v19  ;;  %5188 = vmatprep.subr.bf16.mxu0 %v5447_v16 }
  0xa8   : > { %5062 = vmatprep.mubr.bf16.mxu1 %v5656_v32  ;;  %5139 = vmatpush3.bf16.msra.mxu1 %v5444_v11 }
  0xa9   : > { %5140 = vmatprep.subr.bf16.mxu1 %v5446_v20 }
  0xaa   : > { %5189 = vmatpush3.bf16.msra.mxu0 %v5447_v16 }
  0xab   : > { %5270 = vmatprep.subr.bf16.mxu0 %v5449_v23 }
  0xac   : > { %5141 = vmatpush3.bf16.msra.mxu1 %v5446_v20 }
  0xad   : > { %5111 = vmatmul.mubr.bf16.gmra.mxu0 %v5656_v32  ;;  %5222 = vmatprep.subr.bf16.mxu1 %v5448_v25  ;;  %v5986_v32 = vld [vmem:[#allocation2 + $0x8] sm:$0xff]  }
  0xae   : > { %5114 = vmatprep.mubr.bf16.mxu0 %v5670_v48 }
  0xaf   : > { %5063 = vmatmul.mubr.bf16.gmra.mxu1 %v5670_v48  ;;  %v5451_v48 = vld [vmem:[%s6831_s4 + $0x230] sm:$0xff]  }
  0xb0   : > { %5066 = vmatprep.mubr.bf16.mxu1 %v5706_v18 }
  0xb5   : > { %5115 = vmatmul.mubr.bf16.gmra.mxu0 %v5706_v18 }
  0xb6   : > { %5118 = vmatprep.mubr.bf16.mxu0 %v5721_v36 }
  0xb7   : > { %5067 = vmatmul.mubr.bf16.gmra.mxu1 %v5721_v36 }
  0xb8   : > { %5070 = vmatprep.mubr.bf16.mxu1 %v5747_v0 }
  0xbd   : > { %5119 = vmatmul.mubr.bf16.gmra.mxu0 %v5747_v0 }
  0xbe   : > { %5122 = vmatprep.mubr.bf16.mxu0 %v5759_v12 }
  0xbf   : > { %5071 = vmatmul.mubr.bf16.gmra.mxu1 %v5759_v12 }
  0xc0   : > { %5074 = vmatprep.mubr.bf16.mxu1 %v5771_v15 }
  0xc5   : > { %5123 = vmatmul.mubr.bf16.gmra.mxu0 %v5771_v15 }
  0xc6   : > { %5190 = vmatprep.mubr.bf16.mxu0 %v5986_v32 }
  0xc7   : > { %5075 = vmatmul.mubr.bf16.gmra.mxu1 %v5788_v22 }
  0xc8   : > { %5142 = vmatprep.mubr.bf16.mxu1 %v5778_v17 }
  0xcd   : > { %5191 = vmatmul.mubr.bf16.vlgmr.msra.gmra.mxu0 %v5668_v47  ;;  %v5452_v47 = vld [vmem:[%s6831_s4 + $0xa8] sm:$0xff]  }
  0xce   : > { %5271 = vmatpush3.bf16.msra.mxu0 %v5449_v23  ;;  %5194 = vmatprep.mubr.bf16.mxu0 %v5703_v13  ;;  %v5455_v13 = vld [vmem:[%s6831_s4 + $0x220] sm:$0xff]  }
  0xcf   : > { %5143 = vmatmul.mubr.bf16.vlgmr.msra.gmra.mxu1 %v5796_v24  ;;  %5272 = vmatprep.subr.bf16.mxu0 %v5451_v48 }
  0xd0   : > { %5223 = vmatpush3.bf16.msra.mxu1 %v5448_v25  ;;  %5146 = vmatprep.mubr.bf16.mxu1 %v5801_v27 }
  0xd1   : > { %5224 = vmatprep.subr.bf16.mxu1 %v5450_v28 }
  0xd2   : > { %5273 = vmatpush3.bf16.msra.mxu0 %v5451_v48 }
  0xd3   : > { %5274 = vmatprep.subr.bf16.mxu0 %v5453_v30 }
  0xd4   : > { %5225 = vmatpush3.bf16.msra.mxu1 %v5450_v28 }
  0xd5   : > { %5195 = vmatmul.mubr.bf16.gmra.mxu0 %v5715_v29  ;;  %5226 = vmatprep.subr.bf16.mxu1 %v5452_v47  ;;  %v5456_v29 = vld [vmem:[%s6831_s4 + $0x98] sm:$0xff]  }
  0xd6   : > { %5198 = vmatprep.mubr.bf16.mxu0 %v5738_v56  ;;  %5275 = vmatpush3.bf16.msra.mxu0 %v5453_v30  ;;  %v5459_v56 = vld [vmem:[%s6831_s4 + $0x210] sm:$0xff]  }
  0xd7   : > { %5147 = vmatmul.mubr.bf16.gmra.mxu1 %v5816_v33  ;;  %5276 = vmatprep.subr.bf16.mxu0 %v5455_v13 }
  0xd8   : > { %5150 = vmatprep.mubr.bf16.mxu1 %v5821_v35  ;;  %5227 = vmatpush3.bf16.msra.mxu1 %v5452_v47 }
  0xd9   : > { %5228 = vmatprep.subr.bf16.mxu1 %v5454_v31 }
  0xda   : > { %5277 = vmatpush3.bf16.msra.mxu0 %v5455_v13 }
  0xdb   : > { %5278 = vmatprep.subr.bf16.mxu0 %v5457_v34 }
  0xdc   : > { %5229 = vmatpush3.bf16.msra.mxu1 %v5454_v31 }
  0xdd   : > { %5199 = vmatmul.mubr.bf16.gmra.mxu0 %v5753_v4  ;;  %5230 = vmatprep.subr.bf16.mxu1 %v5456_v29 }
  0xde   : > { %5202 = vmatprep.mubr.bf16.mxu0 %v5769_v14  ;;  %5279 = vmatpush3.bf16.msra.mxu0 %v5457_v34 }
  0xdf   : > { %5151 = vmatmul.mubr.bf16.gmra.mxu1 %v5836_v40  ;;  %5280 = vmatprep.subr.bf16.mxu0 %v5459_v56 }
  0xe0   : > { %5154 = vmatprep.mubr.bf16.mxu1 %v5841_v42  ;;  %5231 = vmatpush3.bf16.msra.mxu1 %v5456_v29  ;;  %v5467_v29 = vld [vmem:[#allocation2 + $0x10] sm:$0xff]  }
  0xe1   : > { %5232 = vmatprep.subr.bf16.mxu1 %v5458_v37 }
  0xe2   : > { %5281 = vmatpush3.bf16.msra.mxu0 %v5459_v56 }
  0xe3   : > { %5282 = vmatprep.subr.bf16.mxu0 %v5461_v38 }
  0xe4   : > { %5233 = vmatpush3.bf16.msra.mxu1 %v5458_v37 }
  0xe5   : > { %5203 = vmatmul.mubr.bf16.gmra.mxu0 %v5780_v19  ;;  %5234 = vmatprep.subr.bf16.mxu1 %v5460_v39 }
  0xe6   : > { %5206 = vmatprep.mubr.bf16.mxu0 %v6046_v44  ;;  %5283 = vmatpush3.bf16.msra.mxu0 %v5461_v38 }
  0xe7   : > { %5155 = vmatmul.mubr.bf16.gmra.mxu1 %v5856_v46  ;;  %5284 = vmatprep.subr.bf16.mxu0 %v5463_v41 }
  0xe8   : > { %5158 = vmatprep.mubr.bf16.mxu1 %v5861_v50  ;;  %5235 = vmatpush3.bf16.msra.mxu1 %v5460_v39 }
  0xe9   : > { %5236 = vmatprep.subr.bf16.mxu1 %v5462_v43 }
  0xea   : > { %5285 = vmatpush3.bf16.msra.mxu0 %v5463_v41 }
  0xec   : > { %5237 = vmatpush3.bf16.msra.mxu1 %v5462_v43 }
  0xed   : > { %v4904_v45 = vpop.f32.mrf.mxu0  ;;  %v6051_v49 = vpop.f32.mrf.mxu1  ;;  %5207 = vmatmul.mubr.bf16.gmra.mxu0 %v6053_v51 }
  0xee   : > { %5210 = vmatprep.mubr.bf16.mxu0 %v5706_v18 }
  0xef   : > { %5159 = vmatmul.mubr.bf16.gmra.mxu1 %v5876_v54  ;;  %v1116_v52 = vpop.f32.mrf.mxu0  ;;  %v6058_v53 = vpop.f32.mrf.mxu1 }
  0xf0   : > { %5162 = vmatprep.mubr.bf16.mxu1 %v5881_v57 }
  0xf1   : > { %v4905_v55 = vpop.f32.mrf.mxu0  ;;  %v6061_v63 = vpop.f32.mrf.mxu1 }
  0xf3   : > { %v1119_v1 = vpop.f32.mrf.mxu0  ;;  %v6063_v2 = vpop.f32.mrf.mxu1 }
  0xf5   : > { %v6065_v26 = vpop.f32.mrf.mxu0  ;;  %v6067_v5 = vpop.f32.mrf.mxu1  ;;  %5211 = vmatmul.mubr.bf16.gmra.mxu0 %v5721_v36 }
  0xf6   : > { %5214 = vmatprep.mubr.bf16.mxu0 %v5747_v0 }
  0xf7   : > { %5163 = vmatmul.mubr.bf16.gmra.mxu1 %v5887_v58  ;;  %v6072_v18 = vpop.f32.mrf.mxu0  ;;  %v6074_v3 = vpop.f32.mrf.mxu1 }
  0xf8   : > { %5166 = vmatprep.mubr.bf16.mxu1 %v5889_v59 }
  0xf9   : > { %v6077_v6 = vpop.f32.mrf.mxu0  ;;  %v6079_v7 = vpop.f32.mrf.mxu1 }
  0xfb   : > { %v6081_v8 = vpop.f32.mrf.mxu0  ;;  %v6083_v9 = vpop.f32.mrf.mxu1 }
  0xfd   : > { %v6085_v10 = vpop.f32.mrf.mxu0  ;;  %5215 = vmatmul.mubr.bf16.gmra.mxu0 %v5759_v12  ;;  %v6088_v36 = vpop.f32.mrf.mxu1 }
  0xfe   : > { %5218 = vmatprep.mubr.bf16.mxu0 %v5771_v15 }
  0xff   : > { %5167 = vmatmul.mubr.bf16.gmra.mxu1 %v5895_v60  ;;  %v6092_v0 = vpop.f32.mrf.mxu0  ;;  %v6094_v11 = vpop.f32.mrf.mxu1 }
 0x100   : > { %5170 = vmatprep.mubr.bf16.mxu1 %v5897_v61 }
 0x101   : > { %v6097_v16 = vpop.f32.mrf.mxu0  ;;  %v6099_v20 = vpop.f32.mrf.mxu1 }
 0x103   : > { %v6101_v23 = vpop.f32.mrf.mxu0  ;;  %v6103_v25 = vpop.f32.mrf.mxu1 }
 0x105   : > { %v6105_v12 = vpop.f32.mrf.mxu0  ;;  %5219 = vmatmul.mubr.bf16.gmra.mxu0 %v5788_v22  ;;  %v6109_v15 = vpop.f32.mrf.mxu1 }
 0x106   : > { %5286 = vmatprep.mubr.bf16.mxu0 %v5778_v17 }
 0x107   : > { %5171 = vmatmul.mubr.bf16.gmra.mxu1 %v5903_v62  ;;  %v6112_v48 = vpop.f32.mrf.mxu0  ;;  %v6115_v28 = vpop.f32.mrf.mxu1 }
 0x108   : > { %5238 = vmatprep.mubr.bf16.mxu1 %v5785_v21  ;;  %6838 = vst [vmem:[#allocation3_spill] sm:$0xff] %v6115_v28 }
 0x109   : > { %v6117_v30 = vpop.f32.mrf.mxu0  ;;  %v6119_v47 = vpop.f32.mrf.mxu1 }
 0x10a   : > { %6839 = vst [vmem:[#allocation4_spill] sm:$0xff] %v6119_v47 }
 0x10b   : > { %v6121_v13 = vpop.f32.mrf.mxu0  ;;  %v6123_v31 = vpop.f32.mrf.mxu1 }
 0x10c   : > { %6840 = vst [vmem:[#allocation5_spill] sm:$0xff] %v6123_v31 }
 0x10d   : > { %v5000_v22 = vpop.f32.mrf.mxu0  ;;  %5287 = vmatmul.mubr.bf16.vlgmr.msra.gmra.mxu0 %v5796_v24 }
 0x10e   : > { %5290 = vmatprep.mubr.bf16.mxu0 %v5801_v27 }
 0x10f   : > { %v4952_v17 = vpop.f32.mrf.mxu1  ;;  %5239 = vmatmul.mubr.bf16.vlgmr.msra.gmra.mxu1 %v5986_v32  ;;  %v1685_v34 = vpop.f32.mrf.mxu0 }
 0x110   : > { %v1340_v21 = vadd.f32 %v4952_v17, %v4904_v45  ;;  %5242 = vmatprep.mubr.bf16.mxu1 %v5467_v29  ;;  %v5468_v17 = vld [vmem:[#allocation2 + $0x18] sm:$0xff]  }
 0x111   : > { %v1331_v56 = vpop.f32.mrf.mxu1  ;;  %v5001_v37 = vpop.f32.mrf.mxu0 }
 0x112   : > { %v6128_v38 = vadd.f32 %v5000_v22, %v1340_v21  ;;  %v1332_v39 = vadd.f32 %v1331_v56, %v1116_v52 }
 0x113   : > { %v4953_v41 = vpop.f32.mrf.mxu1  ;;  %v1688_v43 = vpop.f32.mrf.mxu0 }
 0x114   : > { %v6130_v31 = vadd.f32 %v1685_v34, %v1332_v39  ;;  %v1343_v47 = vadd.f32 %v4953_v41, %v4905_v55  ;;  %v5469_v34 = vld [vmem:[#allocation2 + $0x20] sm:$0xff]  }
 0x115   : > { %v1334_v24 = vpop.f32.mrf.mxu1  ;;  %v5004_v28 = vpop.f32.mrf.mxu0  ;;  %5291 = vmatmul.mubr.bf16.gmra.mxu0 %v5816_v33 }
 0x116   : > { %6841 = vst [vmem:[#allocation6_spill] sm:$0xff] %v6130_v31  ;;  %v6133_v27 = vadd.f32 %v5001_v37, %v1343_v47  ;;  %v1335_v32 = vadd.f32 %v1334_v24, %v1119_v1  ;;  %5294 = vmatprep.mubr.bf16.mxu0 %v5821_v35  ;;  %v5470_v24 = vld [vmem:[#allocation2 + $0x28] sm:$0xff]  }
 0x117   : > { %v4956_v45 = vpop.f32.mrf.mxu1  ;;  %5243 = vmatmul.mubr.bf16.gmra.mxu1 %v5468_v17  ;;  %v1701_v22 = vpop.f32.mrf.mxu0 }
 0x118   : > { %v6136_v21 = vadd.f32 %v1688_v43, %v1335_v32  ;;  %v1356_v52 = vadd.f32 %v4956_v45, %v6065_v26  ;;  %5246 = vmatprep.mubr.bf16.mxu1 %v5469_v34 }
 0x119   : > { %v1347_v55 = vpop.f32.mrf.mxu1  ;;  %v5005_v29 = vpop.f32.mrf.mxu0 }
 0x11a   : > { %v6139_v56 = vadd.f32 %v5004_v28, %v1356_v52  ;;  %v1348_v33 = vadd.f32 %v1347_v55, %v6072_v18 }
 0x11b   : > { %v4957_v47 = vpop.f32.mrf.mxu1  ;;  %v1704_v1 = vpop.f32.mrf.mxu0 }
 0x11c   : > { %v6142_v37 = vadd.f32 %v1701_v22, %v1348_v33  ;;  %v1359_v35 = vadd.f32 %v4957_v47, %v6077_v6 }
 0x11d   : > { %v1350_v39 = vpop.f32.mrf.mxu1  ;;  %v5008_v41 = vpop.f32.mrf.mxu0  ;;  %5295 = vmatmul.mubr.bf16.gmra.mxu0 %v5836_v40 }
 0x11e   : > { %v6146_v43 = vadd.f32 %v5005_v29, %v1359_v35  ;;  %v1351_v26 = vadd.f32 %v1350_v39, %v6081_v8  ;;  %5298 = vmatprep.mubr.bf16.mxu0 %v5841_v42 }
 0x11f   : > { %v4960_v28 = vpop.f32.mrf.mxu1  ;;  %5247 = vmatmul.mubr.bf16.gmra.mxu1 %v5470_v24  ;;  %v1717_v18 = vpop.f32.mrf.mxu0 }
 0x120   : > { %v6150_v32 = vadd.f32 %v1704_v1, %v1351_v26  ;;  %v1372_v45 = vadd.f32 %v4960_v28, %v6085_v10  ;;  %5250 = vmatprep.mubr.bf16.mxu1 %v5753_v4 }
 0x121   : > { %v1363_v6 = vpop.f32.mrf.mxu1  ;;  %v5009_v17 = vpop.f32.mrf.mxu0 }
 0x122   : > { %v6154_v22 = vadd.f32 %v5008_v41, %v1372_v45  ;;  %v1364_v40 = vadd.f32 %v1363_v6, %v6092_v0 }
 0x123   : > { %v4961_v52 = vpop.f32.mrf.mxu1  ;;  %v1720_v8 = vpop.f32.mrf.mxu0 }
 0x124   : > { %v6157_v34 = vadd.f32 %v1717_v18, %v1364_v40  ;;  %v1375_v42 = vadd.f32 %v4961_v52, %v6097_v16 }
 0x125   : > { %v1366_v55 = vpop.f32.mrf.mxu1  ;;  %v5012_v29 = vpop.f32.mrf.mxu0  ;;  %5299 = vmatmul.mubr.bf16.gmra.mxu0 %v5856_v46 }
 0x126   : > { %v6161_v33 = vadd.f32 %v5009_v17, %v1375_v42  ;;  %v1367_v4 = vadd.f32 %v1366_v55, %v6101_v23  ;;  %5302 = vmatprep.mubr.bf16.mxu0 %v5861_v50  ;;  %v5471_v55 = vld [vmem:[#allocation2 + $0x58] sm:$0xff]  }
 0x127   : > { %v4964_v10 = vpop.f32.mrf.mxu1  ;;  %5251 = vmatmul.mubr.bf16.gmra.mxu1 %v5769_v14  ;;  %v1733_v0 = vpop.f32.mrf.mxu0 }
 0x128   : > { %v6166_v47 = vadd.f32 %v1720_v8, %v1367_v4  ;;  %v1388_v1 = vadd.f32 %v4964_v10, %v6105_v12  ;;  %5254 = vmatprep.mubr.bf16.mxu1 %v5780_v19  ;;  %v5472_v10 = vld [vmem:[#allocation2 + $0x60] sm:$0xff]  }
 0x129   : > { %v1379_v16 = vpop.f32.mrf.mxu1  ;;  %v5013_v35 = vpop.f32.mrf.mxu0 }
 0x12a   : > { %v6170_v39 = vadd.f32 %v5012_v29, %v1388_v1  ;;  %v1380_v46 = vadd.f32 %v1379_v16, %v6112_v48 }
 0x12b   : > { %v4965_v41 = vpop.f32.mrf.mxu1  ;;  %v1736_v23 = vpop.f32.mrf.mxu0 }
 0x12c   : > { %v6173_v26 = vadd.f32 %v1733_v0, %v1380_v46  ;;  %v1391_v50 = vadd.f32 %v4965_v41, %v6117_v30 }
 0x12d   : > { %v1382_v14 = vpop.f32.mrf.mxu1  ;;  %v5016_v28 = vpop.f32.mrf.mxu0  ;;  %5303 = vmatmul.mubr.bf16.gmra.mxu0 %v5876_v54 }
 0x12e   : > { %v6177_v24 = vadd.f32 %v5013_v35, %v1391_v50  ;;  %v1383_v19 = vadd.f32 %v1382_v14, %v6121_v13  ;;  %5306 = vmatprep.mubr.bf16.mxu0 %v5881_v57  ;;  %v5473_v14 = vld [vmem:[#allocation2 + $0x68] sm:$0xff]  }
 0x12f   : > { %v4968_v12 = vpop.f32.mrf.mxu1  ;;  %5255 = vmatmul.mubr.bf16.gmra.mxu1 %v6046_v44  ;;  %v1749_v48 = vpop.f32.mrf.mxu0 }
 0x130   : > { %v6182_v18 = vadd.f32 %v1736_v23, %v1383_v19  ;;  %v1404_v45 = vadd.f32 %v4968_v12, %v6051_v49  ;;  %5258 = vmatprep.mubr.bf16.mxu1 %v6053_v51  ;;  %v5474_v12 = vld [vmem:[#allocation2 + $0x70] sm:$0xff]  }
 0x131   : > { %v1395_v30 = vpop.f32.mrf.mxu1  ;;  %v5017_v6 = vpop.f32.mrf.mxu0 }
 0x132   : > { %v6186_v17 = vadd.f32 %v5016_v28, %v1404_v45  ;;  %v1396_v54 = vadd.f32 %v1395_v30, %v6058_v53 }
 0x133   : > { %v4969_v40 = vpop.f32.mrf.mxu1  ;;  %v1752_v13 = vpop.f32.mrf.mxu0 }
 0x134   : > { %v6189_v52 = vadd.f32 %v1749_v48, %v1396_v54  ;;  %v1407_v57 = vadd.f32 %v4969_v40, %v6061_v63 }
 0x135   : > { %v1398_v44 = vpop.f32.mrf.mxu1  ;;  %v5020_v8 = vpop.f32.mrf.mxu0  ;;  %5307 = vmatmul.mubr.bf16.gmra.mxu0 %v5887_v58 }
 0x136   : > { %v6193_v42 = vadd.f32 %v5017_v6, %v1407_v57  ;;  %v1399_v49 = vadd.f32 %v1398_v44, %v6063_v2  ;;  %5310 = vmatprep.mubr.bf16.mxu0 %v5889_v59  ;;  %v5475_v44 = vld [vmem:[#allocation2 + $0x78] sm:$0xff]  }
 0x137   : > { %v4972_v51 = vpop.f32.mrf.mxu1  ;;  %5259 = vmatmul.mubr.bf16.gmra.mxu1 %v5471_v55  ;;  %v1765_v53 = vpop.f32.mrf.mxu0 }
 0x138   : > { %v6197_v29 = vadd.f32 %v1752_v13, %v1399_v49  ;;  %v1420_v4 = vadd.f32 %v4972_v51, %v6067_v5  ;;  %5262 = vmatprep.mubr.bf16.mxu1 %v5472_v10 }
 0x139   : > { %v1411_v63 = vpop.f32.mrf.mxu1  ;;  %v5021_v0 = vpop.f32.mrf.mxu0 }
 0x13a   : > { %v6200_v1 = vadd.f32 %v5020_v8, %v1420_v4  ;;  %v1412_v58 = vadd.f32 %v1411_v63, %v6074_v3 }
 0x13b   : > { %v4973_v16 = vpop.f32.mrf.mxu1  ;;  %v1768_v2 = vpop.f32.mrf.mxu0 }
 0x13c   : > { %6842 = vst [vmem:[#allocation7_spill] sm:$0xff] %v6200_v1  ;;  %v6203_v35 = vadd.f32 %v1765_v53, %v1412_v58  ;;  %v1423_v59 = vadd.f32 %v4973_v16, %v6079_v7 }
 0x13d   : > { %v1414_v46 = vpop.f32.mrf.mxu1  ;;  %v5024_v41 = vpop.f32.mrf.mxu0  ;;  %5311 = vmatmul.mubr.bf16.gmra.mxu0 %v5895_v60 }
 0x13e   : > { %v6207_v23 = vadd.f32 %v5021_v0, %v1423_v59  ;;  %v1415_v5 = vadd.f32 %v1414_v46, %v6083_v9  ;;  %5314 = vmatprep.mubr.bf16.mxu0 %v5897_v61  ;;  %v6851_v0 = vld [vmem:[#allocation4_spill] sm:$0xff]  ;;  %v6853_v59 = vld [vmem:[#allocation5_spill] sm:$0xff] }
 0x13f   : > { %v4976_v50 = vpop.f32.mrf.mxu1  ;;  %5263 = vmatmul.mubr.bf16.gmra.mxu1 %v5473_v14  ;;  %v1781_v3 = vpop.f32.mrf.mxu0 }
 0x140   : > { %v6211_v28 = vadd.f32 %v1768_v2, %v1415_v5  ;;  %v1436_v19 = vadd.f32 %v4976_v50, %v6088_v36  ;;  %5266 = vmatprep.mubr.bf16.mxu1 %v5474_v12 }
 0x141   : > { %v1427_v7 = vpop.f32.mrf.mxu1  ;;  %v5025_v48 = vpop.f32.mrf.mxu0 }
 0x142   : > { %6843 = vst [vmem:[#allocation8_spill] sm:$0xff] %v6211_v28  ;;  %v6214_v45 = vadd.f32 %v5024_v41, %v1436_v19  ;;  %v1428_v60 = vadd.f32 %v1427_v7, %v6094_v11 }
 0x143   : > { %v4977_v30 = vpop.f32.mrf.mxu1  ;;  %v1784_v9 = vpop.f32.mrf.mxu0 }
 0x144   : > { %6844 = vst [vmem:[#allocation9_spill] sm:$0xff] %v6214_v45  ;;  %v6217_v6 = vadd.f32 %v1781_v3, %v1428_v60  ;;  %v1439_v61 = vadd.f32 %v4977_v30, %v6099_v20  ;;  %v6849_v20 = vld [vmem:[#allocation3_spill] sm:$0xff] }
 0x145   : > { %v1430_v54 = vpop.f32.mrf.mxu1  ;;  %v5028_v40 = vpop.f32.mrf.mxu0  ;;  %5315 = vmatmul.mubr.bf16.gmra.mxu0 %v5903_v62 }
 0x146   : > { %6845 = vst [vmem:[#allocation10_spill] sm:$0xff] %v6217_v6  ;;  %v6221_v13 = vadd.f32 %v5025_v48, %v1439_v61  ;;  %v1431_v36 = vadd.f32 %v1430_v54, %v6103_v25 }
 0x147   : > { %v4980_v57 = vpop.f32.mrf.mxu1  ;;  %5267 = vmatmul.mubr.bf16.gmra.mxu1 %v5475_v44  ;;  %v1797_v8 = vpop.f32.mrf.mxu0 }
 0x148   : > { %6846 = vst [vmem:[#allocation11_spill] sm:$0xff] %v6221_v13  ;;  %v6224_v49 = vadd.f32 %v1784_v9, %v1431_v36  ;;  %v1452_v11 = vadd.f32 %v4980_v57, %v6109_v15 }
 0x149   : > { %v1443_v51 = vpop.f32.mrf.mxu1  ;;  %v5029_v55 = vpop.f32.mrf.mxu0 }
 0x14a   : > { %6847 = vst [vmem:[#allocation12_spill] sm:$0xff] %v6224_v49  ;;  %v6227_v53 = vadd.f32 %v5028_v40, %v1452_v11  ;;  %v1444_v4 = vadd.f32 %v1443_v51, %v6849_v20 }
 0x14b   : > { %v4981_v10 = vpop.f32.mrf.mxu1  ;;  %v1800_v62 = vpop.f32.mrf.mxu0 }
 0x14c   : > { %6848 = vst [vmem:[#allocation13_spill] sm:$0xff] %v6227_v53  ;;  %v6230_v63 = vadd.f32 %v1797_v8, %v1444_v4  ;;  %v1455_v25 = vadd.f32 %v4981_v10, %v6851_v0 }
 0x14d   : > { %v1446_v58 = vpop.f32.mrf.mxu1  ;;  %v5096_v16 = vpop.f32.mrf.mxu0 }
 0x14e   : > { %6850 = vst [vmem:[#allocation3_spill] sm:$0xff] %v6230_v63  ;;  %v6233_v2 = vadd.f32 %v5029_v55, %v1455_v25  ;;  %v1447_v46 = vadd.f32 %v1446_v58, %v6853_v59 }
 0x14f   : > { %v5048_v41 = vpop.f32.mrf.mxu1  ;;  %v2170_v15 = vpop.f32.mrf.mxu0 }
 0x150   : > { %6852 = vst [vmem:[#allocation4_spill] sm:$0xff] %v6233_v2  ;;  %v6236_v5 = vadd.f32 %v1800_v62, %v1447_v46  ;;  %v6238_v50 = vadd.f32 %v5096_v16, %v5048_v41 }
 0x151   : > { %v1961_v14 = vpop.f32.mrf.mxu1  ;;  %v5097_v3 = vpop.f32.mrf.mxu0 }
 0x152   : > { %6854 = vst [vmem:[#allocation5_spill] sm:$0xff] %v6236_v5  ;;  %v6240_v19 = vadd.f32 %v2170_v15, %v1961_v14 }
 0x153   : > { %v5049_v12 = vpop.f32.mrf.mxu1  ;;  %v2173_v7 = vpop.f32.mrf.mxu0 }
 0x154   : > { %v6242_v48 = vadd.f32 %v5097_v3, %v5049_v12 }
 0x155   : > { %v1964_v60 = vpop.f32.mrf.mxu1  ;;  %v5100_v30 = vpop.f32.mrf.mxu0 }
 0x156   : > { %v6244_v9 = vadd.f32 %v2173_v7, %v1964_v60 }
 0x157   : > { %v5052_v61 = vpop.f32.mrf.mxu1  ;;  %v2186_v54 = vpop.f32.mrf.mxu0 }
 0x158   : > { %v6246_v40 = vadd.f32 %v5100_v30, %v5052_v61 }
 0x159   : > { %v1977_v36 = vpop.f32.mrf.mxu1  ;;  %v5101_v57 = vpop.f32.mrf.mxu0 }
 0x15a   : > { %v6248_v44 = vadd.f32 %v2186_v54, %v1977_v36 }
 0x15b   : > { %v5053_v8 = vpop.f32.mrf.mxu1  ;;  %v2189_v11 = vpop.f32.mrf.mxu0 }
 0x15c   : > { %v6250_v51 = vadd.f32 %v5101_v57, %v5053_v8 }
 0x15d   : > { %v1980_v55 = vpop.f32.mrf.mxu1  ;;  %v5104_v20 = vpop.f32.mrf.mxu0 }
 0x15e   : > { %v6252_v4 = vadd.f32 %v2189_v11, %v1980_v55 }
 0x15f   : > { %v5056_v10 = vpop.f32.mrf.mxu1  ;;  %v2202_v62 = vpop.f32.mrf.mxu0 }
 0x160   : > { %v6254_v0 = vadd.f32 %v5104_v20, %v5056_v10 }
 0x161   : > { %v1993_v25 = vpop.f32.mrf.mxu1  ;;  %v5105_v58 = vpop.f32.mrf.mxu0 }
 0x162   : > { %v6256_v16 = vadd.f32 %v2202_v62, %v1993_v25 }
 0x163   : > { %v5057_v59 = vpop.f32.mrf.mxu1  ;;  %v2205_v46 = vpop.f32.mrf.mxu0 }
 0x164   : > { %v6258_v41 = vadd.f32 %v5105_v58, %v5057_v59 }
 0x165   : > { %v1996_v15 = vpop.f32.mrf.mxu1  ;;  %v5108_v14 = vpop.f32.mrf.mxu0 }
 0x166   : > { %v6260_v3 = vadd.f32 %v2205_v46, %v1996_v15 }
 0x167   : > { %v5060_v12 = vpop.f32.mrf.mxu1  ;;  %v2218_v7 = vpop.f32.mrf.mxu0 }
 0x168   : > { %v6262_v60 = vadd.f32 %v5108_v14, %v5060_v12 }
 0x169   : > { %v2009_v30 = vpop.f32.mrf.mxu1  ;;  %v5109_v61 = vpop.f32.mrf.mxu0 }
 0x16a   : > { %v6264_v54 = vadd.f32 %v2218_v7, %v2009_v30 }
 0x16b   : > { %v5061_v36 = vpop.f32.mrf.mxu1  ;;  %v2221_v57 = vpop.f32.mrf.mxu0 }
 0x16c   : > { %v6266_v8 = vadd.f32 %v5109_v61, %v5061_v36 }
 0x16d   : > { %v2012_v11 = vpop.f32.mrf.mxu1  ;;  %v5112_v55 = vpop.f32.mrf.mxu0 }
 0x16e   : > { %v6268_v20 = vadd.f32 %v2221_v57, %v2012_v11 }
 0x16f   : > { %v5064_v10 = vpop.f32.mrf.mxu1  ;;  %v2234_v62 = vpop.f32.mrf.mxu0 }
 0x170   : > { %v6270_v25 = vadd.f32 %v5112_v55, %v5064_v10 }
 0x171   : > { %v2025_v58 = vpop.f32.mrf.mxu1  ;;  %v5113_v59 = vpop.f32.mrf.mxu0 }
 0x172   : > { %v6272_v46 = vadd.f32 %v2234_v62, %v2025_v58 }
 0x173   : > { %v5065_v15 = vpop.f32.mrf.mxu1  ;;  %v2237_v14 = vpop.f32.mrf.mxu0 }
 0x174   : > { %v6274_v12 = vadd.f32 %v5113_v59, %v5065_v15 }
 0x175   : > { %v2028_v7 = vpop.f32.mrf.mxu1  ;;  %v5116_v30 = vpop.f32.mrf.mxu0 }
 0x176   : > { %v6276_v61 = vadd.f32 %v2237_v14, %v2028_v7 }
 0x177   : > { %v5068_v36 = vpop.f32.mrf.mxu1  ;;  %v2250_v53 = vpop.f32.mrf.mxu0 }
 0x178   : > { %v6278_v57 = vadd.f32 %v5116_v30, %v5068_v36 }
 0x179   : > { %v2041_v11 = vpop.f32.mrf.mxu1  ;;  %v5117_v5 = vpop.f32.mrf.mxu0 }
 0x17a   : > { %v6280_v55 = vadd.f32 %v2250_v53, %v2041_v11 }
 0x17b   : > { %v5069_v10 = vpop.f32.mrf.mxu1  ;;  %v2253_v31 = vpop.f32.mrf.mxu0 }
 0x17c   : > { %v6282_v62 = vadd.f32 %v5117_v5, %v5069_v10 }
 0x17d   : > { %v2044_v58 = vpop.f32.mrf.mxu1  ;;  %v5120_v2 = vpop.f32.mrf.mxu0 }
 0x17e   : > { %v6284_v59 = vadd.f32 %v2253_v31, %v2044_v58 }
 0x17f   : > { %v5072_v15 = vpop.f32.mrf.mxu1  ;;  %v2266_v63 = vpop.f32.mrf.mxu0 }
 0x180   : > { %v6286_v14 = vadd.f32 %v5120_v2, %v5072_v15 }
 0x181   : > { %v2057_v7 = vpop.f32.mrf.mxu1  ;;  %v5121_v45 = vpop.f32.mrf.mxu0 }
 0x182   : > { %v6288_v30 = vadd.f32 %v2266_v63, %v2057_v7 }
 0x183   : > { %v5073_v36 = vpop.f32.mrf.mxu1  ;;  %v2269_v49 = vpop.f32.mrf.mxu0 }
 0x184   : > { %6855 = vst [vmem:[#allocation14_spill] sm:$0xff] %v6288_v30  ;;  %v6290_v53 = vadd.f32 %v5121_v45, %v5073_v36  ;;  %v867_v45 = vlaneseq }
 0x185   : > { %v2060_v11 = vpop.f32.mrf.mxu1  ;;  %v5124_v13 = vpop.f32.mrf.mxu0 }
 0x186   : > { %v6292_v5 = vadd.f32 %v2269_v49, %v2060_v11 }
 0x187   : > { %v5076_v10 = vpop.f32.mrf.mxu1  ;;  %v2282_v6 = vpop.f32.mrf.mxu0 }
 0x188   : > { %v6294_v31 = vadd.f32 %v5124_v13, %v5076_v10 }
 0x189   : > { %v2073_v58 = vpop.f32.mrf.mxu1  ;;  %v5125_v1 = vpop.f32.mrf.mxu0 }
 0x18a   : > { %6856 = vst [vmem:[#allocation15_spill] sm:$0xff] %v6294_v31  ;;  %v6296_v2 = vadd.f32 %v2282_v6, %v2073_v58  ;;  %v6307_v31 = vshrl.u32 %v867_v45, 7 }
 0x18b   : > { %v5077_v15 = vpop.f32.mrf.mxu1  ;;  %v2285_v28 = vpop.f32.mrf.mxu0 }
 0x18c   : > { %v6298_v63 = vadd.f32 %v5125_v1, %v5077_v15  ;;  %vm2587_vm0 = vcmp.lt.s32.totalorder %v6307_v31, 1  ;;  %vm1844_vm1 = vcmp.ne.s32.totalorder %v6307_v31, 0  ;;  %vm3432_vm2 = vcmp.lt.s32.totalorder %v6307_v31, 7 }
 0x18d   : > { %v2076_v7 = vpop.f32.mrf.mxu1  ;;  %v6300_v30 = vpop.f32.mrf.mxu0 }
 0x18e   : > { %6857 = vst [vmem:[#allocation16_spill] sm:$0xff] %v6300_v30  ;;  %v6302_v36 = vadd.f32 %v2285_v28, %v2076_v7 }
 0x18f   : > { %v5144_v49 = vpop.f32.mrf.mxu1  ;;  %v6304_v11 = vpop.f32.mrf.mxu0 }
 0x190   : > { %6858 = vst [vmem:[#allocation17_spill] sm:$0xff] %v6304_v11  ;;  %v2525_v13 = vadd.f32 %v5144_v49, %v6238_v50 }
 0x191   : > { %v2396_v10 = vpop.f32.mrf.mxu1  ;;  %v6309_v6 = vpop.f32.mrf.mxu0 }
 0x192   : > { %6859 = vst [vmem:[#allocation18_spill] sm:$0xff] %v6309_v6  ;;  %v6312_v58 = vadd.f32 %v2396_v10, %v6240_v19  ;;  %v2557_v11 = vrot.slane %v2525_v13, 7 }
 0x193   : > { %v5145_v1 = vpop.f32.mrf.mxu1  ;;  %v6314_v15 = vpop.f32.mrf.mxu0 }
 0x194   : > { %6860 = vst [vmem:[#allocation19_spill] sm:$0xff] %v6314_v15  ;;  %v2526_v30 = vadd.f32 %v5145_v1, %v6242_v48  ;;  %v6835_v19 = vrot.slane %v6312_v58, 7 }
 0x195   : > { %v2399_v28 = vpop.f32.mrf.mxu1  ;;  %v6318_v7 = vpop.f32.mrf.mxu0 }
 0x196   : > { %6861 = vst [vmem:[#allocation20_spill] sm:$0xff] %v6318_v7  ;;  %v2558_v50 = vrot.slane %v2526_v30, 7  ;;  %v2524_v45 = vadd.f32 %v2399_v28, %v6244_v9 }
 0x197   : > { %v5148_v49 = vpop.f32.mrf.mxu1  ;;  %v6322_v6 = vpop.f32.mrf.mxu0 }
 0x198   : > { %6862 = vst [vmem:[#allocation21_spill] sm:$0xff] %v6322_v6  ;;  %v2616_v10 = vsel %vm2587_vm0, %v2557_v11, %v2558_v50  ;;  %v2556_v48 = vrot.slane %v2524_v45, 7  ;;  %v2529_v1 = vadd.f32 %v5148_v49, %v6246_v40 }
 0x199   : > { %v6329_v15 = vadd.f32 %v2616_v10, %v6133_v27  ;;  %v2412_v13 = vpop.f32.mrf.mxu1  ;;  %v6331_v30 = vpop.f32.mrf.mxu0 }
 0x19a   : > { %6864 = vst [vmem:[#allocation23_spill] sm:$0xff] %v6331_v30  ;;  %v2617_v9 = vsel %vm2587_vm0, %v2556_v48, %v2557_v11  ;;  %v2618_v28 = vsel %vm2587_vm0, %v6835_v19, %v2556_v48  ;;  %v2527_v6 = vadd.f32 %v2412_v13, %v6248_v44  ;;  %v2561_v48 = vrot.slane %v2529_v1, 7 }
 0x19b   : > { %6863 = vst [vmem:[#allocation22_spill] sm:$0xff] %v6329_v15  ;;  %v2626_v45 = vsel %vm1844_vm1, %v2617_v9, 0.0  ;;  %v6343_v40 = vadd.f32 %v2618_v28, %v6136_v21  ;;  %v5149_v27 = vpop.f32.mrf.mxu1  ;;  %v6345_v49 = vpop.f32.mrf.mxu0 }
 0x19c   : > { %v6348_v10 = vadd.f32 %v2626_v45, %v6128_v38  ;;  %v2559_v11 = vrot.slane %v2527_v6, 7  ;;  %v2530_v15 = vadd.f32 %v5149_v27, %v6250_v51 }
 0x19d   : > { %v2415_v30 = vpop.f32.mrf.mxu1  ;;  %v6351_v7 = vpop.f32.mrf.mxu0 }
 0x19e   : > { %v2615_v44 = vsel %vm2587_vm0, %v2558_v50, %v2559_v11  ;;  %v2562_v13 = vrot.slane %v2530_v15, 7  ;;  %v2528_v21 = vadd.f32 %v2415_v30, %v6252_v4 }
 0x19f   : > { %v2628_v9 = vsel %vm1844_vm1, %v2615_v44, 0.0  ;;  %v5152_v28 = vpop.f32.mrf.mxu1  ;;  %v6358_v19 = vpop.f32.mrf.mxu0 }
 0x1a0   : > { %v6361_v38 = vadd.f32 %v2628_v9, %v6142_v37  ;;  %v2612_v51 = vsel %vm2587_vm0, %v2561_v48, %v2562_v13  ;;  %v2560_v6 = vrot.slane %v2528_v21, 7  ;;  %v2533_v1 = vadd.f32 %v5152_v28, %v6254_v0 }
 0x1a1   : > { %v6367_v50 = vadd.f32 %v2612_v51, %v6146_v43  ;;  %v2428_v15 = vpop.f32.mrf.mxu1  ;;  %v6369_v4 = vpop.f32.mrf.mxu0 }
 0x1a2   : > { %v2613_v30 = vsel %vm2587_vm0, %v2560_v6, %v2561_v48  ;;  %v2614_v45 = vsel %vm2587_vm0, %v2559_v11, %v2560_v6  ;;  %v2531_v37 = vadd.f32 %v2428_v15, %v6256_v16  ;;  %v2565_v11 = vrot.slane %v2533_v1, 7 }
 0x1a3   : > { %v2630_v27 = vsel %vm1844_vm1, %v2613_v30, 0.0  ;;  %v6379_v44 = vadd.f32 %v2614_v45, %v6150_v32  ;;  %v5153_v0 = vpop.f32.mrf.mxu1  ;;  %v6381_v43 = vpop.f32.mrf.mxu0 }
 0x1a4   : > { %v6384_v21 = vadd.f32 %v2630_v27, %v6139_v56  ;;  %v2563_v9 = vrot.slane %v2531_v37, 7  ;;  %v2534_v48 = vadd.f32 %v5153_v0, %v6258_v41 }
 0x1a5   : > { %v2431_v28 = vpop.f32.mrf.mxu1  ;;  %v6387_v51 = vpop.f32.mrf.mxu0 }
 0x1a6   : > { %v2611_v16 = vsel %vm2587_vm0, %v2562_v13, %v2563_v9  ;;  %v2566_v6 = vrot.slane %v2534_v48, 7  ;;  %v2532_v32 = vadd.f32 %v2431_v28, %v6260_v3 }
 0x1a7   : > { %v2632_v15 = vsel %vm1844_vm1, %v2611_v16, 0.0  ;;  %v5156_v30 = vpop.f32.mrf.mxu1  ;;  %v6394_v45 = vpop.f32.mrf.mxu0 }
 0x1a8   : > { %v6397_v56 = vadd.f32 %v2632_v15, %v6157_v34  ;;  %v2608_v41 = vsel %vm2587_vm0, %v2565_v11, %v2566_v6  ;;  %v2564_v37 = vrot.slane %v2532_v32, 7  ;;  %v2537_v1 = vadd.f32 %v5156_v30, %v6262_v60 }
 0x1a9   : > { %v6403_v13 = vadd.f32 %v2608_v41, %v6161_v33  ;;  %v2444_v27 = vpop.f32.mrf.mxu1  ;;  %v6405_v3 = vpop.f32.mrf.mxu0 }
 0x1aa   : > { %v2609_v0 = vsel %vm2587_vm0, %v2564_v37, %v2565_v11  ;;  %v2610_v48 = vsel %vm2587_vm0, %v2563_v9, %v2564_v37  ;;  %v2535_v34 = vadd.f32 %v2444_v27, %v6264_v54  ;;  %v2569_v9 = vrot.slane %v2537_v1, 7 }
 0x1ab   : > { %v2634_v28 = vsel %vm1844_vm1, %v2609_v0, 0.0  ;;  %v6415_v16 = vadd.f32 %v2610_v48, %v6166_v47  ;;  %v5157_v60 = vpop.f32.mrf.mxu1  ;;  %v6417_v33 = vpop.f32.mrf.mxu0 }
 0x1ac   : > { %v6420_v32 = vadd.f32 %v2634_v28, %v6154_v22  ;;  %v2567_v15 = vrot.slane %v2535_v34, 7  ;;  %v2538_v11 = vadd.f32 %v5157_v60, %v6266_v8 }
 0x1ad   : > { %v2447_v30 = vpop.f32.mrf.mxu1  ;;  %v6423_v41 = vpop.f32.mrf.mxu0 }
 0x1ae   : > { %v2607_v54 = vsel %vm2587_vm0, %v2566_v6, %v2567_v15  ;;  %v2570_v37 = vrot.slane %v2538_v11, 7  ;;  %v2536_v47 = vadd.f32 %v2447_v30, %v6268_v20 }
 0x1af   : > { %v2636_v27 = vsel %vm1844_vm1, %v2607_v54, 0.0  ;;  %v5160_v0 = vpop.f32.mrf.mxu1  ;;  %v6430_v48 = vpop.f32.mrf.mxu0 }
 0x1b0   : > { %v6433_v22 = vadd.f32 %v2636_v27, %v6173_v26  ;;  %v2604_v8 = vsel %vm2587_vm0, %v2569_v9, %v2570_v37  ;;  %v2568_v34 = vrot.slane %v2536_v47, 7  ;;  %v2541_v1 = vadd.f32 %v5160_v0, %v6270_v25 }
 0x1b1   : > { %v6439_v6 = vadd.f32 %v2604_v8, %v6177_v24  ;;  %v2460_v28 = vpop.f32.mrf.mxu1  ;;  %v6441_v20 = vpop.f32.mrf.mxu0 }
 0x1b2   : > { %v2605_v60 = vsel %vm2587_vm0, %v2568_v34, %v2569_v9  ;;  %v2606_v11 = vsel %vm2587_vm0, %v2567_v15, %v2568_v34  ;;  %v2539_v26 = vadd.f32 %v2460_v28, %v6272_v46  ;;  %v2573_v15 = vrot.slane %v2541_v1, 7 }
 0x1b3   : > { %v2638_v30 = vsel %vm1844_vm1, %v2605_v60, 0.0  ;;  %v6451_v54 = vadd.f32 %v2606_v11, %v6182_v18  ;;  %v5161_v25 = vpop.f32.mrf.mxu1  ;;  %v6453_v24 = vpop.f32.mrf.mxu0 }
 0x1b4   : > { %v6456_v47 = vadd.f32 %v2638_v30, %v6170_v39  ;;  %v2571_v27 = vrot.slane %v2539_v26, 7  ;;  %v2542_v9 = vadd.f32 %v5161_v25, %v6274_v12 }
 0x1b5   : > { %v2463_v0 = vpop.f32.mrf.mxu1  ;;  %v6459_v8 = vpop.f32.mrf.mxu0 }
 0x1b6   : > { %v2603_v46 = vsel %vm2587_vm0, %v2570_v37, %v2571_v27  ;;  %v2574_v34 = vrot.slane %v2542_v9, 7  ;;  %v2540_v18 = vadd.f32 %v2463_v0, %v6276_v61 }
 0x1b7   : > { %v2640_v28 = vsel %vm1844_vm1, %v2603_v46, 0.0  ;;  %v5164_v60 = vpop.f32.mrf.mxu1  ;;  %v6466_v11 = vpop.f32.mrf.mxu0 }
 0x1b8   : > { %v6469_v39 = vadd.f32 %v2640_v28, %v6189_v52  ;;  %v2600_v12 = vsel %vm2587_vm0, %v2573_v15, %v2574_v34  ;;  %v2572_v26 = vrot.slane %v2540_v18, 7  ;;  %v2545_v1 = vadd.f32 %v5164_v60, %v6278_v57 }
 0x1b9   : > { %v6475_v37 = vadd.f32 %v2600_v12, %v6193_v42  ;;  %v2476_v30 = vpop.f32.mrf.mxu1  ;;  %v6477_v61 = vpop.f32.mrf.mxu0 }
 0x1ba   : > { %v2601_v25 = vsel %vm2587_vm0, %v2572_v26, %v2573_v15  ;;  %v2602_v9 = vsel %vm2587_vm0, %v2571_v27, %v2572_v26  ;;  %v2543_v52 = vadd.f32 %v2476_v30, %v6280_v55  ;;  %v2577_v27 = vrot.slane %v2545_v1, 7 }
 0x1bb   : > { %v2642_v0 = vsel %vm1844_vm1, %v2601_v25, 0.0  ;;  %v6487_v46 = vadd.f32 %v2602_v9, %v6197_v29  ;;  %v5165_v57 = vpop.f32.mrf.mxu1  ;;  %v6489_v42 = vpop.f32.mrf.mxu0 }
 0x1bc   : > { %v6492_v18 = vadd.f32 %v2642_v0, %v6186_v17  ;;  %v2575_v28 = vrot.slane %v2543_v52, 7  ;;  %v2546_v15 = vadd.f32 %v5165_v57, %v6282_v62 }
 0x1bd   : > { %v2479_v60 = vpop.f32.mrf.mxu1  ;;  %v6495_v12 = vpop.f32.mrf.mxu0 }
 0x1be   : > { %v2599_v55 = vsel %vm2587_vm0, %v2574_v34, %v2575_v28  ;;  %v2578_v26 = vrot.slane %v2546_v15, 7  ;;  %v2544_v29 = vadd.f32 %v2479_v60, %v6284_v59 }
 0x1bf   : > { %v2644_v30 = vsel %vm1844_vm1, %v2599_v55, 0.0  ;;  %v5168_v25 = vpop.f32.mrf.mxu1  ;;  %v6502_v9 = vpop.f32.mrf.mxu0 }
 0x1c0   : > { %6865 = vst [vmem:[#allocation24_spill] sm:$0xff] %v6502_v9  ;;  %v6505_v17 = vadd.f32 %v2644_v30, %v6203_v35  ;;  %v2596_v62 = vsel %vm2587_vm0, %v2577_v27, %v2578_v26  ;;  %v2576_v52 = vrot.slane %v2544_v29, 7  ;;  %v2549_v1 = vadd.f32 %v5168_v25, %v6286_v14  ;;  %v6869_v35 = vld [vmem:[#allocation14_spill] sm:$0xff]  ;;  %v6870_v29 = vld [vmem:[#allocation8_spill] sm:$0xff]  ;;  %v6873_v25 = vld [vmem:[#allocation7_spill] sm:$0xff] }
 0x1c1   : > { %v6511_v34 = vadd.f32 %v2596_v62, %v6207_v23  ;;  %v2492_v0 = vpop.f32.mrf.mxu1  ;;  %v6513_v59 = vpop.f32.mrf.mxu0 }
 0x1c2   : > { %6866 = vst [vmem:[#allocation25_spill] sm:$0xff] %v6505_v17  ;;  %6868 = vst [vmem:[#allocation27_spill] sm:$0xff] %v6513_v59  ;;  %v2597_v57 = vsel %vm2587_vm0, %v2576_v52, %v2577_v27  ;;  %v2598_v15 = vsel %vm2587_vm0, %v2575_v28, %v2576_v52  ;;  %v2547_v60 = vadd.f32 %v2492_v0, %v6869_v35  ;;  %v2581_v28 = vrot.slane %v2549_v1, 7  ;;  %v6879_v1 = vld [vmem:[#allocation15_spill] sm:$0xff] }
 0x1c3   : > { %6867 = vst [vmem:[#allocation26_spill] sm:$0xff] %v6511_v34  ;;  %v2646_v55 = vsel %vm1844_vm1, %v2597_v57, 0.0  ;;  %v6523_v30 = vadd.f32 %v2598_v15, %v6870_v29  ;;  %v5169_v14 = vpop.f32.mrf.mxu1  ;;  %v6525_v23 = vpop.f32.mrf.mxu0 }
 0x1c4   : > { %6872 = vst [vmem:[#allocation8_spill] sm:$0xff] %v6525_v23  ;;  %v6528_v62 = vadd.f32 %v2646_v55, %v6873_v25  ;;  %v2579_v34 = vrot.slane %v2547_v60, 7  ;;  %v2550_v27 = vadd.f32 %v5169_v14, %v6290_v53  ;;  %v6877_v55 = vld [vmem:[#allocation10_spill] sm:$0xff]  ;;  %v6603_v23 = vadd.s32 8, %v6307_v31 }
 0x1c5   : > { %6871 = vst [vmem:[#allocation14_spill] sm:$0xff] %v6523_v30  ;;  %v2495_v59 = vpop.f32.mrf.mxu1  ;;  %v6531_v9 = vpop.f32.mrf.mxu0 }
 0x1c6   : > { %6874 = vst [vmem:[#allocation7_spill] sm:$0xff] %v6528_v62  ;;  %6875 = vst [vmem:[#allocation28_spill] sm:$0xff] %v6531_v9  ;;  %v2595_v52 = vsel %vm2587_vm0, %v2578_v26, %v2579_v34  ;;  %v2582_v0 = vrot.slane %v2550_v27, 7  ;;  %v2548_v57 = vadd.f32 %v2495_v59, %v6292_v5  ;;  %v6880_v9 = vld [vmem:[#allocation11_spill] sm:$0xff]  ;;  %vm2689_vm3 = vcmp.ne.s32.totalorder %v6603_v23, 15 }
 0x1c7   : > { %v2648_v15 = vsel %vm1844_vm1, %v2595_v52, 0.0  ;;  %v5172_v35 = vpop.f32.mrf.mxu1  ;;  %v6538_v29 = vpop.f32.mrf.mxu0 }
 0x1c8   : > { %6876 = vst [vmem:[#allocation29_spill] sm:$0xff] %v6538_v29  ;;  %v6541_v60 = vadd.f32 %v2648_v15, %v6877_v55  ;;  %v2592_v53 = vsel %vm2587_vm0, %v2581_v28, %v2582_v0  ;;  %v2580_v14 = vrot.slane %v2548_v57, 7  ;;  %v2553_v25 = vadd.f32 %v5172_v35, %v6879_v1  ;;  %v6883_v57 = vld [vmem:[#allocation12_spill] sm:$0xff] }
 0x1c9   : > { %v6547_v26 = vadd.f32 %v2592_v53, %v6880_v9  ;;  %v2508_v27 = vpop.f32.mrf.mxu1  ;;  %v6549_v5 = vpop.f32.mrf.mxu0  ;;  %v6886_v53 = vld [vmem:[#allocation9_spill] sm:$0xff] }
 0x1ca   : > { %6878 = vst [vmem:[#allocation10_spill] sm:$0xff] %v6541_v60  ;;  %6882 = vst [vmem:[#allocation11_spill] sm:$0xff] %v6549_v5  ;;  %v2593_v59 = vsel %vm2587_vm0, %v2580_v14, %v2581_v28  ;;  %v2594_v52 = vsel %vm2587_vm0, %v2579_v34, %v2580_v14  ;;  %v2551_v15 = vadd.f32 %v2508_v27, %v6296_v2  ;;  %v2585_v34 = vrot.slane %v2553_v25, 7 }
 0x1cb   : > { %6881 = vst [vmem:[#allocation15_spill] sm:$0xff] %v6547_v26  ;;  %v2650_v55 = vsel %vm1844_vm1, %v2593_v59, 0.0  ;;  %v6559_v60 = vadd.f32 %v2594_v52, %v6883_v57  ;;  %v5173_v35 = vpop.f32.mrf.mxu1  ;;  %v6561_v9 = vpop.f32.mrf.mxu0 }
 0x1cc   : > { %6885 = vst [vmem:[#allocation30_spill] sm:$0xff] %v6561_v9  ;;  %v6564_v1 = vadd.f32 %v2650_v55, %v6886_v53  ;;  %v2583_v26 = vrot.slane %v2551_v15, 7  ;;  %v2554_v28 = vadd.f32 %v5173_v35, %v6298_v63  ;;  %v6888_v9 = vld [vmem:[#allocation3_spill] sm:$0xff]  ;;  %v6890_v15 = vrot.slane %v6312_v58, 7  ;;  %v6893_v53 = vld [vmem:[#allocation16_spill] sm:$0xff] }
 0x1cd   : > { %6884 = vst [vmem:[#allocation12_spill] sm:$0xff] %v6559_v60  ;;  %v2511_v5 = vpop.f32.mrf.mxu1  ;;  %v5288_v29 = vpop.f32.mrf.mxu0 }
 0x1ce   : > { %6887 = vst [vmem:[#allocation9_spill] sm:$0xff] %v6564_v1  ;;  %v2591_v2 = vsel %vm2587_vm0, %v2582_v0, %v2583_v26  ;;  %v2586_v14 = vrot.slane %v2554_v28, 7  ;;  %v2552_v27 = vadd.f32 %v2511_v5, %v6302_v36  ;;  %v6891_v5 = vld [vmem:[#allocation4_spill] sm:$0xff] }
 0x1cf   : > { %v2652_v59 = vsel %vm1844_vm1, %v2591_v2, 0.0  ;;  %v5240_v52 = vpop.f32.mrf.mxu1  ;;  %v3241_v57 = vpop.f32.mrf.mxu0 }
 0x1d0   : > { %v6573_v55 = vadd.f32 %v2652_v59, %v6888_v9  ;;  %v2588_v63 = vsel %vm2587_vm0, %v2585_v34, %v2586_v14  ;;  %v2619_v25 = vsel %vm2587_vm0, %v2586_v14, %v6890_v15  ;;  %v2584_v0 = vrot.slane %v2552_v27, 7  ;;  %v6894_v59 = vld [vmem:[#allocation6_spill] sm:$0xff]  ;;  %v6895_v14 = vld [vmem:[#allocation17_spill] sm:$0xff] }
 0x1d1   : > { %v2624_v36 = vsel %vm1844_vm1, %v2619_v25, 0.0  ;;  %v6584_v35 = vadd.f32 %v2588_v63, %v6891_v5  ;;  %v3024_v28 = vadd.f32 %v5240_v52, %v6893_v53  ;;  %v3015_v2 = vpop.f32.mrf.mxu1  ;;  %v5289_v9 = vpop.f32.mrf.mxu0  ;;  %v6896_v25 = vld [vmem:[#allocation5_spill] sm:$0xff] }
 0x1d2   : > { %6889 = vst [vmem:[#allocation3_spill] sm:$0xff] %v6573_v55  ;;  %v2656_v55 = vadd.f32 %v2624_v36, %v6894_v59  ;;  %v2589_v1 = vsel %vm2587_vm0, %v2584_v0, %v2585_v34  ;;  %v2590_v58 = vsel %vm2587_vm0, %v2583_v26, %v2584_v0  ;;  %v3016_v27 = vadd.f32 %v3015_v2, %v6895_v14  ;;  %v6898_v53 = vld [vmem:[#allocation13_spill] sm:$0xff]  ;;  %v6900_v59 = vld [vmem:[#allocation18_spill] sm:$0xff] }
 0x1d3   : > { %6892 = vst [vmem:[#allocation4_spill] sm:$0xff] %v6584_v35  ;;  %v2654_v15 = vsel %vm1844_vm1, %v2589_v1, 0.0  ;;  %v6596_v63 = vadd.f32 %v2590_v58, %v6896_v25  ;;  %v5241_v5 = vpop.f32.mrf.mxu1  ;;  %v3244_v52 = vpop.f32.mrf.mxu0  ;;  %v3370_v36 = vadd.f32 %v5288_v29, %v3024_v28  ;;  %v6902_v1 = vld [vmem:[#allocation19_spill] sm:$0xff]  ;;  %v6903_v29 = vld [vmem:[#allocation20_spill] sm:$0xff] }
 0x1d4   : > { %v6599_v35 = vadd.f32 %v2654_v15, %v6898_v53  ;;  %v3027_v60 = vadd.f32 %v5241_v5, %v6900_v59  ;;  %v6605_v0 = vadd.f32 %v3241_v57, %v3016_v27 }
 0x1d5   : > { %6897 = vst [vmem:[#allocation16_spill] sm:$0xff] %v6596_v63  ;;  %v3018_v34 = vpop.f32.mrf.mxu1  ;;  %v5292_v26 = vpop.f32.mrf.mxu0  ;;  %v3402_v63 = vrot.slane %v3370_v36, 1 }
 0x1d6   : > { %6899 = vst [vmem:[#allocation6_spill] sm:$0xff] %v6599_v35  ;;  %6901 = vst [vmem:[#allocation17_spill] sm:$0xff] %v6605_v0  ;;  %v3371_v2 = vadd.f32 %v5289_v9, %v3027_v60  ;;  %v3019_v14 = vadd.f32 %v3018_v34, %v6902_v1  ;;  %v6836_v35 = vrot.slane %v6605_v0, 1  ;;  %v6904_v9 = vld [vmem:[#allocation21_spill] sm:$0xff] }
 0x1d7   : > { %v5244_v58 = vpop.f32.mrf.mxu1  ;;  %v3257_v25 = vpop.f32.mrf.mxu0 }
 0x1d8   : > { %v3403_v15 = vrot.slane %v3371_v2, 1  ;;  %v3369_v53 = vadd.f32 %v3244_v52, %v3019_v14  ;;  %v3040_v28 = vadd.f32 %v5244_v58, %v6903_v29 }
 0x1d9   : > { %v3031_v5 = vpop.f32.mrf.mxu1  ;;  %v5293_v59 = vpop.f32.mrf.mxu0 }
 0x1da   : > { %v3461_v60 = vsel %vm3432_vm2, %v3402_v63, %v3403_v15  ;;  %v3401_v57 = vrot.slane %v3369_v53, 1  ;;  %v3032_v27 = vadd.f32 %v3031_v5, %v6904_v9  ;;  %v3374_v36 = vadd.f32 %v5292_v26, %v3040_v28  ;;  %v6905_v5 = vld [vmem:[#allocation23_spill] sm:$0xff] }
 0x1db   : > { %v3503_v34 = vadd.f32 %v3461_v60, %v6348_v10  ;;  %v5245_v2 = vpop.f32.mrf.mxu1  ;;  %v3260_v52 = vpop.f32.mrf.mxu0 }
 0x1dc   : > { %v3462_v1 = vsel %vm3432_vm2, %v3401_v57, %v3402_v63  ;;  %v3463_v14 = vsel %vm3432_vm2, %v6836_v35, %v3401_v57  ;;  %v3372_v58 = vadd.f32 %v3257_v25, %v3032_v27  ;;  %v3043_v9 = vadd.f32 %v5245_v2, %v6905_v5 }
 0x1dd   : > { %v3470_v53 = vsel %vm2689_vm3, %v3462_v1, 0.0  ;;  %v3501_v29 = vadd.f32 %v3463_v14, %v2656_v55  ;;  %v3034_v10 = vpop.f32.mrf.mxu1  ;;  %v5296_v60 = vpop.f32.mrf.mxu0  ;;  %v3732_v63 = vmul.f32 %v3503_v34, %v3503_v34  ;;  %v3406_v57 = vrot.slane %v3374_v36, 1 }
 0x1de   : > { %v3502_v26 = vadd.f32 %v3470_v53, %v6343_v40  ;;  %v3404_v28 = vrot.slane %v3372_v58, 1  ;;  %v3035_v30 = vadd.f32 %v3034_v10, %v6345_v49  ;;  %v3375_v55 = vadd.f32 %v5293_v59, %v3043_v9  ;;  %v6906_v9 = vld [vmem:[#allocation22_spill] sm:$0xff] }
 0x1df   : > { %v3730_v25 = vmul.f32 %v3501_v29, %v3501_v29  ;;  %v5248_v27 = vpop.f32.mrf.mxu1  ;;  %v3273_v2 = vpop.f32.mrf.mxu0 }
 0x1e0   : > { %v4547_v1 = vpack.c.bf16 %v3502_v26, %v3501_v29  ;;  %v3693_v14 = vadd.f32 %v3502_v26, %v3501_v29  ;;  %v3731_v5 = vmul.f32 %v3502_v26, %v3502_v26  ;;  %v3460_v40 = vsel %vm3432_vm2, %v3403_v15, %v3404_v28 }
 0x1e1   : > { %v3472_v49 = vsel %vm2689_vm3, %v3460_v40, 0.0  ;;  %v3407_v58 = vrot.slane %v3375_v55, 1  ;;  %v3373_v53 = vadd.f32 %v3260_v52, %v3035_v30  ;;  %v3056_v10 = vadd.f32 %v5248_v27, %v6351_v7  ;;  %v3047_v35 = vpop.f32.mrf.mxu1  ;;  %v5297_v0 = vpop.f32.mrf.mxu0 }
 0x1e2   : > { %4548 = vst [vmem:[%s6632_s18] sm:$0xff] %v4547_v1   ;;  %v3694_v36 = vadd.f32 %v3693_v14, %v3503_v34  ;;  %v3762_v59 = vadd.f32 %v3731_v5, %v3730_v25  ;;  %v3504_v17 = vadd.f32 %v3472_v49, %v6906_v9  ;;  %v3048_v29 = vadd.f32 %v3047_v35, %v6358_v19 }
 0x1e3   : > { %v3457_v15 = vsel %vm3432_vm2, %v3406_v57, %v3407_v58  ;;  %v3405_v26 = vrot.slane %v3373_v53, 1  ;;  %v3378_v62 = vadd.f32 %v5296_v60, %v3056_v10  ;;  %v5249_v40 = vpop.f32.mrf.mxu1  ;;  %v3276_v55 = vpop.f32.mrf.mxu0 }
 0x1e4   : > { %v3763_v30 = vadd.f32 %v3762_v59, %v3732_v63  ;;  %v4552_v52 = vpack.c.bf16 %v3504_v17, %v3503_v34  ;;  %v3695_v7 = vadd.f32 %v3694_v36, %v3504_v17  ;;  %v3733_v27 = vmul.f32 %v3504_v17, %v3504_v17 }
 0x1e5   : > { %v3507_v1 = vadd.f32 %v3457_v15, %v6384_v21  ;;  %v3458_v25 = vsel %vm3432_vm2, %v3405_v26, %v3406_v57  ;;  %v3459_v19 = vsel %vm3432_vm2, %v3404_v28, %v3405_v26  ;;  %v3410_v35 = vrot.slane %v3378_v62, 1  ;;  %v3050_v14 = vpop.f32.mrf.mxu1  ;;  %v5300_v5 = vpop.f32.mrf.mxu0 }
 0x1e6   : > { %4655 = vst [vmem:[%s6632_s18 + $0x8] sm:$0xff] %v4552_v52   ;;  %v3764_v49 = vadd.f32 %v3763_v30, %v3733_v27  ;;  %v3474_v60 = vsel %vm2689_vm3, %v3458_v25, 0.0  ;;  %v3505_v34 = vadd.f32 %v3459_v19, %v6361_v38  ;;  %v3376_v63 = vadd.f32 %v3273_v2, %v3048_v29 }
 0x1e7   : > { %v3736_v17 = vmul.f32 %v3507_v1, %v3507_v1  ;;  %v3506_v21 = vadd.f32 %v3474_v60, %v6379_v44  ;;  %v3059_v53 = vadd.f32 %v5249_v40, %v6369_v4  ;;  %v3051_v57 = vadd.f32 %v3050_v14, %v6381_v43  ;;  %v5252_v10 = vpop.f32.mrf.mxu1  ;;  %v3289_v62 = vpop.f32.mrf.mxu0 }
 0x1e8   : > { %v3696_v28 = vadd.f32 %v3695_v7, %v3505_v34  ;;  %v3734_v36 = vmul.f32 %v3505_v34, %v3505_v34  ;;  %v3408_v59 = vrot.slane %v3376_v63, 1  ;;  %v3072_v9 = vadd.f32 %v5252_v10, %v6387_v51 }
 0x1e9   : > { %v4557_v15 = vpack.c.bf16 %v3506_v21, %v3505_v34  ;;  %v3735_v26 = vmul.f32 %v3506_v21, %v3506_v21  ;;  %v3379_v30 = vadd.f32 %v5297_v0, %v3059_v53  ;;  %v3377_v38 = vadd.f32 %v3276_v55, %v3051_v57  ;;  %v3063_v2 = vpop.f32.mrf.mxu1  ;;  %v5301_v29 = vpop.f32.mrf.mxu0 }
 0x1ea   : > { %v3697_v52 = vadd.f32 %v3696_v28, %v3506_v21  ;;  %v3765_v44 = vadd.f32 %v3764_v49, %v3734_v36  ;;  %v3456_v4 = vsel %vm3432_vm2, %v3407_v58, %v3408_v59  ;;  %v6659_v43 = vadd.f32 %v5300_v5, %v3072_v9 }
 0x1eb   : > { %4656 = vst [vmem:[%s6632_s18 + $0x10] sm:$0xff] %v4557_v15   ;;  %v3476_v40 = vsel %vm2689_vm3, %v3456_v4, 0.0  ;;  %v3411_v7 = vrot.slane %v3379_v30, 1  ;;  %v3409_v27 = vrot.slane %v3377_v38, 1  ;;  %v3064_v51 = vadd.f32 %v3063_v2, %v6394_v45  ;;  %v5253_v25 = vpop.f32.mrf.mxu1  ;;  %v3292_v0 = vpop.f32.mrf.mxu0 }
 0x1ec   : > { %v3766_v55 = vadd.f32 %v3765_v44, %v3735_v26  ;;  %v3508_v19 = vadd.f32 %v3476_v40, %v6367_v50  ;;  %v3698_v14 = vadd.f32 %v3697_v52, %v3507_v1  ;;  %v3414_v49 = vrot.slane %v6659_v43, 1 }
 0x1ed   : > { %v3453_v58 = vsel %vm3432_vm2, %v3410_v35, %v3411_v7  ;;  %v3454_v5 = vsel %vm3432_vm2, %v3409_v27, %v3410_v35  ;;  %v3455_v60 = vsel %vm3432_vm2, %v3408_v59, %v3409_v27  ;;  %v3380_v34 = vadd.f32 %v3289_v62, %v3064_v51  ;;  %v3066_v45 = vpop.f32.mrf.mxu1  ;;  %v5304_v63 = vpop.f32.mrf.mxu0 }
 0x1ee   : > { %v4562_v21 = vpack.c.bf16 %v3508_v19, %v3507_v1  ;;  %v3699_v53 = vadd.f32 %v3698_v14, %v3508_v19  ;;  %v3737_v57 = vmul.f32 %v3508_v19, %v3508_v19  ;;  %v3767_v50 = vadd.f32 %v3766_v55, %v3736_v17 }
 0x1ef   : > { %v3511_v10 = vadd.f32 %v3453_v58, %v6420_v32  ;;  %v3478_v28 = vsel %vm2689_vm3, %v3454_v5, 0.0  ;;  %v3509_v36 = vadd.f32 %v3455_v60, %v6397_v56  ;;  %v3412_v9 = vrot.slane %v3380_v34, 1  ;;  %v5256_v15 = vpop.f32.mrf.mxu1  ;;  %v3305_v35 = vpop.f32.mrf.mxu0 }
 0x1f0   : > { %4657 = vst [vmem:[%s6632_s18 + $0x18] sm:$0xff] %v4562_v21   ;;  %v3768_v26 = vadd.f32 %v3767_v50, %v3737_v57  ;;  %v3510_v62 = vadd.f32 %v3478_v28, %v6415_v16  ;;  %v3075_v59 = vadd.f32 %v5253_v25, %v6405_v3  ;;  %v3067_v1 = vadd.f32 %v3066_v45, %v6417_v33 }
 0x1f1   : > { %v3740_v30 = vmul.f32 %v3511_v10, %v3511_v10  ;;  %v3700_v17 = vadd.f32 %v3699_v53, %v3509_v36  ;;  %v3738_v32 = vmul.f32 %v3509_v36, %v3509_v36  ;;  %v3452_v38 = vsel %vm3432_vm2, %v3411_v7, %v3412_v9  ;;  %v3079_v2 = vpop.f32.mrf.mxu1  ;;  %v5305_v56 = vpop.f32.mrf.mxu0 }
 0x1f2   : > { %v4567_v52 = vpack.c.bf16 %v3510_v62, %v3509_v36  ;;  %v3739_v44 = vmul.f32 %v3510_v62, %v3510_v62  ;;  %v3480_v4 = vsel %vm2689_vm3, %v3452_v38, 0.0  ;;  %v3383_v43 = vadd.f32 %v5301_v29, %v3075_v59 }
 0x1f3   : > { %v3701_v16 = vadd.f32 %v3700_v17, %v3510_v62  ;;  %v3769_v40 = vadd.f32 %v3768_v26, %v3738_v32  ;;  %v3512_v3 = vadd.f32 %v3480_v4, %v6403_v13  ;;  %v3381_v33 = vadd.f32 %v3292_v0, %v3067_v1  ;;  %v5257_v27 = vpop.f32.mrf.mxu1  ;;  %v3308_v51 = vpop.f32.mrf.mxu0 }
 0x1f4   : > { %4658 = vst [vmem:[%s6632_s18 + $0x20] sm:$0xff] %v4567_v52   ;;  %v3415_v25 = vrot.slane %v3383_v43, 1  ;;  %v3088_v7 = vadd.f32 %v5256_v15, %v6423_v41  ;;  %v3080_v55 = vadd.f32 %v3079_v2, %v6430_v48  ;;  %v3091_v19 = vadd.f32 %v5257_v27, %v6441_v20 }
 0x1f5   : > { %v3770_v14 = vadd.f32 %v3769_v40, %v3739_v44  ;;  %v4572_v58 = vpack.c.bf16 %v3512_v3, %v3511_v10  ;;  %v3702_v5 = vadd.f32 %v3701_v16, %v3511_v10  ;;  %v3741_v29 = vmul.f32 %v3512_v3, %v3512_v3  ;;  %v3082_v60 = vpop.f32.mrf.mxu1  ;;  %v5308_v34 = vpop.f32.mrf.mxu0 }
 0x1f6   : > { %v3449_v13 = vsel %vm3432_vm2, %v3414_v49, %v3415_v25  ;;  %v3413_v0 = vrot.slane %v3381_v33, 1  ;;  %v3386_v45 = vadd.f32 %v5304_v63, %v3088_v7  ;;  %v3384_v21 = vadd.f32 %v3305_v35, %v3080_v55 }
 0x1f7   : > { %4659 = vst [vmem:[%s6632_s18 + $0x28] sm:$0xff] %v4572_v58   ;;  %v3703_v53 = vadd.f32 %v3702_v5, %v3512_v3  ;;  %v3771_v57 = vadd.f32 %v3770_v14, %v3740_v30  ;;  %v6693_v41 = vadd.f32 %v5305_v56, %v3091_v19  ;;  %v5260_v48 = vpop.f32.mrf.mxu1  ;;  %v3321_v50 = vpop.f32.mrf.mxu0  ;;  %v3515_v20 = vadd.f32 %v3449_v13, %v6456_v47 }
 0x1f8   : > { %v3450_v10 = vsel %vm3432_vm2, %v3413_v0, %v3414_v49  ;;  %v3451_v28 = vsel %vm3432_vm2, %v3412_v9, %v3413_v0  ;;  %v3416_v36 = vrot.slane %v3384_v21, 1  ;;  %v3418_v26 = vrot.slane %v3386_v45, 1 }
 0x1f9   : > { %v3772_v15 = vadd.f32 %v3771_v57, %v3741_v29  ;;  %v3482_v63 = vsel %vm2689_vm3, %v3450_v10, 0.0  ;;  %v3513_v35 = vadd.f32 %v3451_v28, %v6433_v22  ;;  %v3095_v62 = vpop.f32.mrf.mxu1  ;;  %v5309_v59 = vpop.f32.mrf.mxu0  ;;  %v3419_v49 = vrot.slane %v6693_v41, 1 }
 0x1fa   : > { %v3514_v1 = vadd.f32 %v3482_v63, %v6451_v54  ;;  %v3448_v47 = vsel %vm3432_vm2, %v3415_v25, %v3416_v36  ;;  %v3083_v30 = vadd.f32 %v3082_v60, %v6453_v24  ;;  %v3104_v22 = vadd.f32 %v5260_v48, %v6459_v8 }
 0x1fb   : > { %v3704_v9 = vadd.f32 %v3703_v53, %v3513_v35  ;;  %v3742_v17 = vmul.f32 %v3513_v35, %v3513_v35  ;;  %v3484_v32 = vsel %vm2689_vm3, %v3448_v47, 0.0  ;;  %v5261_v38 = vpop.f32.mrf.mxu1  ;;  %v3324_v2 = vpop.f32.mrf.mxu0  ;;  %v3445_v44 = vsel %vm3432_vm2, %v3418_v26, %v3419_v49 }
 0x1fc   : > { %v4577_v56 = vpack.c.bf16 %v3514_v1, %v3513_v35  ;;  %v3743_v52 = vmul.f32 %v3514_v1, %v3514_v1  ;;  %v3516_v54 = vadd.f32 %v3484_v32, %v6439_v6  ;;  %v3744_v4 = vmul.f32 %v3515_v20, %v3515_v20 }
 0x1fd   : > { %v3705_v43 = vadd.f32 %v3704_v9, %v3514_v1  ;;  %v3773_v24 = vadd.f32 %v3772_v15, %v3742_v17  ;;  %v3385_v16 = vadd.f32 %v3308_v51, %v3083_v30  ;;  %v3098_v40 = vpop.f32.mrf.mxu1  ;;  %v5312_v3 = vpop.f32.mrf.mxu0  ;;  %v3519_v8 = vadd.f32 %v3445_v44, %v6492_v18 }
 0x1fe   : > { %4660 = vst [vmem:[%s6632_s18 + $0x30] sm:$0xff] %v4577_v56   ;;  %v4582_v33 = vpack.c.bf16 %v3516_v54, %v3515_v20  ;;  %v3390_v27 = vadd.f32 %v5308_v34, %v3104_v22  ;;  %v3096_v25 = vadd.f32 %v3095_v62, %v6466_v11  ;;  %v3745_v6 = vmul.f32 %v3516_v54, %v3516_v54 }
 0x1ff   : > { %v3774_v7 = vadd.f32 %v3773_v24, %v3743_v52  ;;  %v3706_v55 = vadd.f32 %v3705_v43, %v3515_v20  ;;  %v3417_v19 = vrot.slane %v3385_v16, 1  ;;  %v5264_v14 = vpop.f32.mrf.mxu1  ;;  %v6717_v58 = vpop.f32.mrf.mxu0  ;;  %v3107_v51 = vadd.f32 %v5261_v38, %v6477_v61 }
 0x200   : > { %4661 = vst [vmem:[%s6632_s18 + $0x38] sm:$0xff] %v4582_v33   ;;  %v3422_v5 = vrot.slane %v3390_v27, 1  ;;  %v3388_v29 = vadd.f32 %v3321_v50, %v3096_v25  ;;  %v3099_v60 = vadd.f32 %v3098_v40, %v6489_v42  ;;  %v3120_v50 = vadd.f32 %v5264_v14, %v6495_v12  ;;  %v6909_v27 = vld [vmem:[#allocation14_spill] sm:$0xff]  ;;  %v6912_v14 = vld [vmem:[#allocation8_spill] sm:$0xff] }
 0x201   : > { %v3707_v13 = vadd.f32 %v3706_v55, %v3516_v54  ;;  %v3775_v0 = vadd.f32 %v3774_v7, %v3744_v4  ;;  %v3446_v18 = vsel %vm3432_vm2, %v3417_v19, %v3418_v26  ;;  %v3447_v11 = vsel %vm3432_vm2, %v3416_v36, %v3417_v19  ;;  %v3111_v34 = vpop.f32.mrf.mxu1  ;;  %v5313_v45 = vpop.f32.mrf.mxu0  ;;  %v6908_v4 = vld [vmem:[#allocation25_spill] sm:$0xff]  ;;  %v6910_v7 = vld [vmem:[#allocation24_spill] sm:$0xff] }
 0x202   : > { %v3486_v21 = vsel %vm2689_vm3, %v3446_v18, 0.0  ;;  %v3517_v53 = vadd.f32 %v3447_v11, %v6469_v39  ;;  %v3420_v57 = vrot.slane %v3388_v29, 1  ;;  %v6729_v41 = vadd.f32 %v5309_v59, %v3107_v51  ;;  %v6913_v29 = vld [vmem:[#allocation28_spill] sm:$0xff] }
 0x203   : > { %v3776_v61 = vadd.f32 %v3775_v0, %v3745_v6  ;;  %v3518_v42 = vadd.f32 %v3486_v21, %v6487_v46  ;;  %v3389_v48 = vadd.f32 %v3324_v2, %v3099_v60  ;;  %v5265_v20 = vpop.f32.mrf.mxu1  ;;  %v3340_v10 = vpop.f32.mrf.mxu0  ;;  %v3748_v30 = vmul.f32 %v3519_v8, %v3519_v8  ;;  %v6911_v6 = vld [vmem:[#allocation27_spill] sm:$0xff] }
 0x204   : > { %v3708_v28 = vadd.f32 %v3707_v13, %v3517_v53  ;;  %v3746_v36 = vmul.f32 %v3517_v53, %v3517_v53  ;;  %v3444_v15 = vsel %vm3432_vm2, %v3419_v49, %v3420_v57  ;;  %v3423_v63 = vrot.slane %v6729_v41, 1  ;;  %v6907_v49 = vld [vmem:[#allocation7_spill] sm:$0xff] }
 0x205   : > { %v4587_v39 = vpack.c.bf16 %v3518_v42, %v3517_v53  ;;  %v3747_v35 = vmul.f32 %v3518_v42, %v3518_v42  ;;  %v3488_v26 = vsel %vm2689_vm3, %v3444_v15, 0.0  ;;  %v3421_v62 = vrot.slane %v3389_v48, 1  ;;  %v3114_v46 = vpop.f32.mrf.mxu1  ;;  %v5316_v38 = vpop.f32.mrf.mxu0 }
 0x206   : > { %v3709_v59 = vadd.f32 %v3708_v28, %v3518_v42  ;;  %v3777_v1 = vadd.f32 %v3776_v61, %v3746_v36  ;;  %v3520_v12 = vadd.f32 %v3488_v26, %v6475_v37  ;;  %v3441_v47 = vsel %vm3432_vm2, %v3422_v5, %v3423_v63  ;;  %v6914_v42 = vld [vmem:[#allocation29_spill] sm:$0xff] }
 0x207   : > { %4662 = vst [vmem:[%s6632_s18 + $0x40] sm:$0xff] %v4587_v39   ;;  %v6743_v9 = vadd.f32 %v3441_v47, %v6907_v49  ;;  %v3442_v17 = vsel %vm3432_vm2, %v3421_v62, %v3422_v5  ;;  %v3443_v32 = vsel %vm3432_vm2, %v3420_v57, %v3421_v62  ;;  %v5268_v22 = vpop.f32.mrf.mxu1  ;;  %v3394_v24 = vadd.f32 %v5312_v3, %v3120_v50  ;;  %v3353_v60 = vpop.f32.mrf.mxu0  ;;  %v6915_v50 = vld [vmem:[#allocation11_spill] sm:$0xff] }
 0x208   : > { %v3778_v2 = vadd.f32 %v3777_v1, %v3747_v35  ;;  %v4592_v56 = vpack.c.bf16 %v3520_v12, %v3519_v8  ;;  %v3710_v37 = vadd.f32 %v3709_v59, %v3519_v8  ;;  %v3749_v52 = vmul.f32 %v3520_v12, %v3520_v12 }
 0x209   : > { %v3752_v54 = vmul.f32 %v6743_v9, %v6743_v9  ;;  %v3490_v44 = vsel %vm2689_vm3, %v3442_v17, 0.0  ;;  %v3521_v43 = vadd.f32 %v3443_v32, %v6908_v4  ;;  %v3127_v16 = vpop.f32.mrf.mxu1  ;;  %v3112_v55 = vadd.f32 %v3111_v34, %v6910_v7  ;;  %v5317_v35 = vpop.f32.mrf.mxu0  ;;  %v6916_v17 = vld [vmem:[#allocation26_spill] sm:$0xff] }
 0x20a   : > { %4663 = vst [vmem:[%s6632_s18 + $0x48] sm:$0xff] %v4592_v56   ;;  %v3711_v40 = vadd.f32 %v3710_v37, %v3520_v12  ;;  %v3779_v33 = vadd.f32 %v3778_v2, %v3748_v30  ;;  %v3522_v25 = vadd.f32 %v3490_v44, %v6909_v27  ;;  %v3123_v19 = vadd.f32 %v5265_v20, %v6911_v6  ;;  %v6919_v37 = vld [vmem:[#allocation9_spill] sm:$0xff] }
 0x20b   : > { %v3750_v8 = vmul.f32 %v3521_v43, %v3521_v43  ;;  %v3115_v5 = vadd.f32 %v3114_v46, %v6912_v14  ;;  %v3136_v51 = vadd.f32 %v5268_v22, %v6913_v29  ;;  %v5269_v13 = vpop.f32.mrf.mxu1  ;;  %v3426_v21 = vrot.slane %v3394_v24, 1  ;;  %v6921_v14 = vld [vmem:[#allocation17_spill] sm:$0xff]  ;;  %v3356_v29 = vpop.f32.mrf.mxu0 }
 0x20c   : > { %v3780_v0 = vadd.f32 %v3779_v33, %v3749_v52  ;;  %v4597_v3 = vpack.c.bf16 %v3522_v25, %v3521_v43  ;;  %v3712_v18 = vadd.f32 %v3711_v40, %v3521_v43  ;;  %v3751_v11 = vmul.f32 %v3522_v25, %v3522_v25  ;;  %v6920_v43 = vld [vmem:[#allocation30_spill] sm:$0xff] }
 0x20d   : > { %v3392_v53 = vadd.f32 %v6717_v58, %v3112_v55  ;;  %v3395_v57 = vadd.f32 %v5313_v45, %v3123_v19  ;;  %v3393_v41 = vadd.f32 %v3340_v10, %v3115_v5  ;;  %v3128_v48 = vadd.f32 %v3127_v16, %v6914_v42  ;;  %v3130_v12 = vpop.f32.mrf.mxu1 }
 0x20e   : > { %4664 = vst [vmem:[%s6632_s18 + $0x50] sm:$0xff] %v4597_v3   ;;  %v3713_v34 = vadd.f32 %v3712_v18, %v3522_v25  ;;  %v3781_v61 = vadd.f32 %v3780_v0, %v3750_v8  ;;  %v3139_v20 = vadd.f32 %v5269_v13, %v6915_v50  ;;  %v3398_v39 = vadd.f32 %v5316_v38, %v3136_v51  ;;  %v6918_v38 = vld [vmem:[#allocation12_spill] sm:$0xff]  ;;  %v6923_v51 = vld [vmem:[#allocation15_spill] sm:$0xff]  ;;  %v6924_v0 = vld [vmem:[#allocation6_spill] sm:$0xff] }
 0x20f   : > { %v3424_v28 = vrot.slane %v3392_v53, 1  ;;  %v3427_v36 = vrot.slane %v3395_v57, 1  ;;  %v3425_v15 = vrot.slane %v3393_v41, 1  ;;  %v3396_v46 = vadd.f32 %v3353_v60, %v3128_v48  ;;  %v6925_v53 = vld [vmem:[#allocation4_spill] sm:$0xff] }
 0x210   : > { %v3782_v26 = vadd.f32 %v3781_v61, %v3751_v11  ;;  %v3714_v62 = vadd.f32 %v3713_v34, %v6743_v9  ;;  %v3399_v59 = vadd.f32 %v5317_v35, %v3139_v20  ;;  %v3430_v44 = vrot.slane %v3398_v39, 1 }
 0x211   : > { %v3440_v58 = vsel %vm3432_vm2, %v3423_v63, %v3424_v28  ;;  %v3437_v45 = vsel %vm3432_vm2, %v3426_v21, %v3427_v36  ;;  %v3438_v10 = vsel %vm3432_vm2, %v3425_v15, %v3426_v21  ;;  %v3439_v1 = vsel %vm3432_vm2, %v3424_v28, %v3425_v15  ;;  %v6917_v63 = vld [vmem:[#allocation10_spill] sm:$0xff] }
 0x212   : > { %v3492_v47 = vsel %vm2689_vm3, %v3440_v58, 0.0  ;;  %v3783_v30 = vadd.f32 %v3782_v26, %v3752_v54  ;;  %v3494_v49 = vsel %vm2689_vm3, %v3438_v10, 0.0  ;;  %v3525_v22 = vadd.f32 %v3439_v1, %v6917_v63  ;;  %v6926_v26 = vld [vmem:[#allocation3_spill] sm:$0xff] }
 0x213   : > { %v3524_v32 = vadd.f32 %v3492_v47, %v6916_v17  ;;  %v3526_v2 = vadd.f32 %v3494_v49, %v6918_v38  ;;  %v3428_v56 = vrot.slane %v3396_v46, 1  ;;  %v3527_v52 = vadd.f32 %v3437_v45, %v6919_v37  ;;  %v6927_v46 = vld [vmem:[#allocation16_spill] sm:$0xff] }
 0x214   : > { %v3431_v4 = vrot.slane %v3399_v59, 1  ;;  %v3131_v24 = vadd.f32 %v3130_v12, %v6920_v43  ;;  %v3754_v27 = vmul.f32 %v3525_v22, %v3525_v22 }
 0x215   : > { %v4602_v54 = vpack.c.bf16 %v3524_v32, %v6743_v9  ;;  %v3715_v16 = vadd.f32 %v3714_v62, %v3524_v32  ;;  %v3753_v40 = vmul.f32 %v3524_v32, %v3524_v32  ;;  %v4607_v33 = vpack.c.bf16 %v3526_v2, %v3525_v22 }
 0x216   : > { %v3755_v25 = vmul.f32 %v3526_v2, %v3526_v2  ;;  %v3436_v7 = vsel %vm3432_vm2, %v3427_v36, %v3428_v56  ;;  %v3433_v55 = vsel %vm3432_vm2, %v3430_v44, %v3431_v4  ;;  %v6922_v9 = vrot.slane %v6921_v14, 1 }
 0x217   : > { %4665 = vst [vmem:[%s6632_s18 + $0x58] sm:$0xff] %v4602_v54   ;;  %v3784_v8 = vadd.f32 %v3783_v30, %v3753_v40  ;;  %4666 = vst [vmem:[%s6632_s18 + $0x60] sm:$0xff] %v4607_v33   ;;  %v3716_v6 = vadd.f32 %v3715_v16, %v3525_v22  ;;  %v3496_v19 = vsel %vm2689_vm3, %v3436_v7, 0.0  ;;  %v3531_v3 = vadd.f32 %v3433_v55, %v6924_v0 }
 0x218   : > { %v3464_v5 = vsel %vm3432_vm2, %v3431_v4, %v6922_v9  ;;  %v3528_v60 = vadd.f32 %v3496_v19, %v6923_v51  ;;  %v3397_v18 = vadd.f32 %v3356_v29, %v3131_v24  ;;  %v3756_v41 = vmul.f32 %v3527_v52, %v3527_v52 }
 0x219   : > { %v3500_v13 = vsel %vm2689_vm3, %v3464_v5, 0.0  ;;  %v3717_v11 = vadd.f32 %v3716_v6, %v3526_v2  ;;  %v3785_v21 = vadd.f32 %v3784_v8, %v3754_v27  ;;  %v3760_v31 = vmul.f32 %v3531_v3, %v3531_v3 }
 0x21a   : > { %v3532_v57 = vadd.f32 %v3500_v13, %v6925_v53  ;;  %v4612_v34 = vpack.c.bf16 %v3528_v60, %v3527_v52  ;;  %v3429_v61 = vrot.slane %v3397_v18, 1  ;;  %v3757_v50 = vmul.f32 %v3528_v60, %v3528_v60 }
 0x21b   : > { %v3786_v42 = vadd.f32 %v3785_v21, %v3755_v25  ;;  %v3718_v48 = vadd.f32 %v3717_v11, %v3527_v52 }
 0x21c   : > { %v4622_v20 = vpack.c.bf16 %v3532_v57, %v3531_v3  ;;  %4667 = vst [vmem:[%s6632_s18 + $0x68] sm:$0xff] %v4612_v34   ;;  %v3434_v28 = vsel %vm3432_vm2, %v3429_v61, %v3430_v44  ;;  %v3435_v36 = vsel %vm3432_vm2, %v3428_v56, %v3429_v61  ;;  %v3761_v32 = vmul.f32 %v3532_v57, %v3532_v57 }
 0x21d   : > { %v3719_v15 = vadd.f32 %v3718_v48, %v3528_v60  ;;  %v3787_v39 = vadd.f32 %v3786_v42, %v3756_v41  ;;  %v3498_v35 = vsel %vm2689_vm3, %v3434_v28, 0.0  ;;  %v3529_v62 = vadd.f32 %v3435_v36, %v6926_v26 }
 0x21e   : > { %4669 = vst [vmem:[%s6632_s18 + $0x78] sm:$0xff] %v4622_v20   ;;  %v3530_v59 = vadd.f32 %v3498_v35, %v6927_v46 }
 0x21f   : > { %v3788_v58 = vadd.f32 %v3787_v39, %v3757_v50  ;;  %v3720_v45 = vadd.f32 %v3719_v15, %v3529_v62  ;;  %v3758_v10 = vmul.f32 %v3529_v62, %v3529_v62 }
 0x220   : > { %v4617_v1 = vpack.c.bf16 %v3530_v59, %v3529_v62  ;;  %v3759_v12 = vmul.f32 %v3530_v59, %v3530_v59 }
 0x221   : > { %v3721_v47 = vadd.f32 %v3720_v45, %v3530_v59  ;;  %v3789_v30 = vadd.f32 %v3788_v58, %v3758_v10 }
 0x222   : > { %4668 = vst [vmem:[%s6632_s18 + $0x70] sm:$0xff] %v4617_v1  }
 0x223   : > { %v3722_v49 = vadd.f32 %v3721_v47, %v3531_v3  ;;  %v3790_v17 = vadd.f32 %v3789_v30, %v3759_v12 }
 0x225   : > { %v3723_v63 = vadd.f32 %v3722_v49, %v3532_v57  ;;  %v3791_v23 = vadd.f32 %v3790_v17, %v3760_v31 }
 0x227   : > { %v3724_v22 = vrot.slane %v3723_v63, 4  ;;  %v3792_v38 = vadd.f32 %v3791_v23, %v3761_v32 }
 0x229   : > { %v3725_v2 = vadd.f32 %v3724_v22, %v3723_v63  ;;  %v3793_v56 = vrot.slane %v3792_v38, 4 }
 0x22b   : > { %v3726_v37 = vrot.slane %v3725_v2, 2  ;;  %v3794_v52 = vadd.f32 %v3793_v56, %v3792_v38 }
 0x22d   : > { %v3727_v44 = vadd.f32 %v3726_v37, %v3725_v2  ;;  %v3795_v4 = vrot.slane %v3794_v52, 2 }
 0x22f   : > { %v3728_v43 = vrot.slane %v3727_v44, 1  ;;  %v3796_v24 = vadd.f32 %v3795_v4, %v3794_v52 }
 0x231   : > { %v3729_v54 = vadd.f32 %v3728_v43, %v3727_v44  ;;  %v3797_v16 = vrot.slane %v3796_v24, 1 }
 0x233   : > { %v3798_v40 = vadd.f32 %v3797_v16, %v3796_v24  ;;  %3799 = vst [vmem:[%s470_s21] sm:$0xff] %v3729_v54 }
 0x235   : > { %3800 = vst [vmem:[%s476_s23] sm:$0xff] %v3798_v40 }
 0x236 PF: > { %s18_s2 = sadd.s32 1, %s5498_s2   ;;  %s6928_s24 = smov %s5494_s1 }
 0x237   : > { %p15_p5 = scmp.ge.s32.totalorder %s18_s2, 4   ;;  %s6929_s1 = smov %s6931_s25 }
 0x239   :  { %17 = sbr.rel (!%p15_p5) target bundleno = 2 (0x2), region = 124 }

// kernel: decoder_block_forward.5
= control target key start
LH: loop header
LB: loop body
LE: loop exit
PB: predicated region body
PF: predicated region fallthrough
CT: control target
= control target key end

     0   :  { %s6806_s28 = smov 0   ;;  %s6808_s29 = smov 0   ;;  %s8436_s0 = inlined_call_operand.vmem [shape: bf16[2,16,16,128], index: 0, kind: input, shape index: {}, may-alias: {0,1,2}]   ;;  %s8437_s1 = inlined_call_operand.vmem [shape: bf16[2,16,16,128], index: 1, kind: input, shape index: {}, may-alias: {0,1,2}]   ;;  %s8438_s2 = inlined_call_operand.vmem [shape: bf16[2,16,16,128], index: 2, kind: input, shape index: {}, may-alias: {0,1,2}]   ;;  %s8439_s3 = inlined_call_operand.vmem [shape: bf16[2,16,16,128], index: 3, kind: input, shape index: {}, may-alias: {3,4,5}]   ;;  %s8440_s4 = inlined_call_operand.vmem [shape: bf16[2,16,16,128], index: 4, kind: input, shape index: {}, may-alias: {3,4,5}]   ;;  %s8441_s5 = inlined_call_operand.vmem [shape: bf16[2,16,16,128], index: 5, kind: input, shape index: {}, may-alias: {3,4,5}]   ;;  %s8442_s6 = inlined_call_operand.vmem [shape: bf16[3,3,256,128], index: 6, kind: input, shape index: {}]   ;;  %s8443_s7 = inlined_call_operand.vmem [shape: bf16[2,16,16,128], index: 7, kind: output, shape index: {0}]   ;;  %s8444_s8 = inlined_call_operand.vmem [shape: f32[16,128], index: 8, kind: output, shape index: {1}]   ;;  %s8445_s9 = inlined_call_operand.vmem [shape: f32[16,128], index: 9, kind: output, shape index: {2}]  }
   0x1   :  { %s6810_s4 = smov 0  }
   0x2 LB: > { %s32_s5 = sadd.s32 1, %s6749_s29  ;;  %p4773_p0 = scmp.ge.s32.totalorder %s6753_s4, 1  ;;  %s6753_s4 = sphi %s6810_s4, %s20_s4   ;;  %s6749_s29 = sphi %s6808_s29, %s8572_s29   ;;  %s6745_s28 = sphi %s6806_s28, %s8571_s28  }
   0x3   : > { %p34_p1 = scmp.ge.s32.totalorder %s32_s5, 2  ;;  %p464_p2 = scmp.lt.s32.totalorder %s6753_s4, 3 }
   0x5   : > { %s8574_s5 = smov (%p34_p1, %s32_s5), 0  ;;  %p465_p3 = pnand %p4773_p0, %p464_p2 }
   0x7   : > { %468 = sbr.rel (%p465_p3) target bundleno = 844 (0x34c), region = 48 }
   0xc   : > { %v6475_v0 = vld [vmem:[%s8442_s6 + $0x278] sm:$0xff]   ;;  %v6477_v2 = vld [vmem:[%s8442_s6 + $0x270] sm:$0xff]   ;;  %p583_p4 = scmp.lt.s32.totalorder %s6745_s28, 1  ;;  %v6479_v4 = vld [vmem:[%s8442_s6 + $0x268] sm:$0xff]  }
   0xd   : > { %v6476_v1 = vld [vmem:[%s8442_s6 + $0x238] sm:$0xff]   ;;  %5426 = vmatprep.subr.bf16.mxu0 %v6475_v0  ;;  %6434 = vmatprep.subr.bf16.mxu1 %v6475_v0  ;;  %v6478_v3 = vld [vmem:[%s8442_s6 + $0x230] sm:$0xff]   ;;  %v6480_v5 = vld [vmem:[%s8442_s6 + $0x228] sm:$0xff]  }
   0xe   : > { %5427 = vmatpush3.bf16.msra.mxu0 %v6476_v1  ;;  %6442 = vmatpush3.bf16.msra.mxu1 %v6476_v1  ;;  %s8576_s28 = smov (!%p583_p4, %s6745_s28), 1  ;;  %v6481_v6 = vld [vmem:[%s8442_s6 + $0x260] sm:$0xff]   ;;  %v6483_v8 = vld [vmem:[%s8442_s6 + $0x258] sm:$0xff]   ;;  %v6485_v10 = vld [vmem:[%s8442_s6 + $0x250] sm:$0xff]  }
   0xf   : > { %5428 = vmatprep.subr.bf16.mxu0 %v6477_v2  ;;  %6435 = vmatprep.subr.bf16.mxu1 %v6477_v2  ;;  %s6848_s23 = sshll.u32 %s8576_s28, 7  ;;  %v6482_v7 = vld [vmem:[%s8442_s6 + $0x220] sm:$0xff]   ;;  %v6484_v9 = vld [vmem:[%s8442_s6 + $0x218] sm:$0xff]   ;;  %v6486_v19 = vld [vmem:[%s8442_s6 + $0x210] sm:$0xff]  }
  0x10   : > { %s6860_s30 = scalar_lea.vmem %s8436_s0, %s6848_s23  ;;  %s6866_s12 = scalar_lea.vmem %s8439_s3, %s6848_s23  ;;  %v6487_v20 = vld [vmem:[%s8442_s6 + $0x248] sm:$0xff]   ;;  %v6489_v22 = vld [vmem:[%s8442_s6 + $0x240] sm:$0xff]   ;;  %v6497_v32 = vld [vmem:[%s8442_s6 + $0xf8] sm:$0xff]  }
  0x11   : > { %v696_v11 = vld [vmem:[%s6860_s30] sm:$0xf]  ;;  %v697_v12 = vld [vmem:[%s6860_s30 + $0x4] sm:$0xf]  ;;  %v6488_v21 = vld [vmem:[%s8442_s6 + $0x208] sm:$0xff]  }
  0x12   : > { %5429 = vmatpush3.bf16.msra.mxu0 %v6478_v3  ;;  %6443 = vmatpush3.bf16.msra.mxu1 %v6478_v3  ;;  %v760_v13 = vld [vmem:[%s6866_s12] sm:$0xf]  ;;  %728 = vst [vmem:[#allocation2 + $0x10] sm:$0xf] %v696_v11  ;;  %729 = vst [vmem:[#allocation2 + $0x18] sm:$0xf] %v697_v12 }
  0x13   : > { %5430 = vmatprep.subr.bf16.mxu0 %v6479_v4  ;;  %6436 = vmatprep.subr.bf16.mxu1 %v6479_v4  ;;  %v761_v14 = vld [vmem:[%s6866_s12 + $0x4] sm:$0xf]  ;;  %792 = vst [vmem:[#allocation2 + $0x14] sm:$0xf] %v760_v13  ;;  %v712_v15 = vld [vmem:[%s6860_s30 + $0x40] sm:$0xf] }
  0x14   : > { %v713_v16 = vld [vmem:[%s6860_s30 + $0x44] sm:$0xf]  ;;  %793 = vst [vmem:[#allocation2 + $0x1c] sm:$0xf] %v761_v14  ;;  %744 = vst [vmem:[#allocation2 + $0x90] sm:$0xf] %v712_v15 }
  0x15   : > { %745 = vst [vmem:[#allocation2 + $0x98] sm:$0xf] %v713_v16  ;;  %v776_v17 = vld [vmem:[%s6866_s12 + $0x40] sm:$0xf]  ;;  %v777_v18 = vld [vmem:[%s6866_s12 + $0x44] sm:$0xf] }
  0x16   : > { %5431 = vmatpush3.bf16.msra.mxu0 %v6480_v5  ;;  %6444 = vmatpush3.bf16.msra.mxu1 %v6480_v5  ;;  %808 = vst [vmem:[#allocation2 + $0x94] sm:$0xf] %v776_v17  ;;  %809 = vst [vmem:[#allocation2 + $0x9c] sm:$0xf] %v777_v18  ;;  %v698_v23 = vld [vmem:[%s6860_s30 + $0x8] sm:$0xf] }
  0x17   : > { %5432 = vmatprep.subr.bf16.mxu0 %v6481_v6  ;;  %6437 = vmatprep.subr.bf16.mxu1 %v6481_v6  ;;  %v699_v24 = vld [vmem:[%s6860_s30 + $0xc] sm:$0xf]  ;;  %730 = vst [vmem:[#allocation2 + $0x20] sm:$0xf] %v698_v23  ;;  %v762_v25 = vld [vmem:[%s6866_s12 + $0x8] sm:$0xf] }
  0x18   : > { %v763_v26 = vld [vmem:[%s6866_s12 + $0xc] sm:$0xf]  ;;  %731 = vst [vmem:[#allocation2 + $0x28] sm:$0xf] %v699_v24  ;;  %794 = vst [vmem:[#allocation2 + $0x24] sm:$0xf] %v762_v25 }
  0x19   : > { %795 = vst [vmem:[#allocation2 + $0x2c] sm:$0xf] %v763_v26  ;;  %v714_v27 = vld [vmem:[%s6860_s30 + $0x48] sm:$0xf]  ;;  %v715_v28 = vld [vmem:[%s6860_s30 + $0x4c] sm:$0xf] }
  0x1a   : > { %5433 = vmatpush3.bf16.msra.mxu0 %v6482_v7  ;;  %6445 = vmatpush3.bf16.msra.mxu1 %v6482_v7  ;;  %v6490_v29 = vld [vmem:[%s8442_s6 + $0x200] sm:$0xff]   ;;  %746 = vst [vmem:[#allocation2 + $0xa0] sm:$0xf] %v714_v27  ;;  %747 = vst [vmem:[#allocation2 + $0xa8] sm:$0xf] %v715_v28  ;;  %v6499_v33 = vld [vmem:[%s8442_s6 + $0x3f8] sm:$0xff]  }
  0x1b   : > { %5434 = vmatprep.subr.bf16.mxu0 %v6483_v8  ;;  %6438 = vmatprep.subr.bf16.mxu1 %v6483_v8  ;;  %v6903_v30 = vld [vmem:[#allocation2 + $0x14] ss:$8 sps:$4 sm:$0xff]   ;;  %v778_v34 = vld [vmem:[%s6866_s12 + $0x48] sm:$0xf]  ;;  %v779_v35 = vld [vmem:[%s6866_s12 + $0x4c] sm:$0xf] }
  0x1c   : > { %v6913_v36 = vld [vmem:[#allocation2 + $0x10] ss:$8 sps:$4 sm:$0xff]   ;;  %810 = vst [vmem:[#allocation2 + $0xa4] sm:$0xf] %v778_v34  ;;  %811 = vst [vmem:[#allocation2 + $0xac] sm:$0xf] %v779_v35  ;;  %1249 = vmatprep.mubr.bf16.mxu0 %v6903_v30 }
  0x1d   : > { %v6493_v31 = vld [vmem:[#allocation2 + $0x94] ss:$8 sps:$4 sm:$0xff]   ;;  %v6496_v37 = vld [vmem:[#allocation2 + $0x90] ss:$8 sps:$4 sm:$0xff]   ;;  %v6517_v56 = vld [vmem:[%s8442_s6 + $0xe8] sm:$0xff]  }
  0x1e   : > { %5435 = vmatpush3.bf16.msra.mxu0 %v6484_v9  ;;  %6446 = vmatpush3.bf16.msra.mxu1 %v6484_v9  ;;  %v6498_v38 = vld [vmem:[%s8442_s6 + $0xb8] sm:$0xff]   ;;  %v6507_v40 = vld [vmem:[%s8442_s6 + $0xf0] sm:$0xff]   ;;  %v6518_v57 = vld [vmem:[%s8442_s6 + $0xa8] sm:$0xff]  }
  0x1f   : > { %5436 = vmatprep.subr.bf16.mxu0 %v6485_v10  ;;  %6439 = vmatprep.subr.bf16.mxu1 %v6485_v10  ;;  %v6500_v39 = vld [vmem:[%s8442_s6 + $0x3b8] sm:$0xff]   ;;  %v6509_v41 = vld [vmem:[%s8442_s6 + $0x3f0] sm:$0xff]   ;;  %v6943_v51 = vld [vmem:[#allocation2 + $0x20] ss:$8 sps:$4 sm:$0xff]  }
  0x20   : > { %1313 = vmatprep.mubr.bf16.mxu1 %v6493_v31  ;;  %v6928_v42 = vld [vmem:[#allocation2 + $0x24] ss:$8 sps:$4 sm:$0xff]   ;;  %v6508_v43 = vld [vmem:[%s8442_s6 + $0xb0] sm:$0xff]   ;;  %v702_v60 = vld [vmem:[%s6860_s30 + $0x18] sm:$0xf] }
  0x21   : > { %v6510_v44 = vld [vmem:[%s8442_s6 + $0x3b0] sm:$0xff]   ;;  %v6506_v52 = vld [vmem:[#allocation2 + $0xa0] ss:$8 sps:$4 sm:$0xff]   ;;  %v703_v61 = vld [vmem:[%s6860_s30 + $0x1c] sm:$0xf] }
  0x22   : > { %5437 = vmatpush3.bf16.msra.mxu0 %v6486_v19  ;;  %6447 = vmatpush3.bf16.msra.mxu1 %v6486_v19  ;;  %v700_v45 = vld [vmem:[%s6860_s30 + $0x10] sm:$0xf]  ;;  %v701_v46 = vld [vmem:[%s6860_s30 + $0x14] sm:$0xf]  ;;  %v6519_v58 = vld [vmem:[%s8442_s6 + $0x3e8] sm:$0xff]  }
  0x23   : > { %5438 = vmatprep.subr.bf16.mxu0 %v6487_v20  ;;  %6440 = vmatprep.subr.bf16.mxu1 %v6487_v20  ;;  %732 = vst [vmem:[#allocation2 + $0x30] sm:$0xf] %v700_v45  ;;  %733 = vst [vmem:[#allocation2 + $0x38] sm:$0xf] %v701_v46  ;;  %v764_v47 = vld [vmem:[%s6866_s12 + $0x10] sm:$0xf] }
  0x24   : > { %v765_v48 = vld [vmem:[%s6866_s12 + $0x14] sm:$0xf]  ;;  %v716_v49 = vld [vmem:[%s6860_s30 + $0x50] sm:$0xf]  ;;  %v6503_v50 = vld [vmem:[#allocation2 + $0xa4] ss:$8 sps:$4 sm:$0xff]  }
  0x25   : > { %796 = vst [vmem:[#allocation2 + $0x34] sm:$0xf] %v764_v47  ;;  %797 = vst [vmem:[#allocation2 + $0x3c] sm:$0xf] %v765_v48  ;;  %v717_v53 = vld [vmem:[%s6860_s30 + $0x54] sm:$0xf] }
  0x26   : > { %5439 = vmatpush3.bf16.msra.mxu0 %v6488_v21  ;;  %6448 = vmatpush3.bf16.msra.mxu1 %v6488_v21  ;;  %748 = vst [vmem:[#allocation2 + $0xb0] sm:$0xf] %v716_v49  ;;  %v780_v54 = vld [vmem:[%s6866_s12 + $0x50] sm:$0xf]  ;;  %749 = vst [vmem:[#allocation2 + $0xb8] sm:$0xf] %v717_v53 }
  0x27   : > { %5440 = vmatprep.subr.bf16.mxu0 %v6489_v22  ;;  %6441 = vmatprep.subr.bf16.mxu1 %v6489_v22  ;;  %v781_v55 = vld [vmem:[%s6866_s12 + $0x54] sm:$0xf]  ;;  %812 = vst [vmem:[#allocation2 + $0xb4] sm:$0xf] %v780_v54  ;;  %v6520_v59 = vld [vmem:[%s8442_s6 + $0x3a8] sm:$0xff]   ;;  %v6527_v8 = vld [vmem:[%s8442_s6 + $0xe0] sm:$0xff]  }
  0x28   : > { %813 = vst [vmem:[#allocation2 + $0xbc] sm:$0xf] %v781_v55  ;;  %734 = vst [vmem:[#allocation2 + $0x40] sm:$0xf] %v702_v60  ;;  %v766_v63 = vld [vmem:[%s6866_s12 + $0x18] sm:$0xf] }
  0x29   : > { %735 = vst [vmem:[#allocation2 + $0x48] sm:$0xf] %v703_v61  ;;  %v767_v0 = vld [vmem:[%s6866_s12 + $0x1c] sm:$0xf]  ;;  %798 = vst [vmem:[#allocation2 + $0x44] sm:$0xf] %v766_v63 }
  0x2a   : > { %5441 = vmatpush3.bf16.msra.mxu0 %v6490_v29  ;;  %6449 = vmatpush3.bf16.msra.mxu1 %v6490_v29  ;;  %v6968_v1 = vld [vmem:[#allocation2 + $0x30] ss:$8 sps:$4 sm:$0xff]   ;;  %799 = vst [vmem:[#allocation2 + $0x4c] sm:$0xf] %v767_v0  ;;  %v719_v3 = vld [vmem:[%s6860_s30 + $0x5c] sm:$0xf] }
  0x2b   : > { %5538 = vmatprep.subr.bf16.mxu1 %v6497_v32  ;;  %5650 = vmatprep.subr.bf16.mxu0 %v6499_v33  ;;  %v718_v2 = vld [vmem:[%s6860_s30 + $0x58] sm:$0xf]  ;;  %751 = vst [vmem:[#allocation2 + $0xc8] sm:$0xf] %v719_v3  ;;  %v783_v7 = vld [vmem:[%s6866_s12 + $0x5c] sm:$0xf] }
  0x2c   : > { %v6963_v62 = vld [vmem:[#allocation2 + $0x34] ss:$8 sps:$4 sm:$0xff]   ;;  %750 = vst [vmem:[#allocation2 + $0xc0] sm:$0xf] %v718_v2  ;;  %v782_v6 = vld [vmem:[%s6866_s12 + $0x58] sm:$0xf] }
  0x2d   : > { %1250 = vmatmul.mubr.bf16.vlgmr.msra.gmra.mxu0 %v6913_v36  ;;  %1314 = vmatmul.mubr.bf16.vlgmr.msra.gmra.mxu1 %v6496_v37  ;;  %v6516_v5 = vld [vmem:[#allocation2 + $0xb0] ss:$8 sps:$4 sm:$0xff]   ;;  %814 = vst [vmem:[#allocation2 + $0xc4] sm:$0xf] %v782_v6  ;;  %815 = vst [vmem:[#allocation2 + $0xcc] sm:$0xf] %v783_v7 }
  0x2e   : > { %5539 = vmatpush3.bf16.msra.mxu1 %v6498_v38  ;;  %5651 = vmatpush3.bf16.msra.mxu0 %v6500_v39  ;;  %v6528_v9 = vld [vmem:[%s8442_s6 + $0xa0] sm:$0xff]   ;;  %v6537_v24 = vld [vmem:[%s8442_s6 + $0xd8] sm:$0xff]   ;;  %v706_v28 = vld [vmem:[%s6860_s30 + $0x28] sm:$0xf] }
  0x2f   : > { %1257 = vmatprep.mubr.bf16.mxu0 %v6928_v42  ;;  %5540 = vmatprep.subr.bf16.mxu1 %v6507_v40  ;;  %v6972_v4 = vld [vmem:[#allocation2 + $0xb4] ss:$8 sps:$4 sm:$0xff]   ;;  %v6529_v10 = vld [vmem:[%s8442_s6 + $0x3e0] sm:$0xff]   ;;  %v707_v29 = vld [vmem:[%s6860_s30 + $0x2c] sm:$0xf] }
  0x30   : > { %1321 = vmatprep.mubr.bf16.mxu1 %v6503_v50  ;;  %5652 = vmatprep.subr.bf16.mxu0 %v6509_v41  ;;  %v6530_v11 = vld [vmem:[%s8442_s6 + $0x3a0] sm:$0xff]   ;;  %v6538_v25 = vld [vmem:[%s8442_s6 + $0x98] sm:$0xff]   ;;  %738 = vst [vmem:[#allocation2 + $0x60] sm:$0xf] %v706_v28  ;;  %739 = vst [vmem:[#allocation2 + $0x68] sm:$0xf] %v707_v29 }
  0x31   : > { %v704_v12 = vld [vmem:[%s6860_s30 + $0x20] sm:$0xf]  ;;  %v6991_v13 = vld [vmem:[#allocation2 + $0x44] ss:$8 sps:$4 sm:$0xff]   ;;  %v6539_v26 = vld [vmem:[%s8442_s6 + $0x3d8] sm:$0xff]  }
  0x32   : > { %5541 = vmatpush3.bf16.msra.mxu1 %v6508_v43  ;;  %5653 = vmatpush3.bf16.msra.mxu0 %v6510_v44  ;;  %736 = vst [vmem:[#allocation2 + $0x50] sm:$0xf] %v704_v12  ;;  %v6993_v14 = vld [vmem:[#allocation2 + $0x40] ss:$8 sps:$4 sm:$0xff]   ;;  %v705_v15 = vld [vmem:[%s6860_s30 + $0x24] sm:$0xf] }
  0x33   : > { %5542 = vmatprep.subr.bf16.mxu1 %v6517_v56  ;;  %5654 = vmatprep.subr.bf16.mxu0 %v6519_v58  ;;  %v768_v16 = vld [vmem:[%s6866_s12 + $0x20] sm:$0xf]  ;;  %737 = vst [vmem:[#allocation2 + $0x58] sm:$0xf] %v705_v15  ;;  %v769_v17 = vld [vmem:[%s6866_s12 + $0x24] sm:$0xf] }
  0x34   : > { %800 = vst [vmem:[#allocation2 + $0x54] sm:$0xf] %v768_v16  ;;  %v720_v18 = vld [vmem:[%s6860_s30 + $0x60] sm:$0xf]  ;;  %v721_v19 = vld [vmem:[%s6860_s30 + $0x64] sm:$0xf] }
  0x35   : > { %1258 = vmatmul.mubr.bf16.gmra.mxu0 %v6943_v51  ;;  %1322 = vmatmul.mubr.bf16.gmra.mxu1 %v6506_v52  ;;  %v7001_v20 = vld [vmem:[#allocation2 + $0xc4] ss:$8 sps:$4 sm:$0xff]   ;;  %801 = vst [vmem:[#allocation2 + $0x5c] sm:$0xf] %v769_v17  ;;  %752 = vst [vmem:[#allocation2 + $0xd0] sm:$0xf] %v720_v18 }
  0x36   : > { %5543 = vmatpush3.bf16.msra.mxu1 %v6518_v57  ;;  %1265 = vmatprep.mubr.bf16.mxu0 %v6963_v62  ;;  %753 = vst [vmem:[#allocation2 + $0xd8] sm:$0xf] %v721_v19  ;;  %v7003_v21 = vld [vmem:[#allocation2 + $0xc0] ss:$8 sps:$4 sm:$0xff]   ;;  %v785_v23 = vld [vmem:[%s6866_s12 + $0x64] sm:$0xf] }
  0x37   : > { %5655 = vmatpush3.bf16.msra.mxu0 %v6520_v59  ;;  %1329 = vmatprep.mubr.bf16.mxu1 %v6972_v4  ;;  %v784_v22 = vld [vmem:[%s6866_s12 + $0x60] sm:$0xf]  ;;  %817 = vst [vmem:[#allocation2 + $0xdc] sm:$0xf] %v785_v23  ;;  %v6540_v27 = vld [vmem:[%s8442_s6 + $0x398] sm:$0xff]   ;;  %v6547_v43 = vld [vmem:[%s8442_s6 + $0xd0] sm:$0xff]  }
  0x38   : > { %5544 = vmatprep.subr.bf16.mxu1 %v6527_v8  ;;  %5656 = vmatprep.subr.bf16.mxu0 %v6529_v10  ;;  %816 = vst [vmem:[#allocation2 + $0xd4] sm:$0xf] %v784_v22  ;;  %v770_v33 = vld [vmem:[%s6866_s12 + $0x28] sm:$0xf]  ;;  %v771_v34 = vld [vmem:[%s6866_s12 + $0x2c] sm:$0xf] }
  0x39   : > { %v722_v35 = vld [vmem:[%s6860_s30 + $0x68] sm:$0xf]  ;;  %802 = vst [vmem:[#allocation2 + $0x64] sm:$0xf] %v770_v33  ;;  %803 = vst [vmem:[#allocation2 + $0x6c] sm:$0xf] %v771_v34 }
  0x3a   : > { %5545 = vmatpush3.bf16.msra.mxu1 %v6528_v9  ;;  %v7026_v32 = vld [vmem:[#allocation2 + $0x50] ss:$8 sps:$4 sm:$0xff]   ;;  %754 = vst [vmem:[#allocation2 + $0xe0] sm:$0xf] %v722_v35  ;;  %v723_v39 = vld [vmem:[%s6860_s30 + $0x6c] sm:$0xf] }
  0x3b   : > { %5657 = vmatpush3.bf16.msra.mxu0 %v6530_v11  ;;  %5546 = vmatprep.subr.bf16.mxu1 %v6537_v24  ;;  %v786_v40 = vld [vmem:[%s6866_s12 + $0x68] sm:$0xf]  ;;  %755 = vst [vmem:[#allocation2 + $0xe8] sm:$0xf] %v723_v39  ;;  %v787_v41 = vld [vmem:[%s6866_s12 + $0x6c] sm:$0xf] }
  0x3c   : > { %5658 = vmatprep.subr.bf16.mxu0 %v6539_v26  ;;  %v7024_v31 = vld [vmem:[#allocation2 + $0x54] ss:$8 sps:$4 sm:$0xff]   ;;  %818 = vst [vmem:[#allocation2 + $0xe4] sm:$0xf] %v786_v40  ;;  %819 = vst [vmem:[#allocation2 + $0xec] sm:$0xf] %v787_v41 }
  0x3d   : > { %1266 = vmatmul.mubr.bf16.gmra.mxu0 %v6968_v1  ;;  %1330 = vmatmul.mubr.bf16.gmra.mxu1 %v6516_v5  ;;  %v7034_v38 = vld [vmem:[#allocation2 + $0xd0] ss:$8 sps:$4 sm:$0xff]   ;;  %v709_v48 = vld [vmem:[%s6860_s30 + $0x34] sm:$0xf]  ;;  %v7058_v50 = vld [vmem:[#allocation2 + $0x60] ss:$8 sps:$4 sm:$0xff]  }
  0x3e   : > { %1273 = vmatprep.mubr.bf16.mxu0 %v6991_v13  ;;  %1337 = vmatprep.mubr.bf16.mxu1 %v7001_v20  ;;  %v6548_v44 = vld [vmem:[%s8442_s6 + $0x90] sm:$0xff]   ;;  %741 = vst [vmem:[#allocation2 + $0x78] sm:$0xf] %v709_v48  ;;  %v6557_v60 = vld [vmem:[%s8442_s6 + $0xc8] sm:$0xff]   ;;  %v710_v2 = vld [vmem:[%s6860_s30 + $0x38] sm:$0xf] }
  0x3f   : > { %5547 = vmatpush3.bf16.msra.mxu1 %v6538_v25  ;;  %5659 = vmatpush3.bf16.msra.mxu0 %v6540_v27  ;;  %v7032_v37 = vld [vmem:[#allocation2 + $0xd4] ss:$8 sps:$4 sm:$0xff]   ;;  %v708_v47 = vld [vmem:[%s6860_s30 + $0x30] sm:$0xf]  ;;  %v6558_v61 = vld [vmem:[%s8442_s6 + $0x88] sm:$0xff]   ;;  %v6755_v27 = vmov 0  }
  0x40   : > { %5548 = vmatprep.subr.bf16.mxu1 %v6547_v43  ;;  %v6549_v45 = vld [vmem:[%s8442_s6 + $0x3d0] sm:$0xff]   ;;  %v7056_v49 = vld [vmem:[#allocation2 + $0x64] ss:$8 sps:$4 sm:$0xff]   ;;  %740 = vst [vmem:[#allocation2 + $0x70] sm:$0xf] %v708_v47  ;;  %v6571_v25 = vld [vmem:[%s8442_s6 + $0x1f8] sm:$0xff]   ;;  %v7128_v28 = vcombine.high %v6755_v27, %v6755_v27  ;;  %v7143_v35 = vcombine.low %v6755_v27, %v6755_v27 }
  0x41   : > { %v6550_v46 = vld [vmem:[%s8442_s6 + $0x390] sm:$0xff]   ;;  %5660 = vmatprep.subr.bf16.mxu0 %v6549_v45  ;;  %v6559_v63 = vld [vmem:[%s8442_s6 + $0x3c8] sm:$0xff]   ;;  %742 = vst [vmem:[#allocation2 + $0x80] sm:$0xf] %v710_v2  ;;  %v711_v6 = vld [vmem:[%s6860_s30 + $0x3c] sm:$0xf] }
  0x42   : > { %v772_v52 = vld [vmem:[%s6866_s12 + $0x30] sm:$0xf]  ;;  %v773_v53 = vld [vmem:[%s6866_s12 + $0x34] sm:$0xf]  ;;  %v7067_v57 = vld [vmem:[#allocation2 + $0xe0] ss:$8 sps:$4 sm:$0xff]  }
  0x43   : > { %5549 = vmatpush3.bf16.msra.mxu1 %v6548_v44  ;;  %5661 = vmatpush3.bf16.msra.mxu0 %v6550_v46  ;;  %804 = vst [vmem:[#allocation2 + $0x74] sm:$0xf] %v772_v52  ;;  %805 = vst [vmem:[#allocation2 + $0x7c] sm:$0xf] %v773_v53  ;;  %v724_v54 = vld [vmem:[%s6860_s30 + $0x70] sm:$0xf] }
  0x44   : > { %v725_v55 = vld [vmem:[%s6860_s30 + $0x74] sm:$0xf]  ;;  %v7065_v56 = vld [vmem:[#allocation2 + $0xe4] ss:$8 sps:$4 sm:$0xff]   ;;  %756 = vst [vmem:[#allocation2 + $0xf0] sm:$0xf] %v724_v54  ;;  %5550 = vmatprep.subr.bf16.mxu1 %v6557_v60  ;;  %5662 = vmatprep.subr.bf16.mxu0 %v6559_v63 }
  0x45   : > { %1274 = vmatmul.mubr.bf16.gmra.mxu0 %v6993_v14  ;;  %1338 = vmatmul.mubr.bf16.gmra.mxu1 %v7003_v21  ;;  %757 = vst [vmem:[#allocation2 + $0xf8] sm:$0xf] %v725_v55  ;;  %v788_v58 = vld [vmem:[%s6866_s12 + $0x70] sm:$0xf]  ;;  %v789_v59 = vld [vmem:[%s6866_s12 + $0x74] sm:$0xf] }
  0x46   : > { %1281 = vmatprep.mubr.bf16.mxu0 %v7024_v31  ;;  %1345 = vmatprep.mubr.bf16.mxu1 %v7032_v37  ;;  %820 = vst [vmem:[#allocation2 + $0xf4] sm:$0xf] %v788_v58  ;;  %821 = vst [vmem:[#allocation2 + $0xfc] sm:$0xf] %v789_v59  ;;  %v6560_v0 = vld [vmem:[%s8442_s6 + $0x388] sm:$0xff]   ;;  %v6567_v17 = vld [vmem:[%s8442_s6 + $0xc0] sm:$0xff]  }
  0x47   : > { %5551 = vmatpush3.bf16.msra.mxu1 %v6558_v61  ;;  %v7089_v5 = vld [vmem:[#allocation2 + $0x70] ss:$8 sps:$4 sm:$0xff]   ;;  %5663 = vmatpush3.bf16.msra.mxu0 %v6560_v0  ;;  %743 = vst [vmem:[#allocation2 + $0x88] sm:$0xf] %v711_v6  ;;  %v775_v8 = vld [vmem:[%s6866_s12 + $0x3c] sm:$0xf] }
  0x48   : > { %v774_v7 = vld [vmem:[%s6866_s12 + $0x38] sm:$0xf]  ;;  %v727_v10 = vld [vmem:[%s6860_s30 + $0x7c] sm:$0xf]  ;;  %807 = vst [vmem:[#allocation2 + $0x8c] sm:$0xf] %v775_v8  ;;  %5552 = vmatprep.subr.bf16.mxu1 %v6567_v17 }
  0x49   : > { %806 = vst [vmem:[#allocation2 + $0x84] sm:$0xf] %v774_v7  ;;  %v726_v9 = vld [vmem:[%s6860_s30 + $0x78] sm:$0xf]  ;;  %759 = vst [vmem:[#allocation2 + $0x108] sm:$0xf] %v727_v10  ;;  %s8253_s30 = scalar_lea.vmem %s8443_s7, %s6848_s23 }
  0x4a   : > { %v7087_v3 = vld [vmem:[#allocation2 + $0x74] ss:$8 sps:$4 sm:$0xff]   ;;  %758 = vst [vmem:[#allocation2 + $0x100] sm:$0xf] %v726_v9  ;;  %v790_v15 = vld [vmem:[%s6866_s12 + $0x78] sm:$0xf] }
  0x4b   : > { %v791_v16 = vld [vmem:[%s6866_s12 + $0x7c] sm:$0xf]  ;;  %822 = vst [vmem:[#allocation2 + $0x104] sm:$0xf] %v790_v15  ;;  %v6568_v18 = vld [vmem:[%s8442_s6 + $0x80] sm:$0xff]   ;;  %8453 = vst [vmem:[#allocation3_spill] sm:$0xff] %v7128_v28 }
  0x4c   : > { %v7100_v12 = vld [vmem:[#allocation2 + $0xf0] ss:$8 sps:$4 sm:$0xff]   ;;  %823 = vst [vmem:[#allocation2 + $0x10c] sm:$0xf] %v791_v16  ;;  %v6569_v19 = vld [vmem:[%s8442_s6 + $0x3c0] sm:$0xff]   ;;  %5553 = vmatpush3.bf16.msra.mxu1 %v6568_v18  ;;  %8454 = vst [vmem:[#allocation4_spill] sm:$0xff] %v7143_v35 }
  0x4d   : > { %1282 = vmatmul.mubr.bf16.gmra.mxu0 %v7026_v32  ;;  %1346 = vmatmul.mubr.bf16.gmra.mxu1 %v7034_v38  ;;  %v7097_v11 = vld [vmem:[#allocation2 + $0xf4] ss:$8 sps:$4 sm:$0xff]   ;;  %v6570_v22 = vld [vmem:[%s8442_s6 + $0x380] sm:$0xff]   ;;  %v6581_v44 = vld [vmem:[%s8442_s6 + $0x68] sm:$0xff]   ;;  %s4788_s23 = sshll.u32 %s8576_s28, 3 }
  0x4e   : > { %1289 = vmatprep.mubr.bf16.mxu0 %v7056_v49  ;;  %1353 = vmatprep.mubr.bf16.mxu1 %v7065_v56  ;;  %v7120_v24 = vld [vmem:[#allocation2 + $0x80] ss:$8 sps:$4 sm:$0xff]   ;;  %v6573_v33 = vld [vmem:[%s8442_s6 + $0x78] sm:$0xff]   ;;  %v6577_v39 = vld [vmem:[%s8442_s6 + $0x70] sm:$0xff]   ;;  %s687_s15 = scalar_lea.vmem %s8444_s8, %s4788_s23  ;;  %s693_s17 = scalar_lea.vmem %s8445_s9, %s4788_s23 }
  0x4f   : > { %5664 = vmatprep.subr.bf16.mxu0 %v6569_v19  ;;  %5762 = vmatprep.subr.bf16.mxu1 %v6571_v25  ;;  %v6574_v34 = vld [vmem:[%s8442_s6 + $0x38] sm:$0xff]   ;;  %v6575_v41 = vld [vmem:[%s8442_s6 + $0x1f0] sm:$0xff]   ;;  %v6579_v46 = vld [vmem:[%s8442_s6 + $0x1e8] sm:$0xff]  }
  0x50   : > { %v7118_v23 = vld [vmem:[#allocation2 + $0x84] ss:$8 sps:$4 sm:$0xff]   ;;  %5665 = vmatpush3.bf16.msra.mxu0 %v6570_v22  ;;  %v6572_v40 = vld [vmem:[%s8442_s6 + $0x1b8] sm:$0xff]   ;;  %v6578_v43 = vld [vmem:[%s8442_s6 + $0x30] sm:$0xff]  }
  0x51   : > { %v7131_v29 = vld [vmem:[#allocation2 + $0x100] ss:$8 sps:$4 sm:$0xff]   ;;  %5874 = vmatprep.subr.bf16.mxu0 %v6573_v33  ;;  %v6576_v45 = vld [vmem:[%s8442_s6 + $0x1b0] sm:$0xff]   ;;  %v6589_v54 = vld [vmem:[%s8442_s6 + $0x58] sm:$0xff]  }
  0x52   : > { %v6582_v47 = vld [vmem:[%s8442_s6 + $0x28] sm:$0xff]   ;;  %v6585_v48 = vld [vmem:[%s8442_s6 + $0x60] sm:$0xff]   ;;  %v6587_v58 = vld [vmem:[%s8442_s6 + $0x1d8] sm:$0xff]  }
  0x53   : > { %v7126_v26 = vld [vmem:[#allocation2 + $0x104] ss:$8 sps:$4 sm:$0xff]   ;;  %v6588_v59 = vld [vmem:[%s8442_s6 + $0x198] sm:$0xff]   ;;  %v6591_v60 = vld [vmem:[%s8442_s6 + $0x1d0] sm:$0xff]  }
  0x54   : > { %v6583_v52 = vld [vmem:[%s8442_s6 + $0x1e0] sm:$0xff]   ;;  %v6594_v61 = vld [vmem:[%s8442_s6 + $0x10] sm:$0xff]   ;;  %v6597_v63 = vld [vmem:[%s8442_s6 + $0x48] sm:$0xff]  }
  0x55   : > { %1290 = vmatmul.mubr.bf16.gmra.mxu0 %v7058_v50  ;;  %1354 = vmatmul.mubr.bf16.gmra.mxu1 %v7067_v57  ;;  %v6586_v53 = vld [vmem:[%s8442_s6 + $0x20] sm:$0xff]   ;;  %v6592_v0 = vld [vmem:[%s8442_s6 + $0x190] sm:$0xff]   ;;  %v6595_v2 = vld [vmem:[%s8442_s6 + $0x1c8] sm:$0xff]  }
  0x56   : > { %1297 = vmatprep.mubr.bf16.mxu0 %v7087_v3  ;;  %1361 = vmatprep.mubr.bf16.mxu1 %v7097_v11  ;;  %v6584_v55 = vld [vmem:[%s8442_s6 + $0x1a0] sm:$0xff]   ;;  %v6596_v6 = vld [vmem:[%s8442_s6 + $0x188] sm:$0xff]   ;;  %v6605_v9 = vld [vmem:[%s8442_s6 + $0x2f8] sm:$0xff]  }
  0x57   : > { %v6599_v7 = vld [vmem:[%s8442_s6 + $0x1c0] sm:$0xff]   ;;  %v6603_v15 = vld [vmem:[%s8442_s6 + $0x378] sm:$0xff]   ;;  %v6613_v19 = vld [vmem:[%s8442_s6 + $0x2e8] sm:$0xff]  }
  0x58   : > { %v6602_v8 = vld [vmem:[%s8442_s6] sm:$0xff]   ;;  %v7337_v16 = vld [vmem:[#allocation2 + $0x10] ss:$8 sps:$4 sm:$0xff]   ;;  %v6611_v27 = vld [vmem:[%s8442_s6 + $0x368] sm:$0xff]  }
  0x59   : > { %v6600_v10 = vld [vmem:[%s8442_s6 + $0x180] sm:$0xff]  }
  0x5a   : > { %v7343_v22 = vld [vmem:[#allocation2 + $0x24] ss:$8 sps:$4 sm:$0xff]  }
  0x5d   : > { %1298 = vmatmul.mubr.bf16.gmra.mxu0 %v7089_v5  ;;  %1362 = vmatmul.mubr.bf16.gmra.mxu1 %v7100_v12 }
  0x5e   : > { %1305 = vmatprep.mubr.bf16.mxu0 %v7118_v23  ;;  %1369 = vmatprep.mubr.bf16.mxu1 %v7126_v26 }
  0x65   : > { %1306 = vmatmul.mubr.bf16.gmra.mxu0 %v7120_v24  ;;  %1370 = vmatmul.mubr.bf16.gmra.mxu1 %v7131_v29 }
  0x66   : > { %1998 = vmatprep.mubr.bf16.mxu0 %v6928_v42  ;;  %1516 = vmatprep.mubr.bf16.mxu1 %v7128_v28 }
  0x6d   : > { %1999 = vmatmul.mubr.bf16.vlgmr.msra.gmra.mxu0 %v6943_v51  ;;  %1517 = vmatmul.mubr.bf16.vlgmr.msra.gmra.mxu1 %v7143_v35 }
  0x6e   : > { %5875 = vmatpush3.bf16.msra.mxu0 %v6574_v34  ;;  %2006 = vmatprep.mubr.bf16.mxu0 %v6963_v62  ;;  %v6614_v34 = vld [vmem:[%s8442_s6 + $0x2a8] sm:$0xff]  }
  0x6f   : > { %5876 = vmatprep.subr.bf16.mxu0 %v6577_v39  ;;  %5763 = vmatpush3.bf16.msra.mxu1 %v6572_v40 }
  0x70   : > { %1524 = vmatprep.mubr.bf16.mxu1 %v6903_v30  ;;  %5764 = vmatprep.subr.bf16.mxu1 %v6575_v41  ;;  %v6580_v30 = vld [vmem:[%s8442_s6 + $0x1a8] sm:$0xff]   ;;  %v6617_v41 = vld [vmem:[%s8442_s6 + $0x2e0] sm:$0xff]  }
  0x72   : > { %5877 = vmatpush3.bf16.msra.mxu0 %v6578_v43  ;;  %v6612_v43 = vld [vmem:[%s8442_s6 + $0x328] sm:$0xff]  }
  0x73   : > { %5878 = vmatprep.subr.bf16.mxu0 %v6581_v44  ;;  %5765 = vmatpush3.bf16.msra.mxu1 %v6576_v45 }
  0x74   : > { %5766 = vmatprep.subr.bf16.mxu1 %v6579_v46  ;;  %v6615_v46 = vld [vmem:[%s8442_s6 + $0x360] sm:$0xff]  }
  0x75   : > { %2007 = vmatmul.mubr.bf16.gmra.mxu0 %v6968_v1  ;;  %1525 = vmatmul.mubr.bf16.gmra.mxu1 %v6913_v36  ;;  %v6590_v36 = vld [vmem:[%s8442_s6 + $0x18] sm:$0xff]  }
  0x76   : > { %2014 = vmatprep.mubr.bf16.mxu0 %v6991_v13  ;;  %5879 = vmatpush3.bf16.msra.mxu0 %v6582_v47 }
  0x77   : > { %5880 = vmatprep.subr.bf16.mxu0 %v6585_v48  ;;  %1532 = vmatprep.mubr.bf16.mxu1 %v6928_v42  ;;  %v6593_v42 = vld [vmem:[%s8442_s6 + $0x50] sm:$0xff]  }
  0x78   : > { %5767 = vmatpush3.bf16.msra.mxu1 %v6580_v30  ;;  %v6618_v30 = vld [vmem:[%s8442_s6 + $0x2a0] sm:$0xff]  }
  0x79   : > { %5768 = vmatprep.subr.bf16.mxu1 %v6583_v52  ;;  %v7377_v52 = vld [vmem:[#allocation2 + $0x20] ss:$8 sps:$4 sm:$0xff]  }
  0x7a   : > { %5881 = vmatpush3.bf16.msra.mxu0 %v6586_v53 }
  0x7b   : > { %5882 = vmatprep.subr.bf16.mxu0 %v6589_v54 }
  0x7c   : > { %5769 = vmatpush3.bf16.msra.mxu1 %v6584_v55  ;;  %v6621_v55 = vld [vmem:[%s8442_s6 + $0x2d8] sm:$0xff]  }
  0x7d   : > { %2015 = vmatmul.mubr.bf16.gmra.mxu0 %v6993_v14  ;;  %5770 = vmatprep.subr.bf16.mxu1 %v6587_v58  ;;  %v7383_v58 = vld [vmem:[#allocation2 + $0x34] ss:$8 sps:$4 sm:$0xff]  }
  0x7e   : > { %2022 = vmatprep.mubr.bf16.mxu0 %v7024_v31  ;;  %5883 = vmatpush3.bf16.msra.mxu0 %v6590_v36  ;;  %v6616_v36 = vld [vmem:[%s8442_s6 + $0x320] sm:$0xff]  }
  0x7f   : > { %1533 = vmatmul.mubr.bf16.gmra.mxu1 %v6943_v51  ;;  %5884 = vmatprep.subr.bf16.mxu0 %v6593_v42  ;;  %v6598_v51 = vld [vmem:[%s8442_s6 + $0x8] sm:$0xff]  }
  0x80   : > { %1540 = vmatprep.mubr.bf16.mxu1 %v6963_v62  ;;  %5771 = vmatpush3.bf16.msra.mxu1 %v6588_v59  ;;  %v6601_v62 = vld [vmem:[%s8442_s6 + $0x40] sm:$0xff]  }
  0x81   : > { %5772 = vmatprep.subr.bf16.mxu1 %v6591_v60  ;;  %v6619_v60 = vld [vmem:[%s8442_s6 + $0x358] sm:$0xff]  }
  0x82   : > { %5885 = vmatpush3.bf16.msra.mxu0 %v6594_v61 }
  0x83   : > { %5886 = vmatprep.subr.bf16.mxu0 %v6597_v63 }
  0x84   : > { %5773 = vmatpush3.bf16.msra.mxu1 %v6592_v0  ;;  %v6622_v0 = vld [vmem:[%s8442_s6 + $0x298] sm:$0xff]  }
  0x85   : > { %2023 = vmatmul.mubr.bf16.gmra.mxu0 %v7026_v32  ;;  %5774 = vmatprep.subr.bf16.mxu1 %v6595_v2 }
  0x86   : > { %2030 = vmatprep.mubr.bf16.mxu0 %v7056_v49  ;;  %5887 = vmatpush3.bf16.msra.mxu0 %v6598_v51 }
  0x87   : > { %1541 = vmatmul.mubr.bf16.gmra.mxu1 %v6968_v1  ;;  %5888 = vmatprep.subr.bf16.mxu0 %v6601_v62  ;;  %v7263_v1 = vld [vmem:[#allocation2 + $0x94] ss:$8 sps:$4 sm:$0xff]  }
  0x88   : > { %1548 = vmatprep.mubr.bf16.mxu1 %v6991_v13  ;;  %5775 = vmatpush3.bf16.msra.mxu1 %v6596_v6  ;;  %v7268_v13 = vld [vmem:[#allocation2 + $0x90] ss:$8 sps:$4 sm:$0xff]  }
  0x89   : > { %5776 = vmatprep.subr.bf16.mxu1 %v6599_v7  ;;  %v6625_v62 = vld [vmem:[%s8442_s6 + $0x2d0] sm:$0xff]   ;;  %v6620_v6 = vld [vmem:[%s8442_s6 + $0x318] sm:$0xff]  }
  0x8a   : > { %5889 = vmatpush3.bf16.msra.mxu0 %v6602_v8 }
  0x8b   : > { %6098 = vmatprep.subr.bf16.mxu0 %v6605_v9  ;;  %v6623_v9 = vld [vmem:[%s8442_s6 + $0x350] sm:$0xff]  }
  0x8c   : > { %5777 = vmatpush3.bf16.msra.mxu1 %v6600_v10 }
  0x8d   : > { %2031 = vmatmul.mubr.bf16.gmra.mxu0 %v7058_v50  ;;  %5986 = vmatprep.subr.bf16.mxu1 %v6603_v15 }
  0x8e   : > { %2038 = vmatprep.mubr.bf16.mxu0 %v7087_v3 }
  0x8f   : > { %1549 = vmatmul.mubr.bf16.gmra.mxu1 %v6993_v14  ;;  %v7271_v14 = vld [vmem:[#allocation2 + $0xa4] ss:$8 sps:$4 sm:$0xff]  }
  0x90   : > { %1556 = vmatprep.mubr.bf16.mxu1 %v7024_v31  ;;  %v7276_v31 = vld [vmem:[#allocation2 + $0xa0] ss:$8 sps:$4 sm:$0xff]  }
  0x95   : > { %2039 = vmatmul.mubr.bf16.gmra.mxu0 %v7089_v5 }
  0x96   : > { %2046 = vmatprep.mubr.bf16.mxu0 %v7118_v23 }
  0x97   : > { %1557 = vmatmul.mubr.bf16.gmra.mxu1 %v7026_v32  ;;  %v7282_v32 = vld [vmem:[#allocation2 + $0xb0] ss:$8 sps:$4 sm:$0xff]  }
  0x98   : > { %1564 = vmatprep.mubr.bf16.mxu1 %v7056_v49  ;;  %v6609_v49 = vld [vmem:[%s8442_s6 + $0x2f0] sm:$0xff]  }
  0x9d   : > { %2047 = vmatmul.mubr.bf16.gmra.mxu0 %v7120_v24 }
  0x9e   : > { %2054 = vmatprep.mubr.bf16.mxu0 %v7263_v1 }
  0x9f   : > { %1565 = vmatmul.mubr.bf16.gmra.mxu1 %v7058_v50  ;;  %v6604_v50 = vld [vmem:[%s8442_s6 + $0x338] sm:$0xff]  }
  0xa0   : > { %1572 = vmatprep.mubr.bf16.mxu1 %v7087_v3  ;;  %v6607_v3 = vld [vmem:[%s8442_s6 + $0x370] sm:$0xff]  }
  0xa5   : > { %2055 = vmatmul.mubr.bf16.gmra.mxu0 %v7268_v13 }
  0xa6   : > { %2062 = vmatprep.mubr.bf16.mxu0 %v7271_v14 }
  0xa7   : > { %1573 = vmatmul.mubr.bf16.gmra.mxu1 %v7089_v5 }
  0xa8   : > { %1580 = vmatprep.mubr.bf16.mxu1 %v7118_v23 }
  0xad   : > { %2063 = vmatmul.mubr.bf16.gmra.mxu0 %v7276_v31 }
  0xae   : > { %2070 = vmatprep.mubr.bf16.mxu0 %v6972_v4  ;;  %v7291_v4 = vld [vmem:[#allocation2 + $0xb4] ss:$8 sps:$4 sm:$0xff]  }
  0xaf   : > { %1581 = vmatmul.mubr.bf16.gmra.mxu1 %v7120_v24  ;;  %v6608_v24 = vld [vmem:[%s8442_s6 + $0x330] sm:$0xff]  }
  0xb0   : > { %1588 = vmatprep.mubr.bf16.mxu1 %v7263_v1 }
  0xb5   : > { %2071 = vmatmul.mubr.bf16.gmra.mxu0 %v7282_v32 }
  0xb6   : > { %2078 = vmatprep.mubr.bf16.mxu0 %v7001_v20 }
  0xb7   : > { %1589 = vmatmul.mubr.bf16.gmra.mxu1 %v7268_v13 }
  0xb8   : > { %1596 = vmatprep.mubr.bf16.mxu1 %v7271_v14 }
  0xbd   : > { %2079 = vmatmul.mubr.bf16.gmra.mxu0 %v7003_v21 }
  0xbe   : > { %2086 = vmatprep.mubr.bf16.mxu0 %v7032_v37 }
  0xbf   : > { %1597 = vmatmul.mubr.bf16.gmra.mxu1 %v7276_v31 }
  0xc0   : > { %1604 = vmatprep.mubr.bf16.mxu1 %v7291_v4 }
  0xc5   : > { %2087 = vmatmul.mubr.bf16.gmra.mxu0 %v7034_v38 }
  0xc6   : > { %2094 = vmatprep.mubr.bf16.mxu0 %v7065_v56 }
  0xc7   : > { %1605 = vmatmul.mubr.bf16.gmra.mxu1 %v7282_v32 }
  0xc8   : > { %1612 = vmatprep.mubr.bf16.mxu1 %v7001_v20  ;;  %v7313_v20 = vld [vmem:[#allocation2 + $0x14] ss:$8 sps:$4 sm:$0xff]  }
  0xcd   : > { %2095 = vmatmul.mubr.bf16.gmra.mxu0 %v7067_v57 }
  0xce   : > { %2102 = vmatprep.mubr.bf16.mxu0 %v7097_v11 }
  0xcf   : > { %1613 = vmatmul.mubr.bf16.gmra.mxu1 %v7003_v21  ;;  %v6606_v21 = vld [vmem:[%s8442_s6 + $0x2b8] sm:$0xff]  }
  0xd0   : > { %1620 = vmatprep.mubr.bf16.mxu1 %v7032_v37 }
  0xd5   : > { %2103 = vmatmul.mubr.bf16.gmra.mxu0 %v7100_v12 }
  0xd6   : > { %2110 = vmatprep.mubr.bf16.mxu0 %v7126_v26 }
  0xd7   : > { %1621 = vmatmul.mubr.bf16.gmra.mxu1 %v7034_v38 }
  0xd8   : > { %1628 = vmatprep.mubr.bf16.mxu1 %v7065_v56 }
  0xdd   : > { %2111 = vmatmul.mubr.bf16.gmra.mxu0 %v7131_v29 }
  0xde   : > { %2118 = vmatprep.mubr.bf16.mxu0 %v7128_v28 }
  0xdf   : > { %1629 = vmatmul.mubr.bf16.gmra.mxu1 %v7067_v57 }
  0xe0   : > { %1636 = vmatprep.mubr.bf16.mxu1 %v7097_v11 }
  0xe5   : > { %2119 = vmatmul.mubr.bf16.gmra.mxu0 %v7143_v35 }
  0xe6   : > { %2611 = vmatprep.mubr.bf16.mxu0 %v7128_v28 }
  0xe7   : > { %1637 = vmatmul.mubr.bf16.gmra.mxu1 %v7100_v12  ;;  %v6610_v12 = vld [vmem:[%s8442_s6 + $0x2b0] sm:$0xff]  }
  0xe8   : > { %2354 = vmatprep.mubr.bf16.mxu1 %v7313_v20 }
  0xed   : > { %v5442_v37 = vpop.f32.mrf.mxu0  ;;  %v5490_v38 = vpop.f32.mrf.mxu1  ;;  %2612 = vmatmul.mubr.bf16.vlgmr.msra.gmra.mxu0 %v7143_v35 }
  0xee   : > { %6099 = vmatpush3.bf16.msra.mxu0 %v6606_v21  ;;  %2619 = vmatprep.mubr.bf16.mxu0 %v7313_v20  ;;  %v6626_v21 = vld [vmem:[%s8442_s6 + $0x290] sm:$0xff]  }
  0xef   : > { %v5443_v56 = vpop.f32.mrf.mxu0  ;;  %v5491_v57 = vpop.f32.mrf.mxu1  ;;  %2355 = vmatmul.mubr.bf16.vlgmr.msra.gmra.mxu1 %v7337_v16  ;;  %6100 = vmatprep.subr.bf16.mxu0 %v6609_v49 }
  0xf0   : > { %v7329_v5 = vadd.f32 %v5443_v56, %v5442_v37  ;;  %v7331_v11 = vadd.f32 %v5491_v57, %v5490_v38  ;;  %5987 = vmatpush3.bf16.msra.mxu1 %v6604_v50  ;;  %2362 = vmatprep.mubr.bf16.mxu1 %v7343_v22  ;;  %v7417_v37 = vld [vmem:[#allocation2 + $0x30] ss:$8 sps:$4 sm:$0xff]   ;;  %v6629_v50 = vld [vmem:[%s8442_s6 + $0x2c8] sm:$0xff]  }
  0xf1   : > { %v5445_v17 = vpop.f32.mrf.mxu0  ;;  %v5493_v18 = vpop.f32.mrf.mxu1  ;;  %5988 = vmatprep.subr.bf16.mxu1 %v6607_v3  ;;  %v7423_v56 = vld [vmem:[#allocation2 + $0x44] ss:$8 sps:$4 sm:$0xff]   ;;  %v6624_v57 = vld [vmem:[%s8442_s6 + $0x310] sm:$0xff]  }
  0xf2   : > { %6101 = vmatpush3.bf16.msra.mxu0 %v6610_v12 }
  0xf3   : > { %v5446_v25 = vpop.f32.mrf.mxu0  ;;  %v5494_v26 = vpop.f32.mrf.mxu1  ;;  %6102 = vmatprep.subr.bf16.mxu0 %v6613_v19 }
  0xf4   : > { %v7352_v29 = vadd.f32 %v5446_v25, %v5445_v17  ;;  %v7354_v33 = vadd.f32 %v5494_v26, %v5493_v18  ;;  %5989 = vmatpush3.bf16.msra.mxu1 %v6608_v24  ;;  %v6627_v17 = vld [vmem:[%s8442_s6 + $0x348] sm:$0xff]  }
  0xf5   : > { %v5448_v39 = vpop.f32.mrf.mxu0  ;;  %v5496_v40 = vpop.f32.mrf.mxu1  ;;  %2620 = vmatmul.mubr.bf16.gmra.mxu0 %v7337_v16  ;;  %5990 = vmatprep.subr.bf16.mxu1 %v6611_v27  ;;  %v6630_v24 = vld [vmem:[%s8442_s6 + $0x288] sm:$0xff]   ;;  %v6633_v27 = vld [vmem:[%s8442_s6 + $0x2c0] sm:$0xff]  }
  0xf6   : > { %2627 = vmatprep.mubr.bf16.mxu0 %v7343_v22  ;;  %6103 = vmatpush3.bf16.msra.mxu0 %v6614_v34  ;;  %v6628_v34 = vld [vmem:[%s8442_s6 + $0x308] sm:$0xff]  }
  0xf7   : > { %v5449_v44 = vpop.f32.mrf.mxu0  ;;  %v5497_v45 = vpop.f32.mrf.mxu1  ;;  %2363 = vmatmul.mubr.bf16.gmra.mxu1 %v7377_v52  ;;  %6104 = vmatprep.subr.bf16.mxu0 %v6617_v41  ;;  %v6631_v41 = vld [vmem:[%s8442_s6 + $0x340] sm:$0xff]  }
  0xf8   : > { %v7369_v47 = vadd.f32 %v5449_v44, %v5448_v39  ;;  %v7371_v48 = vadd.f32 %v5497_v45, %v5496_v40  ;;  %2370 = vmatprep.mubr.bf16.mxu1 %v7383_v58  ;;  %5991 = vmatpush3.bf16.msra.mxu1 %v6612_v43  ;;  %v6634_v45 = vld [vmem:[%s8442_s6 + $0x280] sm:$0xff]  }
  0xf9   : > { %v5451_v53 = vpop.f32.mrf.mxu0  ;;  %v5499_v54 = vpop.f32.mrf.mxu1  ;;  %5992 = vmatprep.subr.bf16.mxu1 %v6615_v46  ;;  %v7457_v46 = vld [vmem:[#allocation2 + $0x40] ss:$8 sps:$4 sm:$0xff]  }
  0xfa   : > { %6105 = vmatpush3.bf16.msra.mxu0 %v6618_v30 }
  0xfb   : > { %v5452_v42 = vpop.f32.mrf.mxu0  ;;  %v5500_v59 = vpop.f32.mrf.mxu1  ;;  %6106 = vmatprep.subr.bf16.mxu0 %v6621_v55  ;;  %v7463_v55 = vld [vmem:[#allocation2 + $0x54] ss:$8 sps:$4 sm:$0xff]  }
  0xfc   : > { %v7392_v61 = vadd.f32 %v5452_v42, %v5451_v53  ;;  %v7394_v63 = vadd.f32 %v5500_v59, %v5499_v54  ;;  %5993 = vmatpush3.bf16.msra.mxu1 %v6616_v36  ;;  %v6637_v54 = vld [vmem:[%s8442_s6 + $0x478] sm:$0xff]   ;;  %v6632_v36 = vld [vmem:[%s8442_s6 + $0x300] sm:$0xff]  }
  0xfd   : > { %v5454_v2 = vpop.f32.mrf.mxu0  ;;  %v5502_v51 = vpop.f32.mrf.mxu1  ;;  %2628 = vmatmul.mubr.bf16.gmra.mxu0 %v7377_v52  ;;  %5994 = vmatprep.subr.bf16.mxu1 %v6619_v60  ;;  %v6635_v60 = vld [vmem:[%s8442_s6 + $0x178] sm:$0xff]  }
  0xfe   : > { %2635 = vmatprep.mubr.bf16.mxu0 %v7383_v58  ;;  %6107 = vmatpush3.bf16.msra.mxu0 %v6622_v0 }
  0xff   : > { %v5455_v7 = vpop.f32.mrf.mxu0  ;;  %v5503_v8 = vpop.f32.mrf.mxu1  ;;  %2371 = vmatmul.mubr.bf16.gmra.mxu1 %v7417_v37  ;;  %6108 = vmatprep.subr.bf16.mxu0 %v6625_v62 }
 0x100   : > { %v7409_v10 = vadd.f32 %v5455_v7, %v5454_v2  ;;  %v7411_v15 = vadd.f32 %v5503_v8, %v5502_v51  ;;  %2378 = vmatprep.mubr.bf16.mxu1 %v7423_v56  ;;  %5995 = vmatpush3.bf16.msra.mxu1 %v6620_v6 }
 0x101   : > { %v5457_v38 = vpop.f32.mrf.mxu0  ;;  %v5505_v49 = vpop.f32.mrf.mxu1  ;;  %5996 = vmatprep.subr.bf16.mxu1 %v6623_v9 }
 0x102   : > { %6109 = vmatpush3.bf16.msra.mxu0 %v6626_v21  ;;  %v7482_v21 = vld [vmem:[#allocation2 + $0x50] ss:$8 sps:$4 sm:$0xff]  }
 0x103   : > { %v5458_v3 = vpop.f32.mrf.mxu0  ;;  %v5506_v12 = vpop.f32.mrf.mxu1  ;;  %6110 = vmatprep.subr.bf16.mxu0 %v6629_v50  ;;  %v7485_v50 = vld [vmem:[#allocation2 + $0x64] ss:$8 sps:$4 sm:$0xff]  }
 0x104   : > { %v7432_v18 = vadd.f32 %v5458_v3, %v5457_v38  ;;  %v7434_v19 = vadd.f32 %v5506_v12, %v5505_v49  ;;  %5997 = vmatpush3.bf16.msra.mxu1 %v6624_v57 }
 0x105   : > { %v5460_v25 = vpop.f32.mrf.mxu0  ;;  %v5508_v26 = vpop.f32.mrf.mxu1  ;;  %2636 = vmatmul.mubr.bf16.gmra.mxu0 %v7417_v37  ;;  %5998 = vmatprep.subr.bf16.mxu1 %v6627_v17 }
 0x106   : > { %2643 = vmatprep.mubr.bf16.mxu0 %v7423_v56  ;;  %6111 = vmatpush3.bf16.msra.mxu0 %v6630_v24 }
 0x107   : > { %v5461_v39 = vpop.f32.mrf.mxu0  ;;  %v5509_v40 = vpop.f32.mrf.mxu1  ;;  %2379 = vmatmul.mubr.bf16.gmra.mxu1 %v7457_v46  ;;  %6112 = vmatprep.subr.bf16.mxu0 %v6633_v27 }
 0x108   : > { %v7449_v43 = vadd.f32 %v5461_v39, %v5460_v25  ;;  %v7451_v44 = vadd.f32 %v5509_v40, %v5508_v26  ;;  %2386 = vmatprep.mubr.bf16.mxu1 %v7463_v55  ;;  %5999 = vmatpush3.bf16.msra.mxu1 %v6628_v34  ;;  %v7496_v34 = vld [vmem:[#allocation2 + $0x60] ss:$8 sps:$4 sm:$0xff]  }
 0x109   : > { %v5463_v30 = vpop.f32.mrf.mxu0  ;;  %v5511_v53 = vpop.f32.mrf.mxu1  ;;  %6000 = vmatprep.subr.bf16.mxu1 %v6631_v41 }
 0x10a   : > { %6113 = vmatpush3.bf16.msra.mxu0 %v6634_v45  ;;  %v7501_v45 = vld [vmem:[#allocation2 + $0x74] ss:$8 sps:$4 sm:$0xff]  }
 0x10b   : > { %v5464_v42 = vpop.f32.mrf.mxu0  ;;  %v5512_v59 = vpop.f32.mrf.mxu1  ;;  %6322 = vmatprep.subr.bf16.mxu0 %v6637_v54 }
 0x10c   : > { %v7472_v0 = vadd.f32 %v5464_v42, %v5463_v30  ;;  %v7474_v2 = vadd.f32 %v5512_v59, %v5511_v53  ;;  %6001 = vmatpush3.bf16.msra.mxu1 %v6632_v36 }
 0x10d   : > { %v5466_v51 = vpop.f32.mrf.mxu0  ;;  %v5514_v62 = vpop.f32.mrf.mxu1  ;;  %2644 = vmatmul.mubr.bf16.gmra.mxu0 %v7457_v46  ;;  %6210 = vmatprep.subr.bf16.mxu1 %v6635_v60 }
 0x10e   : > { %2651 = vmatprep.mubr.bf16.mxu0 %v7463_v55 }
 0x10f   : > { %v5467_v6 = vpop.f32.mrf.mxu0  ;;  %v5515_v7 = vpop.f32.mrf.mxu1  ;;  %2387 = vmatmul.mubr.bf16.gmra.mxu1 %v7482_v21 }
 0x110   : > { %v7477_v8 = vadd.f32 %v5467_v6, %v5466_v51  ;;  %v7479_v9 = vadd.f32 %v5515_v7, %v5514_v62  ;;  %2394 = vmatprep.mubr.bf16.mxu1 %v7485_v50  ;;  %v7512_v6 = vld [vmem:[#allocation2 + $0x70] ss:$8 sps:$4 sm:$0xff]  }
 0x111   : > { %v5469_v38 = vpop.f32.mrf.mxu0  ;;  %v5517_v49 = vpop.f32.mrf.mxu1 }
 0x113   : > { %v5470_v57 = vpop.f32.mrf.mxu0  ;;  %v5518_v3 = vpop.f32.mrf.mxu1 }
 0x114   : > { %v7488_v12 = vadd.f32 %v5470_v57, %v5469_v38  ;;  %v7490_v17 = vadd.f32 %v5518_v3, %v5517_v49 }
 0x115   : > { %v5472_v24 = vpop.f32.mrf.mxu0  ;;  %v5520_v25 = vpop.f32.mrf.mxu1  ;;  %2652 = vmatmul.mubr.bf16.gmra.mxu0 %v7482_v21 }
 0x116   : > { %2659 = vmatprep.mubr.bf16.mxu0 %v7485_v50 }
 0x117   : > { %v5473_v26 = vpop.f32.mrf.mxu0  ;;  %2395 = vmatmul.mubr.bf16.gmra.mxu1 %v7496_v34  ;;  %v5521_v39 = vpop.f32.mrf.mxu1 }
 0x118   : > { %v7493_v27 = vadd.f32 %v5473_v26, %v5472_v24  ;;  %v7499_v41 = vadd.f32 %v5521_v39, %v5520_v25  ;;  %2402 = vmatprep.mubr.bf16.mxu1 %v7501_v45 }
 0x119   : > { %v5475_v40 = vpop.f32.mrf.mxu0  ;;  %v5523_v30 = vpop.f32.mrf.mxu1 }
 0x11b   : > { %v5476_v53 = vpop.f32.mrf.mxu0  ;;  %v5524_v36 = vpop.f32.mrf.mxu1 }
 0x11c   : > { %v7504_v54 = vadd.f32 %v5476_v53, %v5475_v40  ;;  %v7506_v59 = vadd.f32 %v5524_v36, %v5523_v30  ;;  %v7523_v40 = vld [vmem:[#allocation2 + $0x84] ss:$8 sps:$4 sm:$0xff]   ;;  %v7526_v53 = vld [vmem:[#allocation2 + $0x80] ss:$8 sps:$4 sm:$0xff]  }
 0x11d   : > { %v5478_v42 = vpop.f32.mrf.mxu0  ;;  %2660 = vmatmul.mubr.bf16.gmra.mxu0 %v7496_v34  ;;  %v5526_v51 = vpop.f32.mrf.mxu1 }
 0x11e   : > { %8455 = vst [vmem:[#allocation5_spill] sm:$0xff] %v7506_v59  ;;  %2667 = vmatprep.mubr.bf16.mxu0 %v7501_v45 }
 0x11f   : > { %v5479_v60 = vpop.f32.mrf.mxu0  ;;  %2403 = vmatmul.mubr.bf16.gmra.mxu1 %v7512_v6  ;;  %v5527_v38 = vpop.f32.mrf.mxu1 }
 0x120   : > { %v7509_v62 = vadd.f32 %v5479_v60, %v5478_v42  ;;  %2410 = vmatprep.mubr.bf16.mxu1 %v7118_v23  ;;  %v7516_v49 = vadd.f32 %v5527_v38, %v5526_v51 }
 0x121   : > { %v5481_v7 = vpop.f32.mrf.mxu0  ;;  %v5529_v3 = vpop.f32.mrf.mxu1 }
 0x122   : > { %8456 = vst [vmem:[#allocation6_spill] sm:$0xff] %v7516_v49 }
 0x123   : > { %v5482_v57 = vpop.f32.mrf.mxu0  ;;  %v5530_v25 = vpop.f32.mrf.mxu1 }
 0x124   : > { %v7518_v24 = vadd.f32 %v5482_v57, %v5481_v7  ;;  %v7520_v26 = vadd.f32 %v5530_v25, %v5529_v3 }
 0x125   : > { %v5484_v39 = vpop.f32.mrf.mxu0  ;;  %2668 = vmatmul.mubr.bf16.gmra.mxu0 %v7512_v6  ;;  %v5532_v30 = vpop.f32.mrf.mxu1 }
 0x126   : > { %8457 = vst [vmem:[#allocation7_spill] sm:$0xff] %v7520_v26  ;;  %2675 = vmatprep.mubr.bf16.mxu0 %v7523_v40 }
 0x127   : > { %2411 = vmatmul.mubr.bf16.gmra.mxu1 %v7526_v53  ;;  %v5485_v23 = vpop.f32.mrf.mxu0  ;;  %v5533_v42 = vpop.f32.mrf.mxu1 }
 0x128   : > { %v7529_v36 = vadd.f32 %v5485_v23, %v5484_v39  ;;  %2418 = vmatprep.mubr.bf16.mxu1 %v7263_v1  ;;  %v7532_v51 = vadd.f32 %v5533_v42, %v5532_v30 }
 0x129   : > { %v5487_v60 = vpop.f32.mrf.mxu0  ;;  %v5535_v7 = vpop.f32.mrf.mxu1 }
 0x12a   : > { %8458 = vst [vmem:[#allocation8_spill] sm:$0xff] %v7532_v51 }
 0x12b   : > { %v5488_v38 = vpop.f32.mrf.mxu0  ;;  %v5536_v3 = vpop.f32.mrf.mxu1 }
 0x12c   : > { %v7534_v57 = vadd.f32 %v5488_v38, %v5487_v60  ;;  %v7537_v35 = vadd.f32 %v5536_v3, %v5535_v7 }
 0x12d   : > { %v5666_v25 = vpop.f32.mrf.mxu0  ;;  %2676 = vmatmul.mubr.bf16.gmra.mxu0 %v7526_v53  ;;  %v5554_v39 = vpop.f32.mrf.mxu1 }
 0x12e   : > { %2683 = vmatprep.mubr.bf16.mxu0 %v7263_v1 }
 0x12f   : > { %2419 = vmatmul.mubr.bf16.gmra.mxu1 %v7268_v13  ;;  %v5667_v23 = vpop.f32.mrf.mxu0  ;;  %v5555_v30 = vpop.f32.mrf.mxu1 }
 0x130   : > { %v5668_v28 = vadd.f32 %v5667_v23, %v5666_v25  ;;  %2426 = vmatprep.mubr.bf16.mxu1 %v7271_v14  ;;  %v5556_v51 = vadd.f32 %v5555_v30, %v5554_v39 }
 0x131   : > { %v5669_v42 = vpop.f32.mrf.mxu0  ;;  %v5557_v60 = vpop.f32.mrf.mxu1 }
 0x132   : > { %v1519_v26 = vadd.f32 %v5556_v51, %v7329_v5 }
 0x133   : > { %v5670_v38 = vpop.f32.mrf.mxu0  ;;  %v5558_v59 = vpop.f32.mrf.mxu1 }
 0x134   : > { %v5671_v49 = vadd.f32 %v5670_v38, %v5669_v42  ;;  %v7544_v1 = vadd.f32 %v5668_v28, %v1519_v26  ;;  %v5559_v3 = vadd.f32 %v5558_v59, %v5557_v60 }
 0x135   : > { %v5672_v7 = vpop.f32.mrf.mxu0  ;;  %2684 = vmatmul.mubr.bf16.gmra.mxu0 %v7268_v13  ;;  %v5560_v25 = vpop.f32.mrf.mxu1 }
 0x136   : > { %8459 = vst [vmem:[#allocation9_spill] sm:$0xff] %v7544_v1  ;;  %2691 = vmatprep.mubr.bf16.mxu0 %v7271_v14  ;;  %v1522_v39 = vadd.f32 %v5559_v3, %v7352_v29 }
 0x137   : > { %2427 = vmatmul.mubr.bf16.gmra.mxu1 %v7276_v31  ;;  %v5673_v23 = vpop.f32.mrf.mxu0  ;;  %v5561_v5 = vpop.f32.mrf.mxu1 }
 0x138   : > { %v5674_v30 = vadd.f32 %v5673_v23, %v5672_v7  ;;  %2434 = vmatprep.mubr.bf16.mxu1 %v7291_v4  ;;  %v7550_v42 = vadd.f32 %v5671_v49, %v1522_v39  ;;  %v5562_v38 = vadd.f32 %v5561_v5, %v5560_v25  ;;  %v7559_v23 = vld [vmem:[#allocation2 + $0xc4] ss:$8 sps:$4 sm:$0xff]  }
 0x139   : > { %v5675_v51 = vpop.f32.mrf.mxu0  ;;  %v5563_v13 = vpop.f32.mrf.mxu1 }
 0x13a   : > { %v1527_v59 = vadd.f32 %v5562_v38, %v7369_v47 }
 0x13b   : > { %v5676_v28 = vpop.f32.mrf.mxu0  ;;  %v5564_v14 = vpop.f32.mrf.mxu1 }
 0x13c   : > { %v5677_v26 = vadd.f32 %v5676_v28, %v5675_v51  ;;  %v7554_v1 = vadd.f32 %v5674_v30, %v1527_v59  ;;  %v5565_v29 = vadd.f32 %v5564_v14, %v5563_v13 }
 0x13d   : > { %v5678_v60 = vpop.f32.mrf.mxu0  ;;  %2692 = vmatmul.mubr.bf16.gmra.mxu0 %v7276_v31 }
 0x13e   : > { %2699 = vmatprep.mubr.bf16.mxu0 %v7291_v4  ;;  %v1530_v3 = vadd.f32 %v5565_v29, %v7392_v61 }
 0x13f   : > { %v5566_v7 = vpop.f32.mrf.mxu1  ;;  %2435 = vmatmul.mubr.bf16.gmra.mxu1 %v7282_v32  ;;  %v5679_v49 = vpop.f32.mrf.mxu0 }
 0x140   : > { %v5680_v25 = vadd.f32 %v5679_v49, %v5678_v60  ;;  %2442 = vmatprep.mubr.bf16.mxu1 %v7559_v23  ;;  %v7562_v5 = vadd.f32 %v5677_v26, %v1530_v3  ;;  %v7569_v60 = vld [vmem:[#allocation2 + $0xc0] ss:$8 sps:$4 sm:$0xff]  }
 0x141   : > { %v5567_v47 = vpop.f32.mrf.mxu1  ;;  %v5681_v39 = vpop.f32.mrf.mxu0 }
 0x142   : > { %v5568_v31 = vadd.f32 %v5567_v47, %v5566_v7 }
 0x143   : > { %v5569_v30 = vpop.f32.mrf.mxu1  ;;  %v5682_v51 = vpop.f32.mrf.mxu0 }
 0x144   : > { %v1535_v4 = vadd.f32 %v5568_v31, %v7409_v10  ;;  %v5683_v38 = vadd.f32 %v5682_v51, %v5681_v39  ;;  %v7573_v10 = vld [vmem:[#allocation2 + $0xd4] ss:$8 sps:$4 sm:$0xff]  }
 0x145   : > { %v5570_v13 = vpop.f32.mrf.mxu1  ;;  %v5684_v28 = vpop.f32.mrf.mxu0  ;;  %2700 = vmatmul.mubr.bf16.gmra.mxu0 %v7282_v32 }
 0x146   : > { %v7566_v61 = vadd.f32 %v5680_v25, %v1535_v4  ;;  %v5571_v59 = vadd.f32 %v5570_v13, %v5569_v30  ;;  %2707 = vmatprep.mubr.bf16.mxu0 %v7559_v23 }
 0x147   : > { %v5572_v14 = vpop.f32.mrf.mxu1  ;;  %2443 = vmatmul.mubr.bf16.gmra.mxu1 %v7569_v60  ;;  %v5685_v26 = vpop.f32.mrf.mxu0 }
 0x148   : > { %v1538_v29 = vadd.f32 %v5571_v59, %v7432_v18  ;;  %v5686_v7 = vadd.f32 %v5685_v26, %v5684_v28  ;;  %2450 = vmatprep.mubr.bf16.mxu1 %v7573_v10  ;;  %v7583_v59 = vld [vmem:[#allocation2 + $0xd0] ss:$8 sps:$4 sm:$0xff]  }
 0x149   : > { %v5573_v49 = vpop.f32.mrf.mxu1  ;;  %v5687_v32 = vpop.f32.mrf.mxu0 }
 0x14a   : > { %v7576_v3 = vadd.f32 %v5683_v38, %v1538_v29  ;;  %v5574_v25 = vadd.f32 %v5573_v49, %v5572_v14 }
 0x14b   : > { %v5575_v47 = vpop.f32.mrf.mxu1  ;;  %v5688_v39 = vpop.f32.mrf.mxu0 }
 0x14c   : > { %v1543_v31 = vadd.f32 %v5574_v25, %v7449_v43  ;;  %v5689_v30 = vadd.f32 %v5688_v39, %v5687_v32  ;;  %v7587_v43 = vld [vmem:[#allocation2 + $0xe4] ss:$8 sps:$4 sm:$0xff]  }
 0x14d   : > { %v5576_v51 = vpop.f32.mrf.mxu1  ;;  %v5690_v4 = vpop.f32.mrf.mxu0  ;;  %2708 = vmatmul.mubr.bf16.gmra.mxu0 %v7569_v60 }
 0x14e   : > { %v7580_v18 = vadd.f32 %v5686_v7, %v1543_v31  ;;  %v5577_v13 = vadd.f32 %v5576_v51, %v5575_v47  ;;  %2715 = vmatprep.mubr.bf16.mxu0 %v7573_v10 }
 0x14f   : > { %v5578_v28 = vpop.f32.mrf.mxu1  ;;  %2451 = vmatmul.mubr.bf16.gmra.mxu1 %v7583_v59  ;;  %v5691_v38 = vpop.f32.mrf.mxu0 }
 0x150   : > { %8460 = vst [vmem:[#allocation10_spill] sm:$0xff] %v7580_v18  ;;  %v1546_v14 = vadd.f32 %v5577_v13, %v7472_v0  ;;  %v5692_v26 = vadd.f32 %v5691_v38, %v5690_v4  ;;  %2458 = vmatprep.mubr.bf16.mxu1 %v7587_v43  ;;  %v7597_v38 = vld [vmem:[#allocation2 + $0xe0] ss:$8 sps:$4 sm:$0xff]  }
 0x151   : > { %v5579_v29 = vpop.f32.mrf.mxu1  ;;  %v5693_v49 = vpop.f32.mrf.mxu0 }
 0x152   : > { %v7590_v7 = vadd.f32 %v5689_v30, %v1546_v14  ;;  %v5580_v32 = vadd.f32 %v5579_v29, %v5578_v28 }
 0x153   : > { %v5581_v25 = vpop.f32.mrf.mxu1  ;;  %v5694_v47 = vpop.f32.mrf.mxu0 }
 0x154   : > { %8461 = vst [vmem:[#allocation11_spill] sm:$0xff] %v7590_v7  ;;  %v1551_v39 = vadd.f32 %v5580_v32, %v7477_v8  ;;  %v5695_v31 = vadd.f32 %v5694_v47, %v5693_v49  ;;  %v7601_v8 = vld [vmem:[#allocation2 + $0xf4] ss:$8 sps:$4 sm:$0xff]  }
 0x155   : > { %v5582_v51 = vpop.f32.mrf.mxu1  ;;  %v5696_v18 = vpop.f32.mrf.mxu0  ;;  %2716 = vmatmul.mubr.bf16.gmra.mxu0 %v7583_v59 }
 0x156   : > { %v7594_v0 = vadd.f32 %v5692_v26, %v1551_v39  ;;  %v5583_v4 = vadd.f32 %v5582_v51, %v5581_v25  ;;  %2723 = vmatprep.mubr.bf16.mxu0 %v7587_v43 }
 0x157   : > { %v5584_v13 = vpop.f32.mrf.mxu1  ;;  %2459 = vmatmul.mubr.bf16.gmra.mxu1 %v7597_v38  ;;  %v5697_v30 = vpop.f32.mrf.mxu0 }
 0x158   : > { %8462 = vst [vmem:[#allocation12_spill] sm:$0xff] %v7594_v0  ;;  %v1554_v28 = vadd.f32 %v5583_v4, %v7488_v12  ;;  %v5698_v14 = vadd.f32 %v5697_v30, %v5696_v18  ;;  %2466 = vmatprep.mubr.bf16.mxu1 %v7601_v8  ;;  %v7611_v30 = vld [vmem:[#allocation2 + $0xf0] ss:$8 sps:$4 sm:$0xff]  }
 0x159   : > { %v5585_v29 = vpop.f32.mrf.mxu1  ;;  %v5699_v49 = vpop.f32.mrf.mxu0 }
 0x15a   : > { %v7604_v26 = vadd.f32 %v5695_v31, %v1554_v28  ;;  %v5586_v32 = vadd.f32 %v5585_v29, %v5584_v13 }
 0x15b   : > { %v5587_v25 = vpop.f32.mrf.mxu1  ;;  %v5700_v47 = vpop.f32.mrf.mxu0 }
 0x15c   : > { %8463 = vst [vmem:[#allocation13_spill] sm:$0xff] %v7604_v26  ;;  %v1559_v39 = vadd.f32 %v5586_v32, %v7493_v27  ;;  %v5701_v51 = vadd.f32 %v5700_v47, %v5699_v49  ;;  %v7615_v27 = vld [vmem:[#allocation2 + $0x104] ss:$8 sps:$4 sm:$0xff]  }
 0x15d   : > { %v5588_v0 = vpop.f32.mrf.mxu1  ;;  %v5702_v7 = vpop.f32.mrf.mxu0  ;;  %2724 = vmatmul.mubr.bf16.gmra.mxu0 %v7597_v38 }
 0x15e   : > { %v7608_v12 = vadd.f32 %v5698_v14, %v1559_v39  ;;  %v5589_v18 = vadd.f32 %v5588_v0, %v5587_v25  ;;  %2731 = vmatprep.mubr.bf16.mxu0 %v7601_v8 }
 0x15f   : > { %v5590_v4 = vpop.f32.mrf.mxu1  ;;  %2467 = vmatmul.mubr.bf16.gmra.mxu1 %v7611_v30  ;;  %v5703_v31 = vpop.f32.mrf.mxu0 }
 0x160   : > { %8464 = vst [vmem:[#allocation14_spill] sm:$0xff] %v7608_v12  ;;  %v1562_v13 = vadd.f32 %v5589_v18, %v7504_v54  ;;  %v5704_v28 = vadd.f32 %v5703_v31, %v5702_v7  ;;  %2474 = vmatprep.mubr.bf16.mxu1 %v7615_v27  ;;  %v7625_v31 = vld [vmem:[#allocation2 + $0x100] ss:$8 sps:$4 sm:$0xff]  }
 0x161   : > { %v5591_v29 = vpop.f32.mrf.mxu1  ;;  %v5705_v49 = vpop.f32.mrf.mxu0 }
 0x162   : > { %v7618_v14 = vadd.f32 %v5701_v51, %v1562_v13  ;;  %v5592_v0 = vadd.f32 %v5591_v29, %v5590_v4 }
 0x163   : > { %v5593_v32 = vpop.f32.mrf.mxu1  ;;  %v5706_v25 = vpop.f32.mrf.mxu0 }
 0x164   : > { %v1567_v47 = vadd.f32 %v5592_v0, %v7509_v62  ;;  %v5707_v39 = vadd.f32 %v5706_v25, %v5705_v49  ;;  %v6636_v25 = vld [vmem:[%s8442_s6 + $0x138] sm:$0xff]  }
 0x165   : > { %v5594_v12 = vpop.f32.mrf.mxu1  ;;  %v5708_v26 = vpop.f32.mrf.mxu0  ;;  %2732 = vmatmul.mubr.bf16.gmra.mxu0 %v7611_v30 }
 0x166   : > { %v7622_v54 = vadd.f32 %v5704_v28, %v1567_v47  ;;  %v5595_v7 = vadd.f32 %v5594_v12, %v5593_v32  ;;  %3391 = vmatprep.mubr.bf16.mxu0 %v7313_v20  ;;  %v6638_v20 = vld [vmem:[%s8442_s6 + $0x438] sm:$0xff]   ;;  %v6641_v32 = vld [vmem:[%s8442_s6 + $0x470] sm:$0xff]  }
 0x167   : > { %v5596_v18 = vpop.f32.mrf.mxu1  ;;  %2475 = vmatmul.mubr.bf16.gmra.mxu1 %v7625_v31  ;;  %v5709_v51 = vpop.f32.mrf.mxu0 }
 0x168   : > { %v1570_v4 = vadd.f32 %v5595_v7, %v7518_v24  ;;  %v5710_v13 = vadd.f32 %v5709_v51, %v5708_v26  ;;  %2901 = vmatprep.mubr.bf16.mxu1 %v7343_v22  ;;  %v6639_v7 = vld [vmem:[%s8442_s6 + $0x170] sm:$0xff]  }
 0x169   : > { %v5597_v62 = vpop.f32.mrf.mxu1  ;;  %v5711_v29 = vpop.f32.mrf.mxu0 }
 0x16a   : > { %v7630_v49 = vadd.f32 %v5707_v39, %v1570_v4  ;;  %v5598_v28 = vadd.f32 %v5597_v62, %v5596_v18 }
 0x16b   : > { %v5599_v12 = vpop.f32.mrf.mxu1  ;;  %v5712_v0 = vpop.f32.mrf.mxu0 }
 0x16c   : > { %v1575_v24 = vadd.f32 %v5598_v28, %v7529_v36  ;;  %v5713_v26 = vadd.f32 %v5712_v0, %v5711_v29  ;;  %v6642_v36 = vld [vmem:[%s8442_s6 + $0x430] sm:$0xff]  }
 0x16d   : > { %v5600_v47 = vpop.f32.mrf.mxu1  ;;  %v5714_v39 = vpop.f32.mrf.mxu0  ;;  %3392 = vmatmul.mubr.bf16.vlgmr.msra.gmra.mxu0 %v7337_v16  ;;  %v6645_v16 = vld [vmem:[%s8442_s6 + $0x468] sm:$0xff]  }
 0x16e   : > { %v7646_v18 = vadd.f32 %v5710_v13, %v1575_v24  ;;  %v5601_v51 = vadd.f32 %v5600_v47, %v5599_v12  ;;  %6323 = vmatpush3.bf16.msra.mxu0 %v6638_v20  ;;  %3399 = vmatprep.mubr.bf16.mxu0 %v7343_v22  ;;  %v6640_v22 = vld [vmem:[%s8442_s6 + $0x130] sm:$0xff]   ;;  %v6643_v12 = vld [vmem:[%s8442_s6 + $0x168] sm:$0xff]   ;;  %v6649_v47 = vld [vmem:[%s8442_s6 + $0x460] sm:$0xff]  }
 0x16f   : > { %v5602_v4 = vpop.f32.mrf.mxu1  ;;  %2902 = vmatmul.mubr.bf16.vlgmr.msra.gmra.mxu1 %v7377_v52  ;;  %v5715_v62 = vpop.f32.mrf.mxu0  ;;  %6324 = vmatprep.subr.bf16.mxu0 %v6641_v32 }
 0x170   : > { %v1578_v13 = vadd.f32 %v5601_v51, %v7534_v57  ;;  %6211 = vmatpush3.bf16.msra.mxu1 %v6636_v25  ;;  %v5716_v29 = vadd.f32 %v5715_v62, %v5714_v39  ;;  %2909 = vmatprep.mubr.bf16.mxu1 %v7383_v58  ;;  %v6646_v57 = vld [vmem:[%s8442_s6 + $0x428] sm:$0xff]  }
 0x171   : > { %v5603_v28 = vpop.f32.mrf.mxu1  ;;  %v5717_v20 = vpop.f32.mrf.mxu0  ;;  %6212 = vmatprep.subr.bf16.mxu1 %v6639_v7 }
 0x172   : > { %v7664_v0 = vadd.f32 %v5713_v26, %v1578_v13  ;;  %v5604_v32 = vadd.f32 %v5603_v28, %v5602_v4  ;;  %6325 = vmatpush3.bf16.msra.mxu0 %v6642_v36  ;;  %v6644_v26 = vld [vmem:[%s8442_s6 + $0x128] sm:$0xff]   ;;  %v6647_v4 = vld [vmem:[%s8442_s6 + $0x160] sm:$0xff]  }
 0x173   : > { %v5605_v24 = vpop.f32.mrf.mxu1  ;;  %v5718_v25 = vpop.f32.mrf.mxu0  ;;  %6326 = vmatprep.subr.bf16.mxu0 %v6645_v16 }
 0x174   : > { %v1583_v39 = vadd.f32 %v5604_v32, %v7331_v11  ;;  %v5719_v7 = vadd.f32 %v5718_v25, %v5717_v20  ;;  %6213 = vmatpush3.bf16.msra.mxu1 %v6640_v22  ;;  %v6650_v11 = vld [vmem:[%s8442_s6 + $0x420] sm:$0xff]   ;;  %v6651_v32 = vld [vmem:[%s8442_s6 + $0x158] sm:$0xff]  }
 0x175   : > { %v5606_v51 = vpop.f32.mrf.mxu1  ;;  %v5720_v36 = vpop.f32.mrf.mxu0  ;;  %3400 = vmatmul.mubr.bf16.gmra.mxu0 %v7377_v52  ;;  %6214 = vmatprep.subr.bf16.mxu1 %v6643_v12  ;;  %v6653_v52 = vld [vmem:[%s8442_s6 + $0x458] sm:$0xff]  }
 0x176   : > { %v7680_v62 = vadd.f32 %v5716_v29, %v1583_v39  ;;  %v5607_v16 = vadd.f32 %v5606_v51, %v5605_v24  ;;  %3407 = vmatprep.mubr.bf16.mxu0 %v7383_v58  ;;  %6327 = vmatpush3.bf16.msra.mxu0 %v6646_v57  ;;  %v6648_v58 = vld [vmem:[%s8442_s6 + $0x120] sm:$0xff]   ;;  %v6657_v39 = vld [vmem:[%s8442_s6 + $0x450] sm:$0xff]  }
 0x177   : > { %v5608_v13 = vpop.f32.mrf.mxu1  ;;  %2910 = vmatmul.mubr.bf16.gmra.mxu1 %v7417_v37  ;;  %v5721_v22 = vpop.f32.mrf.mxu0  ;;  %6328 = vmatprep.subr.bf16.mxu0 %v6649_v47 }
 0x178   : > { %v1586_v29 = vadd.f32 %v5607_v16, %v7354_v33  ;;  %v5722_v28 = vadd.f32 %v5721_v22, %v5720_v36  ;;  %2917 = vmatprep.mubr.bf16.mxu1 %v7423_v56  ;;  %6215 = vmatpush3.bf16.msra.mxu1 %v6644_v26  ;;  %v6654_v33 = vld [vmem:[%s8442_s6 + $0x418] sm:$0xff]   ;;  %v6655_v16 = vld [vmem:[%s8442_s6 + $0x150] sm:$0xff]  }
 0x179   : > { %v5609_v20 = vpop.f32.mrf.mxu1  ;;  %v5723_v12 = vpop.f32.mrf.mxu0  ;;  %6216 = vmatprep.subr.bf16.mxu1 %v6647_v4 }
 0x17a   : > { %v7698_v57 = vadd.f32 %v5719_v7, %v1586_v29  ;;  %v5610_v24 = vadd.f32 %v5609_v20, %v5608_v13  ;;  %6329 = vmatpush3.bf16.msra.mxu0 %v6650_v11  ;;  %v6652_v7 = vld [vmem:[%s8442_s6 + $0x118] sm:$0xff]  }
 0x17b   : > { %v5611_v25 = vpop.f32.mrf.mxu1  ;;  %v5724_v47 = vpop.f32.mrf.mxu0  ;;  %6330 = vmatprep.subr.bf16.mxu0 %v6653_v52 }
 0x17c   : > { %v1591_v26 = vadd.f32 %v5610_v24, %v7371_v48  ;;  %v5725_v51 = vadd.f32 %v5724_v47, %v5723_v12  ;;  %6217 = vmatpush3.bf16.msra.mxu1 %v6648_v58  ;;  %v6658_v48 = vld [vmem:[%s8442_s6 + $0x410] sm:$0xff]   ;;  %v6659_v12 = vld [vmem:[%s8442_s6 + $0x148] sm:$0xff]   ;;  %v6665_v47 = vld [vmem:[%s8442_s6 + $0x440] sm:$0xff]  }
 0x17d   : > { %v5612_v36 = vpop.f32.mrf.mxu1  ;;  %v5726_v4 = vpop.f32.mrf.mxu0  ;;  %3408 = vmatmul.mubr.bf16.gmra.mxu0 %v7417_v37  ;;  %6218 = vmatprep.subr.bf16.mxu1 %v6651_v32  ;;  %v6661_v37 = vld [vmem:[%s8442_s6 + $0x448] sm:$0xff]  }
 0x17e   : > { %v7714_v11 = vadd.f32 %v5722_v28, %v1591_v26  ;;  %v5613_v13 = vadd.f32 %v5612_v36, %v5611_v25  ;;  %3415 = vmatprep.mubr.bf16.mxu0 %v7423_v56  ;;  %6331 = vmatpush3.bf16.msra.mxu0 %v6654_v33  ;;  %v6656_v56 = vld [vmem:[%s8442_s6 + $0x110] sm:$0xff]  }
 0x17f   : > { %v5614_v22 = vpop.f32.mrf.mxu1  ;;  %2918 = vmatmul.mubr.bf16.gmra.mxu1 %v7457_v46  ;;  %v5727_v52 = vpop.f32.mrf.mxu0  ;;  %6332 = vmatprep.subr.bf16.mxu0 %v6657_v39 }
 0x180   : > { %8465 = vst [vmem:[#allocation15_spill] sm:$0xff] %v7714_v11  ;;  %v1594_v29 = vadd.f32 %v5613_v13, %v7394_v63  ;;  %v5728_v28 = vadd.f32 %v5727_v52, %v5726_v4  ;;  %2925 = vmatprep.mubr.bf16.mxu1 %v7463_v55  ;;  %6219 = vmatpush3.bf16.msra.mxu1 %v6652_v7  ;;  %v6662_v63 = vld [vmem:[%s8442_s6 + $0x408] sm:$0xff]   ;;  %v6663_v4 = vld [vmem:[%s8442_s6 + $0x140] sm:$0xff]  }
 0x181   : > { %v5615_v58 = vpop.f32.mrf.mxu1  ;;  %v5729_v20 = vpop.f32.mrf.mxu0  ;;  %6220 = vmatprep.subr.bf16.mxu1 %v6655_v16  ;;  %v6715_v11 = vld [vmem:[#allocation2 + $0x64] ss:$8 sps:$4 sm:$0xff]  }
 0x182   : > { %v7732_v32 = vadd.f32 %v5725_v51, %v1594_v29  ;;  %v5616_v24 = vadd.f32 %v5615_v58, %v5614_v22  ;;  %6333 = vmatpush3.bf16.msra.mxu0 %v6658_v48  ;;  %v6660_v51 = vld [vmem:[%s8442_s6 + $0x108] sm:$0xff]  }
 0x183   : > { %v5617_v33 = vpop.f32.mrf.mxu1  ;;  %v5730_v25 = vpop.f32.mrf.mxu0  ;;  %6334 = vmatprep.subr.bf16.mxu0 %v6661_v37 }
 0x184   : > { %8466 = vst [vmem:[#allocation16_spill] sm:$0xff] %v7732_v32  ;;  %v1599_v39 = vadd.f32 %v5616_v24, %v7411_v15  ;;  %v5731_v26 = vadd.f32 %v5730_v25, %v5729_v20  ;;  %6221 = vmatpush3.bf16.msra.mxu1 %v6656_v56  ;;  %v6666_v15 = vld [vmem:[%s8442_s6 + $0x400] sm:$0xff]  }
 0x185   : > { %v5618_v7 = vpop.f32.mrf.mxu1  ;;  %v5732_v36 = vpop.f32.mrf.mxu0  ;;  %3416 = vmatmul.mubr.bf16.gmra.mxu0 %v7457_v46  ;;  %6222 = vmatprep.subr.bf16.mxu1 %v6659_v12 }
 0x186   : > { %v7748_v16 = vadd.f32 %v5728_v28, %v1599_v39  ;;  %v5619_v13 = vadd.f32 %v5618_v7, %v5617_v33  ;;  %3423 = vmatprep.mubr.bf16.mxu0 %v7463_v55  ;;  %6335 = vmatpush3.bf16.msra.mxu0 %v6662_v63  ;;  %v6664_v55 = vld [vmem:[%s8442_s6 + $0x100] sm:$0xff]  }
 0x187   : > { %v5620_v48 = vpop.f32.mrf.mxu1  ;;  %2926 = vmatmul.mubr.bf16.gmra.mxu1 %v7482_v21  ;;  %v5733_v22 = vpop.f32.mrf.mxu0  ;;  %6336 = vmatprep.subr.bf16.mxu0 %v6665_v47 }
 0x188   : > { %8467 = vst [vmem:[#allocation17_spill] sm:$0xff] %v7748_v16  ;;  %v1602_v46 = vadd.f32 %v5619_v13, %v7434_v19  ;;  %v5734_v52 = vadd.f32 %v5733_v22, %v5732_v36  ;;  %2933 = vmatprep.mubr.bf16.mxu1 %v7485_v50  ;;  %6223 = vmatpush3.bf16.msra.mxu1 %v6660_v51  ;;  %v6713_v16 = vld [vmem:[#allocation2 + $0x54] ss:$8 sps:$4 sm:$0xff]  }
 0x189   : > { %v5621_v37 = vpop.f32.mrf.mxu1  ;;  %v5735_v29 = vpop.f32.mrf.mxu0  ;;  %6224 = vmatprep.subr.bf16.mxu1 %v6663_v4 }
 0x18a   : > { %v7760_v28 = vadd.f32 %v5731_v26, %v1602_v46  ;;  %v5622_v56 = vadd.f32 %v5621_v37, %v5620_v48  ;;  %6337 = vmatpush3.bf16.msra.mxu0 %v6666_v15 }
 0x18b   : > { %v5623_v58 = vpop.f32.mrf.mxu1  ;;  %v5736_v20 = vpop.f32.mrf.mxu0 }
 0x18c   : > { %8468 = vst [vmem:[#allocation18_spill] sm:$0xff] %v7760_v28  ;;  %v1607_v12 = vadd.f32 %v5622_v56, %v7451_v44  ;;  %v5737_v19 = vadd.f32 %v5736_v20, %v5735_v29  ;;  %6225 = vmatpush3.bf16.msra.mxu1 %v6664_v55 }
 0x18d   : > { %v5624_v24 = vpop.f32.mrf.mxu1  ;;  %v5738_v63 = vpop.f32.mrf.mxu0  ;;  %3424 = vmatmul.mubr.bf16.gmra.mxu0 %v7482_v21 }
 0x18e   : > { %v7764_v33 = vadd.f32 %v5734_v52, %v1607_v12  ;;  %v5625_v25 = vadd.f32 %v5624_v24, %v5623_v58  ;;  %3431 = vmatprep.mubr.bf16.mxu0 %v7485_v50 }
 0x18f   : > { %v5626_v47 = vpop.f32.mrf.mxu1  ;;  %2934 = vmatmul.mubr.bf16.gmra.mxu1 %v7496_v34  ;;  %v5739_v39 = vpop.f32.mrf.mxu0 }
 0x190   : > { %8469 = vst [vmem:[#allocation19_spill] sm:$0xff] %v7764_v33  ;;  %v1610_v26 = vadd.f32 %v5625_v25, %v7474_v2  ;;  %v5740_v51 = vadd.f32 %v5739_v39, %v5738_v63  ;;  %2941 = vmatprep.mubr.bf16.mxu1 %v7501_v45 }
 0x191   : > { %v5627_v44 = vpop.f32.mrf.mxu1  ;;  %v5741_v7 = vpop.f32.mrf.mxu0 }
 0x192   : > { %v7770_v36 = vadd.f32 %v5737_v19, %v1610_v26  ;;  %v5628_v4 = vadd.f32 %v5627_v44, %v5626_v47  ;;  %v8474_v26 = vld [vmem:[#allocation5_spill] sm:$0xff] }
 0x193   : > { %v5629_v21 = vpop.f32.mrf.mxu1  ;;  %v5742_v13 = vpop.f32.mrf.mxu0 }
 0x194   : > { %8470 = vst [vmem:[#allocation20_spill] sm:$0xff] %v7770_v36  ;;  %v1615_v15 = vadd.f32 %v5628_v4, %v7479_v9  ;;  %v5743_v48 = vadd.f32 %v5742_v13, %v5741_v7  ;;  %v7789_v7 = vld [vmem:[#allocation2 + $0x94] ss:$8 sps:$4 sm:$0xff]  }
 0x195   : > { %v5630_v50 = vpop.f32.mrf.mxu1  ;;  %v5744_v22 = vpop.f32.mrf.mxu0  ;;  %3432 = vmatmul.mubr.bf16.gmra.mxu0 %v7496_v34 }
 0x196   : > { %v7774_v46 = vadd.f32 %v5740_v51, %v1615_v15  ;;  %v5631_v2 = vadd.f32 %v5630_v50, %v5629_v21  ;;  %3439 = vmatprep.mubr.bf16.mxu0 %v7501_v45 }
 0x197   : > { %v5632_v52 = vpop.f32.mrf.mxu1  ;;  %2942 = vmatmul.mubr.bf16.gmra.mxu1 %v7512_v6  ;;  %v5745_v55 = vpop.f32.mrf.mxu0 }
 0x198   : > { %8471 = vst [vmem:[#allocation21_spill] sm:$0xff] %v7774_v46  ;;  %v1618_v37 = vadd.f32 %v5631_v2, %v7490_v17  ;;  %v5746_v29 = vadd.f32 %v5745_v55, %v5744_v22  ;;  %2949 = vmatprep.mubr.bf16.mxu1 %v7523_v40  ;;  %v6710_v46 = vld [vmem:[#allocation2 + $0x44] ss:$8 sps:$4 sm:$0xff]  }
 0x199   : > { %v5633_v9 = vpop.f32.mrf.mxu1  ;;  %v5747_v56 = vpop.f32.mrf.mxu0 }
 0x19a   : > { %v7780_v58 = vadd.f32 %v5743_v48, %v1618_v37  ;;  %v5634_v20 = vadd.f32 %v5633_v9, %v5632_v52  ;;  %v8476_v48 = vld [vmem:[#allocation6_spill] sm:$0xff] }
 0x19b   : > { %v5635_v34 = vpop.f32.mrf.mxu1  ;;  %v5748_v12 = vpop.f32.mrf.mxu0 }
 0x19c   : > { %8472 = vst [vmem:[#allocation22_spill] sm:$0xff] %v7780_v58  ;;  %v1623_v19 = vadd.f32 %v5634_v20, %v7499_v41  ;;  %v5749_v24 = vadd.f32 %v5748_v12, %v5747_v56  ;;  %v8478_v56 = vld [vmem:[#allocation7_spill] sm:$0xff] }
 0x19d   : > { %v5636_v45 = vpop.f32.mrf.mxu1  ;;  %v5750_v63 = vpop.f32.mrf.mxu0  ;;  %3440 = vmatmul.mubr.bf16.gmra.mxu0 %v7512_v6  ;;  %v7803_v12 = vld [vmem:[#allocation2 + $0xa4] ss:$8 sps:$4 sm:$0xff]  }
 0x19e   : > { %v7784_v25 = vadd.f32 %v5746_v29, %v1623_v19  ;;  %v5637_v17 = vadd.f32 %v5636_v45, %v5635_v34  ;;  %3447 = vmatprep.mubr.bf16.mxu0 %v7523_v40  ;;  %v7799_v29 = vld [vmem:[#allocation2 + $0x90] ss:$8 sps:$4 sm:$0xff]  }
 0x19f   : > { %v5638_v47 = vpop.f32.mrf.mxu1  ;;  %2950 = vmatmul.mubr.bf16.gmra.mxu1 %v7526_v53  ;;  %v5751_v39 = vpop.f32.mrf.mxu0 }
 0x1a0   : > { %8473 = vst [vmem:[#allocation23_spill] sm:$0xff] %v7784_v25  ;;  %v1626_v51 = vadd.f32 %v5637_v17, %v8474_v26  ;;  %v5752_v44 = vadd.f32 %v5751_v39, %v5750_v63  ;;  %2957 = vmatprep.mubr.bf16.mxu1 %v7789_v7  ;;  %v6709_v25 = vld [vmem:[#allocation2 + $0x30] ss:$8 sps:$4 sm:$0xff]  }
 0x1a1   : > { %v5639_v41 = vpop.f32.mrf.mxu1  ;;  %v5753_v4 = vpop.f32.mrf.mxu0 }
 0x1a2   : > { %v7792_v21 = vadd.f32 %v5749_v24, %v1626_v51  ;;  %v5640_v6 = vadd.f32 %v5639_v41, %v5638_v47  ;;  %v8480_v47 = vld [vmem:[#allocation8_spill] sm:$0xff] }
 0x1a3   : > { %v5641_v13 = vpop.f32.mrf.mxu1  ;;  %v5754_v15 = vpop.f32.mrf.mxu0 }
 0x1a4   : > { %8475 = vst [vmem:[#allocation5_spill] sm:$0xff] %v7792_v21  ;;  %v1631_v40 = vadd.f32 %v5640_v6, %v8476_v48  ;;  %v5755_v50 = vadd.f32 %v5754_v15, %v5753_v4 }
 0x1a5   : > { %v5642_v22 = vpop.f32.mrf.mxu1  ;;  %v5756_v2 = vpop.f32.mrf.mxu0  ;;  %3448 = vmatmul.mubr.bf16.gmra.mxu0 %v7526_v53 }
 0x1a6   : > { %v7796_v52 = vadd.f32 %v5752_v44, %v1631_v40  ;;  %v5643_v55 = vadd.f32 %v5642_v22, %v5641_v13  ;;  %3455 = vmatprep.mubr.bf16.mxu0 %v7789_v7  ;;  %v7813_v13 = vld [vmem:[#allocation2 + $0xa0] ss:$8 sps:$4 sm:$0xff]  }
 0x1a7   : > { %v5644_v37 = vpop.f32.mrf.mxu1  ;;  %2958 = vmatmul.mubr.bf16.gmra.mxu1 %v7799_v29  ;;  %v5757_v9 = vpop.f32.mrf.mxu0 }
 0x1a8   : > { %8477 = vst [vmem:[#allocation6_spill] sm:$0xff] %v7796_v52  ;;  %v1634_v20 = vadd.f32 %v5643_v55, %v8478_v56  ;;  %v5758_v34 = vadd.f32 %v5757_v9, %v5756_v2  ;;  %2965 = vmatprep.mubr.bf16.mxu1 %v7803_v12 }
 0x1a9   : > { %v5645_v19 = vpop.f32.mrf.mxu1  ;;  %v5759_v53 = vpop.f32.mrf.mxu0 }
 0x1aa   : > { %v7806_v24 = vadd.f32 %v5755_v50, %v1634_v20  ;;  %v5646_v45 = vadd.f32 %v5645_v19, %v5644_v37  ;;  %v7817_v50 = vld [vmem:[#allocation2 + $0xb4] ss:$8 sps:$4 sm:$0xff]  }
 0x1ab   : > { %v5647_v63 = vpop.f32.mrf.mxu1  ;;  %v5760_v17 = vpop.f32.mrf.mxu0 }
 0x1ac   : > { %8479 = vst [vmem:[#allocation7_spill] sm:$0xff] %v7806_v24  ;;  %v1639_v39 = vadd.f32 %v5646_v45, %v8480_v47  ;;  %v5761_v26 = vadd.f32 %v5760_v17, %v5759_v53  ;;  %v6707_v24 = vld [vmem:[#allocation2 + $0x34] ss:$8 sps:$4 sm:$0xff]  }
 0x1ad   : > { %v5648_v51 = vpop.f32.mrf.mxu1  ;;  %v5890_v44 = vpop.f32.mrf.mxu0  ;;  %3456 = vmatmul.mubr.bf16.gmra.mxu0 %v7799_v29 }
 0x1ae   : > { %v7810_v41 = vadd.f32 %v5758_v34, %v1639_v39  ;;  %v5649_v4 = vadd.f32 %v5648_v51, %v5647_v63  ;;  %3463 = vmatprep.mubr.bf16.mxu0 %v7803_v12  ;;  %v7826_v63 = vld [vmem:[#allocation2 + $0xb0] ss:$8 sps:$4 sm:$0xff]  }
 0x1af   : > { %v5778_v6 = vpop.f32.mrf.mxu1  ;;  %2966 = vmatmul.mubr.bf16.gmra.mxu1 %v7813_v13  ;;  %v5891_v15 = vpop.f32.mrf.mxu0 }
 0x1b0   : > { %8481 = vst [vmem:[#allocation8_spill] sm:$0xff] %v7810_v41  ;;  %v1642_v48 = vadd.f32 %v5649_v4, %v7537_v35  ;;  %v5892_v40 = vadd.f32 %v5891_v15, %v5890_v44  ;;  %2973 = vmatprep.mubr.bf16.mxu1 %v7817_v50 }
 0x1b1   : > { %v5779_v22 = vpop.f32.mrf.mxu1  ;;  %v5893_v2 = vpop.f32.mrf.mxu0 }
 0x1b2   : > { %v7820_v55 = vadd.f32 %v5761_v26, %v1642_v48  ;;  %v5780_v37 = vadd.f32 %v5779_v22, %v5778_v6 }
 0x1b3   : > { %v5781_v9 = vpop.f32.mrf.mxu1  ;;  %v5894_v56 = vpop.f32.mrf.mxu0 }
 0x1b4   : > { %8482 = vst [vmem:[#allocation24_spill] sm:$0xff] %v7820_v55  ;;  %v7822_v20 = vadd.f32 %v5892_v40, %v5780_v37  ;;  %v5895_v34 = vadd.f32 %v5894_v56, %v5893_v2  ;;  %v6706_v55 = vld [vmem:[#allocation2 + $0x20] ss:$8 sps:$4 sm:$0xff]  }
 0x1b5   : > { %v5782_v19 = vpop.f32.mrf.mxu1  ;;  %v5896_v53 = vpop.f32.mrf.mxu0  ;;  %3464 = vmatmul.mubr.bf16.gmra.mxu0 %v7813_v13 }
 0x1b6   : > { %v5783_v35 = vadd.f32 %v5782_v19, %v5781_v9  ;;  %3471 = vmatprep.mubr.bf16.mxu0 %v7817_v50 }
 0x1b7   : > { %v5784_v45 = vpop.f32.mrf.mxu1  ;;  %2974 = vmatmul.mubr.bf16.gmra.mxu1 %v7826_v63  ;;  %v5897_v17 = vpop.f32.mrf.mxu0 }
 0x1b8   : > { %v7829_v47 = vadd.f32 %v5895_v34, %v5783_v35  ;;  %v5898_v39 = vadd.f32 %v5897_v17, %v5896_v53  ;;  %2981 = vmatprep.mubr.bf16.mxu1 %v7559_v23 }
 0x1b9   : > { %v5785_v26 = vpop.f32.mrf.mxu1  ;;  %v5899_v51 = vpop.f32.mrf.mxu0 }
 0x1ba   : > { %v5786_v44 = vadd.f32 %v5785_v26, %v5784_v45 }
 0x1bb   : > { %v5787_v4 = vpop.f32.mrf.mxu1  ;;  %v5900_v6 = vpop.f32.mrf.mxu0 }
 0x1bc   : > { %v7832_v15 = vadd.f32 %v5898_v39, %v5786_v44  ;;  %v5901_v48 = vadd.f32 %v5900_v6, %v5899_v51 }
 0x1bd   : > { %v5788_v40 = vpop.f32.mrf.mxu1  ;;  %v5902_v22 = vpop.f32.mrf.mxu0  ;;  %3472 = vmatmul.mubr.bf16.gmra.mxu0 %v7826_v63 }
 0x1be   : > { %v5789_v2 = vadd.f32 %v5788_v40, %v5787_v4  ;;  %3479 = vmatprep.mubr.bf16.mxu0 %v7559_v23 }
 0x1bf   : > { %v5790_v37 = vpop.f32.mrf.mxu1  ;;  %2982 = vmatmul.mubr.bf16.gmra.mxu1 %v7569_v60  ;;  %v5903_v9 = vpop.f32.mrf.mxu0 }
 0x1c0   : > { %v7837_v56 = vadd.f32 %v5901_v48, %v5789_v2  ;;  %v5904_v34 = vadd.f32 %v5903_v9, %v5902_v22  ;;  %2989 = vmatprep.mubr.bf16.mxu1 %v7573_v10 }
 0x1c1   : > { %v5791_v19 = vpop.f32.mrf.mxu1  ;;  %v5905_v53 = vpop.f32.mrf.mxu0 }
 0x1c2   : > { %v5792_v35 = vadd.f32 %v5791_v19, %v5790_v37 }
 0x1c3   : > { %v5793_v45 = vpop.f32.mrf.mxu1  ;;  %v5906_v17 = vpop.f32.mrf.mxu0 }
 0x1c4   : > { %v7840_v39 = vadd.f32 %v5904_v34, %v5792_v35  ;;  %v5907_v26 = vadd.f32 %v5906_v17, %v5905_v53 }
 0x1c5   : > { %v5794_v51 = vpop.f32.mrf.mxu1  ;;  %v5908_v44 = vpop.f32.mrf.mxu0  ;;  %3480 = vmatmul.mubr.bf16.gmra.mxu0 %v7569_v60 }
 0x1c6   : > { %v5795_v23 = vadd.f32 %v5794_v51, %v5793_v45  ;;  %3487 = vmatprep.mubr.bf16.mxu0 %v7573_v10 }
 0x1c7   : > { %v5796_v4 = vpop.f32.mrf.mxu1  ;;  %2990 = vmatmul.mubr.bf16.gmra.mxu1 %v7583_v59  ;;  %v5909_v6 = vpop.f32.mrf.mxu0 }
 0x1c8   : > { %v7845_v48 = vadd.f32 %v5907_v26, %v5795_v23  ;;  %v5910_v40 = vadd.f32 %v5909_v6, %v5908_v44  ;;  %2997 = vmatprep.mubr.bf16.mxu1 %v7587_v43 }
 0x1c9   : > { %v5797_v22 = vpop.f32.mrf.mxu1  ;;  %v5911_v2 = vpop.f32.mrf.mxu0 }
 0x1ca   : > { %v5798_v37 = vadd.f32 %v5797_v22, %v5796_v4 }
 0x1cb   : > { %v5799_v9 = vpop.f32.mrf.mxu1  ;;  %v5912_v34 = vpop.f32.mrf.mxu0 }
 0x1cc   : > { %v7848_v19 = vadd.f32 %v5910_v40, %v5798_v37  ;;  %v5913_v60 = vadd.f32 %v5912_v34, %v5911_v2 }
 0x1cd   : > { %v5800_v53 = vpop.f32.mrf.mxu1  ;;  %v5914_v35 = vpop.f32.mrf.mxu0  ;;  %3488 = vmatmul.mubr.bf16.gmra.mxu0 %v7583_v59 }
 0x1ce   : > { %v5801_v10 = vadd.f32 %v5800_v53, %v5799_v9  ;;  %3495 = vmatprep.mubr.bf16.mxu0 %v7587_v43 }
 0x1cf   : > { %v5802_v45 = vpop.f32.mrf.mxu1  ;;  %2998 = vmatmul.mubr.bf16.gmra.mxu1 %v7597_v38  ;;  %v5915_v17 = vpop.f32.mrf.mxu0 }
 0x1d0   : > { %v7853_v26 = vadd.f32 %v5913_v60, %v5801_v10  ;;  %v5916_v51 = vadd.f32 %v5915_v17, %v5914_v35  ;;  %3005 = vmatprep.mubr.bf16.mxu1 %v7601_v8 }
 0x1d1   : > { %v5803_v44 = vpop.f32.mrf.mxu1  ;;  %v5917_v23 = vpop.f32.mrf.mxu0 }
 0x1d2   : > { %v5804_v4 = vadd.f32 %v5803_v44, %v5802_v45 }
 0x1d3   : > { %v5805_v6 = vpop.f32.mrf.mxu1  ;;  %v5918_v40 = vpop.f32.mrf.mxu0 }
 0x1d4   : > { %v7856_v22 = vadd.f32 %v5916_v51, %v5804_v4  ;;  %v5919_v59 = vadd.f32 %v5918_v40, %v5917_v23 }
 0x1d5   : > { %v5806_v2 = vpop.f32.mrf.mxu1  ;;  %v5920_v37 = vpop.f32.mrf.mxu0  ;;  %3496 = vmatmul.mubr.bf16.gmra.mxu0 %v7597_v38 }
 0x1d6   : > { %v5807_v43 = vadd.f32 %v5806_v2, %v5805_v6  ;;  %3503 = vmatprep.mubr.bf16.mxu0 %v7601_v8 }
 0x1d7   : > { %v5808_v9 = vpop.f32.mrf.mxu1  ;;  %3006 = vmatmul.mubr.bf16.gmra.mxu1 %v7611_v30  ;;  %v5921_v34 = vpop.f32.mrf.mxu0 }
 0x1d8   : > { %v7861_v60 = vadd.f32 %v5919_v59, %v5807_v43  ;;  %v5922_v53 = vadd.f32 %v5921_v34, %v5920_v37  ;;  %3013 = vmatprep.mubr.bf16.mxu1 %v7615_v27  ;;  %v8483_v37 = vld [vmem:[#allocation3_spill] sm:$0xff] }
 0x1d9   : > { %v5809_v35 = vpop.f32.mrf.mxu1  ;;  %v5923_v10 = vpop.f32.mrf.mxu0 }
 0x1da   : > { %v5810_v45 = vadd.f32 %v5809_v35, %v5808_v9 }
 0x1db   : > { %v5811_v17 = vpop.f32.mrf.mxu1  ;;  %v5924_v51 = vpop.f32.mrf.mxu0 }
 0x1dc   : > { %v7864_v44 = vadd.f32 %v5922_v53, %v5810_v45  ;;  %v5925_v38 = vadd.f32 %v5924_v51, %v5923_v10  ;;  %v6705_v51 = vld [vmem:[#allocation2 + $0x24] ss:$8 sps:$4 sm:$0xff]  }
 0x1dd   : > { %v5812_v23 = vpop.f32.mrf.mxu1  ;;  %v5926_v4 = vpop.f32.mrf.mxu0  ;;  %3504 = vmatmul.mubr.bf16.gmra.mxu0 %v7611_v30 }
 0x1de   : > { %v5813_v8 = vadd.f32 %v5812_v23, %v5811_v17  ;;  %3511 = vmatprep.mubr.bf16.mxu0 %v7615_v27  ;;  %v8484_v23 = vld [vmem:[#allocation4_spill] sm:$0xff] }
 0x1df   : > { %v5814_v6 = vpop.f32.mrf.mxu1  ;;  %3014 = vmatmul.mubr.bf16.gmra.mxu1 %v7625_v31  ;;  %v5927_v40 = vpop.f32.mrf.mxu0 }
 0x1e0   : > { %v7869_v59 = vadd.f32 %v5925_v38, %v5813_v8  ;;  %v5928_v2 = vadd.f32 %v5927_v40, %v5926_v4  ;;  %3021 = vmatprep.mubr.bf16.mxu1 %v8483_v37 }
 0x1e1   : > { %v5815_v43 = vpop.f32.mrf.mxu1  ;;  %v5929_v9 = vpop.f32.mrf.mxu0 }
 0x1e2   : > { %v5816_v34 = vadd.f32 %v5815_v43, %v5814_v6 }
 0x1e3   : > { %v5817_v53 = vpop.f32.mrf.mxu1  ;;  %v5930_v35 = vpop.f32.mrf.mxu0 }
 0x1e4   : > { %v7872_v10 = vadd.f32 %v5928_v2, %v5816_v34  ;;  %v5931_v30 = vadd.f32 %v5930_v35, %v5929_v9 }
 0x1e5   : > { %v5818_v45 = vpop.f32.mrf.mxu1  ;;  %v5932_v17 = vpop.f32.mrf.mxu0  ;;  %3512 = vmatmul.mubr.bf16.gmra.mxu0 %v7625_v31 }
 0x1e6   : > { %v5819_v27 = vadd.f32 %v5818_v45, %v5817_v53  ;;  %3938 = vmatprep.mubr.bf16.mxu0 %v6705_v51 }
 0x1e7   : > { %v5820_v38 = vpop.f32.mrf.mxu1  ;;  %3022 = vmatmul.mubr.bf16.gmra.mxu1 %v8484_v23  ;;  %v5933_v4 = vpop.f32.mrf.mxu0 }
 0x1e8   : > { %v7876_v8 = vadd.f32 %v5931_v30, %v5819_v27  ;;  %v5934_v40 = vadd.f32 %v5933_v4, %v5932_v17  ;;  %3648 = vmatprep.mubr.bf16.mxu1 %v8483_v37 }
 0x1e9   : > { %v5821_v6 = vpop.f32.mrf.mxu1  ;;  %v5935_v2 = vpop.f32.mrf.mxu0 }
 0x1ea   : > { %v5822_v43 = vadd.f32 %v5821_v6, %v5820_v38  ;;  %v6708_v38 = vld [vmem:[#allocation2 + $0x14] ss:$8 sps:$4 sm:$0xff]  }
 0x1eb   : > { %v5823_v9 = vpop.f32.mrf.mxu1  ;;  %v5936_v34 = vpop.f32.mrf.mxu0 }
 0x1ec   : > { %v7879_v35 = vadd.f32 %v5934_v40, %v5822_v43  ;;  %v5937_v31 = vadd.f32 %v5936_v34, %v5935_v2 }
 0x1ed   : > { %v5824_v53 = vpop.f32.mrf.mxu1  ;;  %v5938_v45 = vpop.f32.mrf.mxu0  ;;  %3939 = vmatmul.mubr.bf16.vlgmr.msra.gmra.mxu0 %v6706_v55 }
 0x1ee   : > { %v5825_v41 = vadd.f32 %v5824_v53, %v5823_v9  ;;  %3946 = vmatprep.mubr.bf16.mxu0 %v6707_v24 }
 0x1ef   : > { %v5826_v30 = vpop.f32.mrf.mxu1  ;;  %3649 = vmatmul.mubr.bf16.vlgmr.msra.gmra.mxu1 %v8484_v23  ;;  %v5939_v17 = vpop.f32.mrf.mxu0 }
 0x1f0   : > { %v7882_v27 = vadd.f32 %v5937_v31, %v5825_v41  ;;  %v5940_v4 = vadd.f32 %v5939_v17, %v5938_v45  ;;  %3656 = vmatprep.mubr.bf16.mxu1 %v6708_v38  ;;  %v6711_v31 = vld [vmem:[#allocation2 + $0x10] ss:$8 sps:$4 sm:$0xff]  }
 0x1f1   : > { %v5827_v6 = vpop.f32.mrf.mxu1  ;;  %v5941_v40 = vpop.f32.mrf.mxu0 }
 0x1f2   : > { %v5828_v43 = vadd.f32 %v5827_v6, %v5826_v30 }
 0x1f3   : > { %v5829_v2 = vpop.f32.mrf.mxu1  ;;  %v5942_v34 = vpop.f32.mrf.mxu0 }
 0x1f4   : > { %v7884_v52 = vadd.f32 %v5940_v4, %v5828_v43  ;;  %v5943_v21 = vadd.f32 %v5942_v34, %v5941_v40 }
 0x1f5   : > { %v5830_v9 = vpop.f32.mrf.mxu1  ;;  %v5944_v53 = vpop.f32.mrf.mxu0  ;;  %3947 = vmatmul.mubr.bf16.gmra.mxu0 %v6709_v25 }
 0x1f6   : > { %v5831_v58 = vadd.f32 %v5830_v9, %v5829_v2  ;;  %3954 = vmatprep.mubr.bf16.mxu0 %v6710_v46  ;;  %v6712_v9 = vld [vmem:[#allocation2 + $0x40] ss:$8 sps:$4 sm:$0xff]  }
 0x1f7   : > { %v5832_v41 = vpop.f32.mrf.mxu1  ;;  %3657 = vmatmul.mubr.bf16.gmra.mxu1 %v6711_v31  ;;  %v5945_v45 = vpop.f32.mrf.mxu0 }
 0x1f8   : > { %v7886_v17 = vadd.f32 %v5943_v21, %v5831_v58  ;;  %v5946_v38 = vadd.f32 %v5945_v45, %v5944_v53  ;;  %3664 = vmatprep.mubr.bf16.mxu1 %v6705_v51 }
 0x1f9   : > { %v5833_v30 = vpop.f32.mrf.mxu1  ;;  %v5947_v6 = vpop.f32.mrf.mxu0 }
 0x1fa   : > { %v5834_v4 = vadd.f32 %v5833_v30, %v5832_v41 }
 0x1fb   : > { %v5835_v43 = vpop.f32.mrf.mxu1  ;;  %v5948_v40 = vpop.f32.mrf.mxu0 }
 0x1fc   : > { %v7888_v34 = vadd.f32 %v5946_v38, %v5834_v4  ;;  %v5949_v36 = vadd.f32 %v5948_v40, %v5947_v6 }
 0x1fd   : > { %v5836_v33 = vpop.f32.mrf.mxu1  ;;  %v5950_v2 = vpop.f32.mrf.mxu0  ;;  %3955 = vmatmul.mubr.bf16.gmra.mxu0 %v6712_v9 }
 0x1fe   : > { %v5837_v28 = vadd.f32 %v5836_v33, %v5835_v43  ;;  %3962 = vmatprep.mubr.bf16.mxu0 %v6713_v16  ;;  %v6714_v33 = vld [vmem:[#allocation2 + $0x50] ss:$8 sps:$4 sm:$0xff]  }
 0x1ff   : > { %v5838_v31 = vpop.f32.mrf.mxu1  ;;  %3665 = vmatmul.mubr.bf16.gmra.mxu1 %v6706_v55  ;;  %v5951_v58 = vpop.f32.mrf.mxu0 }
 0x200   : > { %v7890_v21 = vadd.f32 %v5949_v36, %v5837_v28  ;;  %v5952_v51 = vadd.f32 %v5951_v58, %v5950_v2  ;;  %3672 = vmatprep.mubr.bf16.mxu1 %v6707_v24 }
 0x201   : > { %v5839_v53 = vpop.f32.mrf.mxu1  ;;  %v5953_v41 = vpop.f32.mrf.mxu0 }
 0x202   : > { %8485 = vst [vmem:[#allocation3_spill] sm:$0xff] %v7890_v21  ;;  %v5840_v45 = vadd.f32 %v5839_v53, %v5838_v31  ;;  %v6717_v21 = vld [vmem:[#allocation2 + $0x74] ss:$8 sps:$4 sm:$0xff]  }
 0x203   : > { %v5841_v38 = vpop.f32.mrf.mxu1  ;;  %v5954_v30 = vpop.f32.mrf.mxu0 }
 0x204   : > { %v7892_v6 = vadd.f32 %v5952_v51, %v5840_v45  ;;  %v5955_v4 = vadd.f32 %v5954_v30, %v5953_v41 }
 0x205   : > { %v5842_v40 = vpop.f32.mrf.mxu1  ;;  %v5956_v32 = vpop.f32.mrf.mxu0  ;;  %3963 = vmatmul.mubr.bf16.gmra.mxu0 %v6714_v33 }
 0x206   : > { %8486 = vst [vmem:[#allocation4_spill] sm:$0xff] %v7892_v6  ;;  %v5843_v43 = vadd.f32 %v5842_v40, %v5841_v38  ;;  %3970 = vmatprep.mubr.bf16.mxu0 %v6715_v11  ;;  %v6716_v38 = vld [vmem:[#allocation2 + $0x60] ss:$8 sps:$4 sm:$0xff]  }
 0x207   : > { %v5844_v55 = vpop.f32.mrf.mxu1  ;;  %3673 = vmatmul.mubr.bf16.gmra.mxu1 %v6709_v25  ;;  %v5957_v28 = vpop.f32.mrf.mxu0 }
 0x208   : > { %v7894_v36 = vadd.f32 %v5955_v4, %v5843_v43  ;;  %v5958_v24 = vadd.f32 %v5957_v28, %v5956_v32  ;;  %3680 = vmatprep.mubr.bf16.mxu1 %v6710_v46 }
 0x209   : > { %v5845_v2 = vpop.f32.mrf.mxu1  ;;  %v5959_v31 = vpop.f32.mrf.mxu0 }
 0x20a   : > { %8487 = vst [vmem:[#allocation25_spill] sm:$0xff] %v7894_v36  ;;  %v5846_v58 = vadd.f32 %v5845_v2, %v5844_v55  ;;  %v6719_v36 = vld [vmem:[#allocation2 + $0x84] ss:$8 sps:$4 sm:$0xff]  }
 0x20b   : > { %v5847_v51 = vpop.f32.mrf.mxu1  ;;  %v5960_v53 = vpop.f32.mrf.mxu0 }
 0x20c   : > { %v7896_v41 = vadd.f32 %v5958_v24, %v5846_v58  ;;  %v5961_v45 = vadd.f32 %v5960_v53, %v5959_v31 }
 0x20d   : > { %v5848_v30 = vpop.f32.mrf.mxu1  ;;  %v5962_v6 = vpop.f32.mrf.mxu0  ;;  %3971 = vmatmul.mubr.bf16.gmra.mxu0 %v6716_v38 }
 0x20e   : > { %8488 = vst [vmem:[#allocation26_spill] sm:$0xff] %v7896_v41  ;;  %v5849_v40 = vadd.f32 %v5848_v30, %v5847_v51  ;;  %3978 = vmatprep.mubr.bf16.mxu0 %v6717_v21  ;;  %v6718_v51 = vld [vmem:[#allocation2 + $0x70] ss:$8 sps:$4 sm:$0xff]  }
 0x20f   : > { %v5850_v25 = vpop.f32.mrf.mxu1  ;;  %3681 = vmatmul.mubr.bf16.gmra.mxu1 %v6712_v9  ;;  %v5963_v4 = vpop.f32.mrf.mxu0 }
 0x210   : > { %v7898_v32 = vadd.f32 %v5961_v45, %v5849_v40  ;;  %v5964_v46 = vadd.f32 %v5963_v4, %v5962_v6  ;;  %3688 = vmatprep.mubr.bf16.mxu1 %v6713_v16 }
 0x211   : > { %v5851_v43 = vpop.f32.mrf.mxu1  ;;  %v5965_v55 = vpop.f32.mrf.mxu0 }
 0x212   : > { %v5852_v28 = vadd.f32 %v5851_v43, %v5850_v25 }
 0x213   : > { %v5853_v24 = vpop.f32.mrf.mxu1  ;;  %v5966_v2 = vpop.f32.mrf.mxu0 }
 0x214   : > { %v7900_v31 = vadd.f32 %v5964_v46, %v5852_v28  ;;  %v5967_v58 = vadd.f32 %v5966_v2, %v5965_v55 }
 0x215   : > { %v5854_v53 = vpop.f32.mrf.mxu1  ;;  %v5968_v41 = vpop.f32.mrf.mxu0  ;;  %3979 = vmatmul.mubr.bf16.gmra.mxu0 %v6718_v51 }
 0x216   : > { %8489 = vst [vmem:[#allocation27_spill] sm:$0xff] %v7900_v31  ;;  %v5855_v30 = vadd.f32 %v5854_v53, %v5853_v24  ;;  %3986 = vmatprep.mubr.bf16.mxu0 %v6719_v36  ;;  %v6720_v24 = vld [vmem:[#allocation2 + $0x80] ss:$8 sps:$4 sm:$0xff]  }
 0x217   : > { %v5856_v9 = vpop.f32.mrf.mxu1  ;;  %3689 = vmatmul.mubr.bf16.gmra.mxu1 %v6714_v33  ;;  %v5969_v45 = vpop.f32.mrf.mxu0 }
 0x218   : > { %v7902_v6 = vadd.f32 %v5967_v58, %v5855_v30  ;;  %v5970_v16 = vadd.f32 %v5969_v45, %v5968_v41  ;;  %3696 = vmatprep.mubr.bf16.mxu1 %v6715_v11 }
 0x219   : > { %v5857_v40 = vpop.f32.mrf.mxu1  ;;  %v5971_v25 = vpop.f32.mrf.mxu0 }
 0x21a   : > { %v5858_v4 = vadd.f32 %v5857_v40, %v5856_v9 }
 0x21b   : > { %v5859_v46 = vpop.f32.mrf.mxu1  ;;  %v5972_v43 = vpop.f32.mrf.mxu0 }
 0x21c   : > { %v7904_v55 = vadd.f32 %v5970_v16, %v5858_v4  ;;  %v5973_v28 = vadd.f32 %v5972_v43, %v5971_v25 }
 0x21d   : > { %v5860_v2 = vpop.f32.mrf.mxu1  ;;  %v5974_v31 = vpop.f32.mrf.mxu0  ;;  %3987 = vmatmul.mubr.bf16.gmra.mxu0 %v6720_v24 }
 0x21e   : > { %8490 = vst [vmem:[#allocation28_spill] sm:$0xff] %v7904_v55  ;;  %v5861_v53 = vadd.f32 %v5860_v2, %v5859_v46  ;;  %3994 = vmatprep.mubr.bf16.mxu0 %v7789_v7 }
 0x21f   : > { %v5862_v33 = vpop.f32.mrf.mxu1  ;;  %3697 = vmatmul.mubr.bf16.gmra.mxu1 %v6716_v38  ;;  %v5975_v58 = vpop.f32.mrf.mxu0 }
 0x220   : > { %v7907_v41 = vadd.f32 %v5973_v28, %v5861_v53  ;;  %v5976_v11 = vadd.f32 %v5975_v58, %v5974_v31  ;;  %3704 = vmatprep.mubr.bf16.mxu1 %v6717_v21 }
 0x221   : > { %v5863_v30 = vpop.f32.mrf.mxu1  ;;  %v5977_v9 = vpop.f32.mrf.mxu0 }
 0x222   : > { %v5864_v45 = vadd.f32 %v5863_v30, %v5862_v33 }
 0x223   : > { %v5865_v16 = vpop.f32.mrf.mxu1  ;;  %v5978_v40 = vpop.f32.mrf.mxu0 }
 0x224   : > { %v7909_v25 = vadd.f32 %v5976_v11, %v5864_v45  ;;  %v5979_v4 = vadd.f32 %v5978_v40, %v5977_v9 }
 0x225   : > { %v5866_v43 = vpop.f32.mrf.mxu1  ;;  %v5980_v55 = vpop.f32.mrf.mxu0  ;;  %3995 = vmatmul.mubr.bf16.gmra.mxu0 %v7799_v29 }
 0x226   : > { %v5867_v46 = vadd.f32 %v5866_v43, %v5865_v16  ;;  %4002 = vmatprep.mubr.bf16.mxu0 %v7803_v12 }
 0x227   : > { %v5868_v38 = vpop.f32.mrf.mxu1  ;;  %3705 = vmatmul.mubr.bf16.gmra.mxu1 %v6718_v51  ;;  %v5981_v28 = vpop.f32.mrf.mxu0 }
 0x228   : > { %v7913_v31 = vadd.f32 %v5979_v4, %v5867_v46  ;;  %v5982_v21 = vadd.f32 %v5981_v28, %v5980_v55  ;;  %3712 = vmatprep.mubr.bf16.mxu1 %v6719_v36 }
 0x229   : > { %v5869_v2 = vpop.f32.mrf.mxu1  ;;  %v5983_v53 = vpop.f32.mrf.mxu0 }
 0x22a   : > { %v5870_v33 = vadd.f32 %v5869_v2, %v5868_v38  ;;  %v858_v38 = vlaneseq }
 0x22b   : > { %v5871_v58 = vpop.f32.mrf.mxu1  ;;  %v5984_v11 = vpop.f32.mrf.mxu0 }
 0x22c   : > { %v7915_v30 = vadd.f32 %v5982_v21, %v5870_v33  ;;  %v5985_v9 = vadd.f32 %v5984_v11, %v5983_v53 }
 0x22d   : > { %v5872_v45 = vpop.f32.mrf.mxu1  ;;  %v6114_v40 = vpop.f32.mrf.mxu0  ;;  %4003 = vmatmul.mubr.bf16.gmra.mxu0 %v7813_v13 }
 0x22e   : > { %v5873_v16 = vadd.f32 %v5872_v45, %v5871_v58  ;;  %4010 = vmatprep.mubr.bf16.mxu0 %v7817_v50  ;;  %v7929_v58 = vshrl.u32 %v858_v38, 7  ;;  %v6721_v45 = vld [vmem:[#allocation2 + $0xc4] ss:$8 sps:$4 sm:$0xff]  }
 0x22f   : > { %v6002_v51 = vpop.f32.mrf.mxu1  ;;  %3713 = vmatmul.mubr.bf16.gmra.mxu1 %v6720_v24  ;;  %v6115_v4 = vpop.f32.mrf.mxu0 }
 0x230   : > { %v7919_v55 = vadd.f32 %v5985_v9, %v5873_v16  ;;  %v7921_v36 = vadd.f32 %v6115_v4, %v6114_v40  ;;  %3720 = vmatprep.mubr.bf16.mxu1 %v7789_v7  ;;  %vm3094_vm0 = vcmp.lt.s32.totalorder %v7929_v58, 1  ;;  %vm2159_vm1 = vcmp.ne.s32.totalorder %v7929_v58, 0 }
 0x231   : > { %v6003_v43 = vpop.f32.mrf.mxu1  ;;  %v6117_v46 = vpop.f32.mrf.mxu0  ;;  %vm4131_vm2 = vcmp.lt.s32.totalorder %v7929_v58, 7 }
 0x232   : > { %v6004_v28 = vadd.f32 %v6003_v43, %v6002_v51 }
 0x233   : > { %v6005_v21 = vpop.f32.mrf.mxu1  ;;  %v6118_v2 = vpop.f32.mrf.mxu0 }
 0x234   : > { %v7925_v53 = vadd.f32 %v6004_v28, %v7822_v20  ;;  %v7927_v33 = vadd.f32 %v6118_v2, %v6117_v46 }
 0x235   : > { %v6006_v24 = vpop.f32.mrf.mxu1  ;;  %v6120_v11 = vpop.f32.mrf.mxu0  ;;  %4011 = vmatmul.mubr.bf16.gmra.mxu0 %v7826_v63 }
 0x236   : > { %v6007_v9 = vadd.f32 %v6006_v24, %v6005_v21  ;;  %4018 = vmatprep.mubr.bf16.mxu0 %v6721_v45  ;;  %v8450_v43 = vrot.slane %v7925_v53, 7 }
 0x237   : > { %v6008_v7 = vpop.f32.mrf.mxu1  ;;  %3721 = vmatmul.mubr.bf16.gmra.mxu1 %v7799_v29  ;;  %v6121_v40 = vpop.f32.mrf.mxu0 }
 0x238   : > { %v3031_v16 = vadd.f32 %v6007_v9, %v7829_v47  ;;  %v7934_v51 = vadd.f32 %v6121_v40, %v6120_v11  ;;  %3728 = vmatprep.mubr.bf16.mxu1 %v7803_v12  ;;  %v6722_v9 = vld [vmem:[#allocation2 + $0xc0] ss:$8 sps:$4 sm:$0xff]  }
 0x239   : > { %v6009_v20 = vpop.f32.mrf.mxu1  ;;  %v6123_v4 = vpop.f32.mrf.mxu0 }
 0x23a   : > { %v3063_v46 = vrot.slane %v3031_v16, 7  ;;  %v6010_v38 = vadd.f32 %v6009_v20, %v6008_v7  ;;  %v6723_v16 = vld [vmem:[#allocation2 + $0xd4] ss:$8 sps:$4 sm:$0xff]  }
 0x23b   : > { %v6011_v28 = vpop.f32.mrf.mxu1  ;;  %v6124_v21 = vpop.f32.mrf.mxu0 }
 0x23c   : > { %v3125_v29 = vsel %vm3094_vm0, %v8450_v43, %v3063_v46  ;;  %v3032_v47 = vadd.f32 %v6010_v38, %v7832_v15  ;;  %v7944_v2 = vadd.f32 %v6124_v21, %v6123_v4 }
 0x23d   : > { %v7947_v12 = vadd.f32 %v3125_v29, %v7550_v42  ;;  %v6012_v24 = vpop.f32.mrf.mxu1  ;;  %v6126_v11 = vpop.f32.mrf.mxu0  ;;  %4019 = vmatmul.mubr.bf16.gmra.mxu0 %v6722_v9 }
 0x23e   : > { %v3064_v7 = vrot.slane %v3032_v47, 7  ;;  %v6013_v40 = vadd.f32 %v6012_v24, %v6011_v28  ;;  %4026 = vmatprep.mubr.bf16.mxu0 %v6723_v16 }
 0x23f   : > { %8491 = vst [vmem:[#allocation29_spill] sm:$0xff] %v7947_v12  ;;  %v6014_v20 = vpop.f32.mrf.mxu1  ;;  %3729 = vmatmul.mubr.bf16.gmra.mxu1 %v7813_v13  ;;  %v6127_v43 = vpop.f32.mrf.mxu0 }
 0x240   : > { %v3124_v15 = vsel %vm3094_vm0, %v3063_v46, %v3064_v7  ;;  %v3033_v42 = vadd.f32 %v6013_v40, %v7837_v56  ;;  %v7954_v4 = vadd.f32 %v6127_v43, %v6126_v11  ;;  %3736 = vmatprep.mubr.bf16.mxu1 %v7817_v50 }
 0x241   : > { %v3133_v38 = vsel %vm2159_vm1, %v3124_v15, 0.0  ;;  %v6015_v21 = vpop.f32.mrf.mxu1  ;;  %v6129_v28 = vpop.f32.mrf.mxu0  ;;  %v6724_v15 = vld [vmem:[#allocation2 + $0xd0] ss:$8 sps:$4 sm:$0xff]  }
 0x242   : > { %v7960_v29 = vadd.f32 %v3133_v38, %v7554_v1  ;;  %v3065_v47 = vrot.slane %v3033_v42, 7  ;;  %v6016_v13 = vadd.f32 %v6015_v21, %v6014_v20  ;;  %v6725_v42 = vld [vmem:[#allocation2 + $0xe4] ss:$8 sps:$4 sm:$0xff]  }
 0x243   : > { %v6017_v24 = vpop.f32.mrf.mxu1  ;;  %v6130_v12 = vpop.f32.mrf.mxu0 }
 0x244   : > { %v3123_v46 = vsel %vm3094_vm0, %v3064_v7, %v3065_v47  ;;  %v3034_v56 = vadd.f32 %v6016_v13, %v7840_v39  ;;  %v7965_v43 = vadd.f32 %v6130_v12, %v6129_v28 }
 0x245   : > { %v7968_v50 = vadd.f32 %v3123_v46, %v7562_v5  ;;  %v6018_v11 = vpop.f32.mrf.mxu1  ;;  %v6132_v40 = vpop.f32.mrf.mxu0  ;;  %4027 = vmatmul.mubr.bf16.gmra.mxu0 %v6724_v15 }
 0x246   : > { %v3066_v1 = vrot.slane %v3034_v56, 7  ;;  %v6019_v38 = vadd.f32 %v6018_v11, %v6017_v24  ;;  %4034 = vmatprep.mubr.bf16.mxu0 %v6725_v42 }
 0x247   : > { %v6020_v20 = vpop.f32.mrf.mxu1  ;;  %3737 = vmatmul.mubr.bf16.gmra.mxu1 %v7826_v63  ;;  %v6133_v21 = vpop.f32.mrf.mxu0 }
 0x248   : > { %v3122_v39 = vsel %vm3094_vm0, %v3065_v47, %v3066_v1  ;;  %v3035_v12 = vadd.f32 %v6019_v38, %v7845_v48  ;;  %v7974_v7 = vadd.f32 %v6133_v21, %v6132_v40  ;;  %3744 = vmatprep.mubr.bf16.mxu1 %v6721_v45 }
 0x249   : > { %v3135_v5 = vsel %vm2159_vm1, %v3122_v39, 0.0  ;;  %v6021_v28 = vpop.f32.mrf.mxu1  ;;  %v6135_v13 = vpop.f32.mrf.mxu0  ;;  %v6726_v39 = vld [vmem:[#allocation2 + $0xe0] ss:$8 sps:$4 sm:$0xff]  }
 0x24a   : > { %v7979_v24 = vadd.f32 %v3135_v5, %v7566_v61  ;;  %v3067_v46 = vrot.slane %v3035_v12, 7  ;;  %v6022_v56 = vadd.f32 %v6021_v28, %v6020_v20  ;;  %v6727_v12 = vld [vmem:[#allocation2 + $0xf4] ss:$8 sps:$4 sm:$0xff]  }
 0x24b   : > { %v6023_v63 = vpop.f32.mrf.mxu1  ;;  %v6136_v11 = vpop.f32.mrf.mxu0 }
 0x24c   : > { %v3121_v47 = vsel %vm3094_vm0, %v3066_v1, %v3067_v46  ;;  %v3036_v48 = vadd.f32 %v6022_v56, %v7848_v19  ;;  %v7984_v40 = vadd.f32 %v6136_v11, %v6135_v13 }
 0x24d   : > { %v7987_v45 = vadd.f32 %v3121_v47, %v7576_v3  ;;  %v6024_v38 = vpop.f32.mrf.mxu1  ;;  %v6138_v21 = vpop.f32.mrf.mxu0  ;;  %4035 = vmatmul.mubr.bf16.gmra.mxu0 %v6726_v39  ;;  %v8494_v47 = vld [vmem:[#allocation10_spill] sm:$0xff] }
 0x24e   : > { %v3068_v61 = vrot.slane %v3036_v48, 7  ;;  %v6025_v5 = vadd.f32 %v6024_v38, %v6023_v63  ;;  %4042 = vmatprep.mubr.bf16.mxu0 %v6727_v12 }
 0x24f   : > { %8492 = vst [vmem:[#allocation30_spill] sm:$0xff] %v7987_v45  ;;  %v6026_v20 = vpop.f32.mrf.mxu1  ;;  %3745 = vmatmul.mubr.bf16.gmra.mxu1 %v6722_v9  ;;  %v6139_v28 = vpop.f32.mrf.mxu0 }
 0x250   : > { %v3120_v1 = vsel %vm3094_vm0, %v3067_v46, %v3068_v61  ;;  %v3037_v19 = vadd.f32 %v6025_v5, %v7853_v26  ;;  %v7992_v13 = vadd.f32 %v6139_v28, %v6138_v21  ;;  %3752 = vmatprep.mubr.bf16.mxu1 %v6723_v16  ;;  %v8495_v16 = vld [vmem:[#allocation11_spill] sm:$0xff] }
 0x251   : > { %v3137_v3 = vsel %vm2159_vm1, %v3120_v1, 0.0  ;;  %v6027_v56 = vpop.f32.mrf.mxu1  ;;  %v6141_v11 = vpop.f32.mrf.mxu0 }
 0x252   : > { %8493 = vst [vmem:[#allocation31_spill] sm:$0xff] %v7992_v13  ;;  %v7997_v63 = vadd.f32 %v3137_v3, %v8494_v47  ;;  %v3069_v48 = vrot.slane %v3037_v19, 7  ;;  %v6028_v38 = vadd.f32 %v6027_v56, %v6026_v20  ;;  %v6728_v13 = vld [vmem:[#allocation2 + $0xf0] ss:$8 sps:$4 sm:$0xff]   ;;  %v6729_v19 = vld [vmem:[#allocation2 + $0x104] ss:$8 sps:$4 sm:$0xff]  }
 0x253   : > { %v6029_v9 = vpop.f32.mrf.mxu1  ;;  %v6142_v45 = vpop.f32.mrf.mxu0 }
 0x254   : > { %v3119_v46 = vsel %vm3094_vm0, %v3068_v61, %v3069_v48  ;;  %v3038_v26 = vadd.f32 %v6028_v38, %v7856_v22  ;;  %v8002_v21 = vadd.f32 %v6142_v45, %v6141_v11 }
 0x255   : > { %v8005_v5 = vadd.f32 %v3119_v46, %v8495_v16  ;;  %v6030_v28 = vpop.f32.mrf.mxu1  ;;  %v6144_v1 = vpop.f32.mrf.mxu0  ;;  %4043 = vmatmul.mubr.bf16.gmra.mxu0 %v6728_v13 }
 0x256   : > { %v3070_v3 = vrot.slane %v3038_v26, 7  ;;  %v6031_v47 = vadd.f32 %v6030_v28, %v6029_v9  ;;  %4050 = vmatprep.mubr.bf16.mxu0 %v6729_v19  ;;  %v8497_v26 = vld [vmem:[#allocation12_spill] sm:$0xff] }
 0x257   : > { %8496 = vst [vmem:[#allocation10_spill] sm:$0xff] %v8005_v5  ;;  %v6032_v20 = vpop.f32.mrf.mxu1  ;;  %3753 = vmatmul.mubr.bf16.gmra.mxu1 %v6724_v15  ;;  %v6145_v56 = vpop.f32.mrf.mxu0  ;;  %v6730_v5 = vld [vmem:[#allocation2 + $0x100] ss:$8 sps:$4 sm:$0xff]  }
 0x258   : > { %v3118_v61 = vsel %vm3094_vm0, %v3069_v48, %v3070_v3  ;;  %v3039_v22 = vadd.f32 %v6031_v47, %v7861_v60  ;;  %v8010_v45 = vadd.f32 %v6145_v56, %v6144_v1  ;;  %3760 = vmatprep.mubr.bf16.mxu1 %v6725_v42  ;;  %v8498_v42 = vld [vmem:[#allocation13_spill] sm:$0xff] }
 0x259   : > { %v3139_v11 = vsel %vm2159_vm1, %v3118_v61, 0.0  ;;  %v6033_v38 = vpop.f32.mrf.mxu1  ;;  %v6147_v46 = vpop.f32.mrf.mxu0 }
 0x25a   : > { %v8015_v9 = vadd.f32 %v3139_v11, %v8497_v26  ;;  %v3071_v16 = vrot.slane %v3039_v22, 7  ;;  %v6034_v28 = vadd.f32 %v6033_v38, %v6032_v20 }
 0x25b   : > { %v6035_v15 = vpop.f32.mrf.mxu1  ;;  %v6148_v19 = vpop.f32.mrf.mxu0 }
 0x25c   : > { %v3117_v48 = vsel %vm3094_vm0, %v3070_v3, %v3071_v16  ;;  %v3040_v60 = vadd.f32 %v6034_v28, %v7864_v44  ;;  %v8020_v1 = vadd.f32 %v6148_v19, %v6147_v46  ;;  %v8499_v19 = vld [vmem:[#allocation14_spill] sm:$0xff] }
 0x25d   : > { %v8023_v47 = vadd.f32 %v3117_v48, %v8498_v42  ;;  %v6036_v56 = vpop.f32.mrf.mxu1  ;;  %v6150_v61 = vpop.f32.mrf.mxu0  ;;  %4051 = vmatmul.mubr.bf16.gmra.mxu0 %v6730_v5 }
 0x25e   : > { %v3072_v11 = vrot.slane %v3040_v60, 7  ;;  %v6037_v26 = vadd.f32 %v6036_v56, %v6035_v15  ;;  %4058 = vmatprep.mubr.bf16.mxu0 %v8483_v37 }
 0x25f   : > { %v6038_v20 = vpop.f32.mrf.mxu1  ;;  %3761 = vmatmul.mubr.bf16.gmra.mxu1 %v6726_v39  ;;  %v6151_v22 = vpop.f32.mrf.mxu0 }
 0x260   : > { %v3116_v3 = vsel %vm3094_vm0, %v3071_v16, %v3072_v11  ;;  %v3041_v44 = vadd.f32 %v6037_v26, %v7869_v59  ;;  %v8029_v38 = vadd.f32 %v6151_v22, %v6150_v61  ;;  %3768 = vmatprep.mubr.bf16.mxu1 %v6727_v12 }
 0x261   : > { %v3141_v46 = vsel %vm2159_vm1, %v3116_v3, 0.0  ;;  %v6039_v28 = vpop.f32.mrf.mxu1  ;;  %v6153_v5 = vpop.f32.mrf.mxu0 }
 0x262   : > { %v8034_v15 = vadd.f32 %v3141_v46, %v8499_v19  ;;  %v3073_v37 = vrot.slane %v3041_v44, 7  ;;  %v6040_v48 = vadd.f32 %v6039_v28, %v6038_v20 }
 0x263   : > { %v6041_v39 = vpop.f32.mrf.mxu1  ;;  %v6154_v60 = vpop.f32.mrf.mxu0 }
 0x264   : > { %v3115_v16 = vsel %vm3094_vm0, %v3072_v11, %v3073_v37  ;;  %v3042_v59 = vadd.f32 %v6040_v48, %v7872_v10  ;;  %v8039_v42 = vadd.f32 %v6154_v60, %v6153_v5 }
 0x265   : > { %v8042_v12 = vadd.f32 %v3115_v16, %v7618_v14  ;;  %v6042_v56 = vpop.f32.mrf.mxu1  ;;  %v6156_v61 = vpop.f32.mrf.mxu0  ;;  %4059 = vmatmul.mubr.bf16.gmra.mxu0 %v8484_v23 }
 0x266   : > { %v3074_v26 = vrot.slane %v3042_v59, 7  ;;  %v6043_v22 = vadd.f32 %v6042_v56, %v6041_v39 }
 0x267   : > { %v6044_v3 = vpop.f32.mrf.mxu1  ;;  %3769 = vmatmul.mubr.bf16.gmra.mxu1 %v6728_v13  ;;  %v6157_v20 = vpop.f32.mrf.mxu0 }
 0x268   : > { %v3114_v44 = vsel %vm3094_vm0, %v3073_v37, %v3074_v26  ;;  %v3043_v11 = vadd.f32 %v6043_v22, %v7876_v8  ;;  %v8048_v10 = vadd.f32 %v6157_v20, %v6156_v61 }
 0x269   : > { %v3143_v14 = vsel %vm2159_vm1, %v3114_v44, 0.0  ;;  %v6045_v46 = vpop.f32.mrf.mxu1  ;;  %v6159_v28 = vpop.f32.mrf.mxu0 }
 0x26a   : > { %v8053_v5 = vadd.f32 %v3143_v14, %v7622_v54  ;;  %v3075_v23 = vrot.slane %v3043_v11, 7  ;;  %v6046_v19 = vadd.f32 %v6045_v46, %v6044_v3 }
 0x26b   : > { %v6047_v48 = vpop.f32.mrf.mxu1  ;;  %v6160_v13 = vpop.f32.mrf.mxu0 }
 0x26c   : > { %v3113_v39 = vsel %vm3094_vm0, %v3074_v26, %v3075_v23  ;;  %v3044_v37 = vadd.f32 %v6046_v19, %v7879_v35  ;;  %v8058_v8 = vadd.f32 %v6160_v13, %v6159_v28 }
 0x26d   : > { %v8061_v60 = vadd.f32 %v3113_v39, %v7630_v49  ;;  %v6048_v16 = vpop.f32.mrf.mxu1  ;;  %v6162_v59 = vpop.f32.mrf.mxu0 }
 0x26e   : > { %v3076_v56 = vrot.slane %v3044_v37, 7  ;;  %v6049_v61 = vadd.f32 %v6048_v16, %v6047_v48 }
 0x26f   : > { %v6050_v54 = vpop.f32.mrf.mxu1  ;;  %v6163_v22 = vpop.f32.mrf.mxu0 }
 0x270   : > { %v3112_v3 = vsel %vm3094_vm0, %v3075_v23, %v3076_v56  ;;  %v3045_v20 = vadd.f32 %v6049_v61, %v7882_v27  ;;  %v8066_v44 = vadd.f32 %v6163_v22, %v6162_v59 }
 0x271   : > { %v3145_v35 = vsel %vm2159_vm1, %v3112_v3, 0.0  ;;  %v6051_v26 = vpop.f32.mrf.mxu1  ;;  %v6165_v11 = vpop.f32.mrf.mxu0 }
 0x272   : > { %v8071_v49 = vadd.f32 %v3145_v35, %v7646_v18  ;;  %v3077_v14 = vrot.slane %v3045_v20, 7  ;;  %v6052_v46 = vadd.f32 %v6051_v26, %v6050_v54 }
 0x273   : > { %v6053_v28 = vpop.f32.mrf.mxu1  ;;  %v6166_v19 = vpop.f32.mrf.mxu0 }
 0x274   : > { %v3111_v48 = vsel %vm3094_vm0, %v3076_v56, %v3077_v14  ;;  %v3046_v23 = vadd.f32 %v6052_v46, %v7884_v52  ;;  %v8076_v27 = vadd.f32 %v6166_v19, %v6165_v11 }
 0x275   : > { %v8079_v13 = vadd.f32 %v3111_v48, %v7664_v0  ;;  %v6054_v39 = vpop.f32.mrf.mxu1  ;;  %v6168_v37 = vpop.f32.mrf.mxu0 }
 0x276   : > { %v3078_v16 = vrot.slane %v3046_v23, 7  ;;  %v6055_v59 = vadd.f32 %v6054_v39, %v6053_v28 }
 0x277   : > { %v6056_v18 = vpop.f32.mrf.mxu1  ;;  %v6169_v61 = vpop.f32.mrf.mxu0 }
 0x278   : > { %v3110_v54 = vsel %vm3094_vm0, %v3077_v14, %v3078_v16  ;;  %v3047_v22 = vadd.f32 %v6055_v59, %v7886_v17  ;;  %v8084_v3 = vadd.f32 %v6169_v61, %v6168_v37  ;;  %v8500_v61 = vld [vmem:[#allocation3_spill] sm:$0xff] }
 0x279   : > { %v3147_v52 = vsel %vm2159_vm1, %v3110_v54, 0.0  ;;  %v6057_v56 = vpop.f32.mrf.mxu1  ;;  %v6171_v20 = vpop.f32.mrf.mxu0 }
 0x27a   : > { %v8089_v0 = vadd.f32 %v3147_v52, %v7680_v62  ;;  %v3079_v35 = vrot.slane %v3047_v22, 7  ;;  %v6058_v26 = vadd.f32 %v6057_v56, %v6056_v18 }
 0x27b   : > { %v6059_v11 = vpop.f32.mrf.mxu1  ;;  %v6172_v46 = vpop.f32.mrf.mxu0 }
 0x27c   : > { %v3109_v28 = vsel %vm3094_vm0, %v3078_v16, %v3079_v35  ;;  %v3048_v14 = vadd.f32 %v6058_v26, %v7888_v34  ;;  %v8094_v17 = vadd.f32 %v6172_v46, %v6171_v20 }
 0x27d   : > { %v8097_v19 = vadd.f32 %v3109_v28, %v7698_v57  ;;  %v6060_v48 = vpop.f32.mrf.mxu1  ;;  %v6174_v23 = vpop.f32.mrf.mxu0  ;;  %v8502_v57 = vld [vmem:[#allocation15_spill] sm:$0xff] }
 0x27e   : > { %v3080_v39 = vrot.slane %v3048_v14, 7  ;;  %v6061_v37 = vadd.f32 %v6060_v48, %v6059_v11 }
 0x27f   : > { %v6062_v62 = vpop.f32.mrf.mxu1  ;;  %v6175_v59 = vpop.f32.mrf.mxu0 }
 0x280   : > { %v3108_v18 = vsel %vm3094_vm0, %v3079_v35, %v3080_v39  ;;  %v3049_v54 = vadd.f32 %v6061_v37, %v8500_v61  ;;  %v8102_v22 = vadd.f32 %v6175_v59, %v6174_v23  ;;  %v8504_v35 = vld [vmem:[#allocation4_spill] sm:$0xff] }
 0x281   : > { %v3149_v34 = vsel %vm2159_vm1, %v3108_v18, 0.0  ;;  %v6063_v16 = vpop.f32.mrf.mxu1  ;;  %v6177_v52 = vpop.f32.mrf.mxu0  ;;  %v8506_v23 = vld [vmem:[#allocation16_spill] sm:$0xff] }
 0x282   : > { %8501 = vst [vmem:[#allocation11_spill] sm:$0xff] %v8102_v22  ;;  %v8107_v56 = vadd.f32 %v3149_v34, %v8502_v57  ;;  %v3081_v20 = vrot.slane %v3049_v54, 7  ;;  %v6064_v26 = vadd.f32 %v6063_v16, %v6062_v62  ;;  %v8508_v54 = vld [vmem:[#allocation25_spill] sm:$0xff] }
 0x283   : > { %v6065_v11 = vpop.f32.mrf.mxu1  ;;  %v6178_v46 = vpop.f32.mrf.mxu0 }
 0x284   : > { %8503 = vst [vmem:[#allocation12_spill] sm:$0xff] %v8107_v56  ;;  %v3107_v28 = vsel %vm3094_vm0, %v3080_v39, %v3081_v20  ;;  %v3050_v14 = vadd.f32 %v6064_v26, %v8504_v35  ;;  %v8112_v48 = vadd.f32 %v6178_v46, %v6177_v52  ;;  %v8510_v46 = vld [vmem:[#allocation17_spill] sm:$0xff] }
 0x285   : > { %v8115_v37 = vadd.f32 %v3107_v28, %v8506_v23  ;;  %v6066_v59 = vpop.f32.mrf.mxu1  ;;  %v6180_v18 = vpop.f32.mrf.mxu0 }
 0x286   : > { %8505 = vst [vmem:[#allocation13_spill] sm:$0xff] %v8112_v48  ;;  %v3082_v61 = vrot.slane %v3050_v14, 7  ;;  %v6067_v22 = vadd.f32 %v6066_v59, %v6065_v11 }
 0x287   : > { %8507 = vst [vmem:[#allocation14_spill] sm:$0xff] %v8115_v37  ;;  %v6068_v34 = vpop.f32.mrf.mxu1  ;;  %v6181_v57 = vpop.f32.mrf.mxu0 }
 0x288   : > { %v3106_v62 = vsel %vm3094_vm0, %v3081_v20, %v3082_v61  ;;  %v3051_v16 = vadd.f32 %v6067_v22, %v8508_v54  ;;  %v8120_v56 = vadd.f32 %v6181_v57, %v6180_v18  ;;  %v8511_v20 = vld [vmem:[#allocation26_spill] sm:$0xff] }
 0x289   : > { %v3151_v39 = vsel %vm2159_vm1, %v3106_v62, 0.0  ;;  %v6069_v52 = vpop.f32.mrf.mxu1  ;;  %v6183_v26 = vpop.f32.mrf.mxu0  ;;  %v8513_v18 = vld [vmem:[#allocation18_spill] sm:$0xff] }
 0x28a   : > { %8509 = vst [vmem:[#allocation3_spill] sm:$0xff] %v8120_v56  ;;  %v8125_v28 = vadd.f32 %v3151_v39, %v8510_v46  ;;  %v3083_v35 = vrot.slane %v3051_v16, 7  ;;  %v6070_v14 = vadd.f32 %v6069_v52, %v6068_v34 }
 0x28b   : > { %v6071_v11 = vpop.f32.mrf.mxu1  ;;  %v6184_v23 = vpop.f32.mrf.mxu0 }
 0x28c   : > { %v3105_v59 = vsel %vm3094_vm0, %v3082_v61, %v3083_v35  ;;  %v3052_v37 = vadd.f32 %v6070_v14, %v8511_v20  ;;  %v8130_v22 = vadd.f32 %v6184_v23, %v6183_v26  ;;  %v8516_v23 = vld [vmem:[#allocation19_spill] sm:$0xff] }
 0x28d   : > { %v8133_v57 = vadd.f32 %v3105_v59, %v8513_v18  ;;  %v6072_v62 = vpop.f32.mrf.mxu1  ;;  %v6186_v54 = vpop.f32.mrf.mxu0 }
 0x28e   : > { %8512 = vst [vmem:[#allocation15_spill] sm:$0xff] %v8130_v22  ;;  %v3084_v56 = vrot.slane %v3052_v37, 7  ;;  %v6073_v48 = vadd.f32 %v6072_v62, %v6071_v11 }
 0x28f   : > { %8514 = vst [vmem:[#allocation4_spill] sm:$0xff] %v8133_v57  ;;  %v6074_v39 = vpop.f32.mrf.mxu1  ;;  %v6187_v46 = vpop.f32.mrf.mxu0 }
 0x290   : > { %v3104_v34 = vsel %vm3094_vm0, %v3083_v35, %v3084_v56  ;;  %v3053_v16 = vadd.f32 %v6073_v48, %v7898_v32  ;;  %v8138_v52 = vadd.f32 %v6187_v46, %v6186_v54  ;;  %v8517_v35 = vld [vmem:[#allocation27_spill] sm:$0xff]  ;;  %v8519_v48 = vld [vmem:[#allocation20_spill] sm:$0xff] }
 0x291   : > { %v3153_v61 = vsel %vm2159_vm1, %v3104_v34, 0.0  ;;  %v6075_v26 = vpop.f32.mrf.mxu1  ;;  %v6189_v14 = vpop.f32.mrf.mxu0 }
 0x292   : > { %8515 = vst [vmem:[#allocation16_spill] sm:$0xff] %v8138_v52  ;;  %v8143_v59 = vadd.f32 %v3153_v61, %v8516_v23  ;;  %v3085_v20 = vrot.slane %v3053_v16, 7  ;;  %v6076_v37 = vadd.f32 %v6075_v26, %v6074_v39 }
 0x293   : > { %v6077_v11 = vpop.f32.mrf.mxu1  ;;  %v6190_v18 = vpop.f32.mrf.mxu0 }
 0x294   : > { %v3103_v62 = vsel %vm3094_vm0, %v3084_v56, %v3085_v20  ;;  %v3054_v57 = vadd.f32 %v6076_v37, %v8517_v35  ;;  %v8148_v32 = vadd.f32 %v6190_v18, %v6189_v14  ;;  %v8522_v18 = vld [vmem:[#allocation21_spill] sm:$0xff] }
 0x295   : > { %v8151_v54 = vadd.f32 %v3103_v62, %v8519_v48  ;;  %v6078_v46 = vpop.f32.mrf.mxu1  ;;  %v6192_v34 = vpop.f32.mrf.mxu0 }
 0x296   : > { %8518 = vst [vmem:[#allocation25_spill] sm:$0xff] %v8148_v32  ;;  %v3086_v52 = vrot.slane %v3054_v57, 7  ;;  %v6079_v22 = vadd.f32 %v6078_v46, %v6077_v11 }
 0x297   : > { %8520 = vst [vmem:[#allocation17_spill] sm:$0xff] %v8151_v54  ;;  %v6080_v61 = vpop.f32.mrf.mxu1  ;;  %v6193_v23 = vpop.f32.mrf.mxu0 }
 0x298   : > { %v3102_v39 = vsel %vm3094_vm0, %v3085_v20, %v3086_v52  ;;  %v3055_v16 = vadd.f32 %v6079_v22, %v7902_v6  ;;  %v8156_v26 = vadd.f32 %v6193_v23, %v6192_v34  ;;  %v8523_v20 = vld [vmem:[#allocation28_spill] sm:$0xff]  ;;  %v8524_v22 = vld [vmem:[#allocation22_spill] sm:$0xff] }
 0x299   : > { %v3155_v56 = vsel %vm2159_vm1, %v3102_v39, 0.0  ;;  %v6081_v14 = vpop.f32.mrf.mxu1  ;;  %v6195_v37 = vpop.f32.mrf.mxu0 }
 0x29a   : > { %8521 = vst [vmem:[#allocation26_spill] sm:$0xff] %v8156_v26  ;;  %v8161_v62 = vadd.f32 %v3155_v56, %v8522_v18  ;;  %v3087_v35 = vrot.slane %v3055_v16, 7  ;;  %v6082_v57 = vadd.f32 %v6081_v14, %v6080_v61 }
 0x29b   : > { %v6083_v11 = vpop.f32.mrf.mxu1  ;;  %v6196_v48 = vpop.f32.mrf.mxu0 }
 0x29c   : > { %v3101_v46 = vsel %vm3094_vm0, %v3086_v52, %v3087_v35  ;;  %v3056_v54 = vadd.f32 %v6082_v57, %v8523_v20  ;;  %v8166_v6 = vadd.f32 %v6196_v48, %v6195_v37  ;;  %v8527_v48 = vld [vmem:[#allocation23_spill] sm:$0xff] }
 0x29d   : > { %v8169_v34 = vadd.f32 %v3101_v46, %v8524_v22  ;;  %v6084_v23 = vpop.f32.mrf.mxu1  ;;  %v6198_v39 = vpop.f32.mrf.mxu0 }
 0x29e   : > { %v3088_v26 = vrot.slane %v3056_v54, 7  ;;  %v6085_v32 = vadd.f32 %v6084_v23, %v6083_v11 }
 0x29f   : > { %8525 = vst [vmem:[#allocation18_spill] sm:$0xff] %v8169_v34  ;;  %v6086_v56 = vpop.f32.mrf.mxu1  ;;  %v6199_v18 = vpop.f32.mrf.mxu0 }
 0x2a0   : > { %v3100_v61 = vsel %vm3094_vm0, %v3087_v35, %v3088_v26  ;;  %v3057_v16 = vadd.f32 %v6085_v32, %v7907_v41  ;;  %v8174_v14 = vadd.f32 %v6199_v18, %v6198_v39  ;;  %v8529_v32 = vld [vmem:[#allocation5_spill] sm:$0xff] }
 0x2a1   : > { %v3157_v52 = vsel %vm2159_vm1, %v3100_v61, 0.0  ;;  %v6087_v37 = vpop.f32.mrf.mxu1  ;;  %v6201_v57 = vpop.f32.mrf.mxu0 }
 0x2a2   : > { %8526 = vst [vmem:[#allocation19_spill] sm:$0xff] %v8174_v14  ;;  %v8179_v46 = vadd.f32 %v3157_v52, %v8527_v48  ;;  %v3089_v20 = vrot.slane %v3057_v16, 7  ;;  %v6088_v54 = vadd.f32 %v6087_v37, %v6086_v56 }
 0x2a3   : > { %v6089_v11 = vpop.f32.mrf.mxu1  ;;  %v6202_v22 = vpop.f32.mrf.mxu0 }
 0x2a4   : > { %v3099_v23 = vsel %vm3094_vm0, %v3088_v26, %v3089_v20  ;;  %v3058_v35 = vadd.f32 %v6088_v54, %v7909_v25  ;;  %v8184_v41 = vadd.f32 %v6202_v22, %v6201_v57  ;;  %v8532_v54 = vld [vmem:[#allocation6_spill] sm:$0xff] }
 0x2a5   : > { %v8187_v39 = vadd.f32 %v3099_v23, %v8529_v32  ;;  %v6090_v18 = vpop.f32.mrf.mxu1  ;;  %v6204_v61 = vpop.f32.mrf.mxu0 }
 0x2a6   : > { %8528 = vst [vmem:[#allocation27_spill] sm:$0xff] %v8184_v41  ;;  %v3090_v14 = vrot.slane %v3058_v35, 7  ;;  %v6091_v34 = vadd.f32 %v6090_v18, %v6089_v11 }
 0x2a7   : > { %8530 = vst [vmem:[#allocation20_spill] sm:$0xff] %v8187_v39  ;;  %v6092_v52 = vpop.f32.mrf.mxu1  ;;  %v6205_v48 = vpop.f32.mrf.mxu0 }
 0x2a8   : > { %v3098_v56 = vsel %vm3094_vm0, %v3089_v20, %v3090_v14  ;;  %v3059_v16 = vadd.f32 %v6091_v34, %v7913_v31  ;;  %v8192_v37 = vadd.f32 %v6205_v48, %v6204_v61  ;;  %v8535_v34 = vld [vmem:[#allocation7_spill] sm:$0xff] }
 0x2a9   : > { %v3159_v25 = vsel %vm2159_vm1, %v3098_v56, 0.0  ;;  %v6093_v26 = vpop.f32.mrf.mxu1  ;;  %v6207_v57 = vpop.f32.mrf.mxu0 }
 0x2aa   : > { %8531 = vst [vmem:[#allocation21_spill] sm:$0xff] %v8192_v37  ;;  %v8197_v22 = vadd.f32 %v3159_v25, %v8532_v54  ;;  %v3091_v23 = vrot.slane %v3059_v16, 7  ;;  %v6094_v35 = vadd.f32 %v6093_v26, %v6092_v52 }
 0x2ab   : > { %v6095_v11 = vpop.f32.mrf.mxu1  ;;  %v6208_v32 = vpop.f32.mrf.mxu0 }
 0x2ac   : > { %8533 = vst [vmem:[#allocation28_spill] sm:$0xff] %v8197_v22  ;;  %v3097_v18 = vsel %vm3094_vm0, %v3090_v14, %v3091_v23  ;;  %v3060_v20 = vadd.f32 %v6094_v35, %v7915_v30  ;;  %v8202_v31 = vadd.f32 %v6208_v32, %v6207_v57  ;;  %v8537_v57 = vld [vmem:[#allocation8_spill] sm:$0xff] }
 0x2ad   : > { %v8205_v61 = vadd.f32 %v3097_v18, %v8535_v34  ;;  %v6096_v48 = vpop.f32.mrf.mxu1  ;;  %v6338_v56 = vpop.f32.mrf.mxu0 }
 0x2ae   : > { %8534 = vst [vmem:[#allocation22_spill] sm:$0xff] %v8202_v31  ;;  %v3092_v39 = vrot.slane %v3060_v20, 7  ;;  %v6097_v37 = vadd.f32 %v6096_v48, %v6095_v11  ;;  %v8539_v48 = vrot.slane %v7925_v53, 7 }
 0x2af   : > { %8536 = vst [vmem:[#allocation23_spill] sm:$0xff] %v8205_v61  ;;  %v6226_v25 = vpop.f32.mrf.mxu1  ;;  %v6339_v54 = vpop.f32.mrf.mxu0 }
 0x2b0   : > { %v3096_v52 = vsel %vm3094_vm0, %v3091_v23, %v3092_v39  ;;  %v3061_v16 = vadd.f32 %v6097_v37, %v7919_v55 }
 0x2b1   : > { %v3161_v14 = vsel %vm2159_vm1, %v3096_v52, 0.0  ;;  %v6227_v30 = vpop.f32.mrf.mxu1  ;;  %v6341_v26 = vpop.f32.mrf.mxu0  ;;  %v8540_v52 = vld [vmem:[#allocation24_spill] sm:$0xff] }
 0x2b2   : > { %v8213_v35 = vadd.f32 %v3161_v14, %v8537_v57  ;;  %v3093_v32 = vrot.slane %v3061_v16, 7  ;;  %v6228_v18 = vadd.f32 %v6227_v30, %v6226_v25  ;;  %v8542_v30 = vld [vmem:[#allocation9_spill] sm:$0xff] }
 0x2b3   : > { %v6229_v34 = vpop.f32.mrf.mxu1  ;;  %v6342_v20 = vpop.f32.mrf.mxu0 }
 0x2b4   : > { %8538 = vst [vmem:[#allocation5_spill] sm:$0xff] %v8213_v35  ;;  %v3095_v11 = vsel %vm3094_vm0, %v3092_v39, %v3093_v32  ;;  %v3126_v55 = vsel %vm3094_vm0, %v3093_v32, %v8539_v48  ;;  %v3651_v37 = vadd.f32 %v6228_v18, %v7921_v36  ;;  %v6340_v35 = vadd.f32 %v6339_v54, %v6338_v56 }
 0x2b5   : > { %v3131_v23 = vsel %vm2159_vm1, %v3126_v55, 0.0  ;;  %v8225_v14 = vadd.f32 %v3095_v11, %v8540_v52  ;;  %v6230_v16 = vpop.f32.mrf.mxu1  ;;  %v6344_v25 = vpop.f32.mrf.mxu0  ;;  %v6343_v48 = vadd.f32 %v6342_v20, %v6341_v26  ;;  %v8233_v11 = vadd.s32 8, %v7929_v58 }
 0x2b6   : > { %v3163_v57 = vadd.f32 %v3131_v23, %v8542_v30  ;;  %v6231_v61 = vadd.f32 %v6230_v16, %v6229_v34  ;;  %v8228_v53 = vadd.f32 %v6340_v35, %v3651_v37 }
 0x2b7   : > { %8541 = vst [vmem:[#allocation6_spill] sm:$0xff] %v8225_v14  ;;  %v6232_v39 = vpop.f32.mrf.mxu1  ;;  %v6345_v31 = vpop.f32.mrf.mxu0  ;;  %vm3196_vm3 = vcmp.ne.s32.totalorder %v8233_v11, 15 }
 0x2b8   : > { %8543 = vst [vmem:[#allocation7_spill] sm:$0xff] %v8228_v53  ;;  %v3654_v32 = vadd.f32 %v6231_v61, %v7927_v33  ;;  %v8451_v56 = vrot.slane %v8228_v53, 1  ;;  %v6346_v34 = vadd.f32 %v6345_v31, %v6344_v25 }
 0x2b9   : > { %v6233_v36 = vpop.f32.mrf.mxu1  ;;  %v6347_v18 = vpop.f32.mrf.mxu0 }
 0x2ba   : > { %v4068_v22 = vadd.f32 %v6343_v48, %v3654_v32  ;;  %v6234_v55 = vadd.f32 %v6233_v36, %v6232_v39 }
 0x2bb   : > { %v6235_v52 = vpop.f32.mrf.mxu1  ;;  %v6348_v23 = vpop.f32.mrf.mxu0 }
 0x2bc   : > { %v4100_v54 = vrot.slane %v4068_v22, 1  ;;  %v3659_v35 = vadd.f32 %v6234_v55, %v7934_v51  ;;  %v6349_v51 = vadd.f32 %v6348_v23, %v6347_v18 }
 0x2bd   : > { %v6236_v37 = vpop.f32.mrf.mxu1  ;;  %v6350_v33 = vpop.f32.mrf.mxu0 }
 0x2be   : > { %v4162_v61 = vsel %vm4131_vm2, %v8451_v56, %v4100_v54  ;;  %v4069_v26 = vadd.f32 %v6346_v34, %v3659_v35  ;;  %v6237_v20 = vadd.f32 %v6236_v37, %v6235_v52  ;;  %v8544_v34 = vld [vmem:[#allocation29_spill] sm:$0xff] }
 0x2bf   : > { %v4200_v16 = vadd.f32 %v4162_v61, %v3163_v57  ;;  %v6238_v30 = vpop.f32.mrf.mxu1  ;;  %v6351_v39 = vpop.f32.mrf.mxu0 }
 0x2c0   : > { %v4101_v32 = vrot.slane %v4069_v26, 1  ;;  %v3662_v22 = vadd.f32 %v6237_v20, %v7944_v2  ;;  %v6352_v2 = vadd.f32 %v6351_v39, %v6350_v33 }
 0x2c1   : > { %v6239_v31 = vpop.f32.mrf.mxu1  ;;  %v6353_v25 = vpop.f32.mrf.mxu0  ;;  %v4429_v56 = vmul.f32 %v4200_v16, %v4200_v16 }
 0x2c2   : > { %v4161_v48 = vsel %vm4131_vm2, %v4100_v54, %v4101_v32  ;;  %v4070_v36 = vadd.f32 %v6349_v51, %v3662_v22  ;;  %v6240_v55 = vadd.f32 %v6239_v31, %v6238_v30 }
 0x2c3   : > { %v4169_v52 = vsel %vm3196_vm3, %v4161_v48, 0.0  ;;  %v6241_v57 = vpop.f32.mrf.mxu1  ;;  %v6354_v35 = vpop.f32.mrf.mxu0 }
 0x2c4   : > { %v4201_v37 = vadd.f32 %v4169_v52, %v8544_v34  ;;  %v4102_v61 = vrot.slane %v4070_v36, 1  ;;  %v3667_v26 = vadd.f32 %v6240_v55, %v7954_v4  ;;  %v6355_v52 = vadd.f32 %v6354_v35, %v6353_v25 }
 0x2c5   : > { %v6242_v18 = vpop.f32.mrf.mxu1  ;;  %v6356_v23 = vpop.f32.mrf.mxu0 }
 0x2c6   : > { %v5334_v54 = vpack.c.bf16 %v4201_v37, %v4200_v16  ;;  %v4392_v20 = vadd.f32 %v4201_v37, %v4200_v16  ;;  %v4430_v30 = vmul.f32 %v4201_v37, %v4201_v37  ;;  %v4160_v22 = vsel %vm4131_vm2, %v4101_v32, %v4102_v61 }
 0x2c7   : > { %v4202_v51 = vadd.f32 %v4160_v22, %v7960_v29  ;;  %v4071_v31 = vadd.f32 %v6352_v2, %v3667_v26  ;;  %v6243_v4 = vadd.f32 %v6242_v18, %v6241_v57  ;;  %v6244_v48 = vpop.f32.mrf.mxu1  ;;  %v6357_v36 = vpop.f32.mrf.mxu0 }
 0x2c8   : > { %5335 = vst [vmem:[%s8253_s30] sm:$0xff] %v5334_v54   ;;  %v4461_v55 = vadd.f32 %v4430_v30, %v4429_v56  ;;  %v6358_v25 = vadd.f32 %v6357_v36, %v6356_v23 }
 0x2c9   : > { %v4393_v34 = vadd.f32 %v4392_v20, %v4202_v51  ;;  %v4431_v14 = vmul.f32 %v4202_v51, %v4202_v51  ;;  %v4103_v33 = vrot.slane %v4071_v31, 1  ;;  %v3670_v39 = vadd.f32 %v6243_v4, %v7965_v43  ;;  %v6245_v53 = vpop.f32.mrf.mxu1  ;;  %v6359_v16 = vpop.f32.mrf.mxu0 }
 0x2ca   : > { %v6246_v37 = vadd.f32 %v6245_v53, %v6244_v48 }
 0x2cb   : > { %v4462_v41 = vadd.f32 %v4461_v55, %v4431_v14  ;;  %v4159_v32 = vsel %vm4131_vm2, %v4102_v61, %v4103_v33  ;;  %v4072_v29 = vadd.f32 %v6355_v52, %v3670_v39  ;;  %v6247_v26 = vpop.f32.mrf.mxu1  ;;  %v6360_v57 = vpop.f32.mrf.mxu0 }
 0x2cc   : > { %v4171_v2 = vsel %vm3196_vm3, %v4159_v32, 0.0  ;;  %v3675_v56 = vadd.f32 %v6246_v37, %v7974_v7 }
 0x2cd   : > { %v4203_v35 = vadd.f32 %v4171_v2, %v7968_v50  ;;  %v4104_v43 = vrot.slane %v4072_v29, 1  ;;  %v6248_v18 = vpop.f32.mrf.mxu1  ;;  %v6362_v54 = vpop.f32.mrf.mxu0  ;;  %v6361_v50 = vadd.f32 %v6360_v57, %v6359_v16  ;;  %v8545_v2 = vld [vmem:[#allocation30_spill] sm:$0xff] }
 0x2ce   : > { %v4073_v53 = vadd.f32 %v6358_v25, %v3675_v56  ;;  %v6249_v14 = vadd.f32 %v6248_v18, %v6247_v26 }
 0x2cf   : > { %v5339_v20 = vpack.c.bf16 %v4203_v35, %v4202_v51  ;;  %v4394_v30 = vadd.f32 %v4393_v34, %v4203_v35  ;;  %v4432_v61 = vmul.f32 %v4203_v35, %v4203_v35  ;;  %v4158_v22 = vsel %vm4131_vm2, %v4103_v33, %v4104_v43  ;;  %v6250_v31 = vpop.f32.mrf.mxu1  ;;  %v6363_v4 = vpop.f32.mrf.mxu0 }
 0x2d0   : > { %v4204_v48 = vadd.f32 %v4158_v22, %v7979_v24  ;;  %v4105_v7 = vrot.slane %v4073_v53, 1  ;;  %v3678_v23 = vadd.f32 %v6249_v14, %v7984_v40  ;;  %v6364_v56 = vadd.f32 %v6363_v4, %v6362_v54 }
 0x2d1   : > { %5411 = vst [vmem:[%s8253_s30 + $0x8] sm:$0xff] %v5339_v20   ;;  %v4463_v36 = vadd.f32 %v4462_v41, %v4432_v61  ;;  %v6251_v55 = vpop.f32.mrf.mxu1  ;;  %v6365_v52 = vpop.f32.mrf.mxu0  ;;  %v8546_v41 = vld [vmem:[#allocation31_spill] sm:$0xff] }
 0x2d2   : > { %v4395_v39 = vadd.f32 %v4394_v30, %v4204_v48  ;;  %v4433_v37 = vmul.f32 %v4204_v48, %v4204_v48  ;;  %v4157_v51 = vsel %vm4131_vm2, %v4104_v43, %v4105_v7  ;;  %v4074_v34 = vadd.f32 %v6361_v50, %v3678_v23 }
 0x2d3   : > { %v4173_v33 = vsel %vm3196_vm3, %v4157_v51, 0.0  ;;  %v6252_v32 = vadd.f32 %v6251_v55, %v6250_v31  ;;  %v6253_v29 = vpop.f32.mrf.mxu1  ;;  %v6366_v24 = vpop.f32.mrf.mxu0 }
 0x2d4   : > { %v4464_v26 = vadd.f32 %v4463_v36, %v4433_v37  ;;  %v4205_v40 = vadd.f32 %v4173_v33, %v8545_v2  ;;  %v4106_v16 = vrot.slane %v4074_v34, 1  ;;  %v6367_v50 = vadd.f32 %v6366_v24, %v6365_v52  ;;  %v8547_v24 = vld [vmem:[#allocation10_spill] sm:$0xff] }
 0x2d5   : > { %v3683_v57 = vadd.f32 %v6252_v32, %v8546_v41  ;;  %v6254_v25 = vpop.f32.mrf.mxu1  ;;  %v6368_v35 = vpop.f32.mrf.mxu0 }
 0x2d6   : > { %v5344_v18 = vpack.c.bf16 %v4205_v40, %v4204_v48  ;;  %v4396_v53 = vadd.f32 %v4395_v39, %v4205_v40  ;;  %v4434_v43 = vmul.f32 %v4205_v40, %v4205_v40  ;;  %v4156_v14 = vsel %vm4131_vm2, %v4105_v7, %v4106_v16 }
 0x2d7   : > { %v4206_v20 = vadd.f32 %v4156_v14, %v7997_v63  ;;  %v4075_v30 = vadd.f32 %v6364_v56, %v3683_v57  ;;  %v6255_v61 = vadd.f32 %v6254_v25, %v6253_v29  ;;  %v6256_v22 = vpop.f32.mrf.mxu1  ;;  %v6369_v31 = vpop.f32.mrf.mxu0 }
 0x2d8   : > { %5412 = vst [vmem:[%s8253_s30 + $0x10] sm:$0xff] %v5344_v18   ;;  %v4465_v23 = vadd.f32 %v4464_v26, %v4434_v43  ;;  %v6370_v29 = vadd.f32 %v6369_v31, %v6368_v35 }
 0x2d9   : > { %v4397_v36 = vadd.f32 %v4396_v53, %v4206_v20  ;;  %v4435_v55 = vmul.f32 %v4206_v20, %v4206_v20  ;;  %v4107_v54 = vrot.slane %v4075_v30, 1  ;;  %v3686_v4 = vadd.f32 %v6255_v61, %v8002_v21  ;;  %v6257_v48 = vpop.f32.mrf.mxu1  ;;  %v6371_v39 = vpop.f32.mrf.mxu0 }
 0x2da   : > { %v6258_v37 = vadd.f32 %v6257_v48, %v6256_v22 }
 0x2db   : > { %v4466_v51 = vadd.f32 %v4465_v23, %v4435_v55  ;;  %v4155_v7 = vsel %vm4131_vm2, %v4106_v16, %v4107_v54  ;;  %v4076_v63 = vadd.f32 %v6367_v50, %v3686_v4  ;;  %v6259_v34 = vpop.f32.mrf.mxu1  ;;  %v6372_v33 = vpop.f32.mrf.mxu0 }
 0x2dc   : > { %v4175_v32 = vsel %vm3196_vm3, %v4155_v7, 0.0  ;;  %v3691_v52 = vadd.f32 %v6258_v37, %v8010_v45  ;;  %v6373_v30 = vadd.f32 %v6372_v33, %v6371_v39 }
 0x2dd   : > { %v4207_v26 = vadd.f32 %v4175_v32, %v8547_v24  ;;  %v4108_v21 = vrot.slane %v4076_v63, 1  ;;  %v6260_v2 = vpop.f32.mrf.mxu1  ;;  %v6374_v40 = vpop.f32.mrf.mxu0 }
 0x2de   : > { %v4077_v41 = vadd.f32 %v6370_v29, %v3691_v52  ;;  %v6261_v57 = vadd.f32 %v6260_v2, %v6259_v34 }
 0x2df   : > { %v5349_v56 = vpack.c.bf16 %v4207_v26, %v4206_v20  ;;  %v4398_v25 = vadd.f32 %v4397_v36, %v4207_v26  ;;  %v4436_v16 = vmul.f32 %v4207_v26, %v4207_v26  ;;  %v4154_v18 = vsel %vm4131_vm2, %v4107_v54, %v4108_v21  ;;  %v6262_v53 = vpop.f32.mrf.mxu1  ;;  %v6375_v43 = vpop.f32.mrf.mxu0 }
 0x2e0   : > { %v4208_v14 = vadd.f32 %v4154_v18, %v8015_v9  ;;  %v4109_v45 = vrot.slane %v4077_v41, 1  ;;  %v3694_v35 = vadd.f32 %v6261_v57, %v8020_v1 }
 0x2e1   : > { %5413 = vst [vmem:[%s8253_s30 + $0x18] sm:$0xff] %v5349_v56   ;;  %v4467_v61 = vadd.f32 %v4466_v51, %v4436_v16  ;;  %v6263_v22 = vpop.f32.mrf.mxu1  ;;  %v6377_v31 = vpop.f32.mrf.mxu0  ;;  %v6376_v51 = vadd.f32 %v6375_v43, %v6374_v40 }
 0x2e2   : > { %v4399_v23 = vadd.f32 %v4398_v25, %v4208_v14  ;;  %v4437_v50 = vmul.f32 %v4208_v14, %v4208_v14  ;;  %v4153_v20 = vsel %vm4131_vm2, %v4108_v21, %v4109_v45  ;;  %v4078_v36 = vadd.f32 %v6373_v30, %v3694_v35 }
 0x2e3   : > { %v4177_v55 = vsel %vm3196_vm3, %v4153_v20, 0.0  ;;  %v6264_v54 = vadd.f32 %v6263_v22, %v6262_v53  ;;  %v6265_v4 = vpop.f32.mrf.mxu1  ;;  %v6378_v9 = vpop.f32.mrf.mxu0 }
 0x2e4   : > { %v4468_v48 = vadd.f32 %v4467_v61, %v4437_v50  ;;  %v4209_v1 = vadd.f32 %v4177_v55, %v8023_v47  ;;  %v4110_v39 = vrot.slane %v4078_v36, 1  ;;  %v6379_v41 = vadd.f32 %v6378_v9, %v6377_v31 }
 0x2e5   : > { %v3699_v37 = vadd.f32 %v6264_v54, %v8029_v38  ;;  %v6266_v7 = vpop.f32.mrf.mxu1  ;;  %v6380_v63 = vpop.f32.mrf.mxu0 }
 0x2e6   : > { %v5354_v34 = vpack.c.bf16 %v4209_v1, %v4208_v14  ;;  %v4400_v33 = vadd.f32 %v4399_v23, %v4209_v1  ;;  %v4438_v32 = vmul.f32 %v4209_v1, %v4209_v1  ;;  %v4152_v52 = vsel %vm4131_vm2, %v4109_v45, %v4110_v39 }
 0x2e7   : > { %v4210_v29 = vadd.f32 %v4152_v52, %v8034_v15  ;;  %v4079_v24 = vadd.f32 %v6376_v51, %v3699_v37  ;;  %v6267_v26 = vadd.f32 %v6266_v7, %v6265_v4  ;;  %v6268_v21 = vpop.f32.mrf.mxu1  ;;  %v6381_v2 = vpop.f32.mrf.mxu0 }
 0x2e8   : > { %5414 = vst [vmem:[%s8253_s30 + $0x20] sm:$0xff] %v5354_v34   ;;  %v4469_v47 = vadd.f32 %v4468_v48, %v4438_v32  ;;  %v6382_v61 = vadd.f32 %v6381_v2, %v6380_v63 }
 0x2e9   : > { %v4401_v57 = vadd.f32 %v4400_v33, %v4210_v29  ;;  %v4439_v38 = vmul.f32 %v4210_v29, %v4210_v29  ;;  %v4111_v40 = vrot.slane %v4079_v24, 1  ;;  %v3702_v56 = vadd.f32 %v6267_v26, %v8039_v42  ;;  %v6269_v25 = vpop.f32.mrf.mxu1  ;;  %v6383_v16 = vpop.f32.mrf.mxu0 }
 0x2ea   : > { %v6270_v18 = vadd.f32 %v6269_v25, %v6268_v21 }
 0x2eb   : > { %v4470_v53 = vadd.f32 %v4469_v47, %v4439_v38  ;;  %v4151_v43 = vsel %vm4131_vm2, %v4110_v39, %v4111_v40  ;;  %v4080_v15 = vadd.f32 %v6379_v41, %v3702_v56  ;;  %v6271_v14 = vpop.f32.mrf.mxu1  ;;  %v6384_v45 = vpop.f32.mrf.mxu0 }
 0x2ec   : > { %v4179_v35 = vsel %vm3196_vm3, %v4151_v43, 0.0  ;;  %v3707_v30 = vadd.f32 %v6270_v18, %v8048_v10 }
 0x2ed   : > { %v4211_v22 = vadd.f32 %v4179_v35, %v8042_v12  ;;  %v4112_v42 = vrot.slane %v4080_v15, 1  ;;  %v6272_v31 = vpop.f32.mrf.mxu1  ;;  %v6386_v23 = vpop.f32.mrf.mxu0  ;;  %v6385_v12 = vadd.f32 %v6384_v45, %v6383_v16 }
 0x2ee   : > { %v4081_v50 = vadd.f32 %v6382_v61, %v3707_v30  ;;  %v6273_v20 = vadd.f32 %v6272_v31, %v6271_v14 }
 0x2ef   : > { %v5359_v36 = vpack.c.bf16 %v4211_v22, %v4210_v29  ;;  %v4402_v55 = vadd.f32 %v4401_v57, %v4211_v22  ;;  %v4440_v54 = vmul.f32 %v4211_v22, %v4211_v22  ;;  %v4150_v4 = vsel %vm4131_vm2, %v4111_v40, %v4112_v42  ;;  %v6274_v9 = vpop.f32.mrf.mxu1  ;;  %v6387_v48 = vpop.f32.mrf.mxu0 }
 0x2f0   : > { %v4212_v1 = vadd.f32 %v4150_v4, %v8053_v5  ;;  %v4113_v10 = vrot.slane %v4081_v50, 1  ;;  %v3710_v39 = vadd.f32 %v6273_v20, %v8058_v8  ;;  %v6388_v47 = vadd.f32 %v6387_v48, %v6386_v23 }
 0x2f1   : > { %5415 = vst [vmem:[%s8253_s30 + $0x28] sm:$0xff] %v5359_v36   ;;  %v4471_v37 = vadd.f32 %v4470_v53, %v4440_v54  ;;  %v6275_v51 = vpop.f32.mrf.mxu1  ;;  %v6389_v7 = vpop.f32.mrf.mxu0 }
 0x2f2   : > { %v4403_v63 = vadd.f32 %v4402_v55, %v4212_v1  ;;  %v4441_v34 = vmul.f32 %v4212_v1, %v4212_v1  ;;  %v4149_v33 = vsel %vm4131_vm2, %v4112_v42, %v4113_v10  ;;  %v4082_v32 = vadd.f32 %v6385_v12, %v3710_v39 }
 0x2f3   : > { %v4181_v52 = vsel %vm3196_vm3, %v4149_v33, 0.0  ;;  %v6276_v29 = vadd.f32 %v6275_v51, %v6274_v9  ;;  %v6277_v24 = vpop.f32.mrf.mxu1  ;;  %v6390_v5 = vpop.f32.mrf.mxu0 }
 0x2f4   : > { %v4472_v26 = vadd.f32 %v4471_v37, %v4441_v34  ;;  %v4213_v8 = vadd.f32 %v4181_v52, %v8061_v60  ;;  %v4114_v21 = vrot.slane %v4082_v32, 1  ;;  %v6391_v14 = vadd.f32 %v6390_v5, %v6389_v7 }
 0x2f5   : > { %v3715_v2 = vadd.f32 %v6276_v29, %v8066_v44  ;;  %v6278_v41 = vpop.f32.mrf.mxu1  ;;  %v6392_v57 = vpop.f32.mrf.mxu0 }
 0x2f6   : > { %v5364_v38 = vpack.c.bf16 %v4213_v8, %v4212_v1  ;;  %v4404_v40 = vadd.f32 %v4403_v63, %v4213_v8  ;;  %v4442_v56 = vmul.f32 %v4213_v8, %v4213_v8  ;;  %v4148_v25 = vsel %vm4131_vm2, %v4113_v10, %v4114_v21 }
 0x2f7   : > { %v4214_v16 = vadd.f32 %v4148_v25, %v8071_v49  ;;  %v4083_v18 = vadd.f32 %v6388_v47, %v3715_v2  ;;  %v6279_v53 = vadd.f32 %v6278_v41, %v6277_v24  ;;  %v6280_v43 = vpop.f32.mrf.mxu1  ;;  %v6393_v15 = vpop.f32.mrf.mxu0 }
 0x2f8   : > { %5416 = vst [vmem:[%s8253_s30 + $0x30] sm:$0xff] %v5364_v38   ;;  %v4473_v60 = vadd.f32 %v4472_v26, %v4442_v56  ;;  %v6394_v54 = vadd.f32 %v6393_v15, %v6392_v57  ;;  %v8548_v38 = vld [vmem:[#allocation11_spill] sm:$0xff] }
 0x2f9   : > { %v4405_v45 = vadd.f32 %v4404_v40, %v4214_v16  ;;  %v4443_v44 = vmul.f32 %v4214_v16, %v4214_v16  ;;  %v4115_v35 = vrot.slane %v4083_v18, 1  ;;  %v3718_v30 = vadd.f32 %v6279_v53, %v8076_v27  ;;  %v6281_v61 = vpop.f32.mrf.mxu1  ;;  %v6395_v22 = vpop.f32.mrf.mxu0 }
 0x2fa   : > { %v6282_v42 = vadd.f32 %v6281_v61, %v6280_v43 }
 0x2fb   : > { %v4474_v31 = vadd.f32 %v4473_v60, %v4443_v44  ;;  %v4147_v23 = vsel %vm4131_vm2, %v4114_v21, %v4115_v35  ;;  %v4084_v49 = vadd.f32 %v6391_v14, %v3718_v30  ;;  %v6283_v50 = vpop.f32.mrf.mxu1  ;;  %v6396_v20 = vpop.f32.mrf.mxu0  ;;  %v8549_v60 = vld [vmem:[#allocation12_spill] sm:$0xff] }
 0x2fc   : > { %v4183_v36 = vsel %vm3196_vm3, %v4147_v23, 0.0  ;;  %v3723_v55 = vadd.f32 %v6282_v42, %v8084_v3  ;;  %v8550_v23 = vld [vmem:[#allocation13_spill] sm:$0xff] }
 0x2fd   : > { %v4215_v4 = vadd.f32 %v4183_v36, %v8079_v13  ;;  %v4116_v27 = vrot.slane %v4084_v49, 1  ;;  %v6284_v9 = vpop.f32.mrf.mxu1  ;;  %v6398_v48 = vpop.f32.mrf.mxu0  ;;  %v6397_v13 = vadd.f32 %v6396_v20, %v6395_v22 }
 0x2fe   : > { %v4085_v1 = vadd.f32 %v6394_v54, %v3723_v55  ;;  %v6285_v10 = vadd.f32 %v6284_v9, %v6283_v50 }
 0x2ff   : > { %v5369_v39 = vpack.c.bf16 %v4215_v4, %v4214_v16  ;;  %v4406_v12 = vadd.f32 %v4405_v45, %v4215_v4  ;;  %v4444_v37 = vmul.f32 %v4215_v4, %v4215_v4  ;;  %v4146_v51 = vsel %vm4131_vm2, %v4115_v35, %v4116_v27  ;;  %v6286_v7 = vpop.f32.mrf.mxu1  ;;  %v6399_v63 = vpop.f32.mrf.mxu0 }
 0x300   : > { %v4216_v34 = vadd.f32 %v4146_v51, %v8089_v0  ;;  %v4117_v3 = vrot.slane %v4085_v1, 1  ;;  %v3726_v33 = vadd.f32 %v6285_v10, %v8094_v17  ;;  %v6400_v56 = vadd.f32 %v6399_v63, %v6398_v48  ;;  %v8551_v1 = vld [vmem:[#allocation3_spill] sm:$0xff] }
 0x301   : > { %5417 = vst [vmem:[%s8253_s30 + $0x38] sm:$0xff] %v5369_v39   ;;  %v4475_v32 = vadd.f32 %v4474_v31, %v4444_v37  ;;  %v6287_v52 = vpop.f32.mrf.mxu1  ;;  %v6401_v29 = vpop.f32.mrf.mxu0 }
 0x302   : > { %v4407_v24 = vadd.f32 %v4406_v12, %v4216_v34  ;;  %v4445_v5 = vmul.f32 %v4216_v34, %v4216_v34  ;;  %v4145_v26 = vsel %vm4131_vm2, %v4116_v27, %v4117_v3  ;;  %v4086_v8 = vadd.f32 %v6397_v13, %v3726_v33  ;;  %v8552_v12 = vld [vmem:[#allocation14_spill] sm:$0xff] }
 0x303   : > { %v4185_v21 = vsel %vm3196_vm3, %v4145_v26, 0.0  ;;  %v6288_v2 = vadd.f32 %v6287_v52, %v6286_v7  ;;  %v6289_v47 = vpop.f32.mrf.mxu1  ;;  %v6402_v0 = vpop.f32.mrf.mxu0 }
 0x304   : > { %v4476_v41 = vadd.f32 %v4475_v32, %v4445_v5  ;;  %v4217_v17 = vadd.f32 %v4185_v21, %v8097_v19  ;;  %v4118_v57 = vrot.slane %v4086_v8, 1  ;;  %v6403_v61 = vadd.f32 %v6402_v0, %v6401_v29  ;;  %v8553_v8 = vld [vmem:[#allocation15_spill] sm:$0xff] }
 0x305   : > { %v3731_v40 = vadd.f32 %v6288_v2, %v8548_v38  ;;  %v6290_v25 = vpop.f32.mrf.mxu1  ;;  %v6404_v16 = vpop.f32.mrf.mxu0 }
 0x306   : > { %v5374_v18 = vpack.c.bf16 %v4217_v17, %v4216_v34  ;;  %v4408_v53 = vadd.f32 %v4407_v24, %v4217_v17  ;;  %v4446_v43 = vmul.f32 %v4217_v17, %v4217_v17  ;;  %v4144_v15 = vsel %vm4131_vm2, %v4117_v3, %v4118_v57 }
 0x307   : > { %v4218_v14 = vadd.f32 %v4144_v15, %v8549_v60  ;;  %v4087_v45 = vadd.f32 %v6400_v56, %v3731_v40  ;;  %v6291_v44 = vadd.f32 %v6290_v25, %v6289_v47  ;;  %v6292_v35 = vpop.f32.mrf.mxu1  ;;  %v6405_v30 = vpop.f32.mrf.mxu0  ;;  %v8555_v60 = vld [vmem:[#allocation16_spill] sm:$0xff] }
 0x308   : > { %5418 = vst [vmem:[%s8253_s30 + $0x40] sm:$0xff] %v5374_v18   ;;  %v4477_v19 = vadd.f32 %v4476_v41, %v4446_v43  ;;  %v6406_v39 = vadd.f32 %v6405_v30, %v6404_v16 }
 0x309   : > { %v4409_v22 = vadd.f32 %v4408_v53, %v4218_v14  ;;  %v4447_v42 = vmul.f32 %v4218_v14, %v4218_v14  ;;  %v4119_v31 = vrot.slane %v4087_v45, 1  ;;  %v3734_v49 = vadd.f32 %v6291_v44, %v8550_v23  ;;  %v6293_v50 = vpop.f32.mrf.mxu1  ;;  %v6407_v20 = vpop.f32.mrf.mxu0  ;;  %v8554_v53 = vld [vmem:[#allocation4_spill] sm:$0xff] }
 0x30a   : > { %v6294_v36 = vadd.f32 %v6293_v50, %v6292_v35 }
 0x30b   : > { %v4478_v55 = vadd.f32 %v4477_v19, %v4447_v42  ;;  %v4143_v54 = vsel %vm4131_vm2, %v4118_v57, %v4119_v31  ;;  %v4088_v4 = vadd.f32 %v6403_v61, %v3734_v49  ;;  %v6295_v27 = vpop.f32.mrf.mxu1  ;;  %v6408_v9 = vpop.f32.mrf.mxu0 }
 0x30c   : > { %v4187_v48 = vsel %vm3196_vm3, %v4143_v54, 0.0  ;;  %v3739_v10 = vadd.f32 %v6294_v36, %v8551_v1  ;;  %v6409_v2 = vadd.f32 %v6408_v9, %v6407_v20 }
 0x30d   : > { %v4219_v37 = vadd.f32 %v4187_v48, %v8552_v12  ;;  %v4120_v51 = vrot.slane %v4088_v4, 1  ;;  %v6296_v7 = vpop.f32.mrf.mxu1  ;;  %v6410_v63 = vpop.f32.mrf.mxu0 }
 0x30e   : > { %v4089_v34 = vadd.f32 %v6406_v39, %v3739_v10  ;;  %v6297_v3 = vadd.f32 %v6296_v7, %v6295_v27  ;;  %v8556_v27 = vld [vmem:[#allocation25_spill] sm:$0xff] }
 0x30f   : > { %v5379_v33 = vpack.c.bf16 %v4219_v37, %v4218_v14  ;;  %v4410_v13 = vadd.f32 %v4409_v22, %v4219_v37  ;;  %v4448_v32 = vmul.f32 %v4219_v37, %v4219_v37  ;;  %v4142_v52 = vsel %vm4131_vm2, %v4119_v31, %v4120_v51  ;;  %v6298_v29 = vpop.f32.mrf.mxu1  ;;  %v6411_v24 = vpop.f32.mrf.mxu0 }
 0x310   : > { %v4220_v5 = vadd.f32 %v4142_v52, %v8125_v28  ;;  %v4121_v26 = vrot.slane %v4089_v34, 1  ;;  %v3742_v21 = vadd.f32 %v6297_v3, %v8553_v8  ;;  %v6412_v45 = vadd.f32 %v6411_v24, %v6410_v63  ;;  %v8557_v63 = vld [vmem:[#allocation26_spill] sm:$0xff] }
 0x311   : > { %5419 = vst [vmem:[%s8253_s30 + $0x48] sm:$0xff] %v5379_v33   ;;  %v4479_v47 = vadd.f32 %v4478_v55, %v4448_v32  ;;  %v6299_v0 = vpop.f32.mrf.mxu1  ;;  %v6413_v41 = vpop.f32.mrf.mxu0  ;;  %v8558_v33 = vld [vmem:[#allocation17_spill] sm:$0xff] }
 0x312   : > { %v4411_v17 = vadd.f32 %v4410_v13, %v4220_v5  ;;  %v4449_v57 = vmul.f32 %v4220_v5, %v4220_v5  ;;  %v4141_v38 = vsel %vm4131_vm2, %v4120_v51, %v4121_v26  ;;  %v4090_v40 = vadd.f32 %v6409_v2, %v3742_v21 }
 0x313   : > { %v4189_v56 = vsel %vm3196_vm3, %v4141_v38, 0.0  ;;  %v6300_v25 = vadd.f32 %v6299_v0, %v6298_v29  ;;  %v6301_v16 = vpop.f32.mrf.mxu1  ;;  %v6414_v28 = vpop.f32.mrf.mxu0 }
 0x314   : > { %v4480_v18 = vadd.f32 %v4479_v47, %v4449_v57  ;;  %v4221_v43 = vadd.f32 %v4189_v56, %v8554_v53  ;;  %v4122_v15 = vrot.slane %v4090_v40, 1  ;;  %v6415_v36 = vadd.f32 %v6414_v28, %v6413_v41 }
 0x315   : > { %v3747_v14 = vadd.f32 %v6300_v25, %v8555_v60  ;;  %v6302_v44 = vpop.f32.mrf.mxu1  ;;  %v6416_v35 = vpop.f32.mrf.mxu0 }
 0x316   : > { %v5384_v30 = vpack.c.bf16 %v4221_v43, %v4220_v5  ;;  %v4412_v19 = vadd.f32 %v4411_v17, %v4221_v43  ;;  %v4450_v61 = vmul.f32 %v4221_v43, %v4221_v43  ;;  %v4140_v22 = vsel %vm4131_vm2, %v4121_v26, %v4122_v15 }
 0x317   : > { %v4222_v42 = vadd.f32 %v4140_v22, %v8143_v59  ;;  %v4091_v31 = vadd.f32 %v6412_v45, %v3747_v14  ;;  %v6303_v23 = vadd.f32 %v6302_v44, %v6301_v16  ;;  %v6304_v49 = vpop.f32.mrf.mxu1  ;;  %v6417_v50 = vpop.f32.mrf.mxu0  ;;  %v8559_v45 = vld [vmem:[#allocation18_spill] sm:$0xff] }
 0x318   : > { %5420 = vst [vmem:[%s8253_s30 + $0x50] sm:$0xff] %v5384_v30   ;;  %v4481_v20 = vadd.f32 %v4480_v18, %v4450_v61  ;;  %v6418_v3 = vadd.f32 %v6417_v50, %v6416_v35  ;;  %v8560_v35 = vld [vmem:[#allocation19_spill] sm:$0xff] }
 0x319   : > { %v4413_v55 = vadd.f32 %v4412_v19, %v4222_v42  ;;  %v4451_v54 = vmul.f32 %v4222_v42, %v4222_v42  ;;  %v4123_v4 = vrot.slane %v4091_v31, 1  ;;  %v3750_v9 = vadd.f32 %v6303_v23, %v8556_v27  ;;  %v6305_v48 = vpop.f32.mrf.mxu1  ;;  %v6419_v1 = vpop.f32.mrf.mxu0 }
 0x31a   : > { %v6306_v10 = vadd.f32 %v6305_v48, %v6304_v49 }
 0x31b   : > { %v4482_v39 = vadd.f32 %v4481_v20, %v4451_v54  ;;  %v4139_v12 = vsel %vm4131_vm2, %v4122_v15, %v4123_v4  ;;  %v4092_v59 = vadd.f32 %v6415_v36, %v3750_v9  ;;  %v6307_v37 = vpop.f32.mrf.mxu1  ;;  %v6420_v51 = vpop.f32.mrf.mxu0 }
 0x31c   : > { %v4191_v7 = vsel %vm3196_vm3, %v4139_v12, 0.0  ;;  %v3755_v34 = vadd.f32 %v6306_v10, %v8557_v63  ;;  %v6421_v38 = vadd.f32 %v6420_v51, %v6419_v1  ;;  %v8561_v10 = vld [vmem:[#allocation27_spill] sm:$0xff] }
 0x31d   : > { %v4223_v13 = vadd.f32 %v4191_v7, %v8558_v33  ;;  %v4124_v32 = vrot.slane %v4092_v59, 1  ;;  %v6308_v52 = vpop.f32.mrf.mxu1  ;;  %v6422_v29 = vpop.f32.mrf.mxu0 }
 0x31e   : > { %v4093_v24 = vadd.f32 %v6418_v3, %v3755_v34  ;;  %v6309_v5 = vadd.f32 %v6308_v52, %v6307_v37  ;;  %v8562_v3 = vld [vmem:[#allocation21_spill] sm:$0xff] }
 0x31f   : > { %v5389_v26 = vpack.c.bf16 %v4223_v13, %v4222_v42  ;;  %v4414_v8 = vadd.f32 %v4413_v55, %v4223_v13  ;;  %v4452_v21 = vmul.f32 %v4223_v13, %v4223_v13  ;;  %v4138_v2 = vsel %vm4131_vm2, %v4123_v4, %v4124_v32  ;;  %v6310_v47 = vpop.f32.mrf.mxu1  ;;  %v6423_v0 = vpop.f32.mrf.mxu0 }
 0x320   : > { %v4224_v41 = vadd.f32 %v4138_v2, %v8161_v62  ;;  %v4125_v17 = vrot.slane %v4093_v24, 1  ;;  %v3758_v57 = vadd.f32 %v6309_v5, %v8166_v6  ;;  %v6424_v19 = vadd.f32 %v6423_v0, %v6422_v29 }
 0x321   : > { %5421 = vst [vmem:[%s8253_s30 + $0x58] sm:$0xff] %v5389_v26   ;;  %v4483_v40 = vadd.f32 %v4482_v39, %v4452_v21  ;;  %v6311_v56 = vpop.f32.mrf.mxu1  ;;  %v6425_v25 = vpop.f32.mrf.mxu0 }
 0x322   : > { %v4415_v16 = vadd.f32 %v4414_v8, %v4224_v41  ;;  %v4453_v28 = vmul.f32 %v4224_v41, %v4224_v41  ;;  %v4137_v18 = vsel %vm4131_vm2, %v4124_v32, %v4125_v17  ;;  %v4094_v53 = vadd.f32 %v6421_v38, %v3758_v57  ;;  %v8563_v32 = vld [vmem:[#allocation20_spill] sm:$0xff]  ;;  %v8565_v38 = vld [vmem:[#allocation22_spill] sm:$0xff] }
 0x323   : > { %v4193_v43 = vsel %vm3196_vm3, %v4137_v18, 0.0  ;;  %v6312_v15 = vadd.f32 %v6311_v56, %v6310_v47  ;;  %v6313_v60 = vpop.f32.mrf.mxu1  ;;  %v6426_v62 = vpop.f32.mrf.mxu0 }
 0x324   : > { %v4484_v14 = vadd.f32 %v4483_v40, %v4453_v28  ;;  %v4225_v6 = vadd.f32 %v4193_v43, %v8559_v45  ;;  %v4126_v44 = vrot.slane %v4094_v53, 1  ;;  %v6427_v27 = vadd.f32 %v6426_v62, %v6425_v25 }
 0x325   : > { %v3763_v30 = vadd.f32 %v6312_v15, %v8560_v35  ;;  %v6314_v61 = vpop.f32.mrf.mxu1  ;;  %v6428_v22 = vpop.f32.mrf.mxu0 }
 0x326   : > { %v5394_v42 = vpack.c.bf16 %v4225_v6, %v4224_v41  ;;  %v4416_v31 = vadd.f32 %v4415_v16, %v4225_v6  ;;  %v4454_v23 = vmul.f32 %v4225_v6, %v4225_v6  ;;  %v4136_v49 = vsel %vm4131_vm2, %v4125_v17, %v4126_v44  ;;  %v8564_v41 = vld [vmem:[#allocation28_spill] sm:$0xff] }
 0x327   : > { %v4226_v50 = vadd.f32 %v4136_v49, %v8179_v46  ;;  %v4095_v20 = vadd.f32 %v6424_v19, %v3763_v30  ;;  %v6315_v36 = vadd.f32 %v6314_v61, %v6313_v60  ;;  %v6316_v55 = vpop.f32.mrf.mxu1  ;;  %v6429_v54 = vpop.f32.mrf.mxu0  ;;  %v8566_v60 = vld [vmem:[#allocation23_spill] sm:$0xff]  ;;  %v8570_v49 = vld [vmem:[#allocation6_spill] sm:$0xff] }
 0x328   : > { %5422 = vst [vmem:[%s8253_s30 + $0x60] sm:$0xff] %v5394_v42   ;;  %v4485_v4 = vadd.f32 %v4484_v14, %v4454_v23  ;;  %v6430_v13 = vadd.f32 %v6429_v54, %v6428_v22  ;;  %v8567_v30 = vld [vmem:[#allocation7_spill] sm:$0xff]  ;;  %v8569_v22 = vld [vmem:[#allocation5_spill] sm:$0xff] }
 0x329   : > { %v4417_v9 = vadd.f32 %v4416_v31, %v4226_v50  ;;  %v4455_v48 = vmul.f32 %v4226_v50, %v4226_v50  ;;  %v4127_v1 = vrot.slane %v4095_v20, 1  ;;  %v3766_v39 = vadd.f32 %v6315_v36, %v8561_v10  ;;  %v6317_v12 = vpop.f32.mrf.mxu1  ;;  %v6431_v59 = vpop.f32.mrf.mxu0 }
 0x32a   : > { %v6318_v37 = vadd.f32 %v6317_v12, %v6316_v55  ;;  %v8568_v19 = vrot.slane %v8567_v30, 1 }
 0x32b   : > { %v4486_v51 = vadd.f32 %v4485_v4, %v4455_v48  ;;  %v4135_v7 = vsel %vm4131_vm2, %v4126_v44, %v4127_v1  ;;  %v4096_v46 = vadd.f32 %v6427_v27, %v3766_v39  ;;  %v6319_v63 = vpop.f32.mrf.mxu1  ;;  %v6432_v5 = vpop.f32.mrf.mxu0 }
 0x32c   : > { %v4195_v34 = vsel %vm3196_vm3, %v4135_v7, 0.0  ;;  %v3771_v33 = vadd.f32 %v6318_v37, %v8562_v3  ;;  %v6433_v56 = vadd.f32 %v6432_v5, %v6431_v59 }
 0x32d   : > { %v4227_v52 = vadd.f32 %v4195_v34, %v8563_v32  ;;  %v4128_v29 = vrot.slane %v4096_v46, 1  ;;  %v6320_v24 = vpop.f32.mrf.mxu1 }
 0x32e   : > { %v4097_v26 = vadd.f32 %v6430_v13, %v3771_v33  ;;  %v6321_v8 = vadd.f32 %v6320_v24, %v6319_v63 }
 0x32f   : > { %v5399_v21 = vpack.c.bf16 %v4227_v52, %v4226_v50  ;;  %v4418_v2 = vadd.f32 %v4417_v9, %v4227_v52  ;;  %v4456_v47 = vmul.f32 %v4227_v52, %v4227_v52  ;;  %v4134_v0 = vsel %vm4131_vm2, %v4127_v1, %v4128_v29 }
 0x330   : > { %v4228_v17 = vadd.f32 %v4134_v0, %v8564_v41  ;;  %v4129_v57 = vrot.slane %v4097_v26, 1  ;;  %v3774_v40 = vadd.f32 %v6321_v8, %v8565_v38 }
 0x331   : > { %5423 = vst [vmem:[%s8253_s30 + $0x68] sm:$0xff] %v5399_v21   ;;  %v4487_v25 = vadd.f32 %v4486_v51, %v4456_v47 }
 0x332   : > { %v4419_v16 = vadd.f32 %v4418_v2, %v4228_v17  ;;  %v4457_v28 = vmul.f32 %v4228_v17, %v4228_v17  ;;  %v4133_v18 = vsel %vm4131_vm2, %v4128_v29, %v4129_v57  ;;  %v4098_v53 = vadd.f32 %v6433_v56, %v3774_v40 }
 0x333   : > { %v4197_v43 = vsel %vm3196_vm3, %v4133_v18, 0.0 }
 0x334   : > { %v4488_v15 = vadd.f32 %v4487_v25, %v4457_v28  ;;  %v4229_v62 = vadd.f32 %v4197_v43, %v8566_v60  ;;  %v4130_v14 = vrot.slane %v4098_v53, 1 }
 0x336   : > { %v5404_v45 = vpack.c.bf16 %v4229_v62, %v4228_v17  ;;  %v4420_v6 = vadd.f32 %v4419_v16, %v4229_v62  ;;  %v4458_v44 = vmul.f32 %v4229_v62, %v4229_v62  ;;  %v4132_v35 = vsel %vm4131_vm2, %v4129_v57, %v4130_v14 }
 0x337   : > { %v4163_v61 = vsel %vm4131_vm2, %v4130_v14, %v8568_v19  ;;  %v4230_v42 = vadd.f32 %v4132_v35, %v8569_v22 }
 0x338   : > { %5424 = vst [vmem:[%s8253_s30 + $0x70] sm:$0xff] %v5404_v45   ;;  %v4489_v31 = vadd.f32 %v4488_v15, %v4458_v44  ;;  %v4199_v23 = vsel %vm3196_vm3, %v4163_v61, 0.0 }
 0x339   : > { %v4231_v50 = vadd.f32 %v4199_v23, %v8570_v49  ;;  %v4421_v20 = vadd.f32 %v4420_v6, %v4230_v42  ;;  %v4459_v36 = vmul.f32 %v4230_v42, %v4230_v42 }
 0x33b   : > { %v5409_v55 = vpack.c.bf16 %v4231_v50, %v4230_v42  ;;  %v4422_v54 = vadd.f32 %v4421_v20, %v4231_v50  ;;  %v4460_v4 = vmul.f32 %v4231_v50, %v4231_v50  ;;  %v4490_v27 = vadd.f32 %v4489_v31, %v4459_v36 }
 0x33d   : > { %5425 = vst [vmem:[%s8253_s30 + $0x78] sm:$0xff] %v5409_v55   ;;  %v4423_v9 = vrot.slane %v4422_v54, 4  ;;  %v4491_v58 = vadd.f32 %v4490_v27, %v4460_v4 }
 0x33f   : > { %v4424_v48 = vadd.f32 %v4423_v9, %v4422_v54  ;;  %v4492_v1 = vrot.slane %v4491_v58, 4 }
 0x341   : > { %v4425_v10 = vrot.slane %v4424_v48, 2  ;;  %v4493_v39 = vadd.f32 %v4492_v1, %v4491_v58 }
 0x343   : > { %v4426_v12 = vadd.f32 %v4425_v10, %v4424_v48  ;;  %v4494_v11 = vrot.slane %v4493_v39, 2 }
 0x345   : > { %v4427_v59 = vrot.slane %v4426_v12, 1  ;;  %v4495_v37 = vadd.f32 %v4494_v11, %v4493_v39 }
 0x347   : > { %v4428_v51 = vadd.f32 %v4427_v59, %v4426_v12  ;;  %v4496_v7 = vrot.slane %v4495_v37, 1 }
 0x349   : > { %v4497_v46 = vadd.f32 %v4496_v7, %v4495_v37  ;;  %4498 = vst [vmem:[%s687_s15] sm:$0xff] %v4428_v51 }
 0x34b   : > { %4499 = vst [vmem:[%s693_s17] sm:$0xff] %v4497_v46 }
 0x34c PF: > { %s20_s4 = sadd.s32 1, %s6753_s4   ;;  %s8571_s28 = smov %s6749_s29 }
 0x34d   : > { %p17_p5 = scmp.ge.s32.totalorder %s20_s4, 4   ;;  %s8572_s29 = smov %s8574_s5 }
 0x34f   :  { %19 = sbr.rel (!%p17_p5) target bundleno = 2 (0x2), region = 141 }

</bundles_post_ra>
